<compile_context>
chip_gen: v7x
topology: tpu7x:2x2x1
jax: 0.10.0
libtpu: 0.0.40
codegen_flags: <defaults>
</compile_context>

<pallas_src>
import functools

import jax
import jax.numpy as jnp
from jax.experimental import pallas as pl
from jax.experimental.pallas import tpu as pltpu


def _vmem_limit_bytes():
    # Gate the limit on the actual generation (v7x has 64 MiB physical VMEM).
    try:
        cap = int(getattr(pltpu.get_tpu_info(), "vmem_capacity_bytes"))
        return max(16 * 1024 * 1024, min(48 * 1024 * 1024, cap // 2))
    except Exception:
        return 32 * 1024 * 1024


_VMEM_LIMIT = _vmem_limit_bytes()


# ----------------------------------------------------------------------------
# Fused matmul + bias + ReLU.
# Single-K-step kernel (no scratch) used for conv1 (K=48) and the FC (K=9216);
# a K-tiled accumulator kernel is kept as a fallback for large K*N.
# ----------------------------------------------------------------------------
def _matmul_bias_relu_single_kernel(x_ref, w_ref, b_ref, o_ref):
    acc = jnp.dot(x_ref[...], w_ref[...], preferred_element_type=jnp.float32)
    o_ref[...] = jnp.maximum(acc + b_ref[...], 0.0).astype(o_ref.dtype)


def _matmul_bias_relu_ktiled_kernel(x_ref, w_ref, b_ref, o_ref, acc_ref):
    k = pl.program_id(1)

    @pl.when(k == 0)
    def _():
        acc_ref[...] = jnp.zeros_like(acc_ref)

    acc_ref[...] += jnp.dot(x_ref[...], w_ref[...],
                            preferred_element_type=jnp.float32)

    @pl.when(k == pl.num_programs(1) - 1)
    def _():
        o_ref[...] = jnp.maximum(acc_ref[...] + b_ref[...],
                                 0.0).astype(o_ref.dtype)


def _pick_tk(K, N, full_k_weight_bytes=4 * 1024 * 1024, max_tk=2304):
    """Full K when the bf16 weight panel is small; else a 128-multiple tile."""
    if K * N * 2 <= full_k_weight_bytes:
        return K
    for tk in range(max_tk - (max_tk % 128), 127, -128):
        if K % tk == 0:
            return tk
    return K


def _pick_tm(M, tk, bytes_per=2, target=2048, vmem_budget=8 * 1024 * 1024):
    """M tile: largest multiple-of-8 divisor of M under a VMEM-aware cap."""
    cap = max(8, vmem_budget // (2 * tk * bytes_per))   # 2x: double buffering
    target = min(target, cap)
    if M <= target:
        return M                                        # full-dim block is legal
    start = target - (target % 8)
    for tm in range(start, 7, -8):
        if M % tm == 0:
            return tm
    return M  # fallback (never hit for the shapes this module produces)


def matmul_bias_relu(x, w, b, out_dtype=jnp.bfloat16):
    """relu(x @ w + b).  x:(M,K), w:(K,N), b:(N,).  bf16 MXU, f32 accumulate."""
    M, K = x.shape
    K2, N = w.shape
    assert K == K2
    tk = _pick_tk(K, N)
    tm = _pick_tm(M, tk)
    b2 = b.reshape(1, N).astype(jnp.float32)
    xb = x.astype(jnp.bfloat16)
    wb = w.astype(jnp.bfloat16)
    cost = pl.CostEstimate(
        flops=2 * M * K * N,
        transcendentals=0,
        bytes_accessed=(M * K + K * N) * 2 + M * N * jnp.dtype(out_dtype).itemsize)

    if tk == K:
        # Single K step: no accumulator scratch, no pl.when init/finalise.
        return pl.pallas_call(
            _matmul_bias_relu_single_kernel,
            out_shape=jax.ShapeDtypeStruct((M, N), out_dtype),
            grid_spec=pltpu.PrefetchScalarGridSpec(
                num_scalar_prefetch=0,
                grid=(M // tm,),
                in_specs=[
                    pl.BlockSpec((tm, K), lambda i: (i, 0)),
                    pl.BlockSpec((K, N), lambda i: (0, 0)),
                    pl.BlockSpec((1, N), lambda i: (0, 0)),
                ],
                out_specs=pl.BlockSpec((tm, N), lambda i: (i, 0)),
            ),
            compiler_params=pltpu.CompilerParams(
                dimension_semantics=("parallel",),
                vmem_limit_bytes=_VMEM_LIMIT),
            cost_estimate=cost,
        )(xb, wb, b2)

    return pl.pallas_call(
        _matmul_bias_relu_ktiled_kernel,
        out_shape=jax.ShapeDtypeStruct((M, N), out_dtype),
        grid_spec=pltpu.PrefetchScalarGridSpec(
            num_scalar_prefetch=0,
            grid=(M // tm, K // tk),
            in_specs=[
                pl.BlockSpec((tm, tk), lambda i, k: (i, k)),
                pl.BlockSpec((tk, N), lambda i, k: (k, 0)),
                pl.BlockSpec((1, N), lambda i, k: (0, 0)),
            ],
            out_specs=pl.BlockSpec((tm, N), lambda i, k: (i, 0)),
            scratch_shapes=[pltpu.VMEM((tm, N), jnp.float32)],
        ),
        compiler_params=pltpu.CompilerParams(
            dimension_semantics=("parallel", "arbitrary"),
            vmem_limit_bytes=_VMEM_LIMIT),
        cost_estimate=cost,
    )(xb, wb, b2)


# ----------------------------------------------------------------------------
# Fused Conv2d(kernel=4, stride=2, padding=1) + ReLU for conv2..conv4.
#
# The wrapper builds 4 kh-resolved "tap planes":
#   plane[n, kh, h*Wo + w, g*C + c] = x_pad[n, 2h+kh, 2w+g, c]     g = kw in 0..3
# so tap kh contributes ONE matmul (Ho*Wo, 4*Cin) @ (4*Cin, Cout).  The kernel
# accumulates the 4 kh dots in a value (vreg) accumulator and applies
# bias + ReLU once.  No im2col patches hit HBM; K is 128/256/512.
# ----------------------------------------------------------------------------
def _conv_merged_tap_kernel(q_ref, w_ref, b_ref, o_ref):
    # q_ref:(1, 4, tm, 4*Cin) bf16 | w_ref:(4, 4*Cin, Cout) bf16
    # b_ref:(1, Cout) f32          | o_ref:(1, tm, Cout) bf16
    acc = jnp.dot(q_ref[0, 0], w_ref[0], preferred_element_type=jnp.float32)
    for kh in range(1, 4):                    # unrolled: 3 more MXU dots
        acc = acc + jnp.dot(q_ref[0, kh], w_ref[kh],
                            preferred_element_type=jnp.float32)
    o_ref[0] = jnp.maximum(acc + b_ref[...], 0.0).astype(o_ref.dtype)


def _build_tap_planes(x_nhwc):
    """(N,H,W,C) -> (N, 4, Ho*Wo, 4*C), plane kh holds x_pad[2h+kh, 2w+kw, c]
    with the last dim ordered (kw, c)."""
    N, H, W, C = x_nhwc.shape
    Ho, Wo = H // 2, W // 2
    xp = jnp.pad(x_nhwc, ((0, 0), (1, 1), (1, 1), (0, 0)))
    planes = []
    for kh in range(4):
        groups = [xp[:, kh:kh + 2 * Ho:2, g:g + 2 * Wo:2, :] for g in range(4)]
        plane = jnp.concatenate(groups, axis=-1)          # (N, Ho, Wo, 4*C)
        planes.append(plane.reshape(N, Ho * Wo, 4 * C))
    return jnp.stack(planes, axis=1)                      # (N, 4, Ho*Wo, 4*C)


def _pick_conv_tm(M, c_out, acc_budget_bytes=96 * 1024):
    """M tile so the f32 vreg accumulator stays <= ~24 vregs (96 KiB)."""
    if M * c_out * 4 <= acc_budget_bytes:
        return M                                          # full-dim block
    cap = max(8, acc_budget_bytes // (c_out * 4))
    cap -= cap % 8
    for tm in range(cap, 7, -8):
        if M % tm == 0:
            return tm
    return M


def conv4x4s2p1_relu(x_nhwc, w_merged, b):
    """x:(N,H,W,Cin) -> relu(conv(x)) as (N,H/2,W/2,Cout), bf16 NHWC."""
    N, H, W, C = x_nhwc.shape
    Ho, Wo = H // 2, W // 2
    C_out = w_merged.shape[-1]
    M = Ho * Wo
    tm = _pick_conv_tm(M, C_out)
    q = _build_tap_planes(x_nhwc.astype(jnp.bfloat16))    # (N, 4, M, 4*C)
    b2 = b.reshape(1, C_out).astype(jnp.float32)
    cost = pl.CostEstimate(
        flops=2 * N * M * 16 * C * C_out,
        transcendentals=0,
        bytes_accessed=(N * 4 * M * 4 * C + 16 * C * C_out + N * M * C_out) * 2)
    out = pl.pallas_call(
        _conv_merged_tap_kernel,
        out_shape=jax.ShapeDtypeStruct((N, M, C_out), jnp.bfloat16),
        grid_spec=pltpu.PrefetchScalarGridSpec(
            num_scalar_prefetch=0,
            grid=(N, M // tm),
            in_specs=[
                pl.BlockSpec((1, 4, tm, 4 * C), lambda n, m: (n, 0, m, 0)),
                pl.BlockSpec((4, 4 * C, C_out), lambda n, m: (0, 0, 0)),
                pl.BlockSpec((1, C_out), lambda n, m: (0, 0)),
            ],
            out_specs=pl.BlockSpec((1, tm, C_out), lambda n, m: (n, m, 0)),
        ),
        compiler_params=pltpu.CompilerParams(
            dimension_semantics=("parallel", "parallel"),
            vmem_limit_bytes=_VMEM_LIMIT),
        cost_estimate=cost,
    )(q, w_merged.astype(jnp.bfloat16), b2)
    return out.reshape(N, Ho, Wo, C_out)


# ----------------------------------------------------------------------------
# conv1: C_in = 3 is hopeless as a lane dimension, so the first layer uses a
# tiny NHWC im2col (bf16, no transposes) feeding the fused matmul kernel.
# ----------------------------------------------------------------------------
def _im2col_k4s2p1_nhwc(x_nhwc):
    N, H, W, C = x_nhwc.shape
    Ho, Wo = H // 2, W // 2
    xp = jnp.pad(x_nhwc, ((0, 0), (1, 1), (1, 1), (0, 0)))
    taps = [xp[:, kh:kh + 2 * Ho:2, kw:kw + 2 * Wo:2, :]
            for kh in range(4) for kw in range(4)]
    p = jnp.concatenate(taps, axis=-1)            # (N, Ho, Wo, 16*C), (kh,kw,c)
    return p.reshape(N * Ho * Wo, 16 * C), (N, Ho, Wo)


# ----------------------------------------------------------------------------
# Parameters: init in torch layout, then a one-time conversion to the
# kernel-friendly layout (bf16, kh-major/kw-cin merged conv weights, FC weight
# columns permuted from torch's (C,H,W) flatten order to our (H,W,C) order).
# ----------------------------------------------------------------------------
def init_params(key, in_channels, output_size):
    ch = [in_channels, 32, 64, 128, 256]
    convs = []
    for i in range(4):
        key, k1, k2 = jax.random.split(key, 3)
        fan_in = ch[i] * 16
        w = jax.random.normal(k1, (ch[i + 1], ch[i], 4, 4), jnp.float32) / jnp.sqrt(fan_in)
        b = 0.01 * jax.random.normal(k2, (ch[i + 1],), jnp.float32)
        convs.append((w, b))
    fc = None
    if output_size != 0:
        key, k1, k2 = jax.random.split(key, 3)
        fc_size = 256 * 6 * 6
        w_fc = jax.random.normal(k1, (output_size, fc_size), jnp.float32) / jnp.sqrt(fc_size)
        b_fc = 0.01 * jax.random.normal(k2, (output_size,), jnp.float32)
        fc = (w_fc, b_fc)
    return {"convs": convs, "fc": fc}


def prepare_params(raw):
    convs = raw["convs"]
    w1, b1 = convs[0]
    c_out1, c_in1 = w1.shape[0], w1.shape[1]
    conv1 = (w1.transpose(2, 3, 1, 0).reshape(16 * c_in1, c_out1).astype(jnp.bfloat16),
             b1.astype(jnp.float32))
    conv_taps = []
    for (w, b) in convs[1:]:
        c_out, c_in = w.shape[0], w.shape[1]
        # (cout,cin,kh,kw) -> (kh, kw, cin, cout) -> (4, 4*cin, cout): the
        # contraction dim is (kw, cin), matching the tap-plane channel order.
        w_merged = (w.transpose(2, 3, 1, 0)
                    .reshape(4, 4 * c_in, c_out)
                    .astype(jnp.bfloat16))
        conv_taps.append((w_merged, b.astype(jnp.float32)))
    fc = None
    if raw["fc"] is not None:
        w_fc, b_fc = raw["fc"]                       # (out, 256*6*6), (c,h,w) cols
        out = w_fc.shape[0]
        w_hwc = (w_fc.reshape(out, 256, 6, 6)
                 .transpose(0, 2, 3, 1)              # -> (out, h, w, c)
                 .reshape(out, 256 * 6 * 6))
        fc = (w_hwc.T.astype(jnp.bfloat16), b_fc.astype(jnp.float32))
    return {"conv1": conv1, "conv_taps": conv_taps, "fc": fc}


# ----------------------------------------------------------------------------
# Full FeatureExtractorConv forward (activation_function = relu).
# ----------------------------------------------------------------------------
def feature_extractor_conv_forward(inputs, params, output_size):
    ndim = inputs.ndim
    dims_to_recover = 0
    if ndim == 6:
        x = inputs.reshape((-1,) + inputs.shape[3:])       # (B, H, W, C)
        dims_to_recover = 3
    elif ndim == 5:
        x = inputs.reshape((-1,) + inputs.shape[2:])
        dims_to_recover = 2
    elif ndim == 4:
        x = inputs
    elif ndim == 3:
        # TODO(synk): 3-D (unbatched) torch path not replicated.
        raise NotImplementedError("3D (unbatched) input path not implemented")
    else:
        raise ValueError("Unexpected number of dimensions in the input tensor.")

    B = x.shape[0]

    # conv1 + ReLU (tiny im2col, K = 16*C_in, single-K-step matmul) -> NHWC bf16
    w1, b1 = params["conv1"]
    patches, (_, Ho, Wo) = _im2col_k4s2p1_nhwc(x.astype(jnp.bfloat16))
    x = matmul_bias_relu(patches, w1, b1).reshape(B, Ho, Wo, w1.shape[-1])

    # conv2..conv4 + ReLU: merged-tap (4 dots) kernels, NHWC bf16 throughout
    for (w_merged, b) in params["conv_taps"]:
        x = conv4x4s2p1_relu(x, w_merged, b)

    x = x.reshape(B, -1)                                   # (B, 6*6*256), (h,w,c)

    if output_size != 0:
        w_fc, b_fc = params["fc"]                          # columns already (h,w,c)
        ret = matmul_bias_relu(x, w_fc, b_fc, out_dtype=jnp.float32)
        if dims_to_recover != 0:
            ret = ret.reshape(inputs.shape[:dims_to_recover] + (-1,))
        return ret
    # Matches the reference module, which returns torch.zeros(0) when fc is None.
    return jnp.zeros((0,), jnp.float32)


# ----------------------------------------------------------------------------
# Pure-JAX f32 reference (torch semantics) for a loose sanity check.
# ----------------------------------------------------------------------------
def _reference_forward(x_nhwc, raw_params, output_size):
    x = x_nhwc
    for (w, b) in raw_params["convs"]:
        x = jax.lax.conv_general_dilated(
            x, jnp.transpose(w, (2, 3, 1, 0)),             # OIHW -> HWIO
            window_strides=(2, 2), padding=((1, 1), (1, 1)),
            dimension_numbers=("NHWC", "HWIO", "NHWC"))
        x = jax.nn.relu(x + b)
    x = jnp.transpose(x, (0, 3, 1, 2)).reshape(x.shape[0], -1)   # (c,h,w) flatten
    if output_size == 0:
        return jnp.zeros((0,), jnp.float32)
    w_fc, b_fc = raw_params["fc"]
    return jax.nn.relu(x @ w_fc.T + b_fc)


if __name__ == "__main__":
    key = jax.random.PRNGKey(0)
    batch, H, W, C = 2, 96, 96, 3      # 96x96 forced by fc_size = 256*6*6
    output_size = 32

    key, kx, kp = jax.random.split(key, 3)
    x = jax.random.normal(kx, (batch, H, W, C), jnp.float32)
    raw_params = init_params(kp, C, output_size)
    params = prepare_params(raw_params)

    fwd = jax.jit(functools.partial(feature_extractor_conv_forward,
                                    output_size=output_size))
    out = fwd(x, params)
    jax.block_until_ready(out)
    assert out.shape == (batch, output_size)

    # Loose sanity check vs. f32 reference (bf16 activations => ~1% expected).
    ref = _reference_forward(x, raw_params, output_size)
    jax.block_until_ready(ref)
    scale = float(jnp.max(jnp.abs(ref))) + 1e-6
    err = float(jnp.max(jnp.abs(out.astype(jnp.float32) - ref)))
    assert err <= 0.15 * scale, (err, scale)

    print("KERNEL_OK")
</pallas_src>

<mosaic_0001>
module attributes {stable_mosaic.version = 11 : i64} {
  func.func @_matmul_bias_relu_single_kernel(%arg0: i32, %arg1: memref<1536x48xbf16, #tpu.memory_space<vmem>>, %arg2: memref<48x32xbf16, #tpu.memory_space<vmem>>, %arg3: memref<1x32xf32, #tpu.memory_space<vmem>>, %arg4: memref<1536x32xbf16, #tpu.memory_space<vmem>>) attributes {dimension_semantics = [#tpu.dimension_semantics<parallel>], iteration_bounds = array<i64: 3>, scalar_prefetch = 0 : i64, scratch_operands = 0 : i64, tpu.core_type = #tpu.core_type<tc>, window_params = [{transform_indices = @transform_0, window_bounds = array<i64: 1536, 48>}, {pipeline_mode = #tpu.pipeline_mode<synchronous>, transform_indices = @transform_1, window_bounds = array<i64: 48, 32>}, {pipeline_mode = #tpu.pipeline_mode<synchronous>, transform_indices = @transform_2, window_bounds = array<i64: 1, 32>}, {transform_indices = @transform_3, window_bounds = array<i64: 1536, 32>}]} {
    %c0 = arith.constant 0 : index
    %c0_0 = arith.constant 0 : index
    %0 = vector.load %arg1[%c0, %c0_0] : memref<1536x48xbf16, #tpu.memory_space<vmem>>, vector<1536x48xbf16>
    %c0_1 = arith.constant 0 : index
    %c0_2 = arith.constant 0 : index
    %1 = vector.load %arg2[%c0_1, %c0_2] : memref<48x32xbf16, #tpu.memory_space<vmem>>, vector<48x32xbf16>
    %cst = arith.constant dense<0.000000e+00> : vector<1536x32xf32>
    %2 = tpu.matmul %0, %1, %cst {dimension_numbers = #tpu.dot_dimension_numbers<[1], [0], [0], [1], [0, 0, 1, 1], [], []>} : vector<1536x48xbf16>, vector<48x32xbf16>, vector<1536x32xf32> -> vector<1536x32xf32>
    %c0_3 = arith.constant 0 : index
    %c0_4 = arith.constant 0 : index
    %3 = vector.load %arg3[%c0_3, %c0_4] : memref<1x32xf32, #tpu.memory_space<vmem>>, vector<1x32xf32>
    %4 = vector.broadcast %3 : vector<1x32xf32> to vector<1536x32xf32>
    %5 = arith.addf %2, %4 : vector<1536x32xf32>
    %cst_5 = arith.constant 0.000000e+00 : f32
    %6 = vector.broadcast %cst_5 : f32 to vector<1536x32xf32>
    %7 = arith.maximumf %5, %6 : vector<1536x32xf32>
    %8 = arith.truncf %7 : vector<1536x32xf32> to vector<1536x32xbf16>
    %c0_6 = arith.constant 0 : index
    %c0_7 = arith.constant 0 : index
    %9 = vector.load %arg4[%c0_6, %c0_7] : memref<1536x32xbf16, #tpu.memory_space<vmem>>, vector<1536x32xbf16>
    tpu.vector_store %arg4[%c0_6, %c0_7], %8 {strides = array<i32>} : memref<1536x32xbf16, #tpu.memory_space<vmem>>, vector<1536x32xbf16>,
    return
  }
  func.func @transform_0(%arg0: i32) -> (i32, i32) {
    %c0_i32 = arith.constant 0 : i32
    %c0_i32_0 = arith.constant 0 : i32
    return %arg0, %c0_i32 : i32, i32
  }
  func.func @transform_1(%arg0: i32) -> (i32, i32) {
    %c0_i32 = arith.constant 0 : i32
    %c0_i32_0 = arith.constant 0 : i32
    %c0_i32_1 = arith.constant 0 : i32
    return %c0_i32, %c0_i32_0 : i32, i32
  }
  func.func @transform_2(%arg0: i32) -> (i32, i32) {
    %c0_i32 = arith.constant 0 : i32
    %c0_i32_0 = arith.constant 0 : i32
    %c0_i32_1 = arith.constant 0 : i32
    return %c0_i32, %c0_i32_0 : i32, i32
  }
  func.func @transform_3(%arg0: i32) -> (i32, i32) {
    %c0_i32 = arith.constant 0 : i32
    %c0_i32_0 = arith.constant 0 : i32
    return %arg0, %c0_i32 : i32, i32
  }
}

module attributes {stable_mosaic.version = 11 : i64} {
  func.func @_conv_merged_tap_kernel(%arg0: i32, %arg1: i32, %arg2: memref<1x4x288x128xbf16, #tpu.memory_space<vmem>>, %arg3: memref<4x128x64xbf16, #tpu.memory_space<vmem>>, %arg4: memref<1x64xf32, #tpu.memory_space<vmem>>, %arg5: memref<1x288x64xbf16, #tpu.memory_space<vmem>>) attributes {dimension_semantics = [#tpu.dimension_semantics<parallel>, #tpu.dimension_semantics<parallel>], iteration_bounds = array<i64: 2, 2>, scalar_prefetch = 0 : i64, scratch_operands = 0 : i64, tpu.core_type = #tpu.core_type<tc>, window_params = [{transform_indices = @transform_0, window_bounds = array<i64: 1, 4, 288, 128>}, {pipeline_mode = #tpu.pipeline_mode<synchronous>, transform_indices = @transform_1, window_bounds = array<i64: 4, 128, 64>}, {pipeline_mode = #tpu.pipeline_mode<synchronous>, transform_indices = @transform_2, window_bounds = array<i64: 1, 64>}, {transform_indices = @transform_3, window_bounds = array<i64: 1, 288, 64>}]} {
    %c0 = arith.constant 0 : index
    %c0_0 = arith.constant 0 : index
    %c0_1 = arith.constant 0 : index
    %c0_2 = arith.constant 0 : index
    %0 = vector.load %arg2[%c0, %c0_0, %c0_1, %c0_2] : memref<1x4x288x128xbf16, #tpu.memory_space<vmem>>, vector<1x1x288x128xbf16>
    %1 = vector.shape_cast %0 : vector<1x1x288x128xbf16> to vector<288x128xbf16>
    %c0_3 = arith.constant 0 : index
    %c0_4 = arith.constant 0 : index
    %c0_5 = arith.constant 0 : index
    %2 = vector.load %arg3[%c0_3, %c0_4, %c0_5] : memref<4x128x64xbf16, #tpu.memory_space<vmem>>, vector<1x128x64xbf16>
    %3 = vector.shape_cast %2 : vector<1x128x64xbf16> to vector<128x64xbf16>
    %cst = arith.constant dense<0.000000e+00> : vector<288x64xf32>
    %4 = tpu.matmul %1, %3, %cst {dimension_numbers = #tpu.dot_dimension_numbers<[1], [0], [0], [1], [0, 0, 1, 1], [], []>} : vector<288x128xbf16>, vector<128x64xbf16>, vector<288x64xf32> -> vector<288x64xf32>
    %c0_6 = arith.constant 0 : index
    %c1 = arith.constant 1 : index
    %c0_7 = arith.constant 0 : index
    %c0_8 = arith.constant 0 : index
    %5 = vector.load %arg2[%c0_6, %c1, %c0_7, %c0_8] : memref<1x4x288x128xbf16, #tpu.memory_space<vmem>>, vector<1x1x288x128xbf16>
    %6 = vector.shape_cast %5 : vector<1x1x288x128xbf16> to vector<288x128xbf16>
    %c1_9 = arith.constant 1 : index
    %c0_10 = arith.constant 0 : index
    %c0_11 = arith.constant 0 : index
    %7 = vector.load %arg3[%c1_9, %c0_10, %c0_11] : memref<4x128x64xbf16, #tpu.memory_space<vmem>>, vector<1x128x64xbf16>
    %8 = vector.shape_cast %7 : vector<1x128x64xbf16> to vector<128x64xbf16>
    %cst_12 = arith.constant dense<0.000000e+00> : vector<288x64xf32>
    %9 = tpu.matmul %6, %8, %cst_12 {dimension_numbers = #tpu.dot_dimension_numbers<[1], [0], [0], [1], [0, 0, 1, 1], [], []>} : vector<288x128xbf16>, vector<128x64xbf16>, vector<288x64xf32> -> vector<288x64xf32>
    %10 = arith.addf %4, %9 : vector<288x64xf32>
    %c0_13 = arith.constant 0 : index
    %c2 = arith.constant 2 : index
    %c0_14 = arith.constant 0 : index
    %c0_15 = arith.constant 0 : index
    %11 = vector.load %arg2[%c0_13, %c2, %c0_14, %c0_15] : memref<1x4x288x128xbf16, #tpu.memory_space<vmem>>, vector<1x1x288x128xbf16>
    %12 = vector.shape_cast %11 : vector<1x1x288x128xbf16> to vector<288x128xbf16>
    %c2_16 = arith.constant 2 : index
    %c0_17 = arith.constant 0 : index
    %c0_18 = arith.constant 0 : index
    %13 = vector.load %arg3[%c2_16, %c0_17, %c0_18] : memref<4x128x64xbf16, #tpu.memory_space<vmem>>, vector<1x128x64xbf16>
    %14 = vector.shape_cast %13 : vector<1x128x64xbf16> to vector<128x64xbf16>
    %cst_19 = arith.constant dense<0.000000e+00> : vector<288x64xf32>
    %15 = tpu.matmul %12, %14, %cst_19 {dimension_numbers = #tpu.dot_dimension_numbers<[1], [0], [0], [1], [0, 0, 1, 1], [], []>} : vector<288x128xbf16>, vector<128x64xbf16>, vector<288x64xf32> -> vector<288x64xf32>
    %16 = arith.addf %10, %15 : vector<288x64xf32>
    %c0_20 = arith.constant 0 : index
    %c3 = arith.constant 3 : index
    %c0_21 = arith.constant 0 : index
    %c0_22 = arith.constant 0 : index
    %17 = vector.load %arg2[%c0_20, %c3, %c0_21, %c0_22] : memref<1x4x288x128xbf16, #tpu.memory_space<vmem>>, vector<1x1x288x128xbf16>
    %18 = vector.shape_cast %17 : vector<1x1x288x128xbf16> to vector<288x128xbf16>
    %c3_23 = arith.constant 3 : index
    %c0_24 = arith.constant 0 : index
    %c0_25 = arith.constant 0 : index
    %19 = vector.load %arg3[%c3_23, %c0_24, %c0_25] : memref<4x128x64xbf16, #tpu.memory_space<vmem>>, vector<1x128x64xbf16>
    %20 = vector.shape_cast %19 : vector<1x128x64xbf16> to vector<128x64xbf16>
    %cst_26 = arith.constant dense<0.000000e+00> : vector<288x64xf32>
    %21 = tpu.matmul %18, %20, %cst_26 {dimension_numbers = #tpu.dot_dimension_numbers<[1], [0], [0], [1], [0, 0, 1, 1], [], []>} : vector<288x128xbf16>, vector<128x64xbf16>, vector<288x64xf32> -> vector<288x64xf32>
    %22 = arith.addf %16, %21 : vector<288x64xf32>
    %c0_27 = arith.constant 0 : index
    %c0_28 = arith.constant 0 : index
    %23 = vector.load %arg4[%c0_27, %c0_28] : memref<1x64xf32, #tpu.memory_space<vmem>>, vector<1x64xf32>
    %24 = vector.broadcast %23 : vector<1x64xf32> to vector<288x64xf32>
    %25 = arith.addf %22, %24 : vector<288x64xf32>
    %cst_29 = arith.constant 0.000000e+00 : f32
    %26 = vector.broadcast %cst_29 : f32 to vector<288x64xf32>
    %27 = arith.maximumf %25, %26 : vector<288x64xf32>
    %28 = arith.truncf %27 : vector<288x64xf32> to vector<288x64xbf16>
    %c0_30 = arith.constant 0 : index
    %c0_31 = arith.constant 0 : index
    %c0_32 = arith.constant 0 : index
    %29 = vector.load %arg5[%c0_30, %c0_31, %c0_32] : memref<1x288x64xbf16, #tpu.memory_space<vmem>>, vector<1x288x64xbf16>
    %30 = vector.shape_cast %29 : vector<1x288x64xbf16> to vector<288x64xbf16>
    %31 = vector.shape_cast %28 : vector<288x64xbf16> to vector<1x288x64xbf16>
    tpu.vector_store %arg5[%c0_30, %c0_31, %c0_32], %31 {strides = array<i32>} : memref<1x288x64xbf16, #tpu.memory_space<vmem>>, vector<1x288x64xbf16>,
    return
  }
  func.func @transform_0(%arg0: i32, %arg1: i32) -> (i32, i32, i32, i32) {
    %c0_i32 = arith.constant 0 : i32
    %c0_i32_0 = arith.constant 0 : i32
    %c0_i32_1 = arith.constant 0 : i32
    return %arg0, %c0_i32, %arg1, %c0_i32_0 : i32, i32, i32, i32
  }
  func.func @transform_1(%arg0: i32, %arg1: i32) -> (i32, i32, i32) {
    %c0_i32 = arith.constant 0 : i32
    %c0_i32_0 = arith.constant 0 : i32
    %c0_i32_1 = arith.constant 0 : i32
    %c0_i32_2 = arith.constant 0 : i32
    return %c0_i32, %c0_i32_0, %c0_i32_1 : i32, i32, i32
  }
  func.func @transform_2(%arg0: i32, %arg1: i32) -> (i32, i32) {
    %c0_i32 = arith.constant 0 : i32
    %c0_i32_0 = arith.constant 0 : i32
    %c0_i32_1 = arith.constant 0 : i32
    return %c0_i32, %c0_i32_0 : i32, i32
  }
  func.func @transform_3(%arg0: i32, %arg1: i32) -> (i32, i32, i32) {
    %c0_i32 = arith.constant 0 : i32
    %c0_i32_0 = arith.constant 0 : i32
    return %arg0, %arg1, %c0_i32 : i32, i32, i32
  }
}

module attributes {stable_mosaic.version = 11 : i64} {
  func.func @_conv_merged_tap_kernel(%arg0: i32, %arg1: i32, %arg2: memref<1x4x144x256xbf16, #tpu.memory_space<vmem>>, %arg3: memref<4x256x128xbf16, #tpu.memory_space<vmem>>, %arg4: memref<1x128xf32, #tpu.memory_space<vmem>>, %arg5: memref<1x144x128xbf16, #tpu.memory_space<vmem>>) attributes {dimension_semantics = [#tpu.dimension_semantics<parallel>, #tpu.dimension_semantics<parallel>], iteration_bounds = array<i64: 2, 1>, scalar_prefetch = 0 : i64, scratch_operands = 0 : i64, tpu.core_type = #tpu.core_type<tc>, window_params = [{transform_indices = @transform_0, window_bounds = array<i64: 1, 4, 144, 256>}, {pipeline_mode = #tpu.pipeline_mode<synchronous>, transform_indices = @transform_1, window_bounds = array<i64: 4, 256, 128>}, {pipeline_mode = #tpu.pipeline_mode<synchronous>, transform_indices = @transform_2, window_bounds = array<i64: 1, 128>}, {transform_indices = @transform_3, window_bounds = array<i64: 1, 144, 128>}]} {
    %c0 = arith.constant 0 : index
    %c0_0 = arith.constant 0 : index
    %c0_1 = arith.constant 0 : index
    %c0_2 = arith.constant 0 : index
    %0 = vector.load %arg2[%c0, %c0_0, %c0_1, %c0_2] : memref<1x4x144x256xbf16, #tpu.memory_space<vmem>>, vector<1x1x144x256xbf16>
    %1 = vector.shape_cast %0 : vector<1x1x144x256xbf16> to vector<144x256xbf16>
    %c0_3 = arith.constant 0 : index
    %c0_4 = arith.constant 0 : index
    %c0_5 = arith.constant 0 : index
    %2 = vector.load %arg3[%c0_3, %c0_4, %c0_5] : memref<4x256x128xbf16, #tpu.memory_space<vmem>>, vector<1x256x128xbf16>
    %3 = vector.shape_cast %2 : vector<1x256x128xbf16> to vector<256x128xbf16>
    %cst = arith.constant dense<0.000000e+00> : vector<144x128xf32>
    %4 = tpu.matmul %1, %3, %cst {dimension_numbers = #tpu.dot_dimension_numbers<[1], [0], [0], [1], [0, 0, 1, 1], [], []>} : vector<144x256xbf16>, vector<256x128xbf16>, vector<144x128xf32> -> vector<144x128xf32>
    %c0_6 = arith.constant 0 : index
    %c1 = arith.constant 1 : index
    %c0_7 = arith.constant 0 : index
    %c0_8 = arith.constant 0 : index
    %5 = vector.load %arg2[%c0_6, %c1, %c0_7, %c0_8] : memref<1x4x144x256xbf16, #tpu.memory_space<vmem>>, vector<1x1x144x256xbf16>
    %6 = vector.shape_cast %5 : vector<1x1x144x256xbf16> to vector<144x256xbf16>
    %c1_9 = arith.constant 1 : index
    %c0_10 = arith.constant 0 : index
    %c0_11 = arith.constant 0 : index
    %7 = vector.load %arg3[%c1_9, %c0_10, %c0_11] : memref<4x256x128xbf16, #tpu.memory_space<vmem>>, vector<1x256x128xbf16>
    %8 = vector.shape_cast %7 : vector<1x256x128xbf16> to vector<256x128xbf16>
    %cst_12 = arith.constant dense<0.000000e+00> : vector<144x128xf32>
    %9 = tpu.matmul %6, %8, %cst_12 {dimension_numbers = #tpu.dot_dimension_numbers<[1], [0], [0], [1], [0, 0, 1, 1], [], []>} : vector<144x256xbf16>, vector<256x128xbf16>, vector<144x128xf32> -> vector<144x128xf32>
    %10 = arith.addf %4, %9 : vector<144x128xf32>
    %c0_13 = arith.constant 0 : index
    %c2 = arith.constant 2 : index
    %c0_14 = arith.constant 0 : index
    %c0_15 = arith.constant 0 : index
    %11 = vector.load %arg2[%c0_13, %c2, %c0_14, %c0_15] : memref<1x4x144x256xbf16, #tpu.memory_space<vmem>>, vector<1x1x144x256xbf16>
    %12 = vector.shape_cast %11 : vector<1x1x144x256xbf16> to vector<144x256xbf16>
    %c2_16 = arith.constant 2 : index
    %c0_17 = arith.constant 0 : index
    %c0_18 = arith.constant 0 : index
    %13 = vector.load %arg3[%c2_16, %c0_17, %c0_18] : memref<4x256x128xbf16, #tpu.memory_space<vmem>>, vector<1x256x128xbf16>
    %14 = vector.shape_cast %13 : vector<1x256x128xbf16> to vector<256x128xbf16>
    %cst_19 = arith.constant dense<0.000000e+00> : vector<144x128xf32>
    %15 = tpu.matmul %12, %14, %cst_19 {dimension_numbers = #tpu.dot_dimension_numbers<[1], [0], [0], [1], [0, 0, 1, 1], [], []>} : vector<144x256xbf16>, vector<256x128xbf16>, vector<144x128xf32> -> vector<144x128xf32>
    %16 = arith.addf %10, %15 : vector<144x128xf32>
    %c0_20 = arith.constant 0 : index
    %c3 = arith.constant 3 : index
    %c0_21 = arith.constant 0 : index
    %c0_22 = arith.constant 0 : index
    %17 = vector.load %arg2[%c0_20, %c3, %c0_21, %c0_22] : memref<1x4x144x256xbf16, #tpu.memory_space<vmem>>, vector<1x1x144x256xbf16>
    %18 = vector.shape_cast %17 : vector<1x1x144x256xbf16> to vector<144x256xbf16>
    %c3_23 = arith.constant 3 : index
    %c0_24 = arith.constant 0 : index
    %c0_25 = arith.constant 0 : index
    %19 = vector.load %arg3[%c3_23, %c0_24, %c0_25] : memref<4x256x128xbf16, #tpu.memory_space<vmem>>, vector<1x256x128xbf16>
    %20 = vector.shape_cast %19 : vector<1x256x128xbf16> to vector<256x128xbf16>
    %cst_26 = arith.constant dense<0.000000e+00> : vector<144x128xf32>
    %21 = tpu.matmul %18, %20, %cst_26 {dimension_numbers = #tpu.dot_dimension_numbers<[1], [0], [0], [1], [0, 0, 1, 1], [], []>} : vector<144x256xbf16>, vector<256x128xbf16>, vector<144x128xf32> -> vector<144x128xf32>
    %22 = arith.addf %16, %21 : vector<144x128xf32>
    %c0_27 = arith.constant 0 : index
    %c0_28 = arith.constant 0 : index
    %23 = vector.load %arg4[%c0_27, %c0_28] : memref<1x128xf32, #tpu.memory_space<vmem>>, vector<1x128xf32>
    %24 = vector.broadcast %23 : vector<1x128xf32> to vector<144x128xf32>
    %25 = arith.addf %22, %24 : vector<144x128xf32>
    %cst_29 = arith.constant 0.000000e+00 : f32
    %26 = vector.broadcast %cst_29 : f32 to vector<144x128xf32>
    %27 = arith.maximumf %25, %26 : vector<144x128xf32>
    %28 = arith.truncf %27 : vector<144x128xf32> to vector<144x128xbf16>
    %c0_30 = arith.constant 0 : index
    %c0_31 = arith.constant 0 : index
    %c0_32 = arith.constant 0 : index
    %29 = vector.load %arg5[%c0_30, %c0_31, %c0_32] : memref<1x144x128xbf16, #tpu.memory_space<vmem>>, vector<1x144x128xbf16>
    %30 = vector.shape_cast %29 : vector<1x144x128xbf16> to vector<144x128xbf16>
    %31 = vector.shape_cast %28 : vector<144x128xbf16> to vector<1x144x128xbf16>
    tpu.vector_store %arg5[%c0_30, %c0_31, %c0_32], %31 {strides = array<i32>} : memref<1x144x128xbf16, #tpu.memory_space<vmem>>, vector<1x144x128xbf16>,
    return
  }
  func.func @transform_0(%arg0: i32, %arg1: i32) -> (i32, i32, i32, i32) {
    %c0_i32 = arith.constant 0 : i32
    %c0_i32_0 = arith.constant 0 : i32
    %c0_i32_1 = arith.constant 0 : i32
    return %arg0, %c0_i32, %arg1, %c0_i32_0 : i32, i32, i32, i32
  }
  func.func @transform_1(%arg0: i32, %arg1: i32) -> (i32, i32, i32) {
    %c0_i32 = arith.constant 0 : i32
    %c0_i32_0 = arith.constant 0 : i32
    %c0_i32_1 = arith.constant 0 : i32
    %c0_i32_2 = arith.constant 0 : i32
    return %c0_i32, %c0_i32_0, %c0_i32_1 : i32, i32, i32
  }
  func.func @transform_2(%arg0: i32, %arg1: i32) -> (i32, i32) {
    %c0_i32 = arith.constant 0 : i32
    %c0_i32_0 = arith.constant 0 : i32
    %c0_i32_1 = arith.constant 0 : i32
    return %c0_i32, %c0_i32_0 : i32, i32
  }
  func.func @transform_3(%arg0: i32, %arg1: i32) -> (i32, i32, i32) {
    %c0_i32 = arith.constant 0 : i32
    %c0_i32_0 = arith.constant 0 : i32
    return %arg0, %arg1, %c0_i32 : i32, i32, i32
  }
}

module attributes {stable_mosaic.version = 11 : i64} {
  func.func @_conv_merged_tap_kernel(%arg0: i32, %arg1: i32, %arg2: memref<1x4x36x512xbf16, #tpu.memory_space<vmem>>, %arg3: memref<4x512x256xbf16, #tpu.memory_space<vmem>>, %arg4: memref<1x256xf32, #tpu.memory_space<vmem>>, %arg5: memref<1x36x256xbf16, #tpu.memory_space<vmem>>) attributes {dimension_semantics = [#tpu.dimension_semantics<parallel>, #tpu.dimension_semantics<parallel>], iteration_bounds = array<i64: 2, 1>, scalar_prefetch = 0 : i64, scratch_operands = 0 : i64, tpu.core_type = #tpu.core_type<tc>, window_params = [{transform_indices = @transform_0, window_bounds = array<i64: 1, 4, 36, 512>}, {pipeline_mode = #tpu.pipeline_mode<synchronous>, transform_indices = @transform_1, window_bounds = array<i64: 4, 512, 256>}, {pipeline_mode = #tpu.pipeline_mode<synchronous>, transform_indices = @transform_2, window_bounds = array<i64: 1, 256>}, {transform_indices = @transform_3, window_bounds = array<i64: 1, 36, 256>}]} {
    %c0 = arith.constant 0 : index
    %c0_0 = arith.constant 0 : index
    %c0_1 = arith.constant 0 : index
    %c0_2 = arith.constant 0 : index
    %0 = vector.load %arg2[%c0, %c0_0, %c0_1, %c0_2] : memref<1x4x36x512xbf16, #tpu.memory_space<vmem>>, vector<1x1x36x512xbf16>
    %1 = vector.shape_cast %0 : vector<1x1x36x512xbf16> to vector<36x512xbf16>
    %c0_3 = arith.constant 0 : index
    %c0_4 = arith.constant 0 : index
    %c0_5 = arith.constant 0 : index
    %2 = vector.load %arg3[%c0_3, %c0_4, %c0_5] : memref<4x512x256xbf16, #tpu.memory_space<vmem>>, vector<1x512x256xbf16>
    %3 = vector.shape_cast %2 : vector<1x512x256xbf16> to vector<512x256xbf16>
    %cst = arith.constant dense<0.000000e+00> : vector<36x256xf32>
    %4 = tpu.matmul %1, %3, %cst {dimension_numbers = #tpu.dot_dimension_numbers<[1], [0], [0], [1], [0, 0, 1, 1], [], []>} : vector<36x512xbf16>, vector<512x256xbf16>, vector<36x256xf32> -> vector<36x256xf32>
    %c0_6 = arith.constant 0 : index
    %c1 = arith.constant 1 : index
    %c0_7 = arith.constant 0 : index
    %c0_8 = arith.constant 0 : index
    %5 = vector.load %arg2[%c0_6, %c1, %c0_7, %c0_8] : memref<1x4x36x512xbf16, #tpu.memory_space<vmem>>, vector<1x1x36x512xbf16>
    %6 = vector.shape_cast %5 : vector<1x1x36x512xbf16> to vector<36x512xbf16>
    %c1_9 = arith.constant 1 : index
    %c0_10 = arith.constant 0 : index
    %c0_11 = arith.constant 0 : index
    %7 = vector.load %arg3[%c1_9, %c0_10, %c0_11] : memref<4x512x256xbf16, #tpu.memory_space<vmem>>, vector<1x512x256xbf16>
    %8 = vector.shape_cast %7 : vector<1x512x256xbf16> to vector<512x256xbf16>
    %cst_12 = arith.constant dense<0.000000e+00> : vector<36x256xf32>
    %9 = tpu.matmul %6, %8, %cst_12 {dimension_numbers = #tpu.dot_dimension_numbers<[1], [0], [0], [1], [0, 0, 1, 1], [], []>} : vector<36x512xbf16>, vector<512x256xbf16>, vector<36x256xf32> -> vector<36x256xf32>
    %10 = arith.addf %4, %9 : vector<36x256xf32>
    %c0_13 = arith.constant 0 : index
    %c2 = arith.constant 2 : index
    %c0_14 = arith.constant 0 : index
    %c0_15 = arith.constant 0 : index
    %11 = vector.load %arg2[%c0_13, %c2, %c0_14, %c0_15] : memref<1x4x36x512xbf16, #tpu.memory_space<vmem>>, vector<1x1x36x512xbf16>
    %12 = vector.shape_cast %11 : vector<1x1x36x512xbf16> to vector<36x512xbf16>
    %c2_16 = arith.constant 2 : index
    %c0_17 = arith.constant 0 : index
    %c0_18 = arith.constant 0 : index
    %13 = vector.load %arg3[%c2_16, %c0_17, %c0_18] : memref<4x512x256xbf16, #tpu.memory_space<vmem>>, vector<1x512x256xbf16>
    %14 = vector.shape_cast %13 : vector<1x512x256xbf16> to vector<512x256xbf16>
    %cst_19 = arith.constant dense<0.000000e+00> : vector<36x256xf32>
    %15 = tpu.matmul %12, %14, %cst_19 {dimension_numbers = #tpu.dot_dimension_numbers<[1], [0], [0], [1], [0, 0, 1, 1], [], []>} : vector<36x512xbf16>, vector<512x256xbf16>, vector<36x256xf32> -> vector<36x256xf32>
    %16 = arith.addf %10, %15 : vector<36x256xf32>
    %c0_20 = arith.constant 0 : index
    %c3 = arith.constant 3 : index
    %c0_21 = arith.constant 0 : index
    %c0_22 = arith.constant 0 : index
    %17 = vector.load %arg2[%c0_20, %c3, %c0_21, %c0_22] : memref<1x4x36x512xbf16, #tpu.memory_space<vmem>>, vector<1x1x36x512xbf16>
    %18 = vector.shape_cast %17 : vector<1x1x36x512xbf16> to vector<36x512xbf16>
    %c3_23 = arith.constant 3 : index
    %c0_24 = arith.constant 0 : index
    %c0_25 = arith.constant 0 : index
    %19 = vector.load %arg3[%c3_23, %c0_24, %c0_25] : memref<4x512x256xbf16, #tpu.memory_space<vmem>>, vector<1x512x256xbf16>
    %20 = vector.shape_cast %19 : vector<1x512x256xbf16> to vector<512x256xbf16>
    %cst_26 = arith.constant dense<0.000000e+00> : vector<36x256xf32>
    %21 = tpu.matmul %18, %20, %cst_26 {dimension_numbers = #tpu.dot_dimension_numbers<[1], [0], [0], [1], [0, 0, 1, 1], [], []>} : vector<36x512xbf16>, vector<512x256xbf16>, vector<36x256xf32> -> vector<36x256xf32>
    %22 = arith.addf %16, %21 : vector<36x256xf32>
    %c0_27 = arith.constant 0 : index
    %c0_28 = arith.constant 0 : index
    %23 = vector.load %arg4[%c0_27, %c0_28] : memref<1x256xf32, #tpu.memory_space<vmem>>, vector<1x256xf32>
    %24 = vector.broadcast %23 : vector<1x256xf32> to vector<36x256xf32>
    %25 = arith.addf %22, %24 : vector<36x256xf32>
    %cst_29 = arith.constant 0.000000e+00 : f32
    %26 = vector.broadcast %cst_29 : f32 to vector<36x256xf32>
    %27 = arith.maximumf %25, %26 : vector<36x256xf32>
    %28 = arith.truncf %27 : vector<36x256xf32> to vector<36x256xbf16>
    %c0_30 = arith.constant 0 : index
    %c0_31 = arith.constant 0 : index
    %c0_32 = arith.constant 0 : index
    %29 = vector.load %arg5[%c0_30, %c0_31, %c0_32] : memref<1x36x256xbf16, #tpu.memory_space<vmem>>, vector<1x36x256xbf16>
    %30 = vector.shape_cast %29 : vector<1x36x256xbf16> to vector<36x256xbf16>
    %31 = vector.shape_cast %28 : vector<36x256xbf16> to vector<1x36x256xbf16>
    tpu.vector_store %arg5[%c0_30, %c0_31, %c0_32], %31 {strides = array<i32>} : memref<1x36x256xbf16, #tpu.memory_space<vmem>>, vector<1x36x256xbf16>,
    return
  }
  func.func @transform_0(%arg0: i32, %arg1: i32) -> (i32, i32, i32, i32) {
    %c0_i32 = arith.constant 0 : i32
    %c0_i32_0 = arith.constant 0 : i32
    %c0_i32_1 = arith.constant 0 : i32
    return %arg0, %c0_i32, %arg1, %c0_i32_0 : i32, i32, i32, i32
  }
  func.func @transform_1(%arg0: i32, %arg1: i32) -> (i32, i32, i32) {
    %c0_i32 = arith.constant 0 : i32
    %c0_i32_0 = arith.constant 0 : i32
    %c0_i32_1 = arith.constant 0 : i32
    %c0_i32_2 = arith.constant 0 : i32
    return %c0_i32, %c0_i32_0, %c0_i32_1 : i32, i32, i32
  }
  func.func @transform_2(%arg0: i32, %arg1: i32) -> (i32, i32) {
    %c0_i32 = arith.constant 0 : i32
    %c0_i32_0 = arith.constant 0 : i32
    %c0_i32_1 = arith.constant 0 : i32
    return %c0_i32, %c0_i32_0 : i32, i32
  }
  func.func @transform_3(%arg0: i32, %arg1: i32) -> (i32, i32, i32) {
    %c0_i32 = arith.constant 0 : i32
    %c0_i32_0 = arith.constant 0 : i32
    return %arg0, %arg1, %c0_i32 : i32, i32, i32
  }
}

module attributes {stable_mosaic.version = 11 : i64} {
  func.func @_matmul_bias_relu_single_kernel(%arg0: i32, %arg1: memref<2x9216xbf16, #tpu.memory_space<vmem>>, %arg2: memref<9216x32xbf16, #tpu.memory_space<vmem>>, %arg3: memref<1x32xf32, #tpu.memory_space<vmem>>, %arg4: memref<2x32xf32, #tpu.memory_space<vmem>>) attributes {dimension_semantics = [#tpu.dimension_semantics<parallel>], iteration_bounds = array<i64: 1>, scalar_prefetch = 0 : i64, scratch_operands = 0 : i64, tpu.core_type = #tpu.core_type<tc>, window_params = [{transform_indices = @transform_0, window_bounds = array<i64: 2, 9216>}, {pipeline_mode = #tpu.pipeline_mode<synchronous>, transform_indices = @transform_1, window_bounds = array<i64: 9216, 32>}, {pipeline_mode = #tpu.pipeline_mode<synchronous>, transform_indices = @transform_2, window_bounds = array<i64: 1, 32>}, {transform_indices = @transform_3, window_bounds = array<i64: 2, 32>}]} {
    %c0 = arith.constant 0 : index
    %c0_0 = arith.constant 0 : index
    %0 = vector.load %arg1[%c0, %c0_0] : memref<2x9216xbf16, #tpu.memory_space<vmem>>, vector<2x9216xbf16>
    %c0_1 = arith.constant 0 : index
    %c0_2 = arith.constant 0 : index
    %1 = vector.load %arg2[%c0_1, %c0_2] : memref<9216x32xbf16, #tpu.memory_space<vmem>>, vector<9216x32xbf16>
    %cst = arith.constant dense<0.000000e+00> : vector<2x32xf32>
    %2 = tpu.matmul %0, %1, %cst {dimension_numbers = #tpu.dot_dimension_numbers<[1], [0], [0], [1], [0, 0, 1, 1], [], []>} : vector<2x9216xbf16>, vector<9216x32xbf16>, vector<2x32xf32> -> vector<2x32xf32>
    %c0_3 = arith.constant 0 : index
    %c0_4 = arith.constant 0 : index
    %3 = vector.load %arg3[%c0_3, %c0_4] : memref<1x32xf32, #tpu.memory_space<vmem>>, vector<1x32xf32>
    %4 = vector.broadcast %3 : vector<1x32xf32> to vector<2x32xf32>
    %5 = arith.addf %2, %4 : vector<2x32xf32>
    %cst_5 = arith.constant 0.000000e+00 : f32
    %6 = vector.broadcast %cst_5 : f32 to vector<2x32xf32>
    %7 = arith.maximumf %5, %6 : vector<2x32xf32>
    %c0_6 = arith.constant 0 : index
    %c0_7 = arith.constant 0 : index
    %8 = vector.load %arg4[%c0_6, %c0_7] : memref<2x32xf32, #tpu.memory_space<vmem>>, vector<2x32xf32>
    tpu.vector_store %arg4[%c0_6, %c0_7], %7 {strides = array<i32>} : memref<2x32xf32, #tpu.memory_space<vmem>>, vector<2x32xf32>,
    return
  }
  func.func @transform_0(%arg0: i32) -> (i32, i32) {
    %c0_i32 = arith.constant 0 : i32
    %c0_i32_0 = arith.constant 0 : i32
    return %arg0, %c0_i32 : i32, i32
  }
  func.func @transform_1(%arg0: i32) -> (i32, i32) {
    %c0_i32 = arith.constant 0 : i32
    %c0_i32_0 = arith.constant 0 : i32
    %c0_i32_1 = arith.constant 0 : i32
    return %c0_i32, %c0_i32_0 : i32, i32
  }
  func.func @transform_2(%arg0: i32) -> (i32, i32) {
    %c0_i32 = arith.constant 0 : i32
    %c0_i32_0 = arith.constant 0 : i32
    %c0_i32_1 = arith.constant 0 : i32
    return %c0_i32, %c0_i32_0 : i32, i32
  }
  func.func @transform_3(%arg0: i32) -> (i32, i32) {
    %c0_i32 = arith.constant 0 : i32
    %c0_i32_0 = arith.constant 0 : i32
    return %arg0, %c0_i32 : i32, i32
  }
}

</mosaic_0001>

<bundles_post_ra>
// kernel: feature_extractor_conv_forward.5
= control target key start
LH: loop header
LB: loop body
LE: loop exit
PB: predicated region body
PF: predicated region fallthrough
CT: control target
= control target key end

     0   :  { %s4205_s12 = smov 0   ;;  %s5020_s0 = inlined_call_operand.vmem [shape: bf16[4608,48], index: 0, kind: input, shape index: {}]   ;;  %s5021_s1 = inlined_call_operand.vmem [shape: bf16[48,32], index: 1, kind: input, shape index: {}]   ;;  %s5022_s2 = inlined_call_operand.vmem [shape: f32[1,32], index: 2, kind: input, shape index: {}]   ;;  %s5023_s3 = inlined_call_operand.vmem [shape: bf16[4608,32], index: 3, kind: output, shape index: {}]  }
   0x1 LB: > { %s3177_s13 = sadd.s32 4294967295, %s4183_s12   ;;  %p3181_p0 = scmp.ge.s32.totalorder %s4183_s12, 1  ;;  %s4183_s12 = sphi %s4205_s12, %s13_s12  }
   0x2   : > { %p138_p1 = scmp.lt.s32.totalorder %s4183_s12, 4 }
   0x4   : > { %p139_p2 = pnand %p3181_p0, %p138_p1 }
   0x5   : > { %v4077_v0 = vld [vmem:[%s5021_s1] sm:$0xff] (!%p139_p2)   ;;  %s162_s16 = smul.u32 (!%p139_p2), 192, %s3177_s13  ;;  %v4078_v1 = vld [vmem:[%s5021_s1 + $0x8] sm:$0xff] (!%p139_p2)   ;;  %v4079_v2 = vld [vmem:[%s5021_s1 + $0x10] sm:$0xff] (!%p139_p2)   ;;  %vm878_vm0 = vcmask (!%p139_p2), 392192   ;;  %vm2928_vm1 = vcmask (!%p139_p2), 257024  }
   0x6   : > { %142 = sbr.rel (%p139_p2) target bundleno = 425 (0x1a9), region = 32  ;;  %3865 = vmatprep.subr.bf16.mxu0 (!%p139_p2), %v4077_v0  ;;  %4063 = vmatprep.subr.bf16.mxu1 (!%p139_p2), %v4077_v0 }
   0x7   : > { %p163_p3 = scmp.lt.s32.totalorder (!%p139_p2), %s162_s16, 575  ;;  %3866 = vmatpush3.bf16.msra.mxu0 (!%p139_p2), %v4077_v0  ;;  %4066 = vmatpush3.bf16.msra.mxu1 (!%p139_p2), %v4077_v0 }
   0x8   : > { %3867 = vmatprep.subr.bf16.mxu0 (!%p139_p2), %v4078_v1  ;;  %4064 = vmatprep.subr.bf16.mxu1 (!%p139_p2), %v4078_v1 }
   0xb   : > { %3868 = vmatpush3.bf16.msra.mxu0 (!%p139_p2), %v4078_v1  ;;  %4067 = vmatpush3.bf16.msra.mxu1 (!%p139_p2), %v4078_v1 }
   0xc   : > { %3869 = vmatprep.subr.bf16.mxu0 (!%p139_p2), %v4079_v2  ;;  %4065 = vmatprep.subr.bf16.mxu1 (!%p139_p2), %v4079_v2 }
   0xd   : > { %s5025_s16 = smov (!%p163_p3, %s162_s16), 575 }
   0xe   : > { %s3182_s21 = sshll.u32 %s5025_s16, 2 }
   0xf   : > { %s4230_s24 = scalar_lea.vmem %s5020_s0, %s3182_s21  ;;  %3870 = vmatpush3.bf16.msra.mxu0 %v4079_v2  ;;  %4068 = vmatpush3.bf16.msra.mxu1 %v4079_v2  ;;  %s4440_s29 = scalar_lea.vmem %s5023_s3, %s3182_s21 }
  0x10   : > { %v4080_v3 = vld [vmem:[%s4230_s24] sm:$0xff]   ;;  %v4082_v5 = vld [vmem:[%s4230_s24 + $0x8] sm:$0xff]   ;;  %v4084_v7 = vld [vmem:[%s4230_s24 + $0x10] sm:$0xff]  }
  0x11   : > { %v4081_v4 = vld [vmem:[%s4230_s24 + $0x180] sm:$0xff]   ;;  %3871 = vmatprep.mubr.msk.bf16.mxu0 %vm878_vm0, %v4080_v3  ;;  %v4083_v6 = vld [vmem:[%s4230_s24 + $0x188] sm:$0xff]   ;;  %v4085_v8 = vld [vmem:[%s4230_s24 + $0x190] sm:$0xff]  }
  0x12   : > { %3967 = vmatprep.mubr.msk.bf16.mxu1 %vm878_vm0, %v4081_v4  ;;  %3872 = vmatmul.mubr.msk.bf16.vlgmr.msra.gmra.mrb[0].mxu0 %vm878_vm0, %v4082_v5  ;;  %v4086_v9 = vld [vmem:[%s4230_s24 + $0x18] sm:$0xff]   ;;  %v4088_v11 = vld [vmem:[%s4230_s24 + $0x20] sm:$0xff]   ;;  %v4090_v13 = vld [vmem:[%s4230_s24 + $0x28] sm:$0xff]  }
  0x13   : > { %3968 = vmatmul.mubr.msk.bf16.vlgmr.msra.gmra.mrb[0].mxu1 %vm878_vm0, %v4083_v6  ;;  %3875 = vmatprep.mubr.msk.bf16.mxu0 %vm878_vm0, %v4084_v7  ;;  %v4087_v10 = vld [vmem:[%s4230_s24 + $0x198] sm:$0xff]   ;;  %v4089_v12 = vld [vmem:[%s4230_s24 + $0x1a0] sm:$0xff]   ;;  %v4091_v14 = vld [vmem:[%s4230_s24 + $0x1a8] sm:$0xff]  }
  0x14   : > { %3971 = vmatprep.mubr.msk.bf16.mxu1 %vm878_vm0, %v4085_v8  ;;  %v4092_v15 = vld [vmem:[%s4230_s24 + $0x30] sm:$0xff]   ;;  %v4094_v17 = vld [vmem:[%s4230_s24 + $0x38] sm:$0xff]   ;;  %v4096_v19 = vld [vmem:[%s4230_s24 + $0x40] sm:$0xff]  }
  0x15   : > { %v4093_v16 = vld [vmem:[%s4230_s24 + $0x1b0] sm:$0xff]   ;;  %v4095_v18 = vld [vmem:[%s4230_s24 + $0x1b8] sm:$0xff]   ;;  %v4097_v20 = vld [vmem:[%s4230_s24 + $0x1c0] sm:$0xff]  }
  0x16   : > { %v4098_v21 = vld [vmem:[%s4230_s24 + $0x48] sm:$0xff]   ;;  %v4100_v23 = vld [vmem:[%s4230_s24 + $0x50] sm:$0xff]   ;;  %v4102_v25 = vld [vmem:[%s4230_s24 + $0x58] sm:$0xff]  }
  0x17   : > { %v4099_v22 = vld [vmem:[%s4230_s24 + $0x1c8] sm:$0xff]   ;;  %v4101_v24 = vld [vmem:[%s4230_s24 + $0x1d0] sm:$0xff]   ;;  %v4103_v26 = vld [vmem:[%s4230_s24 + $0x1d8] sm:$0xff]  }
  0x18   : > { %v4104_v27 = vld [vmem:[%s4230_s24 + $0x60] sm:$0xff]   ;;  %v4106_v29 = vld [vmem:[%s4230_s24 + $0x68] sm:$0xff]   ;;  %v4108_v31 = vld [vmem:[%s4230_s24 + $0x70] sm:$0xff]  }
  0x19   : > { %v4105_v28 = vld [vmem:[%s4230_s24 + $0x1e0] sm:$0xff]   ;;  %v4107_v30 = vld [vmem:[%s4230_s24 + $0x1e8] sm:$0xff]   ;;  %v4109_v32 = vld [vmem:[%s4230_s24 + $0x1f0] sm:$0xff]  }
  0x1a   : > { %3876 = vmatmul.mubr.msk.bf16.gmra.mrb[4].mxu0 %vm878_vm0, %v4086_v9  ;;  %v4110_v33 = vld [vmem:[%s4230_s24 + $0x78] sm:$0xff]   ;;  %v4112_v35 = vld [vmem:[%s4230_s24 + $0x80] sm:$0xff]   ;;  %v4114_v37 = vld [vmem:[%s4230_s24 + $0x88] sm:$0xff]  }
  0x1b   : > { %3972 = vmatmul.mubr.msk.bf16.gmra.mrb[4].mxu1 %vm878_vm0, %v4087_v10  ;;  %3879 = vmatprep.mubr.msk.bf16.mxu0 %vm878_vm0, %v4088_v11  ;;  %v4111_v34 = vld [vmem:[%s4230_s24 + $0x1f8] sm:$0xff]   ;;  %v4113_v36 = vld [vmem:[%s4230_s24 + $0x200] sm:$0xff]   ;;  %v4115_v38 = vld [vmem:[%s4230_s24 + $0x208] sm:$0xff]  }
  0x1c   : > { %3975 = vmatprep.mubr.msk.bf16.mxu1 %vm878_vm0, %v4089_v12  ;;  %v4116_v39 = vld [vmem:[%s4230_s24 + $0x90] sm:$0xff]   ;;  %v4118_v41 = vld [vmem:[%s4230_s24 + $0x98] sm:$0xff]   ;;  %v4120_v43 = vld [vmem:[%s4230_s24 + $0xa0] sm:$0xff]  }
  0x1d   : > { %v4117_v40 = vld [vmem:[%s4230_s24 + $0x210] sm:$0xff]   ;;  %v4119_v42 = vld [vmem:[%s4230_s24 + $0x218] sm:$0xff]   ;;  %v4121_v44 = vld [vmem:[%s4230_s24 + $0x220] sm:$0xff]  }
  0x1e   : > { %v4122_v45 = vld [vmem:[%s4230_s24 + $0xa8] sm:$0xff]   ;;  %v4124_v47 = vld [vmem:[%s4230_s24 + $0xb0] sm:$0xff]   ;;  %v4126_v49 = vld [vmem:[%s4230_s24 + $0xb8] sm:$0xff]  }
  0x1f   : > { %v4123_v46 = vld [vmem:[%s4230_s24 + $0x228] sm:$0xff]   ;;  %v4125_v48 = vld [vmem:[%s4230_s24 + $0x230] sm:$0xff]   ;;  %v4127_v50 = vld [vmem:[%s4230_s24 + $0x238] sm:$0xff]  }
  0x20   : > { %v4128_v51 = vld [vmem:[%s4230_s24 + $0xc0] sm:$0xff]   ;;  %v4130_v53 = vld [vmem:[%s4230_s24 + $0xc8] sm:$0xff]   ;;  %v4132_v55 = vld [vmem:[%s4230_s24 + $0xd0] sm:$0xff]  }
  0x21   : > { %v4129_v52 = vld [vmem:[%s4230_s24 + $0x240] sm:$0xff]   ;;  %v4131_v54 = vld [vmem:[%s4230_s24 + $0x248] sm:$0xff]   ;;  %v4133_v56 = vld [vmem:[%s4230_s24 + $0x250] sm:$0xff]  }
  0x22   : > { %3880 = vmatmul.mubr.msk.bf16.gmra.mrb[8].mxu0 %vm878_vm0, %v4090_v13  ;;  %v4134_v57 = vld [vmem:[%s4230_s24 + $0xd8] sm:$0xff]   ;;  %v4136_v59 = vld [vmem:[%s4230_s24 + $0xe0] sm:$0xff]   ;;  %v4138_v61 = vld [vmem:[%s4230_s24 + $0xe8] sm:$0xff]  }
  0x23   : > { %3976 = vmatmul.mubr.msk.bf16.gmra.mrb[8].mxu1 %vm878_vm0, %v4091_v14  ;;  %3883 = vmatprep.mubr.msk.bf16.mxu0 %vm878_vm0, %v4092_v15  ;;  %v4135_v58 = vld [vmem:[%s4230_s24 + $0x258] sm:$0xff]   ;;  %v4137_v60 = vld [vmem:[%s4230_s24 + $0x260] sm:$0xff]   ;;  %v4139_v62 = vld [vmem:[%s4230_s24 + $0x268] sm:$0xff]  }
  0x24   : > { %3979 = vmatprep.mubr.msk.bf16.mxu1 %vm878_vm0, %v4093_v16  ;;  %v4140_v63 = vld [vmem:[%s4230_s24 + $0xf0] sm:$0xff]   ;;  %v4142_v1 = vld [vmem:[%s4230_s24 + $0xf8] sm:$0xff]   ;;  %v4144_v3 = vld [vmem:[%s4230_s24 + $0x100] sm:$0xff]  }
  0x25   : > { %v4141_v0 = vld [vmem:[%s4230_s24 + $0x270] sm:$0xff]   ;;  %v4143_v2 = vld [vmem:[%s4230_s24 + $0x278] sm:$0xff]   ;;  %v4145_v4 = vld [vmem:[%s4230_s24 + $0x280] sm:$0xff]  }
  0x26   : > { %v4146_v5 = vld [vmem:[%s4230_s24 + $0x108] sm:$0xff]   ;;  %v4148_v7 = vld [vmem:[%s4230_s24 + $0x110] sm:$0xff]   ;;  %v4150_v9 = vld [vmem:[%s4230_s24 + $0x118] sm:$0xff]  }
  0x27   : > { %v4147_v6 = vld [vmem:[%s4230_s24 + $0x288] sm:$0xff]   ;;  %v4149_v8 = vld [vmem:[%s4230_s24 + $0x290] sm:$0xff]   ;;  %v4151_v10 = vld [vmem:[%s4230_s24 + $0x298] sm:$0xff]  }
  0x28   : > { %v4152_v11 = vld [vmem:[%s4230_s24 + $0x120] sm:$0xff]   ;;  %v4154_v13 = vld [vmem:[%s4230_s24 + $0x128] sm:$0xff]   ;;  %v4156_v15 = vld [vmem:[%s4230_s24 + $0x130] sm:$0xff]  }
  0x29   : > { %v4153_v12 = vld [vmem:[%s4230_s24 + $0x2a0] sm:$0xff]   ;;  %v4155_v14 = vld [vmem:[%s4230_s24 + $0x2a8] sm:$0xff]   ;;  %v4157_v16 = vld [vmem:[%s4230_s24 + $0x2b0] sm:$0xff]  }
  0x2a   : > { %3884 = vmatmul.mubr.msk.bf16.gmra.mrb[12].mxu0 %vm878_vm0, %v4094_v17  ;;  %v4158_v17 = vld [vmem:[%s4230_s24 + $0x138] sm:$0xff]  }
  0x2b   : > { %3980 = vmatmul.mubr.msk.bf16.gmra.mrb[12].mxu1 %vm878_vm0, %v4095_v18  ;;  %3887 = vmatprep.mubr.msk.bf16.mxu0 %vm878_vm0, %v4096_v19  ;;  %v4159_v18 = vld [vmem:[%s4230_s24 + $0x2b8] sm:$0xff]   ;;  %v4160_v19 = vld [vmem:[%s4230_s24 + $0x140] sm:$0xff]  }
  0x2c   : > { %3983 = vmatprep.mubr.msk.bf16.mxu1 %vm878_vm0, %v4097_v20  ;;  %v4161_v20 = vld [vmem:[%s4230_s24 + $0x2c0] sm:$0xff]  }
  0x32   : > { %3888 = vmatmul.mubr.msk.bf16.gmra.mrb[16].mxu0 %vm878_vm0, %v4098_v21  ;;  %v4162_v21 = vld [vmem:[%s4230_s24 + $0x148] sm:$0xff]  }
  0x33   : > { %3984 = vmatmul.mubr.msk.bf16.gmra.mrb[16].mxu1 %vm878_vm0, %v4099_v22  ;;  %3891 = vmatprep.mubr.msk.bf16.mxu0 %vm878_vm0, %v4100_v23  ;;  %v4163_v22 = vld [vmem:[%s4230_s24 + $0x2c8] sm:$0xff]   ;;  %v4164_v23 = vld [vmem:[%s4230_s24 + $0x150] sm:$0xff]  }
  0x34   : > { %3987 = vmatprep.mubr.msk.bf16.mxu1 %vm878_vm0, %v4101_v24  ;;  %v4165_v24 = vld [vmem:[%s4230_s24 + $0x2d0] sm:$0xff]  }
  0x3a   : > { %3892 = vmatmul.mubr.msk.bf16.gmra.mrb[20].mxu0 %vm878_vm0, %v4102_v25  ;;  %v4166_v25 = vld [vmem:[%s4230_s24 + $0x158] sm:$0xff]  }
  0x3b   : > { %3988 = vmatmul.mubr.msk.bf16.gmra.mrb[20].mxu1 %vm878_vm0, %v4103_v26  ;;  %3895 = vmatprep.mubr.msk.bf16.mxu0 %vm878_vm0, %v4104_v27  ;;  %v4167_v26 = vld [vmem:[%s4230_s24 + $0x2d8] sm:$0xff]   ;;  %v4168_v27 = vld [vmem:[%s4230_s24 + $0x160] sm:$0xff]  }
  0x3c   : > { %3991 = vmatprep.mubr.msk.bf16.mxu1 %vm878_vm0, %v4105_v28  ;;  %v4169_v28 = vld [vmem:[%s4230_s24 + $0x2e0] sm:$0xff]  }
  0x42   : > { %3896 = vmatmul.mubr.msk.bf16.gmra.mrb[24].mxu0 %vm878_vm0, %v4106_v29  ;;  %v4170_v29 = vld [vmem:[%s4230_s24 + $0x168] sm:$0xff]  }
  0x43   : > { %3992 = vmatmul.mubr.msk.bf16.gmra.mrb[24].mxu1 %vm878_vm0, %v4107_v30  ;;  %3899 = vmatprep.mubr.msk.bf16.mxu0 %vm878_vm0, %v4108_v31  ;;  %v4171_v30 = vld [vmem:[%s4230_s24 + $0x2e8] sm:$0xff]   ;;  %v4172_v31 = vld [vmem:[%s4230_s24 + $0x170] sm:$0xff]  }
  0x44   : > { %3995 = vmatprep.mubr.msk.bf16.mxu1 %vm878_vm0, %v4109_v32  ;;  %v4173_v32 = vld [vmem:[%s4230_s24 + $0x2f0] sm:$0xff]  }
  0x4a   : > { %3900 = vmatmul.mubr.msk.bf16.gmra.mrb[28].mxu0 %vm878_vm0, %v4110_v33  ;;  %v4174_v33 = vld [vmem:[%s4230_s24 + $0x178] sm:$0xff]  }
  0x4b   : > { %3996 = vmatmul.mubr.msk.bf16.gmra.mrb[28].mxu1 %vm878_vm0, %v4111_v34  ;;  %3903 = vmatprep.mubr.msk.bf16.mxu0 %vm878_vm0, %v4112_v35  ;;  %v4175_v34 = vld [vmem:[%s4230_s24 + $0x2f8] sm:$0xff]   ;;  %v4427_v35 = vld [vmem:[%s5022_s2] ss:$0 sm:$0xff] }
  0x4c   : > { %3999 = vmatprep.mubr.msk.bf16.mxu1 %vm878_vm0, %v4113_v36 }
  0x52   : > { %3904 = vmatmul.mubr.msk.bf16.gmra.mrb[32].mxu0 %vm878_vm0, %v4114_v37 }
  0x53   : > { %4000 = vmatmul.mubr.msk.bf16.gmra.mrb[32].mxu1 %vm878_vm0, %v4115_v38  ;;  %3907 = vmatprep.mubr.msk.bf16.mxu0 %vm878_vm0, %v4116_v39 }
  0x54   : > { %4003 = vmatprep.mubr.msk.bf16.mxu1 %vm878_vm0, %v4117_v40 }
  0x5a   : > { %3908 = vmatmul.mubr.msk.bf16.gmra.mrb[36].mxu0 %vm878_vm0, %v4118_v41 }
  0x5b   : > { %4004 = vmatmul.mubr.msk.bf16.gmra.mrb[36].mxu1 %vm878_vm0, %v4119_v42  ;;  %3911 = vmatprep.mubr.msk.bf16.mxu0 %vm878_vm0, %v4120_v43 }
  0x5c   : > { %4007 = vmatprep.mubr.msk.bf16.mxu1 %vm878_vm0, %v4121_v44 }
  0x62   : > { %3912 = vmatmul.mubr.msk.bf16.gmra.mrb[40].mxu0 %vm878_vm0, %v4122_v45 }
  0x63   : > { %4008 = vmatmul.mubr.msk.bf16.gmra.mrb[40].mxu1 %vm878_vm0, %v4123_v46  ;;  %3915 = vmatprep.mubr.msk.bf16.mxu0 %vm878_vm0, %v4124_v47 }
  0x64   : > { %4011 = vmatprep.mubr.msk.bf16.mxu1 %vm878_vm0, %v4125_v48 }
  0x6a   : > { %3916 = vmatmul.mubr.msk.bf16.gmra.mrb[44].mxu0 %vm878_vm0, %v4126_v49 }
  0x6b   : > { %4012 = vmatmul.mubr.msk.bf16.gmra.mrb[44].mxu1 %vm878_vm0, %v4127_v50  ;;  %3919 = vmatprep.mubr.msk.bf16.mxu0 %vm878_vm0, %v4128_v51 }
  0x6c   : > { %4015 = vmatprep.mubr.msk.bf16.mxu1 %vm878_vm0, %v4129_v52 }
  0x72   : > { %3920 = vmatmul.mubr.msk.bf16.gmra.mrb[48].mxu0 %vm878_vm0, %v4130_v53 }
  0x73   : > { %4016 = vmatmul.mubr.msk.bf16.gmra.mrb[48].mxu1 %vm878_vm0, %v4131_v54  ;;  %3923 = vmatprep.mubr.msk.bf16.mxu0 %vm878_vm0, %v4132_v55 }
  0x74   : > { %4019 = vmatprep.mubr.msk.bf16.mxu1 %vm878_vm0, %v4133_v56 }
  0x7a   : > { %3924 = vmatmul.mubr.msk.bf16.gmra.mrb[52].mxu0 %vm878_vm0, %v4134_v57 }
  0x7b   : > { %4020 = vmatmul.mubr.msk.bf16.gmra.mrb[52].mxu1 %vm878_vm0, %v4135_v58  ;;  %3927 = vmatprep.mubr.msk.bf16.mxu0 %vm878_vm0, %v4136_v59 }
  0x7c   : > { %4023 = vmatprep.mubr.msk.bf16.mxu1 %vm878_vm0, %v4137_v60 }
  0x82   : > { %3928 = vmatmul.mubr.msk.bf16.gmra.mrb[56].mxu0 %vm878_vm0, %v4138_v61 }
  0x83   : > { %4024 = vmatmul.mubr.msk.bf16.gmra.mrb[56].mxu1 %vm878_vm0, %v4139_v62  ;;  %3931 = vmatprep.mubr.msk.bf16.mxu0 %vm878_vm0, %v4140_v63 }
  0x84   : > { %4027 = vmatprep.mubr.msk.bf16.mxu1 %vm878_vm0, %v4141_v0 }
  0x8a   : > { %3932 = vmatmul.mubr.msk.bf16.gmra.mrb[60].mxu0 %vm878_vm0, %v4142_v1 }
  0x8b   : > { %4028 = vmatmul.mubr.msk.bf16.gmra.mrb[60].mxu1 %vm878_vm0, %v4143_v2  ;;  %3935 = vmatprep.mubr.msk.bf16.mxu0 %vm878_vm0, %v4144_v3 }
  0x8c   : > { %4031 = vmatprep.mubr.msk.bf16.mxu1 %vm878_vm0, %v4145_v4 }
  0x92   : > { %3936 = vmatmul.mubr.msk.bf16.gmra.mrb[64].mxu0 %vm878_vm0, %v4146_v5 }
  0x93   : > { %4032 = vmatmul.mubr.msk.bf16.gmra.mrb[64].mxu1 %vm878_vm0, %v4147_v6  ;;  %3939 = vmatprep.mubr.msk.bf16.mxu0 %vm878_vm0, %v4148_v7 }
  0x94   : > { %4035 = vmatprep.mubr.msk.bf16.mxu1 %vm878_vm0, %v4149_v8 }
  0x9a   : > { %3940 = vmatmul.mubr.msk.bf16.gmra.mrb[68].mxu0 %vm878_vm0, %v4150_v9 }
  0x9b   : > { %4036 = vmatmul.mubr.msk.bf16.gmra.mrb[68].mxu1 %vm878_vm0, %v4151_v10  ;;  %3943 = vmatprep.mubr.msk.bf16.mxu0 %vm878_vm0, %v4152_v11 }
  0x9c   : > { %4039 = vmatprep.mubr.msk.bf16.mxu1 %vm878_vm0, %v4153_v12 }
  0xa2   : > { %3944 = vmatmul.mubr.msk.bf16.gmra.mrb[72].mxu0 %vm878_vm0, %v4154_v13 }
  0xa3   : > { %4040 = vmatmul.mubr.msk.bf16.gmra.mrb[72].mxu1 %vm878_vm0, %v4155_v14  ;;  %3947 = vmatprep.mubr.msk.bf16.mxu0 %vm878_vm0, %v4156_v15 }
  0xa4   : > { %4043 = vmatprep.mubr.msk.bf16.mxu1 %vm878_vm0, %v4157_v16 }
  0xaa   : > { %3948 = vmatmul.mubr.msk.bf16.gmra.mrb[76].mxu0 %vm878_vm0, %v4158_v17 }
  0xab   : > { %4044 = vmatmul.mubr.msk.bf16.gmra.mrb[76].mxu1 %vm878_vm0, %v4159_v18  ;;  %3951 = vmatprep.mubr.msk.bf16.mxu0 %vm878_vm0, %v4160_v19 }
  0xac   : > { %4047 = vmatprep.mubr.msk.bf16.mxu1 %vm878_vm0, %v4161_v20 }
  0xb2   : > { %3952 = vmatmul.mubr.msk.bf16.gmra.mrb[80].mxu0 %vm878_vm0, %v4162_v21 }
  0xb3   : > { %4048 = vmatmul.mubr.msk.bf16.gmra.mrb[80].mxu1 %vm878_vm0, %v4163_v22  ;;  %3955 = vmatprep.mubr.msk.bf16.mxu0 %vm878_vm0, %v4164_v23 }
  0xb4   : > { %4051 = vmatprep.mubr.msk.bf16.mxu1 %vm878_vm0, %v4165_v24 }
  0xba   : > { %3956 = vmatmul.mubr.msk.bf16.gmra.mrb[84].mxu0 %vm878_vm0, %v4166_v25 }
  0xbb   : > { %4052 = vmatmul.mubr.msk.bf16.gmra.mrb[84].mxu1 %vm878_vm0, %v4167_v26  ;;  %3959 = vmatprep.mubr.msk.bf16.mxu0 %vm878_vm0, %v4168_v27 }
  0xbc   : > { %4055 = vmatprep.mubr.msk.bf16.mxu1 %vm878_vm0, %v4169_v28 }
  0xc2   : > { %3960 = vmatmul.mubr.msk.bf16.gmra.mrb[88].mxu0 %vm878_vm0, %v4170_v29 }
  0xc3   : > { %4056 = vmatmul.mubr.msk.bf16.gmra.mrb[88].mxu1 %vm878_vm0, %v4171_v30  ;;  %3963 = vmatprep.mubr.msk.bf16.mxu0 %vm878_vm0, %v4172_v31 }
  0xc4   : > { %4059 = vmatprep.mubr.msk.bf16.mxu1 %vm878_vm0, %v4173_v32 }
  0xca   : > { %3964 = vmatmul.mubr.msk.bf16.gmra.mrb[92].mxu0 %vm878_vm0, %v4174_v33 }
  0xcb   : > { %4060 = vmatmul.mubr.msk.bf16.gmra.mrb[92].mxu1 %vm878_vm0, %v4175_v34 }
  0xe5   : > { %v3873_v36 = vpop.f32.mrb[0].mxu0 }
  0xe6   : > { %v3969_v37 = vpop.f32.mrb[0].mxu1  ;;  %v1210_v38 = vadd.f32 %v3873_v36, %v4427_v35  ;;  %v1201_v40 = vpop.f32.mrb[1].mxu0 }
  0xe7   : > { %v1594_v39 = vadd.f32 %v3969_v37, %v4427_v35  ;;  %v1585_v41 = vpop.f32.mrb[1].mxu1  ;;  %v1202_v42 = vadd.f32 %v4427_v35, %v1201_v40  ;;  %v3874_v44 = vpop.f32.mrb[2].mxu0 }
  0xe8   : > { %v1586_v43 = vadd.f32 %v4427_v35, %v1585_v41  ;;  %v3970_v45 = vpop.f32.mrb[2].mxu1  ;;  %v1970_v46 = vmax.f32 %v1210_v38, 0.0  ;;  %v1213_v48 = vadd.f32 %v3874_v44, %v4427_v35  ;;  %v1204_v50 = vpop.f32.mrb[3].mxu0 }
  0xe9   : > { %v2066_v47 = vmax.f32 %v1594_v39, 0.0  ;;  %v1597_v49 = vadd.f32 %v3970_v45, %v4427_v35  ;;  %v1588_v51 = vpop.f32.mrb[3].mxu1  ;;  %v1968_v52 = vmax.f32 %v1202_v42, 0.0  ;;  %v1205_v54 = vadd.f32 %v4427_v35, %v1204_v50 }
  0xea   : > { %v2064_v53 = vmax.f32 %v1586_v43, 0.0  ;;  %v1589_v55 = vadd.f32 %v4427_v35, %v1588_v51  ;;  %v3576_v56 = vpack.c.bf16 %v1970_v46, %v1970_v46  ;;  %v1971_v58 = vmax.f32 %v1213_v48, 0.0 }
  0xeb   : > { %v3672_v57 = vpack.c.bf16 %v2066_v47, %v2066_v47  ;;  %v2067_v59 = vmax.f32 %v1597_v49, 0.0  ;;  %v3574_v60 = vpack.c.bf16 %v1968_v52, %v1968_v52  ;;  %v1969_v62 = vmax.f32 %v1205_v54, 0.0 }
  0xec   : > { %v3670_v61 = vpack.c.bf16 %v2064_v53, %v2064_v53  ;;  %v2065_v63 = vmax.f32 %v1589_v55, 0.0  ;;  %2931 = vst.msk [vmem:[%s4440_s29 + $0x8] sm:$0xf] %vm2928_vm1, %v3576_v56  ;;  %v3577_v0 = vpack.c.bf16 %v1971_v58, %v1971_v58 }
  0xed   : > { %3027 = vst.msk [vmem:[%s4440_s29 + $0x188] sm:$0xf] %vm2928_vm1, %v3672_v57  ;;  %v3673_v1 = vpack.c.bf16 %v2067_v59, %v2067_v59  ;;  %2929 = vst.msk [vmem:[%s4440_s29] sm:$0xf] %vm2928_vm1, %v3574_v60  ;;  %v3575_v2 = vpack.c.bf16 %v1969_v62, %v1969_v62  ;;  %v3877_v4 = vpop.f32.mrb[4].mxu0 }
  0xee   : > { %3025 = vst.msk [vmem:[%s4440_s29 + $0x180] sm:$0xf] %vm2928_vm1, %v3670_v61  ;;  %v3671_v3 = vpack.c.bf16 %v2065_v63, %v2065_v63  ;;  %v3973_v5 = vpop.f32.mrb[4].mxu1  ;;  %2932 = vst.msk [vmem:[%s4440_s29 + $0xc] sm:$0xf] %vm2928_vm1, %v3577_v0  ;;  %v1226_v6 = vadd.f32 %v3877_v4, %v4427_v35  ;;  %v1217_v8 = vpop.f32.mrb[5].mxu0 }
  0xef   : > { %3028 = vst.msk [vmem:[%s4440_s29 + $0x18c] sm:$0xf] %vm2928_vm1, %v3673_v1  ;;  %v1610_v7 = vadd.f32 %v3973_v5, %v4427_v35  ;;  %v1601_v9 = vpop.f32.mrb[5].mxu1  ;;  %2930 = vst.msk [vmem:[%s4440_s29 + $0x4] sm:$0xf] %vm2928_vm1, %v3575_v2  ;;  %v1218_v10 = vadd.f32 %v4427_v35, %v1217_v8  ;;  %v3878_v12 = vpop.f32.mrb[6].mxu0 }
  0xf0   : > { %3026 = vst.msk [vmem:[%s4440_s29 + $0x184] sm:$0xf] %vm2928_vm1, %v3671_v3  ;;  %v1602_v11 = vadd.f32 %v4427_v35, %v1601_v9  ;;  %v3974_v13 = vpop.f32.mrb[6].mxu1  ;;  %v1974_v14 = vmax.f32 %v1226_v6, 0.0  ;;  %v1229_v16 = vadd.f32 %v3878_v12, %v4427_v35  ;;  %v1220_v18 = vpop.f32.mrb[7].mxu0 }
  0xf1   : > { %v2070_v15 = vmax.f32 %v1610_v7, 0.0  ;;  %v1613_v17 = vadd.f32 %v3974_v13, %v4427_v35  ;;  %v1604_v19 = vpop.f32.mrb[7].mxu1  ;;  %v1972_v20 = vmax.f32 %v1218_v10, 0.0  ;;  %v1221_v22 = vadd.f32 %v4427_v35, %v1220_v18 }
  0xf2   : > { %v2068_v21 = vmax.f32 %v1602_v11, 0.0  ;;  %v1605_v23 = vadd.f32 %v4427_v35, %v1604_v19  ;;  %v3580_v24 = vpack.c.bf16 %v1974_v14, %v1974_v14  ;;  %v1975_v26 = vmax.f32 %v1229_v16, 0.0 }
  0xf3   : > { %v3676_v25 = vpack.c.bf16 %v2070_v15, %v2070_v15  ;;  %v2071_v27 = vmax.f32 %v1613_v17, 0.0  ;;  %v3578_v28 = vpack.c.bf16 %v1972_v20, %v1972_v20  ;;  %v1973_v30 = vmax.f32 %v1221_v22, 0.0 }
  0xf4   : > { %v3674_v29 = vpack.c.bf16 %v2068_v21, %v2068_v21  ;;  %v2069_v31 = vmax.f32 %v1605_v23, 0.0  ;;  %2935 = vst.msk [vmem:[%s4440_s29 + $0x18] sm:$0xf] %vm2928_vm1, %v3580_v24  ;;  %v3581_v32 = vpack.c.bf16 %v1975_v26, %v1975_v26 }
  0xf5   : > { %3031 = vst.msk [vmem:[%s4440_s29 + $0x198] sm:$0xf] %vm2928_vm1, %v3676_v25  ;;  %v3677_v33 = vpack.c.bf16 %v2071_v27, %v2071_v27  ;;  %2933 = vst.msk [vmem:[%s4440_s29 + $0x10] sm:$0xf] %vm2928_vm1, %v3578_v28  ;;  %v3579_v34 = vpack.c.bf16 %v1973_v30, %v1973_v30  ;;  %v3881_v37 = vpop.f32.mrb[8].mxu0 }
  0xf6   : > { %3029 = vst.msk [vmem:[%s4440_s29 + $0x190] sm:$0xf] %vm2928_vm1, %v3674_v29  ;;  %v3675_v36 = vpack.c.bf16 %v2069_v31, %v2069_v31  ;;  %v3977_v38 = vpop.f32.mrb[8].mxu1  ;;  %2936 = vst.msk [vmem:[%s4440_s29 + $0x1c] sm:$0xf] %vm2928_vm1, %v3581_v32  ;;  %v1242_v39 = vadd.f32 %v3881_v37, %v4427_v35  ;;  %v1233_v41 = vpop.f32.mrb[9].mxu0 }
  0xf7   : > { %3032 = vst.msk [vmem:[%s4440_s29 + $0x19c] sm:$0xf] %vm2928_vm1, %v3677_v33  ;;  %v1626_v40 = vadd.f32 %v3977_v38, %v4427_v35  ;;  %v1617_v42 = vpop.f32.mrb[9].mxu1  ;;  %2934 = vst.msk [vmem:[%s4440_s29 + $0x14] sm:$0xf] %vm2928_vm1, %v3579_v34  ;;  %v1234_v43 = vadd.f32 %v4427_v35, %v1233_v41  ;;  %v3882_v45 = vpop.f32.mrb[10].mxu0 }
  0xf8   : > { %3030 = vst.msk [vmem:[%s4440_s29 + $0x194] sm:$0xf] %vm2928_vm1, %v3675_v36  ;;  %v1618_v44 = vadd.f32 %v4427_v35, %v1617_v42  ;;  %v3978_v46 = vpop.f32.mrb[10].mxu1  ;;  %v1978_v47 = vmax.f32 %v1242_v39, 0.0  ;;  %v1245_v49 = vadd.f32 %v3882_v45, %v4427_v35  ;;  %v1236_v51 = vpop.f32.mrb[11].mxu0 }
  0xf9   : > { %v2074_v48 = vmax.f32 %v1626_v40, 0.0  ;;  %v1629_v50 = vadd.f32 %v3978_v46, %v4427_v35  ;;  %v1620_v52 = vpop.f32.mrb[11].mxu1  ;;  %v1976_v53 = vmax.f32 %v1234_v43, 0.0  ;;  %v1237_v55 = vadd.f32 %v4427_v35, %v1236_v51 }
  0xfa   : > { %v2072_v54 = vmax.f32 %v1618_v44, 0.0  ;;  %v1621_v56 = vadd.f32 %v4427_v35, %v1620_v52  ;;  %v3584_v57 = vpack.c.bf16 %v1978_v47, %v1978_v47  ;;  %v1979_v59 = vmax.f32 %v1245_v49, 0.0 }
  0xfb   : > { %v3680_v58 = vpack.c.bf16 %v2074_v48, %v2074_v48  ;;  %v2075_v60 = vmax.f32 %v1629_v50, 0.0  ;;  %v3582_v61 = vpack.c.bf16 %v1976_v53, %v1976_v53  ;;  %v1977_v63 = vmax.f32 %v1237_v55, 0.0 }
  0xfc   : > { %v3678_v62 = vpack.c.bf16 %v2072_v54, %v2072_v54  ;;  %v2073_v0 = vmax.f32 %v1621_v56, 0.0  ;;  %2939 = vst.msk [vmem:[%s4440_s29 + $0x28] sm:$0xf] %vm2928_vm1, %v3584_v57  ;;  %v3585_v1 = vpack.c.bf16 %v1979_v59, %v1979_v59 }
  0xfd   : > { %3035 = vst.msk [vmem:[%s4440_s29 + $0x1a8] sm:$0xf] %vm2928_vm1, %v3680_v58  ;;  %v3681_v2 = vpack.c.bf16 %v2075_v60, %v2075_v60  ;;  %2937 = vst.msk [vmem:[%s4440_s29 + $0x20] sm:$0xf] %vm2928_vm1, %v3582_v61  ;;  %v3583_v3 = vpack.c.bf16 %v1977_v63, %v1977_v63  ;;  %v3885_v5 = vpop.f32.mrb[12].mxu0 }
  0xfe   : > { %3033 = vst.msk [vmem:[%s4440_s29 + $0x1a0] sm:$0xf] %vm2928_vm1, %v3678_v62  ;;  %v3679_v4 = vpack.c.bf16 %v2073_v0, %v2073_v0  ;;  %v3981_v6 = vpop.f32.mrb[12].mxu1  ;;  %2940 = vst.msk [vmem:[%s4440_s29 + $0x2c] sm:$0xf] %vm2928_vm1, %v3585_v1  ;;  %v1258_v7 = vadd.f32 %v3885_v5, %v4427_v35  ;;  %v1249_v9 = vpop.f32.mrb[13].mxu0 }
  0xff   : > { %3036 = vst.msk [vmem:[%s4440_s29 + $0x1ac] sm:$0xf] %vm2928_vm1, %v3681_v2  ;;  %v1642_v8 = vadd.f32 %v3981_v6, %v4427_v35  ;;  %v1633_v10 = vpop.f32.mrb[13].mxu1  ;;  %2938 = vst.msk [vmem:[%s4440_s29 + $0x24] sm:$0xf] %vm2928_vm1, %v3583_v3  ;;  %v1250_v11 = vadd.f32 %v4427_v35, %v1249_v9  ;;  %v3886_v13 = vpop.f32.mrb[14].mxu0 }
 0x100   : > { %3034 = vst.msk [vmem:[%s4440_s29 + $0x1a4] sm:$0xf] %vm2928_vm1, %v3679_v4  ;;  %v1634_v12 = vadd.f32 %v4427_v35, %v1633_v10  ;;  %v3982_v14 = vpop.f32.mrb[14].mxu1  ;;  %v1982_v15 = vmax.f32 %v1258_v7, 0.0  ;;  %v1261_v17 = vadd.f32 %v3886_v13, %v4427_v35  ;;  %v1252_v19 = vpop.f32.mrb[15].mxu0 }
 0x101   : > { %v2078_v16 = vmax.f32 %v1642_v8, 0.0  ;;  %v1645_v18 = vadd.f32 %v3982_v14, %v4427_v35  ;;  %v1636_v20 = vpop.f32.mrb[15].mxu1  ;;  %v1980_v21 = vmax.f32 %v1250_v11, 0.0  ;;  %v1253_v23 = vadd.f32 %v4427_v35, %v1252_v19 }
 0x102   : > { %v2076_v22 = vmax.f32 %v1634_v12, 0.0  ;;  %v1637_v24 = vadd.f32 %v4427_v35, %v1636_v20  ;;  %v3588_v25 = vpack.c.bf16 %v1982_v15, %v1982_v15  ;;  %v1983_v27 = vmax.f32 %v1261_v17, 0.0 }
 0x103   : > { %v3684_v26 = vpack.c.bf16 %v2078_v16, %v2078_v16  ;;  %v2079_v28 = vmax.f32 %v1645_v18, 0.0  ;;  %v3586_v29 = vpack.c.bf16 %v1980_v21, %v1980_v21  ;;  %v1981_v31 = vmax.f32 %v1253_v23, 0.0 }
 0x104   : > { %v3682_v30 = vpack.c.bf16 %v2076_v22, %v2076_v22  ;;  %v2077_v32 = vmax.f32 %v1637_v24, 0.0  ;;  %2943 = vst.msk [vmem:[%s4440_s29 + $0x38] sm:$0xf] %vm2928_vm1, %v3588_v25  ;;  %v3589_v33 = vpack.c.bf16 %v1983_v27, %v1983_v27 }
 0x105   : > { %3039 = vst.msk [vmem:[%s4440_s29 + $0x1b8] sm:$0xf] %vm2928_vm1, %v3684_v26  ;;  %v3685_v34 = vpack.c.bf16 %v2079_v28, %v2079_v28  ;;  %2941 = vst.msk [vmem:[%s4440_s29 + $0x30] sm:$0xf] %vm2928_vm1, %v3586_v29  ;;  %v3587_v36 = vpack.c.bf16 %v1981_v31, %v1981_v31  ;;  %v3889_v38 = vpop.f32.mrb[16].mxu0 }
 0x106   : > { %3037 = vst.msk [vmem:[%s4440_s29 + $0x1b0] sm:$0xf] %vm2928_vm1, %v3682_v30  ;;  %v3683_v37 = vpack.c.bf16 %v2077_v32, %v2077_v32  ;;  %v3985_v39 = vpop.f32.mrb[16].mxu1  ;;  %2944 = vst.msk [vmem:[%s4440_s29 + $0x3c] sm:$0xf] %vm2928_vm1, %v3589_v33  ;;  %v1274_v40 = vadd.f32 %v3889_v38, %v4427_v35  ;;  %v1265_v42 = vpop.f32.mrb[17].mxu0 }
 0x107   : > { %3040 = vst.msk [vmem:[%s4440_s29 + $0x1bc] sm:$0xf] %vm2928_vm1, %v3685_v34  ;;  %v1658_v41 = vadd.f32 %v3985_v39, %v4427_v35  ;;  %v1649_v43 = vpop.f32.mrb[17].mxu1  ;;  %2942 = vst.msk [vmem:[%s4440_s29 + $0x34] sm:$0xf] %vm2928_vm1, %v3587_v36  ;;  %v1266_v44 = vadd.f32 %v4427_v35, %v1265_v42  ;;  %v3890_v46 = vpop.f32.mrb[18].mxu0 }
 0x108   : > { %3038 = vst.msk [vmem:[%s4440_s29 + $0x1b4] sm:$0xf] %vm2928_vm1, %v3683_v37  ;;  %v1650_v45 = vadd.f32 %v4427_v35, %v1649_v43  ;;  %v3986_v47 = vpop.f32.mrb[18].mxu1  ;;  %v1986_v48 = vmax.f32 %v1274_v40, 0.0  ;;  %v1277_v50 = vadd.f32 %v3890_v46, %v4427_v35  ;;  %v1268_v52 = vpop.f32.mrb[19].mxu0 }
 0x109   : > { %v2082_v49 = vmax.f32 %v1658_v41, 0.0  ;;  %v1661_v51 = vadd.f32 %v3986_v47, %v4427_v35  ;;  %v1652_v53 = vpop.f32.mrb[19].mxu1  ;;  %v1984_v54 = vmax.f32 %v1266_v44, 0.0  ;;  %v1269_v56 = vadd.f32 %v4427_v35, %v1268_v52 }
 0x10a   : > { %v2080_v55 = vmax.f32 %v1650_v45, 0.0  ;;  %v1653_v57 = vadd.f32 %v4427_v35, %v1652_v53  ;;  %v3592_v58 = vpack.c.bf16 %v1986_v48, %v1986_v48  ;;  %v1987_v60 = vmax.f32 %v1277_v50, 0.0 }
 0x10b   : > { %v3688_v59 = vpack.c.bf16 %v2082_v49, %v2082_v49  ;;  %v2083_v61 = vmax.f32 %v1661_v51, 0.0  ;;  %v3590_v62 = vpack.c.bf16 %v1984_v54, %v1984_v54  ;;  %v1985_v0 = vmax.f32 %v1269_v56, 0.0 }
 0x10c   : > { %v3686_v63 = vpack.c.bf16 %v2080_v55, %v2080_v55  ;;  %v2081_v1 = vmax.f32 %v1653_v57, 0.0  ;;  %2947 = vst.msk [vmem:[%s4440_s29 + $0x48] sm:$0xf] %vm2928_vm1, %v3592_v58  ;;  %v3593_v2 = vpack.c.bf16 %v1987_v60, %v1987_v60 }
 0x10d   : > { %3043 = vst.msk [vmem:[%s4440_s29 + $0x1c8] sm:$0xf] %vm2928_vm1, %v3688_v59  ;;  %v3689_v3 = vpack.c.bf16 %v2083_v61, %v2083_v61  ;;  %2945 = vst.msk [vmem:[%s4440_s29 + $0x40] sm:$0xf] %vm2928_vm1, %v3590_v62  ;;  %v3591_v4 = vpack.c.bf16 %v1985_v0, %v1985_v0  ;;  %v3893_v6 = vpop.f32.mrb[20].mxu0 }
 0x10e   : > { %3041 = vst.msk [vmem:[%s4440_s29 + $0x1c0] sm:$0xf] %vm2928_vm1, %v3686_v63  ;;  %v3687_v5 = vpack.c.bf16 %v2081_v1, %v2081_v1  ;;  %v3989_v7 = vpop.f32.mrb[20].mxu1  ;;  %2948 = vst.msk [vmem:[%s4440_s29 + $0x4c] sm:$0xf] %vm2928_vm1, %v3593_v2  ;;  %v1290_v8 = vadd.f32 %v3893_v6, %v4427_v35  ;;  %v1281_v10 = vpop.f32.mrb[21].mxu0 }
 0x10f   : > { %3044 = vst.msk [vmem:[%s4440_s29 + $0x1cc] sm:$0xf] %vm2928_vm1, %v3689_v3  ;;  %v1674_v9 = vadd.f32 %v3989_v7, %v4427_v35  ;;  %v1665_v11 = vpop.f32.mrb[21].mxu1  ;;  %2946 = vst.msk [vmem:[%s4440_s29 + $0x44] sm:$0xf] %vm2928_vm1, %v3591_v4  ;;  %v1282_v12 = vadd.f32 %v4427_v35, %v1281_v10  ;;  %v3894_v14 = vpop.f32.mrb[22].mxu0 }
 0x110   : > { %3042 = vst.msk [vmem:[%s4440_s29 + $0x1c4] sm:$0xf] %vm2928_vm1, %v3687_v5  ;;  %v1666_v13 = vadd.f32 %v4427_v35, %v1665_v11  ;;  %v3990_v15 = vpop.f32.mrb[22].mxu1  ;;  %v1990_v16 = vmax.f32 %v1290_v8, 0.0  ;;  %v1293_v18 = vadd.f32 %v3894_v14, %v4427_v35  ;;  %v1284_v20 = vpop.f32.mrb[23].mxu0 }
 0x111   : > { %v2086_v17 = vmax.f32 %v1674_v9, 0.0  ;;  %v1677_v19 = vadd.f32 %v3990_v15, %v4427_v35  ;;  %v1668_v21 = vpop.f32.mrb[23].mxu1  ;;  %v1988_v22 = vmax.f32 %v1282_v12, 0.0  ;;  %v1285_v24 = vadd.f32 %v4427_v35, %v1284_v20 }
 0x112   : > { %v2084_v23 = vmax.f32 %v1666_v13, 0.0  ;;  %v1669_v25 = vadd.f32 %v4427_v35, %v1668_v21  ;;  %v3596_v26 = vpack.c.bf16 %v1990_v16, %v1990_v16  ;;  %v1991_v28 = vmax.f32 %v1293_v18, 0.0 }
 0x113   : > { %v3692_v27 = vpack.c.bf16 %v2086_v17, %v2086_v17  ;;  %v2087_v29 = vmax.f32 %v1677_v19, 0.0  ;;  %v3594_v30 = vpack.c.bf16 %v1988_v22, %v1988_v22  ;;  %v1989_v32 = vmax.f32 %v1285_v24, 0.0 }
 0x114   : > { %v3690_v31 = vpack.c.bf16 %v2084_v23, %v2084_v23  ;;  %v2085_v33 = vmax.f32 %v1669_v25, 0.0  ;;  %2951 = vst.msk [vmem:[%s4440_s29 + $0x58] sm:$0xf] %vm2928_vm1, %v3596_v26  ;;  %v3597_v34 = vpack.c.bf16 %v1991_v28, %v1991_v28 }
 0x115   : > { %3047 = vst.msk [vmem:[%s4440_s29 + $0x1d8] sm:$0xf] %vm2928_vm1, %v3692_v27  ;;  %v3693_v36 = vpack.c.bf16 %v2087_v29, %v2087_v29  ;;  %2949 = vst.msk [vmem:[%s4440_s29 + $0x50] sm:$0xf] %vm2928_vm1, %v3594_v30  ;;  %v3595_v37 = vpack.c.bf16 %v1989_v32, %v1989_v32  ;;  %v3897_v39 = vpop.f32.mrb[24].mxu0 }
 0x116   : > { %3045 = vst.msk [vmem:[%s4440_s29 + $0x1d0] sm:$0xf] %vm2928_vm1, %v3690_v31  ;;  %v3691_v38 = vpack.c.bf16 %v2085_v33, %v2085_v33  ;;  %v3993_v40 = vpop.f32.mrb[24].mxu1  ;;  %2952 = vst.msk [vmem:[%s4440_s29 + $0x5c] sm:$0xf] %vm2928_vm1, %v3597_v34  ;;  %v1306_v41 = vadd.f32 %v3897_v39, %v4427_v35  ;;  %v1297_v43 = vpop.f32.mrb[25].mxu0 }
 0x117   : > { %3048 = vst.msk [vmem:[%s4440_s29 + $0x1dc] sm:$0xf] %vm2928_vm1, %v3693_v36  ;;  %v1690_v42 = vadd.f32 %v3993_v40, %v4427_v35  ;;  %v1681_v44 = vpop.f32.mrb[25].mxu1  ;;  %2950 = vst.msk [vmem:[%s4440_s29 + $0x54] sm:$0xf] %vm2928_vm1, %v3595_v37  ;;  %v1298_v45 = vadd.f32 %v4427_v35, %v1297_v43  ;;  %v3898_v47 = vpop.f32.mrb[26].mxu0 }
 0x118   : > { %3046 = vst.msk [vmem:[%s4440_s29 + $0x1d4] sm:$0xf] %vm2928_vm1, %v3691_v38  ;;  %v1682_v46 = vadd.f32 %v4427_v35, %v1681_v44  ;;  %v3994_v48 = vpop.f32.mrb[26].mxu1  ;;  %v1994_v49 = vmax.f32 %v1306_v41, 0.0  ;;  %v1309_v51 = vadd.f32 %v3898_v47, %v4427_v35  ;;  %v1300_v53 = vpop.f32.mrb[27].mxu0 }
 0x119   : > { %v2090_v50 = vmax.f32 %v1690_v42, 0.0  ;;  %v1693_v52 = vadd.f32 %v3994_v48, %v4427_v35  ;;  %v1684_v54 = vpop.f32.mrb[27].mxu1  ;;  %v1992_v55 = vmax.f32 %v1298_v45, 0.0  ;;  %v1301_v57 = vadd.f32 %v4427_v35, %v1300_v53 }
 0x11a   : > { %v2088_v56 = vmax.f32 %v1682_v46, 0.0  ;;  %v1685_v58 = vadd.f32 %v4427_v35, %v1684_v54  ;;  %v3600_v59 = vpack.c.bf16 %v1994_v49, %v1994_v49  ;;  %v1995_v61 = vmax.f32 %v1309_v51, 0.0 }
 0x11b   : > { %v3696_v60 = vpack.c.bf16 %v2090_v50, %v2090_v50  ;;  %v2091_v62 = vmax.f32 %v1693_v52, 0.0  ;;  %v3598_v63 = vpack.c.bf16 %v1992_v55, %v1992_v55  ;;  %v1993_v1 = vmax.f32 %v1301_v57, 0.0 }
 0x11c   : > { %v3694_v0 = vpack.c.bf16 %v2088_v56, %v2088_v56  ;;  %v2089_v2 = vmax.f32 %v1685_v58, 0.0  ;;  %2955 = vst.msk [vmem:[%s4440_s29 + $0x68] sm:$0xf] %vm2928_vm1, %v3600_v59  ;;  %v3601_v3 = vpack.c.bf16 %v1995_v61, %v1995_v61 }
 0x11d   : > { %3051 = vst.msk [vmem:[%s4440_s29 + $0x1e8] sm:$0xf] %vm2928_vm1, %v3696_v60  ;;  %v3697_v4 = vpack.c.bf16 %v2091_v62, %v2091_v62  ;;  %2953 = vst.msk [vmem:[%s4440_s29 + $0x60] sm:$0xf] %vm2928_vm1, %v3598_v63  ;;  %v3599_v5 = vpack.c.bf16 %v1993_v1, %v1993_v1  ;;  %v3901_v7 = vpop.f32.mrb[28].mxu0 }
 0x11e   : > { %3049 = vst.msk [vmem:[%s4440_s29 + $0x1e0] sm:$0xf] %vm2928_vm1, %v3694_v0  ;;  %v3695_v6 = vpack.c.bf16 %v2089_v2, %v2089_v2  ;;  %v3997_v8 = vpop.f32.mrb[28].mxu1  ;;  %2956 = vst.msk [vmem:[%s4440_s29 + $0x6c] sm:$0xf] %vm2928_vm1, %v3601_v3  ;;  %v1322_v9 = vadd.f32 %v3901_v7, %v4427_v35  ;;  %v1313_v11 = vpop.f32.mrb[29].mxu0 }
 0x11f   : > { %3052 = vst.msk [vmem:[%s4440_s29 + $0x1ec] sm:$0xf] %vm2928_vm1, %v3697_v4  ;;  %v1706_v10 = vadd.f32 %v3997_v8, %v4427_v35  ;;  %v1697_v12 = vpop.f32.mrb[29].mxu1  ;;  %2954 = vst.msk [vmem:[%s4440_s29 + $0x64] sm:$0xf] %vm2928_vm1, %v3599_v5  ;;  %v1314_v13 = vadd.f32 %v4427_v35, %v1313_v11  ;;  %v3902_v15 = vpop.f32.mrb[30].mxu0 }
 0x120   : > { %3050 = vst.msk [vmem:[%s4440_s29 + $0x1e4] sm:$0xf] %vm2928_vm1, %v3695_v6  ;;  %v1698_v14 = vadd.f32 %v4427_v35, %v1697_v12  ;;  %v3998_v16 = vpop.f32.mrb[30].mxu1  ;;  %v1998_v17 = vmax.f32 %v1322_v9, 0.0  ;;  %v1325_v19 = vadd.f32 %v3902_v15, %v4427_v35  ;;  %v1316_v21 = vpop.f32.mrb[31].mxu0 }
 0x121   : > { %v2094_v18 = vmax.f32 %v1706_v10, 0.0  ;;  %v1709_v20 = vadd.f32 %v3998_v16, %v4427_v35  ;;  %v1700_v22 = vpop.f32.mrb[31].mxu1  ;;  %v1996_v23 = vmax.f32 %v1314_v13, 0.0  ;;  %v1317_v25 = vadd.f32 %v4427_v35, %v1316_v21 }
 0x122   : > { %v2092_v24 = vmax.f32 %v1698_v14, 0.0  ;;  %v1701_v26 = vadd.f32 %v4427_v35, %v1700_v22  ;;  %v3604_v27 = vpack.c.bf16 %v1998_v17, %v1998_v17  ;;  %v1999_v29 = vmax.f32 %v1325_v19, 0.0 }
 0x123   : > { %v3700_v28 = vpack.c.bf16 %v2094_v18, %v2094_v18  ;;  %v2095_v30 = vmax.f32 %v1709_v20, 0.0  ;;  %v3602_v31 = vpack.c.bf16 %v1996_v23, %v1996_v23  ;;  %v1997_v33 = vmax.f32 %v1317_v25, 0.0 }
 0x124   : > { %v3698_v32 = vpack.c.bf16 %v2092_v24, %v2092_v24  ;;  %v2093_v34 = vmax.f32 %v1701_v26, 0.0  ;;  %2959 = vst.msk [vmem:[%s4440_s29 + $0x78] sm:$0xf] %vm2928_vm1, %v3604_v27  ;;  %v3605_v36 = vpack.c.bf16 %v1999_v29, %v1999_v29 }
 0x125   : > { %3055 = vst.msk [vmem:[%s4440_s29 + $0x1f8] sm:$0xf] %vm2928_vm1, %v3700_v28  ;;  %v3701_v37 = vpack.c.bf16 %v2095_v30, %v2095_v30  ;;  %2957 = vst.msk [vmem:[%s4440_s29 + $0x70] sm:$0xf] %vm2928_vm1, %v3602_v31  ;;  %v3603_v38 = vpack.c.bf16 %v1997_v33, %v1997_v33  ;;  %v3905_v40 = vpop.f32.mrb[32].mxu0 }
 0x126   : > { %3053 = vst.msk [vmem:[%s4440_s29 + $0x1f0] sm:$0xf] %vm2928_vm1, %v3698_v32  ;;  %v3699_v39 = vpack.c.bf16 %v2093_v34, %v2093_v34  ;;  %v4001_v41 = vpop.f32.mrb[32].mxu1  ;;  %2960 = vst.msk [vmem:[%s4440_s29 + $0x7c] sm:$0xf] %vm2928_vm1, %v3605_v36  ;;  %v1338_v42 = vadd.f32 %v3905_v40, %v4427_v35  ;;  %v1329_v44 = vpop.f32.mrb[33].mxu0 }
 0x127   : > { %3056 = vst.msk [vmem:[%s4440_s29 + $0x1fc] sm:$0xf] %vm2928_vm1, %v3701_v37  ;;  %v1722_v43 = vadd.f32 %v4001_v41, %v4427_v35  ;;  %v1713_v45 = vpop.f32.mrb[33].mxu1  ;;  %2958 = vst.msk [vmem:[%s4440_s29 + $0x74] sm:$0xf] %vm2928_vm1, %v3603_v38  ;;  %v1330_v46 = vadd.f32 %v4427_v35, %v1329_v44  ;;  %v3906_v48 = vpop.f32.mrb[34].mxu0 }
 0x128   : > { %3054 = vst.msk [vmem:[%s4440_s29 + $0x1f4] sm:$0xf] %vm2928_vm1, %v3699_v39  ;;  %v1714_v47 = vadd.f32 %v4427_v35, %v1713_v45  ;;  %v4002_v49 = vpop.f32.mrb[34].mxu1  ;;  %v2002_v50 = vmax.f32 %v1338_v42, 0.0  ;;  %v1341_v52 = vadd.f32 %v3906_v48, %v4427_v35  ;;  %v1332_v54 = vpop.f32.mrb[35].mxu0 }
 0x129   : > { %v2098_v51 = vmax.f32 %v1722_v43, 0.0  ;;  %v1725_v53 = vadd.f32 %v4002_v49, %v4427_v35  ;;  %v1716_v55 = vpop.f32.mrb[35].mxu1  ;;  %v2000_v56 = vmax.f32 %v1330_v46, 0.0  ;;  %v1333_v58 = vadd.f32 %v4427_v35, %v1332_v54 }
 0x12a   : > { %v2096_v57 = vmax.f32 %v1714_v47, 0.0  ;;  %v1717_v59 = vadd.f32 %v4427_v35, %v1716_v55  ;;  %v3608_v60 = vpack.c.bf16 %v2002_v50, %v2002_v50  ;;  %v2003_v62 = vmax.f32 %v1341_v52, 0.0 }
 0x12b   : > { %v3704_v61 = vpack.c.bf16 %v2098_v51, %v2098_v51  ;;  %v2099_v63 = vmax.f32 %v1725_v53, 0.0  ;;  %v3606_v0 = vpack.c.bf16 %v2000_v56, %v2000_v56  ;;  %v2001_v2 = vmax.f32 %v1333_v58, 0.0 }
 0x12c   : > { %v3702_v1 = vpack.c.bf16 %v2096_v57, %v2096_v57  ;;  %v2097_v3 = vmax.f32 %v1717_v59, 0.0  ;;  %2963 = vst.msk [vmem:[%s4440_s29 + $0x88] sm:$0xf] %vm2928_vm1, %v3608_v60  ;;  %v3609_v4 = vpack.c.bf16 %v2003_v62, %v2003_v62 }
 0x12d   : > { %3059 = vst.msk [vmem:[%s4440_s29 + $0x208] sm:$0xf] %vm2928_vm1, %v3704_v61  ;;  %v3705_v5 = vpack.c.bf16 %v2099_v63, %v2099_v63  ;;  %2961 = vst.msk [vmem:[%s4440_s29 + $0x80] sm:$0xf] %vm2928_vm1, %v3606_v0  ;;  %v3607_v6 = vpack.c.bf16 %v2001_v2, %v2001_v2  ;;  %v3909_v8 = vpop.f32.mrb[36].mxu0 }
 0x12e   : > { %3057 = vst.msk [vmem:[%s4440_s29 + $0x200] sm:$0xf] %vm2928_vm1, %v3702_v1  ;;  %v3703_v7 = vpack.c.bf16 %v2097_v3, %v2097_v3  ;;  %v4005_v9 = vpop.f32.mrb[36].mxu1  ;;  %2964 = vst.msk [vmem:[%s4440_s29 + $0x8c] sm:$0xf] %vm2928_vm1, %v3609_v4  ;;  %v1354_v10 = vadd.f32 %v3909_v8, %v4427_v35  ;;  %v1345_v12 = vpop.f32.mrb[37].mxu0 }
 0x12f   : > { %3060 = vst.msk [vmem:[%s4440_s29 + $0x20c] sm:$0xf] %vm2928_vm1, %v3705_v5  ;;  %v1738_v11 = vadd.f32 %v4005_v9, %v4427_v35  ;;  %v1729_v13 = vpop.f32.mrb[37].mxu1  ;;  %2962 = vst.msk [vmem:[%s4440_s29 + $0x84] sm:$0xf] %vm2928_vm1, %v3607_v6  ;;  %v1346_v14 = vadd.f32 %v4427_v35, %v1345_v12  ;;  %v3910_v16 = vpop.f32.mrb[38].mxu0 }
 0x130   : > { %3058 = vst.msk [vmem:[%s4440_s29 + $0x204] sm:$0xf] %vm2928_vm1, %v3703_v7  ;;  %v1730_v15 = vadd.f32 %v4427_v35, %v1729_v13  ;;  %v4006_v17 = vpop.f32.mrb[38].mxu1  ;;  %v2006_v18 = vmax.f32 %v1354_v10, 0.0  ;;  %v1357_v20 = vadd.f32 %v3910_v16, %v4427_v35  ;;  %v1348_v22 = vpop.f32.mrb[39].mxu0 }
 0x131   : > { %v2102_v19 = vmax.f32 %v1738_v11, 0.0  ;;  %v1741_v21 = vadd.f32 %v4006_v17, %v4427_v35  ;;  %v1732_v23 = vpop.f32.mrb[39].mxu1  ;;  %v2004_v24 = vmax.f32 %v1346_v14, 0.0  ;;  %v1349_v26 = vadd.f32 %v4427_v35, %v1348_v22 }
 0x132   : > { %v2100_v25 = vmax.f32 %v1730_v15, 0.0  ;;  %v1733_v27 = vadd.f32 %v4427_v35, %v1732_v23  ;;  %v3612_v28 = vpack.c.bf16 %v2006_v18, %v2006_v18  ;;  %v2007_v30 = vmax.f32 %v1357_v20, 0.0 }
 0x133   : > { %v3708_v29 = vpack.c.bf16 %v2102_v19, %v2102_v19  ;;  %v2103_v31 = vmax.f32 %v1741_v21, 0.0  ;;  %v3610_v32 = vpack.c.bf16 %v2004_v24, %v2004_v24  ;;  %v2005_v34 = vmax.f32 %v1349_v26, 0.0 }
 0x134   : > { %v3706_v33 = vpack.c.bf16 %v2100_v25, %v2100_v25  ;;  %v2101_v36 = vmax.f32 %v1733_v27, 0.0  ;;  %2967 = vst.msk [vmem:[%s4440_s29 + $0x98] sm:$0xf] %vm2928_vm1, %v3612_v28  ;;  %v3613_v37 = vpack.c.bf16 %v2007_v30, %v2007_v30 }
 0x135   : > { %3063 = vst.msk [vmem:[%s4440_s29 + $0x218] sm:$0xf] %vm2928_vm1, %v3708_v29  ;;  %v3709_v38 = vpack.c.bf16 %v2103_v31, %v2103_v31  ;;  %2965 = vst.msk [vmem:[%s4440_s29 + $0x90] sm:$0xf] %vm2928_vm1, %v3610_v32  ;;  %v3611_v39 = vpack.c.bf16 %v2005_v34, %v2005_v34  ;;  %v3913_v41 = vpop.f32.mrb[40].mxu0 }
 0x136   : > { %3061 = vst.msk [vmem:[%s4440_s29 + $0x210] sm:$0xf] %vm2928_vm1, %v3706_v33  ;;  %v3707_v40 = vpack.c.bf16 %v2101_v36, %v2101_v36  ;;  %v4009_v42 = vpop.f32.mrb[40].mxu1  ;;  %2968 = vst.msk [vmem:[%s4440_s29 + $0x9c] sm:$0xf] %vm2928_vm1, %v3613_v37  ;;  %v1370_v43 = vadd.f32 %v3913_v41, %v4427_v35  ;;  %v1361_v45 = vpop.f32.mrb[41].mxu0 }
 0x137   : > { %3064 = vst.msk [vmem:[%s4440_s29 + $0x21c] sm:$0xf] %vm2928_vm1, %v3709_v38  ;;  %v1754_v44 = vadd.f32 %v4009_v42, %v4427_v35  ;;  %v1745_v46 = vpop.f32.mrb[41].mxu1  ;;  %2966 = vst.msk [vmem:[%s4440_s29 + $0x94] sm:$0xf] %vm2928_vm1, %v3611_v39  ;;  %v1362_v47 = vadd.f32 %v4427_v35, %v1361_v45  ;;  %v3914_v49 = vpop.f32.mrb[42].mxu0 }
 0x138   : > { %3062 = vst.msk [vmem:[%s4440_s29 + $0x214] sm:$0xf] %vm2928_vm1, %v3707_v40  ;;  %v1746_v48 = vadd.f32 %v4427_v35, %v1745_v46  ;;  %v4010_v50 = vpop.f32.mrb[42].mxu1  ;;  %v2010_v51 = vmax.f32 %v1370_v43, 0.0  ;;  %v1373_v53 = vadd.f32 %v3914_v49, %v4427_v35  ;;  %v1364_v55 = vpop.f32.mrb[43].mxu0 }
 0x139   : > { %v2106_v52 = vmax.f32 %v1754_v44, 0.0  ;;  %v1757_v54 = vadd.f32 %v4010_v50, %v4427_v35  ;;  %v1748_v56 = vpop.f32.mrb[43].mxu1  ;;  %v2008_v57 = vmax.f32 %v1362_v47, 0.0  ;;  %v1365_v59 = vadd.f32 %v4427_v35, %v1364_v55 }
 0x13a   : > { %v2104_v58 = vmax.f32 %v1746_v48, 0.0  ;;  %v1749_v60 = vadd.f32 %v4427_v35, %v1748_v56  ;;  %v3616_v61 = vpack.c.bf16 %v2010_v51, %v2010_v51  ;;  %v2011_v63 = vmax.f32 %v1373_v53, 0.0 }
 0x13b   : > { %v3712_v62 = vpack.c.bf16 %v2106_v52, %v2106_v52  ;;  %v2107_v0 = vmax.f32 %v1757_v54, 0.0  ;;  %v3614_v1 = vpack.c.bf16 %v2008_v57, %v2008_v57  ;;  %v2009_v3 = vmax.f32 %v1365_v59, 0.0 }
 0x13c   : > { %v3710_v2 = vpack.c.bf16 %v2104_v58, %v2104_v58  ;;  %v2105_v4 = vmax.f32 %v1749_v60, 0.0  ;;  %2971 = vst.msk [vmem:[%s4440_s29 + $0xa8] sm:$0xf] %vm2928_vm1, %v3616_v61  ;;  %v3617_v5 = vpack.c.bf16 %v2011_v63, %v2011_v63 }
 0x13d   : > { %3067 = vst.msk [vmem:[%s4440_s29 + $0x228] sm:$0xf] %vm2928_vm1, %v3712_v62  ;;  %v3713_v6 = vpack.c.bf16 %v2107_v0, %v2107_v0  ;;  %2969 = vst.msk [vmem:[%s4440_s29 + $0xa0] sm:$0xf] %vm2928_vm1, %v3614_v1  ;;  %v3615_v7 = vpack.c.bf16 %v2009_v3, %v2009_v3  ;;  %v3917_v9 = vpop.f32.mrb[44].mxu0 }
 0x13e   : > { %3065 = vst.msk [vmem:[%s4440_s29 + $0x220] sm:$0xf] %vm2928_vm1, %v3710_v2  ;;  %v3711_v8 = vpack.c.bf16 %v2105_v4, %v2105_v4  ;;  %v4013_v10 = vpop.f32.mrb[44].mxu1  ;;  %2972 = vst.msk [vmem:[%s4440_s29 + $0xac] sm:$0xf] %vm2928_vm1, %v3617_v5  ;;  %v1386_v11 = vadd.f32 %v3917_v9, %v4427_v35  ;;  %v1377_v13 = vpop.f32.mrb[45].mxu0 }
 0x13f   : > { %3068 = vst.msk [vmem:[%s4440_s29 + $0x22c] sm:$0xf] %vm2928_vm1, %v3713_v6  ;;  %v1770_v12 = vadd.f32 %v4013_v10, %v4427_v35  ;;  %v1761_v14 = vpop.f32.mrb[45].mxu1  ;;  %2970 = vst.msk [vmem:[%s4440_s29 + $0xa4] sm:$0xf] %vm2928_vm1, %v3615_v7  ;;  %v1378_v15 = vadd.f32 %v4427_v35, %v1377_v13  ;;  %v3918_v17 = vpop.f32.mrb[46].mxu0 }
 0x140   : > { %3066 = vst.msk [vmem:[%s4440_s29 + $0x224] sm:$0xf] %vm2928_vm1, %v3711_v8  ;;  %v1762_v16 = vadd.f32 %v4427_v35, %v1761_v14  ;;  %v4014_v18 = vpop.f32.mrb[46].mxu1  ;;  %v2014_v19 = vmax.f32 %v1386_v11, 0.0  ;;  %v1389_v21 = vadd.f32 %v3918_v17, %v4427_v35  ;;  %v1380_v23 = vpop.f32.mrb[47].mxu0 }
 0x141   : > { %v2110_v20 = vmax.f32 %v1770_v12, 0.0  ;;  %v1773_v22 = vadd.f32 %v4014_v18, %v4427_v35  ;;  %v1764_v24 = vpop.f32.mrb[47].mxu1  ;;  %v2012_v25 = vmax.f32 %v1378_v15, 0.0  ;;  %v1381_v27 = vadd.f32 %v4427_v35, %v1380_v23  ;;  %v4747_v11 = vld [vmem:[%s5022_s2] ss:$0 sm:$0xff] }
 0x142   : > { %v2108_v26 = vmax.f32 %v1762_v16, 0.0  ;;  %v1765_v28 = vadd.f32 %v4427_v35, %v1764_v24  ;;  %v3620_v29 = vpack.c.bf16 %v2014_v19, %v2014_v19  ;;  %v2015_v31 = vmax.f32 %v1389_v21, 0.0 }
 0x143   : > { %v3716_v30 = vpack.c.bf16 %v2110_v20, %v2110_v20  ;;  %v2111_v32 = vmax.f32 %v1773_v22, 0.0  ;;  %v3618_v33 = vpack.c.bf16 %v2012_v25, %v2012_v25  ;;  %v2013_v36 = vmax.f32 %v1381_v27, 0.0 }
 0x144   : > { %v3714_v34 = vpack.c.bf16 %v2108_v26, %v2108_v26  ;;  %v2109_v37 = vmax.f32 %v1765_v28, 0.0  ;;  %2975 = vst.msk [vmem:[%s4440_s29 + $0xb8] sm:$0xf] %vm2928_vm1, %v3620_v29  ;;  %v3621_v38 = vpack.c.bf16 %v2015_v31, %v2015_v31 }
 0x145   : > { %3071 = vst.msk [vmem:[%s4440_s29 + $0x238] sm:$0xf] %vm2928_vm1, %v3716_v30  ;;  %v3717_v39 = vpack.c.bf16 %v2111_v32, %v2111_v32  ;;  %2973 = vst.msk [vmem:[%s4440_s29 + $0xb0] sm:$0xf] %vm2928_vm1, %v3618_v33  ;;  %v3619_v40 = vpack.c.bf16 %v2013_v36, %v2013_v36  ;;  %v3921_v42 = vpop.f32.mrb[48].mxu0 }
 0x146   : > { %3069 = vst.msk [vmem:[%s4440_s29 + $0x230] sm:$0xf] %vm2928_vm1, %v3714_v34  ;;  %v3715_v41 = vpack.c.bf16 %v2109_v37, %v2109_v37  ;;  %v4017_v43 = vpop.f32.mrb[48].mxu1  ;;  %2976 = vst.msk [vmem:[%s4440_s29 + $0xbc] sm:$0xf] %vm2928_vm1, %v3621_v38  ;;  %v1402_v44 = vadd.f32 %v3921_v42, %v4427_v35  ;;  %v1393_v46 = vpop.f32.mrb[49].mxu0 }
 0x147   : > { %3072 = vst.msk [vmem:[%s4440_s29 + $0x23c] sm:$0xf] %vm2928_vm1, %v3717_v39  ;;  %v1786_v45 = vadd.f32 %v4017_v43, %v4427_v35  ;;  %v1777_v47 = vpop.f32.mrb[49].mxu1  ;;  %2974 = vst.msk [vmem:[%s4440_s29 + $0xb4] sm:$0xf] %vm2928_vm1, %v3619_v40  ;;  %v1394_v48 = vadd.f32 %v4427_v35, %v1393_v46  ;;  %v3922_v50 = vpop.f32.mrb[50].mxu0 }
 0x148   : > { %3070 = vst.msk [vmem:[%s4440_s29 + $0x234] sm:$0xf] %vm2928_vm1, %v3715_v41  ;;  %v1778_v49 = vadd.f32 %v4427_v35, %v1777_v47  ;;  %v4018_v51 = vpop.f32.mrb[50].mxu1  ;;  %v2018_v52 = vmax.f32 %v1402_v44, 0.0  ;;  %v1405_v54 = vadd.f32 %v3922_v50, %v4427_v35  ;;  %v1396_v56 = vpop.f32.mrb[51].mxu0 }
 0x149   : > { %v2114_v53 = vmax.f32 %v1786_v45, 0.0  ;;  %v1789_v55 = vadd.f32 %v4018_v51, %v4427_v35  ;;  %v1780_v57 = vpop.f32.mrb[51].mxu1  ;;  %v2016_v58 = vmax.f32 %v1394_v48, 0.0  ;;  %v1397_v60 = vadd.f32 %v4427_v35, %v1396_v56 }
 0x14a   : > { %v2112_v59 = vmax.f32 %v1778_v49, 0.0  ;;  %v1781_v61 = vadd.f32 %v4427_v35, %v1780_v57  ;;  %v3624_v62 = vpack.c.bf16 %v2018_v52, %v2018_v52  ;;  %v2019_v0 = vmax.f32 %v1405_v54, 0.0 }
 0x14b   : > { %v3720_v63 = vpack.c.bf16 %v2114_v53, %v2114_v53  ;;  %v2115_v1 = vmax.f32 %v1789_v55, 0.0  ;;  %v3622_v2 = vpack.c.bf16 %v2016_v58, %v2016_v58  ;;  %v2017_v4 = vmax.f32 %v1397_v60, 0.0 }
 0x14c   : > { %v3718_v3 = vpack.c.bf16 %v2112_v59, %v2112_v59  ;;  %v2113_v5 = vmax.f32 %v1781_v61, 0.0  ;;  %2979 = vst.msk [vmem:[%s4440_s29 + $0xc8] sm:$0xf] %vm2928_vm1, %v3624_v62  ;;  %v3625_v6 = vpack.c.bf16 %v2019_v0, %v2019_v0 }
 0x14d   : > { %3075 = vst.msk [vmem:[%s4440_s29 + $0x248] sm:$0xf] %vm2928_vm1, %v3720_v63  ;;  %v3721_v7 = vpack.c.bf16 %v2115_v1, %v2115_v1  ;;  %2977 = vst.msk [vmem:[%s4440_s29 + $0xc0] sm:$0xf] %vm2928_vm1, %v3622_v2  ;;  %v3623_v35 = vpack.c.bf16 %v2017_v4, %v2017_v4  ;;  %v3925_v9 = vpop.f32.mrb[52].mxu0 }
 0x14e   : > { %3073 = vst.msk [vmem:[%s4440_s29 + $0x240] sm:$0xf] %vm2928_vm1, %v3718_v3  ;;  %v3719_v8 = vpack.c.bf16 %v2113_v5, %v2113_v5  ;;  %v4021_v10 = vpop.f32.mrb[52].mxu1  ;;  %2980 = vst.msk [vmem:[%s4440_s29 + $0xcc] sm:$0xf] %vm2928_vm1, %v3625_v6  ;;  %v1418_v12 = vadd.f32 %v4747_v11, %v3925_v9  ;;  %v1409_v14 = vpop.f32.mrb[53].mxu0 }
 0x14f   : > { %3076 = vst.msk [vmem:[%s4440_s29 + $0x24c] sm:$0xf] %vm2928_vm1, %v3721_v7  ;;  %v1802_v13 = vadd.f32 %v4747_v11, %v4021_v10  ;;  %v1793_v15 = vpop.f32.mrb[53].mxu1  ;;  %2978 = vst.msk [vmem:[%s4440_s29 + $0xc4] sm:$0xf] %vm2928_vm1, %v3623_v35  ;;  %v1410_v16 = vadd.f32 %v4747_v11, %v1409_v14  ;;  %v3926_v18 = vpop.f32.mrb[54].mxu0 }
 0x150   : > { %3074 = vst.msk [vmem:[%s4440_s29 + $0x244] sm:$0xf] %vm2928_vm1, %v3719_v8  ;;  %v1794_v17 = vadd.f32 %v4747_v11, %v1793_v15  ;;  %v4022_v19 = vpop.f32.mrb[54].mxu1  ;;  %v2022_v20 = vmax.f32 %v1418_v12, 0.0  ;;  %v1421_v22 = vadd.f32 %v4747_v11, %v3926_v18  ;;  %v1412_v24 = vpop.f32.mrb[55].mxu0 }
 0x151   : > { %v2118_v21 = vmax.f32 %v1802_v13, 0.0  ;;  %v1805_v23 = vadd.f32 %v4747_v11, %v4022_v19  ;;  %v1796_v25 = vpop.f32.mrb[55].mxu1  ;;  %v2020_v26 = vmax.f32 %v1410_v16, 0.0  ;;  %v1413_v28 = vadd.f32 %v4747_v11, %v1412_v24 }
 0x152   : > { %v2116_v27 = vmax.f32 %v1794_v17, 0.0  ;;  %v1797_v29 = vadd.f32 %v4747_v11, %v1796_v25  ;;  %v3628_v30 = vpack.c.bf16 %v2022_v20, %v2022_v20  ;;  %v2023_v32 = vmax.f32 %v1421_v22, 0.0 }
 0x153   : > { %v3724_v31 = vpack.c.bf16 %v2118_v21, %v2118_v21  ;;  %v2119_v33 = vmax.f32 %v1805_v23, 0.0  ;;  %v3626_v34 = vpack.c.bf16 %v2020_v26, %v2020_v26  ;;  %v2021_v37 = vmax.f32 %v1413_v28, 0.0 }
 0x154   : > { %v3722_v36 = vpack.c.bf16 %v2116_v27, %v2116_v27  ;;  %v2117_v38 = vmax.f32 %v1797_v29, 0.0  ;;  %2983 = vst.msk [vmem:[%s4440_s29 + $0xd8] sm:$0xf] %vm2928_vm1, %v3628_v30  ;;  %v3629_v39 = vpack.c.bf16 %v2023_v32, %v2023_v32 }
 0x155   : > { %3079 = vst.msk [vmem:[%s4440_s29 + $0x258] sm:$0xf] %vm2928_vm1, %v3724_v31  ;;  %v3725_v40 = vpack.c.bf16 %v2119_v33, %v2119_v33  ;;  %2981 = vst.msk [vmem:[%s4440_s29 + $0xd0] sm:$0xf] %vm2928_vm1, %v3626_v34  ;;  %v3627_v41 = vpack.c.bf16 %v2021_v37, %v2021_v37  ;;  %v3929_v43 = vpop.f32.mrb[56].mxu0 }
 0x156   : > { %3077 = vst.msk [vmem:[%s4440_s29 + $0x250] sm:$0xf] %vm2928_vm1, %v3722_v36  ;;  %v3723_v42 = vpack.c.bf16 %v2117_v38, %v2117_v38  ;;  %v4025_v44 = vpop.f32.mrb[56].mxu1  ;;  %2984 = vst.msk [vmem:[%s4440_s29 + $0xdc] sm:$0xf] %vm2928_vm1, %v3629_v39  ;;  %v1434_v45 = vadd.f32 %v4747_v11, %v3929_v43  ;;  %v1425_v47 = vpop.f32.mrb[57].mxu0 }
 0x157   : > { %3080 = vst.msk [vmem:[%s4440_s29 + $0x25c] sm:$0xf] %vm2928_vm1, %v3725_v40  ;;  %v1818_v46 = vadd.f32 %v4747_v11, %v4025_v44  ;;  %v1809_v48 = vpop.f32.mrb[57].mxu1  ;;  %2982 = vst.msk [vmem:[%s4440_s29 + $0xd4] sm:$0xf] %vm2928_vm1, %v3627_v41  ;;  %v1426_v49 = vadd.f32 %v4747_v11, %v1425_v47  ;;  %v3930_v51 = vpop.f32.mrb[58].mxu0 }
 0x158   : > { %3078 = vst.msk [vmem:[%s4440_s29 + $0x254] sm:$0xf] %vm2928_vm1, %v3723_v42  ;;  %v1810_v50 = vadd.f32 %v4747_v11, %v1809_v48  ;;  %v4026_v52 = vpop.f32.mrb[58].mxu1  ;;  %v2026_v53 = vmax.f32 %v1434_v45, 0.0  ;;  %v1437_v55 = vadd.f32 %v4747_v11, %v3930_v51  ;;  %v1428_v57 = vpop.f32.mrb[59].mxu0 }
 0x159   : > { %v2122_v54 = vmax.f32 %v1818_v46, 0.0  ;;  %v1821_v56 = vadd.f32 %v4747_v11, %v4026_v52  ;;  %v1812_v58 = vpop.f32.mrb[59].mxu1  ;;  %v2024_v59 = vmax.f32 %v1426_v49, 0.0  ;;  %v1429_v61 = vadd.f32 %v4747_v11, %v1428_v57 }
 0x15a   : > { %v2120_v60 = vmax.f32 %v1810_v50, 0.0  ;;  %v1813_v62 = vadd.f32 %v4747_v11, %v1812_v58  ;;  %v3632_v63 = vpack.c.bf16 %v2026_v53, %v2026_v53  ;;  %v2027_v1 = vmax.f32 %v1437_v55, 0.0 }
 0x15b   : > { %v3728_v0 = vpack.c.bf16 %v2122_v54, %v2122_v54  ;;  %v2123_v2 = vmax.f32 %v1821_v56, 0.0  ;;  %v3630_v3 = vpack.c.bf16 %v2024_v59, %v2024_v59  ;;  %v2025_v5 = vmax.f32 %v1429_v61, 0.0 }
 0x15c   : > { %v3726_v4 = vpack.c.bf16 %v2120_v60, %v2120_v60  ;;  %v2121_v6 = vmax.f32 %v1813_v62, 0.0  ;;  %2987 = vst.msk [vmem:[%s4440_s29 + $0xe8] sm:$0xf] %vm2928_vm1, %v3632_v63  ;;  %v3633_v7 = vpack.c.bf16 %v2027_v1, %v2027_v1 }
 0x15d   : > { %3083 = vst.msk [vmem:[%s4440_s29 + $0x268] sm:$0xf] %vm2928_vm1, %v3728_v0  ;;  %v3729_v35 = vpack.c.bf16 %v2123_v2, %v2123_v2  ;;  %2985 = vst.msk [vmem:[%s4440_s29 + $0xe0] sm:$0xf] %vm2928_vm1, %v3630_v3  ;;  %v3631_v8 = vpack.c.bf16 %v2025_v5, %v2025_v5  ;;  %v3933_v10 = vpop.f32.mrb[60].mxu0 }
 0x15e   : > { %3081 = vst.msk [vmem:[%s4440_s29 + $0x260] sm:$0xf] %vm2928_vm1, %v3726_v4  ;;  %v3727_v9 = vpack.c.bf16 %v2121_v6, %v2121_v6  ;;  %v4029_v12 = vpop.f32.mrb[60].mxu1  ;;  %2988 = vst.msk [vmem:[%s4440_s29 + $0xec] sm:$0xf] %vm2928_vm1, %v3633_v7  ;;  %v1450_v13 = vadd.f32 %v4747_v11, %v3933_v10  ;;  %v1441_v15 = vpop.f32.mrb[61].mxu0 }
 0x15f   : > { %3084 = vst.msk [vmem:[%s4440_s29 + $0x26c] sm:$0xf] %vm2928_vm1, %v3729_v35  ;;  %v1834_v14 = vadd.f32 %v4747_v11, %v4029_v12  ;;  %v1825_v16 = vpop.f32.mrb[61].mxu1  ;;  %2986 = vst.msk [vmem:[%s4440_s29 + $0xe4] sm:$0xf] %vm2928_vm1, %v3631_v8  ;;  %v1442_v17 = vadd.f32 %v4747_v11, %v1441_v15  ;;  %v3934_v19 = vpop.f32.mrb[62].mxu0 }
 0x160   : > { %3082 = vst.msk [vmem:[%s4440_s29 + $0x264] sm:$0xf] %vm2928_vm1, %v3727_v9  ;;  %v1826_v18 = vadd.f32 %v4747_v11, %v1825_v16  ;;  %v4030_v20 = vpop.f32.mrb[62].mxu1  ;;  %v2030_v21 = vmax.f32 %v1450_v13, 0.0  ;;  %v1453_v23 = vadd.f32 %v4747_v11, %v3934_v19  ;;  %v1444_v25 = vpop.f32.mrb[63].mxu0 }
 0x161   : > { %v2126_v22 = vmax.f32 %v1834_v14, 0.0  ;;  %v1837_v24 = vadd.f32 %v4747_v11, %v4030_v20  ;;  %v1828_v26 = vpop.f32.mrb[63].mxu1  ;;  %v2028_v27 = vmax.f32 %v1442_v17, 0.0  ;;  %v1445_v29 = vadd.f32 %v4747_v11, %v1444_v25 }
 0x162   : > { %v2124_v28 = vmax.f32 %v1826_v18, 0.0  ;;  %v1829_v30 = vadd.f32 %v4747_v11, %v1828_v26  ;;  %v3636_v31 = vpack.c.bf16 %v2030_v21, %v2030_v21  ;;  %v2031_v33 = vmax.f32 %v1453_v23, 0.0 }
 0x163   : > { %v3732_v32 = vpack.c.bf16 %v2126_v22, %v2126_v22  ;;  %v2127_v34 = vmax.f32 %v1837_v24, 0.0  ;;  %v3634_v36 = vpack.c.bf16 %v2028_v27, %v2028_v27  ;;  %v2029_v38 = vmax.f32 %v1445_v29, 0.0 }
 0x164   : > { %v3730_v37 = vpack.c.bf16 %v2124_v28, %v2124_v28  ;;  %v2125_v39 = vmax.f32 %v1829_v30, 0.0  ;;  %2991 = vst.msk [vmem:[%s4440_s29 + $0xf8] sm:$0xf] %vm2928_vm1, %v3636_v31  ;;  %v3637_v40 = vpack.c.bf16 %v2031_v33, %v2031_v33 }
 0x165   : > { %3087 = vst.msk [vmem:[%s4440_s29 + $0x278] sm:$0xf] %vm2928_vm1, %v3732_v32  ;;  %v3733_v41 = vpack.c.bf16 %v2127_v34, %v2127_v34  ;;  %2989 = vst.msk [vmem:[%s4440_s29 + $0xf0] sm:$0xf] %vm2928_vm1, %v3634_v36  ;;  %v3635_v42 = vpack.c.bf16 %v2029_v38, %v2029_v38  ;;  %v3937_v44 = vpop.f32.mrb[64].mxu0 }
 0x166   : > { %3085 = vst.msk [vmem:[%s4440_s29 + $0x270] sm:$0xf] %vm2928_vm1, %v3730_v37  ;;  %v3731_v43 = vpack.c.bf16 %v2125_v39, %v2125_v39  ;;  %v4033_v45 = vpop.f32.mrb[64].mxu1  ;;  %2992 = vst.msk [vmem:[%s4440_s29 + $0xfc] sm:$0xf] %vm2928_vm1, %v3637_v40  ;;  %v1466_v46 = vadd.f32 %v4747_v11, %v3937_v44  ;;  %v1457_v48 = vpop.f32.mrb[65].mxu0 }
 0x167   : > { %3088 = vst.msk [vmem:[%s4440_s29 + $0x27c] sm:$0xf] %vm2928_vm1, %v3733_v41  ;;  %v1850_v47 = vadd.f32 %v4747_v11, %v4033_v45  ;;  %v1841_v49 = vpop.f32.mrb[65].mxu1  ;;  %2990 = vst.msk [vmem:[%s4440_s29 + $0xf4] sm:$0xf] %vm2928_vm1, %v3635_v42  ;;  %v1458_v50 = vadd.f32 %v4747_v11, %v1457_v48  ;;  %v3938_v52 = vpop.f32.mrb[66].mxu0 }
 0x168   : > { %3086 = vst.msk [vmem:[%s4440_s29 + $0x274] sm:$0xf] %vm2928_vm1, %v3731_v43  ;;  %v1842_v51 = vadd.f32 %v4747_v11, %v1841_v49  ;;  %v4034_v53 = vpop.f32.mrb[66].mxu1  ;;  %v2034_v54 = vmax.f32 %v1466_v46, 0.0  ;;  %v1469_v56 = vadd.f32 %v4747_v11, %v3938_v52  ;;  %v1460_v58 = vpop.f32.mrb[67].mxu0 }
 0x169   : > { %v2130_v55 = vmax.f32 %v1850_v47, 0.0  ;;  %v1853_v57 = vadd.f32 %v4747_v11, %v4034_v53  ;;  %v1844_v59 = vpop.f32.mrb[67].mxu1  ;;  %v2032_v60 = vmax.f32 %v1458_v50, 0.0  ;;  %v1461_v62 = vadd.f32 %v4747_v11, %v1460_v58 }
 0x16a   : > { %v2128_v61 = vmax.f32 %v1842_v51, 0.0  ;;  %v1845_v63 = vadd.f32 %v4747_v11, %v1844_v59  ;;  %v3640_v0 = vpack.c.bf16 %v2034_v54, %v2034_v54  ;;  %v2035_v2 = vmax.f32 %v1469_v56, 0.0 }
 0x16b   : > { %v3736_v1 = vpack.c.bf16 %v2130_v55, %v2130_v55  ;;  %v2131_v3 = vmax.f32 %v1853_v57, 0.0  ;;  %v3638_v4 = vpack.c.bf16 %v2032_v60, %v2032_v60  ;;  %v2033_v6 = vmax.f32 %v1461_v62, 0.0 }
 0x16c   : > { %v3734_v5 = vpack.c.bf16 %v2128_v61, %v2128_v61  ;;  %v2129_v7 = vmax.f32 %v1845_v63, 0.0  ;;  %2995 = vst.msk [vmem:[%s4440_s29 + $0x108] sm:$0xf] %vm2928_vm1, %v3640_v0  ;;  %v3641_v35 = vpack.c.bf16 %v2035_v2, %v2035_v2 }
 0x16d   : > { %3091 = vst.msk [vmem:[%s4440_s29 + $0x288] sm:$0xf] %vm2928_vm1, %v3736_v1  ;;  %v3737_v8 = vpack.c.bf16 %v2131_v3, %v2131_v3  ;;  %2993 = vst.msk [vmem:[%s4440_s29 + $0x100] sm:$0xf] %vm2928_vm1, %v3638_v4  ;;  %v3639_v9 = vpack.c.bf16 %v2033_v6, %v2033_v6  ;;  %v3941_v12 = vpop.f32.mrb[68].mxu0 }
 0x16e   : > { %3089 = vst.msk [vmem:[%s4440_s29 + $0x280] sm:$0xf] %vm2928_vm1, %v3734_v5  ;;  %v3735_v10 = vpack.c.bf16 %v2129_v7, %v2129_v7  ;;  %v4037_v13 = vpop.f32.mrb[68].mxu1  ;;  %2996 = vst.msk [vmem:[%s4440_s29 + $0x10c] sm:$0xf] %vm2928_vm1, %v3641_v35  ;;  %v1482_v14 = vadd.f32 %v4747_v11, %v3941_v12  ;;  %v1473_v16 = vpop.f32.mrb[69].mxu0 }
 0x16f   : > { %3092 = vst.msk [vmem:[%s4440_s29 + $0x28c] sm:$0xf] %vm2928_vm1, %v3737_v8  ;;  %v1866_v15 = vadd.f32 %v4747_v11, %v4037_v13  ;;  %v1857_v17 = vpop.f32.mrb[69].mxu1  ;;  %2994 = vst.msk [vmem:[%s4440_s29 + $0x104] sm:$0xf] %vm2928_vm1, %v3639_v9  ;;  %v1474_v18 = vadd.f32 %v4747_v11, %v1473_v16  ;;  %v3942_v20 = vpop.f32.mrb[70].mxu0 }
 0x170   : > { %3090 = vst.msk [vmem:[%s4440_s29 + $0x284] sm:$0xf] %vm2928_vm1, %v3735_v10  ;;  %v1858_v19 = vadd.f32 %v4747_v11, %v1857_v17  ;;  %v4038_v21 = vpop.f32.mrb[70].mxu1  ;;  %v2038_v22 = vmax.f32 %v1482_v14, 0.0  ;;  %v1485_v24 = vadd.f32 %v4747_v11, %v3942_v20  ;;  %v1476_v26 = vpop.f32.mrb[71].mxu0 }
 0x171   : > { %v2134_v23 = vmax.f32 %v1866_v15, 0.0  ;;  %v1869_v25 = vadd.f32 %v4747_v11, %v4038_v21  ;;  %v1860_v27 = vpop.f32.mrb[71].mxu1  ;;  %v2036_v28 = vmax.f32 %v1474_v18, 0.0  ;;  %v1477_v30 = vadd.f32 %v4747_v11, %v1476_v26 }
 0x172   : > { %v2132_v29 = vmax.f32 %v1858_v19, 0.0  ;;  %v1861_v31 = vadd.f32 %v4747_v11, %v1860_v27  ;;  %v3644_v32 = vpack.c.bf16 %v2038_v22, %v2038_v22  ;;  %v2039_v34 = vmax.f32 %v1485_v24, 0.0 }
 0x173   : > { %v3740_v33 = vpack.c.bf16 %v2134_v23, %v2134_v23  ;;  %v2135_v36 = vmax.f32 %v1869_v25, 0.0  ;;  %v3642_v37 = vpack.c.bf16 %v2036_v28, %v2036_v28  ;;  %v2037_v39 = vmax.f32 %v1477_v30, 0.0 }
 0x174   : > { %v3738_v38 = vpack.c.bf16 %v2132_v29, %v2132_v29  ;;  %v2133_v40 = vmax.f32 %v1861_v31, 0.0  ;;  %2999 = vst.msk [vmem:[%s4440_s29 + $0x118] sm:$0xf] %vm2928_vm1, %v3644_v32  ;;  %v3645_v41 = vpack.c.bf16 %v2039_v34, %v2039_v34 }
 0x175   : > { %3095 = vst.msk [vmem:[%s4440_s29 + $0x298] sm:$0xf] %vm2928_vm1, %v3740_v33  ;;  %v3741_v42 = vpack.c.bf16 %v2135_v36, %v2135_v36  ;;  %2997 = vst.msk [vmem:[%s4440_s29 + $0x110] sm:$0xf] %vm2928_vm1, %v3642_v37  ;;  %v3643_v43 = vpack.c.bf16 %v2037_v39, %v2037_v39  ;;  %v3945_v45 = vpop.f32.mrb[72].mxu0 }
 0x176   : > { %3093 = vst.msk [vmem:[%s4440_s29 + $0x290] sm:$0xf] %vm2928_vm1, %v3738_v38  ;;  %v3739_v44 = vpack.c.bf16 %v2133_v40, %v2133_v40  ;;  %v4041_v46 = vpop.f32.mrb[72].mxu1  ;;  %3000 = vst.msk [vmem:[%s4440_s29 + $0x11c] sm:$0xf] %vm2928_vm1, %v3645_v41  ;;  %v1498_v47 = vadd.f32 %v4747_v11, %v3945_v45  ;;  %v1489_v49 = vpop.f32.mrb[73].mxu0 }
 0x177   : > { %3096 = vst.msk [vmem:[%s4440_s29 + $0x29c] sm:$0xf] %vm2928_vm1, %v3741_v42  ;;  %v1882_v48 = vadd.f32 %v4747_v11, %v4041_v46  ;;  %v1873_v50 = vpop.f32.mrb[73].mxu1  ;;  %2998 = vst.msk [vmem:[%s4440_s29 + $0x114] sm:$0xf] %vm2928_vm1, %v3643_v43  ;;  %v1490_v51 = vadd.f32 %v4747_v11, %v1489_v49  ;;  %v3946_v53 = vpop.f32.mrb[74].mxu0 }
 0x178   : > { %3094 = vst.msk [vmem:[%s4440_s29 + $0x294] sm:$0xf] %vm2928_vm1, %v3739_v44  ;;  %v1874_v52 = vadd.f32 %v4747_v11, %v1873_v50  ;;  %v4042_v54 = vpop.f32.mrb[74].mxu1  ;;  %v2042_v55 = vmax.f32 %v1498_v47, 0.0  ;;  %v1501_v57 = vadd.f32 %v4747_v11, %v3946_v53  ;;  %v1492_v59 = vpop.f32.mrb[75].mxu0 }
 0x179   : > { %v2138_v56 = vmax.f32 %v1882_v48, 0.0  ;;  %v1885_v58 = vadd.f32 %v4747_v11, %v4042_v54  ;;  %v1876_v60 = vpop.f32.mrb[75].mxu1  ;;  %v2040_v61 = vmax.f32 %v1490_v51, 0.0  ;;  %v1493_v63 = vadd.f32 %v4747_v11, %v1492_v59 }
 0x17a   : > { %v2136_v62 = vmax.f32 %v1874_v52, 0.0  ;;  %v1877_v0 = vadd.f32 %v4747_v11, %v1876_v60  ;;  %v3648_v1 = vpack.c.bf16 %v2042_v55, %v2042_v55  ;;  %v2043_v3 = vmax.f32 %v1501_v57, 0.0 }
 0x17b   : > { %v3744_v2 = vpack.c.bf16 %v2138_v56, %v2138_v56  ;;  %v2139_v4 = vmax.f32 %v1885_v58, 0.0  ;;  %v3646_v5 = vpack.c.bf16 %v2040_v61, %v2040_v61  ;;  %v2041_v7 = vmax.f32 %v1493_v63, 0.0 }
 0x17c   : > { %v3742_v6 = vpack.c.bf16 %v2136_v62, %v2136_v62  ;;  %v2137_v35 = vmax.f32 %v1877_v0, 0.0  ;;  %3003 = vst.msk [vmem:[%s4440_s29 + $0x128] sm:$0xf] %vm2928_vm1, %v3648_v1  ;;  %v3649_v8 = vpack.c.bf16 %v2043_v3, %v2043_v3 }
 0x17d   : > { %3099 = vst.msk [vmem:[%s4440_s29 + $0x2a8] sm:$0xf] %vm2928_vm1, %v3744_v2  ;;  %v3745_v9 = vpack.c.bf16 %v2139_v4, %v2139_v4  ;;  %3001 = vst.msk [vmem:[%s4440_s29 + $0x120] sm:$0xf] %vm2928_vm1, %v3646_v5  ;;  %v3647_v10 = vpack.c.bf16 %v2041_v7, %v2041_v7  ;;  %v3949_v13 = vpop.f32.mrb[76].mxu0 }
 0x17e   : > { %3097 = vst.msk [vmem:[%s4440_s29 + $0x2a0] sm:$0xf] %vm2928_vm1, %v3742_v6  ;;  %v3743_v12 = vpack.c.bf16 %v2137_v35, %v2137_v35  ;;  %v4045_v14 = vpop.f32.mrb[76].mxu1  ;;  %3004 = vst.msk [vmem:[%s4440_s29 + $0x12c] sm:$0xf] %vm2928_vm1, %v3649_v8  ;;  %v1514_v15 = vadd.f32 %v4747_v11, %v3949_v13  ;;  %v1505_v17 = vpop.f32.mrb[77].mxu0 }
 0x17f   : > { %3100 = vst.msk [vmem:[%s4440_s29 + $0x2ac] sm:$0xf] %vm2928_vm1, %v3745_v9  ;;  %v1898_v16 = vadd.f32 %v4747_v11, %v4045_v14  ;;  %v1889_v18 = vpop.f32.mrb[77].mxu1  ;;  %3002 = vst.msk [vmem:[%s4440_s29 + $0x124] sm:$0xf] %vm2928_vm1, %v3647_v10  ;;  %v1506_v19 = vadd.f32 %v4747_v11, %v1505_v17  ;;  %v3950_v21 = vpop.f32.mrb[78].mxu0 }
 0x180   : > { %3098 = vst.msk [vmem:[%s4440_s29 + $0x2a4] sm:$0xf] %vm2928_vm1, %v3743_v12  ;;  %v1890_v20 = vadd.f32 %v4747_v11, %v1889_v18  ;;  %v4046_v22 = vpop.f32.mrb[78].mxu1  ;;  %v2046_v23 = vmax.f32 %v1514_v15, 0.0  ;;  %v1517_v25 = vadd.f32 %v4747_v11, %v3950_v21  ;;  %v1508_v27 = vpop.f32.mrb[79].mxu0 }
 0x181   : > { %v2142_v24 = vmax.f32 %v1898_v16, 0.0  ;;  %v1901_v26 = vadd.f32 %v4747_v11, %v4046_v22  ;;  %v1892_v28 = vpop.f32.mrb[79].mxu1  ;;  %v2044_v29 = vmax.f32 %v1506_v19, 0.0  ;;  %v1509_v31 = vadd.f32 %v4747_v11, %v1508_v27 }
 0x182   : > { %v2140_v30 = vmax.f32 %v1890_v20, 0.0  ;;  %v1893_v32 = vadd.f32 %v4747_v11, %v1892_v28  ;;  %v3652_v33 = vpack.c.bf16 %v2046_v23, %v2046_v23  ;;  %v2047_v36 = vmax.f32 %v1517_v25, 0.0 }
 0x183   : > { %v3748_v34 = vpack.c.bf16 %v2142_v24, %v2142_v24  ;;  %v2143_v37 = vmax.f32 %v1901_v26, 0.0  ;;  %v3650_v38 = vpack.c.bf16 %v2044_v29, %v2044_v29  ;;  %v2045_v40 = vmax.f32 %v1509_v31, 0.0 }
 0x184   : > { %v3746_v39 = vpack.c.bf16 %v2140_v30, %v2140_v30  ;;  %v2141_v41 = vmax.f32 %v1893_v32, 0.0  ;;  %3007 = vst.msk [vmem:[%s4440_s29 + $0x138] sm:$0xf] %vm2928_vm1, %v3652_v33  ;;  %v3653_v42 = vpack.c.bf16 %v2047_v36, %v2047_v36 }
 0x185   : > { %3103 = vst.msk [vmem:[%s4440_s29 + $0x2b8] sm:$0xf] %vm2928_vm1, %v3748_v34  ;;  %v3749_v43 = vpack.c.bf16 %v2143_v37, %v2143_v37  ;;  %3005 = vst.msk [vmem:[%s4440_s29 + $0x130] sm:$0xf] %vm2928_vm1, %v3650_v38  ;;  %v3651_v44 = vpack.c.bf16 %v2045_v40, %v2045_v40  ;;  %v3953_v46 = vpop.f32.mrb[80].mxu0 }
 0x186   : > { %3101 = vst.msk [vmem:[%s4440_s29 + $0x2b0] sm:$0xf] %vm2928_vm1, %v3746_v39  ;;  %v3747_v45 = vpack.c.bf16 %v2141_v41, %v2141_v41  ;;  %v4049_v47 = vpop.f32.mrb[80].mxu1  ;;  %3008 = vst.msk [vmem:[%s4440_s29 + $0x13c] sm:$0xf] %vm2928_vm1, %v3653_v42  ;;  %v1530_v48 = vadd.f32 %v4747_v11, %v3953_v46  ;;  %v1521_v50 = vpop.f32.mrb[81].mxu0 }
 0x187   : > { %3104 = vst.msk [vmem:[%s4440_s29 + $0x2bc] sm:$0xf] %vm2928_vm1, %v3749_v43  ;;  %v1914_v49 = vadd.f32 %v4747_v11, %v4049_v47  ;;  %v1905_v51 = vpop.f32.mrb[81].mxu1  ;;  %3006 = vst.msk [vmem:[%s4440_s29 + $0x134] sm:$0xf] %vm2928_vm1, %v3651_v44  ;;  %v1522_v52 = vadd.f32 %v4747_v11, %v1521_v50  ;;  %v3954_v54 = vpop.f32.mrb[82].mxu0 }
 0x188   : > { %3102 = vst.msk [vmem:[%s4440_s29 + $0x2b4] sm:$0xf] %vm2928_vm1, %v3747_v45  ;;  %v1906_v53 = vadd.f32 %v4747_v11, %v1905_v51  ;;  %v4050_v55 = vpop.f32.mrb[82].mxu1  ;;  %v2050_v56 = vmax.f32 %v1530_v48, 0.0  ;;  %v1533_v58 = vadd.f32 %v4747_v11, %v3954_v54  ;;  %v1524_v60 = vpop.f32.mrb[83].mxu0 }
 0x189   : > { %v2146_v57 = vmax.f32 %v1914_v49, 0.0  ;;  %v1917_v59 = vadd.f32 %v4747_v11, %v4050_v55  ;;  %v1908_v61 = vpop.f32.mrb[83].mxu1  ;;  %v2048_v62 = vmax.f32 %v1522_v52, 0.0  ;;  %v1525_v0 = vadd.f32 %v4747_v11, %v1524_v60 }
 0x18a   : > { %v2144_v63 = vmax.f32 %v1906_v53, 0.0  ;;  %v1909_v1 = vadd.f32 %v4747_v11, %v1908_v61  ;;  %v3656_v2 = vpack.c.bf16 %v2050_v56, %v2050_v56  ;;  %v2051_v4 = vmax.f32 %v1533_v58, 0.0 }
 0x18b   : > { %v3752_v3 = vpack.c.bf16 %v2146_v57, %v2146_v57  ;;  %v2147_v5 = vmax.f32 %v1917_v59, 0.0  ;;  %v3654_v6 = vpack.c.bf16 %v2048_v62, %v2048_v62  ;;  %v2049_v35 = vmax.f32 %v1525_v0, 0.0 }
 0x18c   : > { %v3750_v7 = vpack.c.bf16 %v2144_v63, %v2144_v63  ;;  %v2145_v8 = vmax.f32 %v1909_v1, 0.0  ;;  %3011 = vst.msk [vmem:[%s4440_s29 + $0x148] sm:$0xf] %vm2928_vm1, %v3656_v2  ;;  %v3657_v9 = vpack.c.bf16 %v2051_v4, %v2051_v4 }
 0x18d   : > { %3107 = vst.msk [vmem:[%s4440_s29 + $0x2c8] sm:$0xf] %vm2928_vm1, %v3752_v3  ;;  %v3753_v10 = vpack.c.bf16 %v2147_v5, %v2147_v5  ;;  %3009 = vst.msk [vmem:[%s4440_s29 + $0x140] sm:$0xf] %vm2928_vm1, %v3654_v6  ;;  %v3655_v12 = vpack.c.bf16 %v2049_v35, %v2049_v35  ;;  %v3957_v14 = vpop.f32.mrb[84].mxu0 }
 0x18e   : > { %3105 = vst.msk [vmem:[%s4440_s29 + $0x2c0] sm:$0xf] %vm2928_vm1, %v3750_v7  ;;  %v3751_v13 = vpack.c.bf16 %v2145_v8, %v2145_v8  ;;  %v4053_v15 = vpop.f32.mrb[84].mxu1  ;;  %3012 = vst.msk [vmem:[%s4440_s29 + $0x14c] sm:$0xf] %vm2928_vm1, %v3657_v9  ;;  %v1546_v16 = vadd.f32 %v4747_v11, %v3957_v14  ;;  %v1537_v18 = vpop.f32.mrb[85].mxu0 }
 0x18f   : > { %3108 = vst.msk [vmem:[%s4440_s29 + $0x2cc] sm:$0xf] %vm2928_vm1, %v3753_v10  ;;  %v1930_v17 = vadd.f32 %v4747_v11, %v4053_v15  ;;  %v1921_v19 = vpop.f32.mrb[85].mxu1  ;;  %3010 = vst.msk [vmem:[%s4440_s29 + $0x144] sm:$0xf] %vm2928_vm1, %v3655_v12  ;;  %v1538_v20 = vadd.f32 %v4747_v11, %v1537_v18  ;;  %v3958_v22 = vpop.f32.mrb[86].mxu0 }
 0x190   : > { %3106 = vst.msk [vmem:[%s4440_s29 + $0x2c4] sm:$0xf] %vm2928_vm1, %v3751_v13  ;;  %v1922_v21 = vadd.f32 %v4747_v11, %v1921_v19  ;;  %v4054_v23 = vpop.f32.mrb[86].mxu1  ;;  %v2054_v24 = vmax.f32 %v1546_v16, 0.0  ;;  %v1549_v26 = vadd.f32 %v4747_v11, %v3958_v22  ;;  %v1540_v28 = vpop.f32.mrb[87].mxu0 }
 0x191   : > { %v2150_v25 = vmax.f32 %v1930_v17, 0.0  ;;  %v1933_v27 = vadd.f32 %v4747_v11, %v4054_v23  ;;  %v1924_v29 = vpop.f32.mrb[87].mxu1  ;;  %v2052_v30 = vmax.f32 %v1538_v20, 0.0  ;;  %v1541_v32 = vadd.f32 %v4747_v11, %v1540_v28 }
 0x192   : > { %v2148_v31 = vmax.f32 %v1922_v21, 0.0  ;;  %v1925_v33 = vadd.f32 %v4747_v11, %v1924_v29  ;;  %v3660_v34 = vpack.c.bf16 %v2054_v24, %v2054_v24  ;;  %v2055_v37 = vmax.f32 %v1549_v26, 0.0 }
 0x193   : > { %v3756_v36 = vpack.c.bf16 %v2150_v25, %v2150_v25  ;;  %v2151_v38 = vmax.f32 %v1933_v27, 0.0  ;;  %v3658_v39 = vpack.c.bf16 %v2052_v30, %v2052_v30  ;;  %v2053_v41 = vmax.f32 %v1541_v32, 0.0 }
 0x194   : > { %v3754_v40 = vpack.c.bf16 %v2148_v31, %v2148_v31  ;;  %v2149_v42 = vmax.f32 %v1925_v33, 0.0  ;;  %3015 = vst.msk [vmem:[%s4440_s29 + $0x158] sm:$0xf] %vm2928_vm1, %v3660_v34  ;;  %v3661_v43 = vpack.c.bf16 %v2055_v37, %v2055_v37 }
 0x195   : > { %3111 = vst.msk [vmem:[%s4440_s29 + $0x2d8] sm:$0xf] %vm2928_vm1, %v3756_v36  ;;  %v3757_v44 = vpack.c.bf16 %v2151_v38, %v2151_v38  ;;  %3013 = vst.msk [vmem:[%s4440_s29 + $0x150] sm:$0xf] %vm2928_vm1, %v3658_v39  ;;  %v3659_v45 = vpack.c.bf16 %v2053_v41, %v2053_v41  ;;  %v3961_v47 = vpop.f32.mrb[88].mxu0 }
 0x196   : > { %3109 = vst.msk [vmem:[%s4440_s29 + $0x2d0] sm:$0xf] %vm2928_vm1, %v3754_v40  ;;  %v3755_v46 = vpack.c.bf16 %v2149_v42, %v2149_v42  ;;  %v4057_v48 = vpop.f32.mrb[88].mxu1  ;;  %3016 = vst.msk [vmem:[%s4440_s29 + $0x15c] sm:$0xf] %vm2928_vm1, %v3661_v43  ;;  %v1562_v49 = vadd.f32 %v4747_v11, %v3961_v47  ;;  %v1553_v51 = vpop.f32.mrb[89].mxu0 }
 0x197   : > { %3112 = vst.msk [vmem:[%s4440_s29 + $0x2dc] sm:$0xf] %vm2928_vm1, %v3757_v44  ;;  %v1946_v50 = vadd.f32 %v4747_v11, %v4057_v48  ;;  %v1937_v52 = vpop.f32.mrb[89].mxu1  ;;  %3014 = vst.msk [vmem:[%s4440_s29 + $0x154] sm:$0xf] %vm2928_vm1, %v3659_v45  ;;  %v1554_v53 = vadd.f32 %v4747_v11, %v1553_v51  ;;  %v3962_v55 = vpop.f32.mrb[90].mxu0 }
 0x198   : > { %3110 = vst.msk [vmem:[%s4440_s29 + $0x2d4] sm:$0xf] %vm2928_vm1, %v3755_v46  ;;  %v1938_v54 = vadd.f32 %v4747_v11, %v1937_v52  ;;  %v4058_v56 = vpop.f32.mrb[90].mxu1  ;;  %v2058_v57 = vmax.f32 %v1562_v49, 0.0  ;;  %v1565_v59 = vadd.f32 %v4747_v11, %v3962_v55  ;;  %v1556_v61 = vpop.f32.mrb[91].mxu0 }
 0x199   : > { %v2154_v58 = vmax.f32 %v1946_v50, 0.0  ;;  %v1949_v60 = vadd.f32 %v4747_v11, %v4058_v56  ;;  %v1940_v62 = vpop.f32.mrb[91].mxu1  ;;  %v2056_v63 = vmax.f32 %v1554_v53, 0.0  ;;  %v1557_v1 = vadd.f32 %v4747_v11, %v1556_v61 }
 0x19a   : > { %v2152_v0 = vmax.f32 %v1938_v54, 0.0  ;;  %v1941_v2 = vadd.f32 %v4747_v11, %v1940_v62  ;;  %v3664_v3 = vpack.c.bf16 %v2058_v57, %v2058_v57  ;;  %v2059_v5 = vmax.f32 %v1565_v59, 0.0 }
 0x19b   : > { %v3760_v4 = vpack.c.bf16 %v2154_v58, %v2154_v58  ;;  %v2155_v6 = vmax.f32 %v1949_v60, 0.0  ;;  %v3662_v7 = vpack.c.bf16 %v2056_v63, %v2056_v63  ;;  %v2057_v8 = vmax.f32 %v1557_v1, 0.0 }
 0x19c   : > { %v3758_v35 = vpack.c.bf16 %v2152_v0, %v2152_v0  ;;  %v2153_v9 = vmax.f32 %v1941_v2, 0.0  ;;  %3019 = vst.msk [vmem:[%s4440_s29 + $0x168] sm:$0xf] %vm2928_vm1, %v3664_v3  ;;  %v3665_v10 = vpack.c.bf16 %v2059_v5, %v2059_v5 }
 0x19d   : > { %3115 = vst.msk [vmem:[%s4440_s29 + $0x2e8] sm:$0xf] %vm2928_vm1, %v3760_v4  ;;  %v3761_v12 = vpack.c.bf16 %v2155_v6, %v2155_v6  ;;  %3017 = vst.msk [vmem:[%s4440_s29 + $0x160] sm:$0xf] %vm2928_vm1, %v3662_v7  ;;  %v3663_v13 = vpack.c.bf16 %v2057_v8, %v2057_v8  ;;  %v3965_v15 = vpop.f32.mrb[92].mxu0 }
 0x19e   : > { %3113 = vst.msk [vmem:[%s4440_s29 + $0x2e0] sm:$0xf] %vm2928_vm1, %v3758_v35  ;;  %v3759_v14 = vpack.c.bf16 %v2153_v9, %v2153_v9  ;;  %v4061_v16 = vpop.f32.mrb[92].mxu1  ;;  %3020 = vst.msk [vmem:[%s4440_s29 + $0x16c] sm:$0xf] %vm2928_vm1, %v3665_v10  ;;  %v1578_v17 = vadd.f32 %v4747_v11, %v3965_v15  ;;  %v1569_v19 = vpop.f32.mrb[93].mxu0 }
 0x19f   : > { %3116 = vst.msk [vmem:[%s4440_s29 + $0x2ec] sm:$0xf] %vm2928_vm1, %v3761_v12  ;;  %v1962_v18 = vadd.f32 %v4747_v11, %v4061_v16  ;;  %v1953_v20 = vpop.f32.mrb[93].mxu1  ;;  %3018 = vst.msk [vmem:[%s4440_s29 + $0x164] sm:$0xf] %vm2928_vm1, %v3663_v13  ;;  %v1570_v21 = vadd.f32 %v4747_v11, %v1569_v19  ;;  %v3966_v23 = vpop.f32.mrb[94].mxu0 }
 0x1a0   : > { %3114 = vst.msk [vmem:[%s4440_s29 + $0x2e4] sm:$0xf] %vm2928_vm1, %v3759_v14  ;;  %v1954_v22 = vadd.f32 %v4747_v11, %v1953_v20  ;;  %v4062_v24 = vpop.f32.mrb[94].mxu1  ;;  %v2062_v25 = vmax.f32 %v1578_v17, 0.0  ;;  %v1581_v27 = vadd.f32 %v4747_v11, %v3966_v23  ;;  %v1572_v29 = vpop.f32.mrb[95].mxu0 }
 0x1a1   : > { %v2158_v26 = vmax.f32 %v1962_v18, 0.0  ;;  %v1965_v28 = vadd.f32 %v4747_v11, %v4062_v24  ;;  %v1956_v30 = vpop.f32.mrb[95].mxu1  ;;  %v2060_v31 = vmax.f32 %v1570_v21, 0.0  ;;  %v1573_v33 = vadd.f32 %v4747_v11, %v1572_v29 }
 0x1a2   : > { %v2156_v32 = vmax.f32 %v1954_v22, 0.0  ;;  %v1957_v34 = vadd.f32 %v4747_v11, %v1956_v30  ;;  %v3668_v36 = vpack.c.bf16 %v2062_v25, %v2062_v25  ;;  %v2063_v38 = vmax.f32 %v1581_v27, 0.0 }
 0x1a3   : > { %v3764_v37 = vpack.c.bf16 %v2158_v26, %v2158_v26  ;;  %v2159_v39 = vmax.f32 %v1965_v28, 0.0  ;;  %v3666_v40 = vpack.c.bf16 %v2060_v31, %v2060_v31  ;;  %v2061_v42 = vmax.f32 %v1573_v33, 0.0 }
 0x1a4   : > { %v3762_v41 = vpack.c.bf16 %v2156_v32, %v2156_v32  ;;  %v2157_v43 = vmax.f32 %v1957_v34, 0.0  ;;  %3023 = vst.msk [vmem:[%s4440_s29 + $0x178] sm:$0xf] %vm2928_vm1, %v3668_v36  ;;  %v3669_v44 = vpack.c.bf16 %v2063_v38, %v2063_v38 }
 0x1a5   : > { %3119 = vst.msk [vmem:[%s4440_s29 + $0x2f8] sm:$0xf] %vm2928_vm1, %v3764_v37  ;;  %v3765_v45 = vpack.c.bf16 %v2159_v39, %v2159_v39  ;;  %3021 = vst.msk [vmem:[%s4440_s29 + $0x170] sm:$0xf] %vm2928_vm1, %v3666_v40  ;;  %v3667_v11 = vpack.c.bf16 %v2061_v42, %v2061_v42 }
 0x1a6   : > { %3117 = vst.msk [vmem:[%s4440_s29 + $0x2f0] sm:$0xf] %vm2928_vm1, %v3762_v41  ;;  %v3763_v46 = vpack.c.bf16 %v2157_v43, %v2157_v43  ;;  %3024 = vst.msk [vmem:[%s4440_s29 + $0x17c] sm:$0xf] %vm2928_vm1, %v3669_v44 }
 0x1a7   : > { %3120 = vst.msk [vmem:[%s4440_s29 + $0x2fc] sm:$0xf] %vm2928_vm1, %v3765_v45  ;;  %3022 = vst.msk [vmem:[%s4440_s29 + $0x174] sm:$0xf] %vm2928_vm1, %v3667_v11 }
 0x1a8   : > { %3118 = vst.msk [vmem:[%s4440_s29 + $0x2f4] sm:$0xf] %vm2928_vm1, %v3763_v46 }
 0x1a9 PF: > { %s13_s12 = sadd.s32 1, %s4183_s12  }
 0x1aa   : > { %p10_p4 = scmp.ge.s32.totalorder %s13_s12, 5  }
 0x1ac   :  { %12 = sbr.rel (!%p10_p4) target bundleno = 1 (0x1), region = 62 }

// kernel: feature_extractor_conv_forward.6
= control target key start
LH: loop header
LB: loop body
LE: loop exit
PB: predicated region body
PF: predicated region fallthrough
CT: control target
= control target key end

     0   :  { %s3787_s12 = smov 0   ;;  %s3789_s13 = smov 0   ;;  %s4310_s0 = inlined_call_operand.vmem [shape: bf16[2,4,576,128], index: 0, kind: input, shape index: {}]   ;;  %s4311_s1 = inlined_call_operand.vmem [shape: bf16[4,128,64], index: 1, kind: input, shape index: {}]   ;;  %s4312_s2 = inlined_call_operand.vmem [shape: f32[1,64], index: 2, kind: input, shape index: {}]   ;;  %s4313_s3 = inlined_call_operand.vmem [shape: bf16[2,576,64], index: 3, kind: output, shape index: {}]  }
   0x1   :  { %s3791_s14 = smov 0   ;;  %s3793_s15 = smov 0  }
   0x2   :  { %s3795_s16 = smov 0   ;;  %s3797_s17 = smov 0  }
   0x3   :  { %s3799_s18 = smov 0  }
   0x4 LB: > { %s22_s19 = sadd.s32 1, %s3757_s16  ;;  %s25_s20 = sadd.s32 1, %s3761_s17  ;;  %s3765_s18 = sphi %s3799_s18, %s13_s18   ;;  %s3761_s17 = sphi %s3797_s17, %s4319_s17   ;;  %s3757_s16 = sphi %s3795_s16, %s4318_s16   ;;  %s3753_s15 = sphi %s3793_s15, %s4317_s15   ;;  %s3749_s14 = sphi %s3791_s14, %s4316_s14   ;;  %s3745_s13 = sphi %s3789_s13, %s4315_s13   ;;  %s3741_s12 = sphi %s3787_s12, %s4314_s12  }
   0x5   : > { %p23_p0 = scmp.ge.s32.totalorder %s22_s19, 2  ;;  %p41_p1 = scmp.ne.s32.totalorder %s3745_s13, %s3741_s12 }
   0x6   : > { %p42_p2 = scmp.eq.s32.totalorder %s3765_s18, 0  ;;  %s34_s24 = sadd.s32 1, %s3745_s13 }
   0x7   : > { %s4321_s19 = smov (%p23_p0, %s22_s19), 0  ;;  %s4323_s20 = smov (!%p23_p0, %s25_s20), %s3761_s17 }
   0x8   : > { %p43_p3 = por %p42_p2, %p41_p1  ;;  %p27_p4 = scmp.ge.s32.totalorder %s4323_s20, 2 }
   0x9   : > { %s30_s21 = ssub.s32 %s3757_s16, %s4321_s19  ;;  %p2788_p6 = scmp.ge.s32.totalorder %s3765_s18, 4 }
   0xa   : > { %s4325_s20 = smov (%p27_p4, %s4323_s20), 0 }
   0xb   : > { %s29_s22 = ssub.s32 %s3761_s17, %s4325_s20  ;;  %143 = sbr.rel (%p2788_p6) target bundleno = 63 (0x3f), region = 24 }
   0xc   : > { %s31_s23 = sor.u32 %s30_s21, %s29_s22 }
   0xd   : > { %p32_p5 = scmp.eq.s32.totalorder %s31_s23, 0 }
   0xf   : > { %s3838_s25 = scalar_select %p32_p5, %s3745_s13, %s34_s24  }
  0x12   : > { %146 = sbr.rel (!%p43_p3) target bundleno = 63 (0x3f), region = 28  ;;  %s148_s26 = sand.u32 (%p43_p3), 1, %s3745_s13  }
  0x13   : > { %s151_s27 = smul.u32 (%p43_p3), 36, %s3757_s16 }
  0x14   : > { %s3547_s28 = smul.u32 (%p43_p3), 576, %s148_s26 }
  0x15   : > { %s3548_s29 = smul.u32 (%p43_p3), 288, %s3761_s17 }
  0x16   : > { %s3852_s8 = scalar_lea.vmem (%p43_p3), [#allocation2], %s3547_s28 }
  0x17   : > { %s153_s30 = sadd.s32 (%p43_p3), %s3548_s29, %s151_s27 }
  0x18   : > { %s2789_s4 = sshll.u32 (%p43_p3), %s153_s30, 2 }
  0x19   : > { %s3847_s7 = scalar_lea.vmem %s4310_s0, %s2789_s4 }
  0x1a   : > { %v171_v0 = vld [vmem:[%s3847_s7] sm:$0xff]   ;;  %v175_v1 = vld [vmem:[%s3847_s7 + $0x8] sm:$0xff]   ;;  %v179_v2 = vld [vmem:[%s3847_s7 + $0x10] sm:$0xff]  }
  0x1b   : > { %172 = vst [vmem:[%s3852_s8] sm:$0xff] %v171_v0   ;;  %176 = vst [vmem:[%s3852_s8 + $0x8] sm:$0xff] %v175_v1   ;;  %v183_v3 = vld [vmem:[%s3847_s7 + $0x18] sm:$0xff]   ;;  %v187_v4 = vld [vmem:[%s3847_s7 + $0x20] sm:$0xff]  }
  0x1c   : > { %180 = vst [vmem:[%s3852_s8 + $0x10] sm:$0xff] %v179_v2   ;;  %v191_v5 = vld [vmem:[%s3847_s7 + $0x28] sm:$0xff]   ;;  %184 = vst [vmem:[%s3852_s8 + $0x18] sm:$0xff] %v183_v3   ;;  %v195_v6 = vld [vmem:[%s3847_s7 + $0x30] sm:$0xff]  }
  0x1d   : > { %188 = vst [vmem:[%s3852_s8 + $0x20] sm:$0xff] %v187_v4   ;;  %192 = vst [vmem:[%s3852_s8 + $0x28] sm:$0xff] %v191_v5   ;;  %v199_v7 = vld [vmem:[%s3847_s7 + $0x38] sm:$0xff]   ;;  %v203_v8 = vld [vmem:[%s3847_s7 + $0x40] sm:$0xff]  }
  0x1e   : > { %196 = vst [vmem:[%s3852_s8 + $0x30] sm:$0xff] %v195_v6   ;;  %200 = vst [vmem:[%s3852_s8 + $0x38] sm:$0xff] %v199_v7   ;;  %v207_v9 = vld [vmem:[%s3847_s7 + $0x48] sm:$0xff]   ;;  %v211_v10 = vld [vmem:[%s3847_s7 + $0x50] sm:$0xff]  }
  0x1f   : > { %204 = vst [vmem:[%s3852_s8 + $0x40] sm:$0xff] %v203_v8   ;;  %v215_v11 = vld [vmem:[%s3847_s7 + $0x58] sm:$0xff]   ;;  %208 = vst [vmem:[%s3852_s8 + $0x48] sm:$0xff] %v207_v9   ;;  %v219_v12 = vld [vmem:[%s3847_s7 + $0x60] sm:$0xff]  }
  0x20   : > { %212 = vst [vmem:[%s3852_s8 + $0x50] sm:$0xff] %v211_v10   ;;  %216 = vst [vmem:[%s3852_s8 + $0x58] sm:$0xff] %v215_v11   ;;  %v223_v13 = vld [vmem:[%s3847_s7 + $0x68] sm:$0xff]   ;;  %v227_v14 = vld [vmem:[%s3847_s7 + $0x70] sm:$0xff]  }
  0x21   : > { %220 = vst [vmem:[%s3852_s8 + $0x60] sm:$0xff] %v219_v12   ;;  %224 = vst [vmem:[%s3852_s8 + $0x68] sm:$0xff] %v223_v13   ;;  %v231_v15 = vld [vmem:[%s3847_s7 + $0x78] sm:$0xff]   ;;  %v235_v16 = vld [vmem:[%s3847_s7 + $0x80] sm:$0xff]  }
  0x22   : > { %228 = vst [vmem:[%s3852_s8 + $0x70] sm:$0xff] %v227_v14   ;;  %v239_v17 = vld [vmem:[%s3847_s7 + $0x88] sm:$0xff]   ;;  %232 = vst [vmem:[%s3852_s8 + $0x78] sm:$0xff] %v231_v15   ;;  %v243_v18 = vld [vmem:[%s3847_s7 + $0x120] sm:$0xff]  }
  0x23   : > { %236 = vst [vmem:[%s3852_s8 + $0x80] sm:$0xff] %v235_v16   ;;  %240 = vst [vmem:[%s3852_s8 + $0x88] sm:$0xff] %v239_v17   ;;  %v247_v19 = vld [vmem:[%s3847_s7 + $0x128] sm:$0xff]   ;;  %v251_v20 = vld [vmem:[%s3847_s7 + $0x130] sm:$0xff]  }
  0x24   : > { %244 = vst [vmem:[%s3852_s8 + $0x90] sm:$0xff] %v243_v18   ;;  %248 = vst [vmem:[%s3852_s8 + $0x98] sm:$0xff] %v247_v19   ;;  %v255_v21 = vld [vmem:[%s3847_s7 + $0x138] sm:$0xff]   ;;  %v259_v22 = vld [vmem:[%s3847_s7 + $0x140] sm:$0xff]  }
  0x25   : > { %252 = vst [vmem:[%s3852_s8 + $0xa0] sm:$0xff] %v251_v20   ;;  %v263_v23 = vld [vmem:[%s3847_s7 + $0x148] sm:$0xff]   ;;  %256 = vst [vmem:[%s3852_s8 + $0xa8] sm:$0xff] %v255_v21   ;;  %v267_v24 = vld [vmem:[%s3847_s7 + $0x150] sm:$0xff]  }
  0x26   : > { %260 = vst [vmem:[%s3852_s8 + $0xb0] sm:$0xff] %v259_v22   ;;  %264 = vst [vmem:[%s3852_s8 + $0xb8] sm:$0xff] %v263_v23   ;;  %v271_v25 = vld [vmem:[%s3847_s7 + $0x158] sm:$0xff]   ;;  %v275_v26 = vld [vmem:[%s3847_s7 + $0x160] sm:$0xff]  }
  0x27   : > { %268 = vst [vmem:[%s3852_s8 + $0xc0] sm:$0xff] %v267_v24   ;;  %272 = vst [vmem:[%s3852_s8 + $0xc8] sm:$0xff] %v271_v25   ;;  %v279_v27 = vld [vmem:[%s3847_s7 + $0x168] sm:$0xff]   ;;  %v283_v28 = vld [vmem:[%s3847_s7 + $0x170] sm:$0xff]  }
  0x28   : > { %276 = vst [vmem:[%s3852_s8 + $0xd0] sm:$0xff] %v275_v26   ;;  %v287_v29 = vld [vmem:[%s3847_s7 + $0x178] sm:$0xff]   ;;  %280 = vst [vmem:[%s3852_s8 + $0xd8] sm:$0xff] %v279_v27   ;;  %v291_v30 = vld [vmem:[%s3847_s7 + $0x180] sm:$0xff]  }
  0x29   : > { %284 = vst [vmem:[%s3852_s8 + $0xe0] sm:$0xff] %v283_v28   ;;  %288 = vst [vmem:[%s3852_s8 + $0xe8] sm:$0xff] %v287_v29   ;;  %v295_v31 = vld [vmem:[%s3847_s7 + $0x188] sm:$0xff]   ;;  %v299_v32 = vld [vmem:[%s3847_s7 + $0x190] sm:$0xff]  }
  0x2a   : > { %292 = vst [vmem:[%s3852_s8 + $0xf0] sm:$0xff] %v291_v30   ;;  %296 = vst [vmem:[%s3852_s8 + $0xf8] sm:$0xff] %v295_v31   ;;  %v303_v33 = vld [vmem:[%s3847_s7 + $0x198] sm:$0xff]   ;;  %v307_v34 = vld [vmem:[%s3847_s7 + $0x1a0] sm:$0xff]  }
  0x2b   : > { %300 = vst [vmem:[%s3852_s8 + $0x100] sm:$0xff] %v299_v32   ;;  %v311_v35 = vld [vmem:[%s3847_s7 + $0x1a8] sm:$0xff]   ;;  %304 = vst [vmem:[%s3852_s8 + $0x108] sm:$0xff] %v303_v33   ;;  %v315_v36 = vld [vmem:[%s3847_s7 + $0x240] sm:$0xff]  }
  0x2c   : > { %308 = vst [vmem:[%s3852_s8 + $0x110] sm:$0xff] %v307_v34   ;;  %312 = vst [vmem:[%s3852_s8 + $0x118] sm:$0xff] %v311_v35   ;;  %v319_v37 = vld [vmem:[%s3847_s7 + $0x248] sm:$0xff]   ;;  %v323_v38 = vld [vmem:[%s3847_s7 + $0x250] sm:$0xff]  }
  0x2d   : > { %316 = vst [vmem:[%s3852_s8 + $0x120] sm:$0xff] %v315_v36   ;;  %320 = vst [vmem:[%s3852_s8 + $0x128] sm:$0xff] %v319_v37   ;;  %v327_v39 = vld [vmem:[%s3847_s7 + $0x258] sm:$0xff]   ;;  %v331_v40 = vld [vmem:[%s3847_s7 + $0x260] sm:$0xff]  }
  0x2e   : > { %324 = vst [vmem:[%s3852_s8 + $0x130] sm:$0xff] %v323_v38   ;;  %v335_v41 = vld [vmem:[%s3847_s7 + $0x268] sm:$0xff]   ;;  %328 = vst [vmem:[%s3852_s8 + $0x138] sm:$0xff] %v327_v39   ;;  %v339_v42 = vld [vmem:[%s3847_s7 + $0x270] sm:$0xff]  }
  0x2f   : > { %332 = vst [vmem:[%s3852_s8 + $0x140] sm:$0xff] %v331_v40   ;;  %336 = vst [vmem:[%s3852_s8 + $0x148] sm:$0xff] %v335_v41   ;;  %v343_v43 = vld [vmem:[%s3847_s7 + $0x278] sm:$0xff]   ;;  %v347_v44 = vld [vmem:[%s3847_s7 + $0x280] sm:$0xff]  }
  0x30   : > { %340 = vst [vmem:[%s3852_s8 + $0x150] sm:$0xff] %v339_v42   ;;  %344 = vst [vmem:[%s3852_s8 + $0x158] sm:$0xff] %v343_v43   ;;  %v351_v45 = vld [vmem:[%s3847_s7 + $0x288] sm:$0xff]   ;;  %v355_v46 = vld [vmem:[%s3847_s7 + $0x290] sm:$0xff]  }
  0x31   : > { %348 = vst [vmem:[%s3852_s8 + $0x160] sm:$0xff] %v347_v44   ;;  %v359_v47 = vld [vmem:[%s3847_s7 + $0x298] sm:$0xff]   ;;  %352 = vst [vmem:[%s3852_s8 + $0x168] sm:$0xff] %v351_v45   ;;  %v363_v48 = vld [vmem:[%s3847_s7 + $0x2a0] sm:$0xff]  }
  0x32   : > { %356 = vst [vmem:[%s3852_s8 + $0x170] sm:$0xff] %v355_v46   ;;  %360 = vst [vmem:[%s3852_s8 + $0x178] sm:$0xff] %v359_v47   ;;  %v367_v49 = vld [vmem:[%s3847_s7 + $0x2a8] sm:$0xff]   ;;  %v371_v50 = vld [vmem:[%s3847_s7 + $0x2b0] sm:$0xff]  }
  0x33   : > { %364 = vst [vmem:[%s3852_s8 + $0x180] sm:$0xff] %v363_v48   ;;  %368 = vst [vmem:[%s3852_s8 + $0x188] sm:$0xff] %v367_v49   ;;  %v375_v51 = vld [vmem:[%s3847_s7 + $0x2b8] sm:$0xff]   ;;  %v379_v52 = vld [vmem:[%s3847_s7 + $0x2c0] sm:$0xff]  }
  0x34   : > { %372 = vst [vmem:[%s3852_s8 + $0x190] sm:$0xff] %v371_v50   ;;  %v383_v53 = vld [vmem:[%s3847_s7 + $0x2c8] sm:$0xff]   ;;  %376 = vst [vmem:[%s3852_s8 + $0x198] sm:$0xff] %v375_v51   ;;  %v387_v54 = vld [vmem:[%s3847_s7 + $0x360] sm:$0xff]  }
  0x35   : > { %380 = vst [vmem:[%s3852_s8 + $0x1a0] sm:$0xff] %v379_v52   ;;  %384 = vst [vmem:[%s3852_s8 + $0x1a8] sm:$0xff] %v383_v53   ;;  %v391_v55 = vld [vmem:[%s3847_s7 + $0x368] sm:$0xff]   ;;  %v395_v56 = vld [vmem:[%s3847_s7 + $0x370] sm:$0xff]  }
  0x36   : > { %388 = vst [vmem:[%s3852_s8 + $0x1b0] sm:$0xff] %v387_v54   ;;  %392 = vst [vmem:[%s3852_s8 + $0x1b8] sm:$0xff] %v391_v55   ;;  %v399_v57 = vld [vmem:[%s3847_s7 + $0x378] sm:$0xff]   ;;  %v403_v58 = vld [vmem:[%s3847_s7 + $0x380] sm:$0xff]  }
  0x37   : > { %396 = vst [vmem:[%s3852_s8 + $0x1c0] sm:$0xff] %v395_v56   ;;  %v407_v59 = vld [vmem:[%s3847_s7 + $0x388] sm:$0xff]   ;;  %400 = vst [vmem:[%s3852_s8 + $0x1c8] sm:$0xff] %v399_v57   ;;  %v411_v60 = vld [vmem:[%s3847_s7 + $0x390] sm:$0xff]  }
  0x38   : > { %404 = vst [vmem:[%s3852_s8 + $0x1d0] sm:$0xff] %v403_v58   ;;  %408 = vst [vmem:[%s3852_s8 + $0x1d8] sm:$0xff] %v407_v59   ;;  %v415_v61 = vld [vmem:[%s3847_s7 + $0x398] sm:$0xff]   ;;  %v419_v62 = vld [vmem:[%s3847_s7 + $0x3a0] sm:$0xff]  }
  0x39   : > { %412 = vst [vmem:[%s3852_s8 + $0x1e0] sm:$0xff] %v411_v60   ;;  %416 = vst [vmem:[%s3852_s8 + $0x1e8] sm:$0xff] %v415_v61   ;;  %v423_v63 = vld [vmem:[%s3847_s7 + $0x3a8] sm:$0xff]   ;;  %v427_v0 = vld [vmem:[%s3847_s7 + $0x3b0] sm:$0xff]  }
  0x3a   : > { %420 = vst [vmem:[%s3852_s8 + $0x1f0] sm:$0xff] %v419_v62   ;;  %v431_v1 = vld [vmem:[%s3847_s7 + $0x3b8] sm:$0xff]   ;;  %424 = vst [vmem:[%s3852_s8 + $0x1f8] sm:$0xff] %v423_v63   ;;  %v435_v2 = vld [vmem:[%s3847_s7 + $0x3c0] sm:$0xff]  }
  0x3b   : > { %428 = vst [vmem:[%s3852_s8 + $0x200] sm:$0xff] %v427_v0   ;;  %432 = vst [vmem:[%s3852_s8 + $0x208] sm:$0xff] %v431_v1   ;;  %v439_v3 = vld [vmem:[%s3847_s7 + $0x3c8] sm:$0xff]   ;;  %v443_v4 = vld [vmem:[%s3847_s7 + $0x3d0] sm:$0xff]  }
  0x3c   : > { %436 = vst [vmem:[%s3852_s8 + $0x210] sm:$0xff] %v435_v2   ;;  %440 = vst [vmem:[%s3852_s8 + $0x218] sm:$0xff] %v439_v3   ;;  %v447_v5 = vld [vmem:[%s3847_s7 + $0x3d8] sm:$0xff]   ;;  %v451_v6 = vld [vmem:[%s3847_s7 + $0x3e0] sm:$0xff]  }
  0x3d   : > { %444 = vst [vmem:[%s3852_s8 + $0x220] sm:$0xff] %v443_v4   ;;  %v455_v7 = vld [vmem:[%s3847_s7 + $0x3e8] sm:$0xff]   ;;  %448 = vst [vmem:[%s3852_s8 + $0x228] sm:$0xff] %v447_v5  }
  0x3e   : > { %452 = vst [vmem:[%s3852_s8 + $0x230] sm:$0xff] %v451_v6   ;;  %456 = vst [vmem:[%s3852_s8 + $0x238] sm:$0xff] %v455_v7  }
  0x3f PF: > { %p2790_p7 = scmp.ge.s32.totalorder %s3765_s18, 1  ;;  %p768_p8 = scmp.lt.s32.totalorder %s3765_s18, 5 }
  0x41   : > { %p769_p9 = pnand %p2790_p7, %p768_p8 }
  0x42   : > { %v3607_v8 = vld [vmem:[%s4311_s1 + $0x40] sm:$0xff] (!%p769_p9)   ;;  %v3609_v10 = vld [vmem:[%s4311_s1 + $0x48] sm:$0xff] (!%p769_p9)   ;;  %v3611_v12 = vld [vmem:[%s4311_s1 + $0x50] sm:$0xff] (!%p769_p9)   ;;  %s775_s4 = sand.u32 (!%p769_p9), 1, %s3741_s12   ;;  %p804_p10 = scmp.lt.s32.totalorder (!%p769_p9), %s3753_s15, 1  ;;  %vm2655_vm0 = vcmask (!%p769_p9), 519168  }
  0x43   : > { %772 = sbr.rel (%p769_p9) target bundleno = 460 (0x1cc), region = 69  ;;  %v3608_v9 = vld [vmem:[%s4311_s1 + $0x80] sm:$0xff] (!%p769_p9)   ;;  %3231 = vmatprep.subr.bf16.mxu1 (!%p769_p9), %v3607_v8  ;;  %v3610_v11 = vld [vmem:[%s4311_s1 + $0x88] sm:$0xff] (!%p769_p9)   ;;  %v3612_v13 = vld [vmem:[%s4311_s1 + $0x90] sm:$0xff] (!%p769_p9)  }
  0x44   : > { %3335 = vmatprep.subr.bf16.mxu0 (!%p769_p9), %v3608_v9  ;;  %3232 = vmatpush3.bf16.msra.mxu1 (!%p769_p9), %v3607_v8  ;;  %v3613_v14 = vld [vmem:[%s4311_s1 + $0x58] sm:$0xff] (!%p769_p9)   ;;  %s3549_s9 = smul.u32 (!%p769_p9), 576, %s775_s4  ;;  %v3615_v16 = vld [vmem:[%s4311_s1 + $0x60] sm:$0xff] (!%p769_p9)   ;;  %v3617_v18 = vld [vmem:[%s4311_s1 + $0x68] sm:$0xff] (!%p769_p9)  }
  0x45   : > { %3336 = vmatpush3.bf16.msra.mxu0 (!%p769_p9), %v3608_v9  ;;  %3233 = vmatprep.subr.bf16.mxu1 (!%p769_p9), %v3609_v10  ;;  %v3614_v15 = vld [vmem:[%s4311_s1 + $0x98] sm:$0xff] (!%p769_p9)   ;;  %v3616_v17 = vld [vmem:[%s4311_s1 + $0xa0] sm:$0xff] (!%p769_p9)   ;;  %v3618_v19 = vld [vmem:[%s4311_s1 + $0xa8] sm:$0xff] (!%p769_p9)   ;;  %s803_s7 = smul.u32 (!%p769_p9), 36, %s3749_s14 }
  0x46   : > { %3337 = vmatprep.subr.bf16.mxu0 (!%p769_p9), %v3610_v11  ;;  %s4034_s27 = scalar_lea.vmem (!%p769_p9), [#allocation2], %s3549_s9  ;;  %v3619_v22 = vld [vmem:[%s4311_s1 + $0x70] sm:$0xff] (!%p769_p9)   ;;  %v3621_v24 = vld [vmem:[%s4311_s1 + $0x78] sm:$0xff] (!%p769_p9)   ;;  %v3626_v27 = vld [vmem:[%s4311_s1] sm:$0xff] (!%p769_p9)  }
  0x47   : > { %v3623_v20 = vld [vmem:[%s4034_s27 + $0x90] sm:$0xff] (!%p769_p9)   ;;  %v3624_v21 = vld [vmem:[%s4034_s27 + $0x120] sm:$0xff] (!%p769_p9)   ;;  %v3622_v25 = vld [vmem:[%s4311_s1 + $0xb8] sm:$0xff] (!%p769_p9)   ;;  %p806_p11 = scmp.lt.s32.totalorder (!%p769_p9), %s803_s7, 71 }
  0x48   : > { %3234 = vmatpush3.bf16.msra.mxu1 (!%p769_p9), %v3609_v10  ;;  %3247 = vmatprep.mubr.bf16.mxu1 (!%p769_p9), %v3623_v20  ;;  %v3620_v23 = vld [vmem:[%s4311_s1 + $0xb0] sm:$0xff] (!%p769_p9)   ;;  %v3625_v26 = vld [vmem:[%s4034_s27 + $0x98] sm:$0xff] (!%p769_p9)   ;;  %v3628_v28 = vld [vmem:[%s4311_s1 + $0xc0] sm:$0xff] (!%p769_p9)  }
  0x49   : > { %3338 = vmatpush3.bf16.msra.mxu0 (!%p769_p9), %v3610_v11  ;;  %3235 = vmatprep.subr.bf16.mxu1 (!%p769_p9), %v3611_v12  ;;  %v3627_v29 = vld [vmem:[%s4034_s27 + $0x128] sm:$0xff] (!%p769_p9)   ;;  %v3629_v30 = vld [vmem:[%s4034_s27 + $0xa0] sm:$0xff] (!%p769_p9)   ;;  %v3630_v31 = vld [vmem:[%s4034_s27 + $0x130] sm:$0xff] (!%p769_p9)  }
  0x4a   : > { %3339 = vmatprep.subr.bf16.mxu0 %v3612_v13  ;;  %3351 = vmatprep.mubr.bf16.mxu0 %v3624_v21  ;;  %v3633_v32 = vld [vmem:[%s4311_s1 + $0x8] sm:$0xff]   ;;  %v3639_v35 = vld [vmem:[%s4311_s1 + $0x10] sm:$0xff]   ;;  %v3632_v37 = vld [vmem:[%s4034_s27 + $0x138] sm:$0xff]   ;;  %s4327_s15 = smov (!%p804_p10, %s3753_s15), 1  ;;  %s4329_s7 = smov (!%p806_p11, %s803_s7), 71 }
  0x4b   : > { %v3634_v33 = vld [vmem:[%s4311_s1 + $0xc8] sm:$0xff]   ;;  %v3640_v36 = vld [vmem:[%s4311_s1 + $0xd0] sm:$0xff]   ;;  %v3636_v39 = vld [vmem:[%s4034_s27 + $0x140] sm:$0xff]   ;;  %s3550_s8 = smul.u32 72, %s4327_s15 }
  0x4c   : > { %3236 = vmatpush3.bf16.msra.mxu1 %v3611_v12  ;;  %v3631_v34 = vld [vmem:[%s4034_s27 + $0xa8] sm:$0xff]   ;;  %v3635_v38 = vld [vmem:[%s4034_s27 + $0xb0] sm:$0xff]   ;;  %v3645_v40 = vld [vmem:[%s4311_s1 + $0x18] sm:$0xff]  }
  0x4d   : > { %3340 = vmatpush3.bf16.msra.mxu0 %v3612_v13  ;;  %3237 = vmatprep.subr.bf16.mxu1 %v3613_v14  ;;  %v3646_v41 = vld [vmem:[%s4311_s1 + $0xd8] sm:$0xff]   ;;  %v3638_v43 = vld [vmem:[%s4034_s27 + $0x148] sm:$0xff]   ;;  %v3651_v44 = vld [vmem:[%s4311_s1 + $0x20] sm:$0xff]   ;;  %s809_s9 = sadd.s32 %s3550_s8, %s4329_s7 }
  0x4e   : > { %3341 = vmatprep.subr.bf16.mxu0 %v3614_v15  ;;  %v3637_v42 = vld [vmem:[%s4034_s27 + $0xb8] sm:$0xff]   ;;  %v3652_v45 = vld [vmem:[%s4311_s1 + $0xe0] sm:$0xff]   ;;  %v3642_v47 = vld [vmem:[%s4034_s27 + $0x150] sm:$0xff]   ;;  %s2791_s14 = sshll.u32 %s809_s9, 2 }
  0x4f   : > { %v3641_v46 = vld [vmem:[%s4034_s27 + $0xc0] sm:$0xff]   ;;  %v3657_v48 = vld [vmem:[%s4311_s1 + $0x28] sm:$0xff]   ;;  %v3644_v51 = vld [vmem:[%s4034_s27 + $0x158] sm:$0xff]   ;;  %s4182_s12 = scalar_lea.vmem %s4313_s3, %s2791_s14 }
  0x50   : > { %3238 = vmatpush3.bf16.msra.mxu1 %v3613_v14  ;;  %v3658_v49 = vld [vmem:[%s4311_s1 + $0xe8] sm:$0xff]   ;;  %v3647_v52 = vld [vmem:[%s4034_s27 + $0xd0] sm:$0xff]   ;;  %v3648_v53 = vld [vmem:[%s4034_s27 + $0x160] sm:$0xff]  }
  0x51   : > { %3342 = vmatpush3.bf16.msra.mxu0 %v3614_v15  ;;  %3239 = vmatprep.subr.bf16.mxu1 %v3615_v16  ;;  %v3643_v50 = vld [vmem:[%s4034_s27 + $0xc8] sm:$0xff]   ;;  %v3663_v54 = vld [vmem:[%s4311_s1 + $0x30] sm:$0xff]   ;;  %v3649_v56 = vld [vmem:[%s4034_s27 + $0xd8] sm:$0xff]  }
  0x52   : > { %3343 = vmatprep.subr.bf16.mxu0 %v3616_v17  ;;  %v3664_v55 = vld [vmem:[%s4311_s1 + $0xf0] sm:$0xff]   ;;  %v3650_v57 = vld [vmem:[%s4034_s27 + $0x168] sm:$0xff]   ;;  %v3653_v58 = vld [vmem:[%s4034_s27 + $0xe0] sm:$0xff]  }
  0x53   : > { %v3670_v59 = vld [vmem:[%s4311_s1 + $0x38] sm:$0xff]   ;;  %v3654_v60 = vld [vmem:[%s4034_s27 + $0x170] sm:$0xff]   ;;  %v3655_v62 = vld [vmem:[%s4034_s27 + $0xe8] sm:$0xff]  }
  0x54   : > { %3240 = vmatpush3.bf16.msra.mxu1 %v3615_v16  ;;  %v3672_v61 = vld [vmem:[%s4311_s1 + $0xf8] sm:$0xff]   ;;  %v3659_v0 = vld [vmem:[%s4034_s27 + $0xf0] sm:$0xff]   ;;  %v3660_v1 = vld [vmem:[%s4034_s27 + $0x180] sm:$0xff]  }
  0x55   : > { %3344 = vmatpush3.bf16.msra.mxu0 %v3616_v17  ;;  %3241 = vmatprep.subr.bf16.mxu1 %v3617_v18  ;;  %v3656_v63 = vld [vmem:[%s4034_s27 + $0x178] sm:$0xff]   ;;  %v3662_v3 = vld [vmem:[%s4034_s27 + $0x188] sm:$0xff]   ;;  %v3665_v4 = vld [vmem:[%s4034_s27 + $0x100] sm:$0xff]  }
  0x56   : > { %3345 = vmatprep.subr.bf16.mxu0 %v3618_v19  ;;  %v3661_v2 = vld [vmem:[%s4034_s27 + $0xf8] sm:$0xff]   ;;  %v3666_v5 = vld [vmem:[%s4034_s27 + $0x190] sm:$0xff]   ;;  %v3667_v6 = vld [vmem:[%s4034_s27 + $0x108] sm:$0xff]  }
  0x57   : > { %v3668_v7 = vld [vmem:[%s4034_s27 + $0x198] sm:$0xff]   ;;  %v3669_v8 = vld [vmem:[%s4034_s27 + $0x110] sm:$0xff]   ;;  %v3671_v9 = vld [vmem:[%s4034_s27 + $0x1a0] sm:$0xff]  }
  0x58   : > { %3242 = vmatpush3.bf16.msra.mxu1 %v3617_v18  ;;  %v3673_v10 = vld [vmem:[%s4034_s27 + $0x118] sm:$0xff]   ;;  %v3674_v11 = vld [vmem:[%s4034_s27 + $0x1a8] sm:$0xff]   ;;  %v3675_v12 = vld [vmem:[%s4034_s27] sm:$0xff]  }
  0x59   : > { %3346 = vmatpush3.bf16.msra.mxu0 %v3618_v19  ;;  %3243 = vmatprep.subr.bf16.mxu1 %v3619_v22  ;;  %v3676_v13 = vld [vmem:[%s4034_s27 + $0x1b0] sm:$0xff]   ;;  %v3677_v14 = vld [vmem:[%s4034_s27 + $0x8] sm:$0xff]   ;;  %v3678_v15 = vld [vmem:[%s4034_s27 + $0x1b8] sm:$0xff]  }
  0x5a   : > { %3347 = vmatprep.subr.bf16.mxu0 %v3620_v23  ;;  %v3679_v16 = vld [vmem:[%s4034_s27 + $0x10] sm:$0xff]   ;;  %v3680_v17 = vld [vmem:[%s4034_s27 + $0x1c0] sm:$0xff]   ;;  %v3681_v18 = vld [vmem:[%s4034_s27 + $0x18] sm:$0xff]  }
  0x5b   : > { %v3682_v19 = vld [vmem:[%s4034_s27 + $0x1c8] sm:$0xff]   ;;  %v3683_v20 = vld [vmem:[%s4034_s27 + $0x20] sm:$0xff]   ;;  %v3684_v21 = vld [vmem:[%s4034_s27 + $0x1d0] sm:$0xff]  }
  0x5c   : > { %3244 = vmatpush3.bf16.msra.mxu1 %v3619_v22  ;;  %v3685_v22 = vld [vmem:[%s4034_s27 + $0x28] sm:$0xff]  }
  0x5d   : > { %3348 = vmatpush3.bf16.msra.mxu0 %v3620_v23  ;;  %3245 = vmatprep.subr.bf16.mxu1 %v3621_v24  ;;  %v3686_v23 = vld [vmem:[%s4034_s27 + $0x1d8] sm:$0xff]  }
  0x5e   : > { %3349 = vmatprep.subr.bf16.mxu0 %v3622_v25 }
  0x60   : > { %3246 = vmatpush3.bf16.msra.mxu1 %v3621_v24  ;;  %v3687_v24 = vld [vmem:[%s4034_s27 + $0x30] sm:$0xff]  }
  0x61   : > { %3350 = vmatpush3.bf16.msra.mxu0 %v3622_v25  ;;  %3283 = vmatprep.subr.bf16.mxu1 %v3626_v27  ;;  %v3688_v25 = vld [vmem:[%s4034_s27 + $0x1e0] sm:$0xff]  }
  0x62   : > { %3387 = vmatprep.subr.bf16.mxu0 %v3628_v28 }
  0x63   : > { %3248 = vmatmul.mubr.bf16.vlgmr.msra.gmra.mrb[0].mxu1 %v3625_v26  ;;  %v3689_v26 = vld [vmem:[%s4034_s27 + $0x38] sm:$0xff]  }
  0x64   : > { %3352 = vmatmul.mubr.bf16.vlgmr.msra.gmra.mrb[0].mxu0 %v3627_v29  ;;  %3284 = vmatpush3.bf16.msra.mxu1 %v3626_v27  ;;  %v3690_v27 = vld [vmem:[%s4034_s27 + $0x1e8] sm:$0xff]   ;;  %v3692_v29 = vld [vmem:[%s4034_s27 + $0x1f0] sm:$0xff]  }
  0x65   : > { %3388 = vmatpush3.bf16.msra.mxu0 %v3628_v28  ;;  %3251 = vmatprep.mubr.bf16.mxu1 %v3629_v30  ;;  %v3691_v28 = vld [vmem:[%s4034_s27 + $0x40] sm:$0xff]   ;;  %v3693_v30 = vld [vmem:[%s4034_s27 + $0x48] sm:$0xff]  }
  0x66   : > { %3355 = vmatprep.mubr.bf16.mxu0 %v3630_v31  ;;  %3285 = vmatprep.subr.bf16.mxu1 %v3633_v32  ;;  %v3694_v31 = vld [vmem:[%s4034_s27 + $0x1f8] sm:$0xff]  }
  0x67   : > { %3389 = vmatprep.subr.bf16.mxu0 %v3634_v33 }
  0x68   : > { %3286 = vmatpush3.bf16.msra.mxu1 %v3633_v32  ;;  %v3695_v32 = vld [vmem:[%s4034_s27 + $0x50] sm:$0xff]  }
  0x69   : > { %3390 = vmatpush3.bf16.msra.mxu0 %v3634_v33  ;;  %3287 = vmatprep.subr.bf16.mxu1 %v3639_v35  ;;  %v3696_v33 = vld [vmem:[%s4034_s27 + $0x200] sm:$0xff]  }
  0x6a   : > { %3391 = vmatprep.subr.bf16.mxu0 %v3640_v36 }
  0x6b   : > { %3252 = vmatmul.mubr.bf16.gmra.mrb[4].mxu1 %v3631_v34  ;;  %v3697_v34 = vld [vmem:[%s4034_s27 + $0x58] sm:$0xff]  }
  0x6c   : > { %3356 = vmatmul.mubr.bf16.gmra.mrb[4].mxu0 %v3632_v37  ;;  %3255 = vmatprep.mubr.bf16.mxu1 %v3635_v38  ;;  %v3700_v37 = vld [vmem:[%s4034_s27 + $0x210] sm:$0xff]   ;;  %v3701_v38 = vld [vmem:[%s4034_s27 + $0x68] sm:$0xff]  }
  0x6d   : > { %3359 = vmatprep.mubr.bf16.mxu0 %v3636_v39  ;;  %3288 = vmatpush3.bf16.msra.mxu1 %v3639_v35  ;;  %v3698_v35 = vld [vmem:[%s4034_s27 + $0x208] sm:$0xff]   ;;  %v3702_v39 = vld [vmem:[%s4034_s27 + $0x218] sm:$0xff]  }
  0x6e   : > { %3392 = vmatpush3.bf16.msra.mxu0 %v3640_v36  ;;  %3289 = vmatprep.subr.bf16.mxu1 %v3645_v40  ;;  %v3699_v36 = vld [vmem:[%s4034_s27 + $0x60] sm:$0xff]  }
  0x6f   : > { %3393 = vmatprep.subr.bf16.mxu0 %v3646_v41 }
  0x71   : > { %3290 = vmatpush3.bf16.msra.mxu1 %v3645_v40  ;;  %v3703_v40 = vld [vmem:[%s4034_s27 + $0x70] sm:$0xff]  }
  0x72   : > { %3394 = vmatpush3.bf16.msra.mxu0 %v3646_v41  ;;  %3291 = vmatprep.subr.bf16.mxu1 %v3651_v44  ;;  %v3704_v41 = vld [vmem:[%s4034_s27 + $0x220] sm:$0xff]  }
  0x73   : > { %3256 = vmatmul.mubr.bf16.gmra.mrb[8].mxu1 %v3637_v42  ;;  %3395 = vmatprep.subr.bf16.mxu0 %v3652_v45  ;;  %v3705_v42 = vld [vmem:[%s4034_s27 + $0x78] sm:$0xff]  }
  0x74   : > { %3360 = vmatmul.mubr.bf16.gmra.mrb[8].mxu0 %v3638_v43  ;;  %3259 = vmatprep.mubr.bf16.mxu1 %v3641_v46  ;;  %v3706_v43 = vld [vmem:[%s4034_s27 + $0x228] sm:$0xff]  }
  0x75   : > { %3363 = vmatprep.mubr.bf16.mxu0 %v3642_v47  ;;  %3292 = vmatpush3.bf16.msra.mxu1 %v3651_v44  ;;  %v3707_v44 = vld [vmem:[%s4034_s27 + $0x80] sm:$0xff]   ;;  %v3709_v46 = vld [vmem:[%s4034_s27 + $0x88] sm:$0xff]   ;;  %v3710_v47 = vld [vmem:[%s4034_s27 + $0x238] sm:$0xff]  }
  0x76   : > { %3396 = vmatpush3.bf16.msra.mxu0 %v3652_v45  ;;  %3293 = vmatprep.subr.bf16.mxu1 %v3657_v48  ;;  %v3708_v45 = vld [vmem:[%s4034_s27 + $0x230] sm:$0xff]  }
  0x77   : > { %3397 = vmatprep.subr.bf16.mxu0 %v3658_v49 }
  0x79   : > { %3294 = vmatpush3.bf16.msra.mxu1 %v3657_v48 }
  0x7a   : > { %3398 = vmatpush3.bf16.msra.mxu0 %v3658_v49  ;;  %3295 = vmatprep.subr.bf16.mxu1 %v3663_v54 }
  0x7b   : > { %3260 = vmatmul.mubr.bf16.gmra.mrb[12].mxu1 %v3643_v50  ;;  %3399 = vmatprep.subr.bf16.mxu0 %v3664_v55  ;;  %v4174_v50 = vld [vmem:[%s4312_s2] ss:$0 sm:$0xff] }
  0x7c   : > { %3364 = vmatmul.mubr.bf16.gmra.mrb[12].mxu0 %v3644_v51  ;;  %3263 = vmatprep.mubr.bf16.mxu1 %v3647_v52 }
  0x7d   : > { %3367 = vmatprep.mubr.bf16.mxu0 %v3648_v53  ;;  %3296 = vmatpush3.bf16.msra.mxu1 %v3663_v54 }
  0x7e   : > { %3400 = vmatpush3.bf16.msra.mxu0 %v3664_v55  ;;  %3297 = vmatprep.subr.bf16.mxu1 %v3670_v59 }
  0x7f   : > { %3401 = vmatprep.subr.bf16.mxu0 %v3672_v61 }
  0x81   : > { %3298 = vmatpush3.bf16.msra.mxu1 %v3670_v59 }
  0x82   : > { %3402 = vmatpush3.bf16.msra.mxu0 %v3672_v61 }
  0x83   : > { %3264 = vmatmul.mubr.bf16.gmra.mrb[16].mxu1 %v3649_v56 }
  0x84   : > { %3368 = vmatmul.mubr.bf16.gmra.mrb[16].mxu0 %v3650_v57  ;;  %3267 = vmatprep.mubr.bf16.mxu1 %v3653_v58 }
  0x85   : > { %3371 = vmatprep.mubr.bf16.mxu0 %v3654_v60 }
  0x8b   : > { %3268 = vmatmul.mubr.bf16.gmra.mrb[20].mxu1 %v3655_v62 }
  0x8c   : > { %3372 = vmatmul.mubr.bf16.gmra.mrb[20].mxu0 %v3656_v63  ;;  %3271 = vmatprep.mubr.bf16.mxu1 %v3659_v0 }
  0x8d   : > { %3375 = vmatprep.mubr.bf16.mxu0 %v3660_v1 }
  0x93   : > { %3272 = vmatmul.mubr.bf16.gmra.mrb[24].mxu1 %v3661_v2 }
  0x94   : > { %3376 = vmatmul.mubr.bf16.gmra.mrb[24].mxu0 %v3662_v3  ;;  %3275 = vmatprep.mubr.bf16.mxu1 %v3665_v4 }
  0x95   : > { %3379 = vmatprep.mubr.bf16.mxu0 %v3666_v5 }
  0x9b   : > { %3276 = vmatmul.mubr.bf16.gmra.mrb[28].mxu1 %v3667_v6 }
  0x9c   : > { %3380 = vmatmul.mubr.bf16.gmra.mrb[28].mxu0 %v3668_v7  ;;  %3279 = vmatprep.mubr.bf16.mxu1 %v3669_v8 }
  0x9d   : > { %3383 = vmatprep.mubr.bf16.mxu0 %v3671_v9 }
  0xa3   : > { %3280 = vmatmul.mubr.bf16.gmra.mrb[32].mxu1 %v3673_v10 }
  0xa4   : > { %3384 = vmatmul.mubr.bf16.gmra.mrb[32].mxu0 %v3674_v11  ;;  %3299 = vmatprep.mubr.bf16.mxu1 %v3675_v12 }
  0xa5   : > { %3403 = vmatprep.mubr.bf16.mxu0 %v3676_v13 }
  0xab   : > { %3300 = vmatmul.mubr.bf16.vlgmr.msra.gmra.mrb[0].mxu1 %v3677_v14 }
  0xac   : > { %3404 = vmatmul.mubr.bf16.vlgmr.msra.gmra.mrb[0].mxu0 %v3678_v15  ;;  %3303 = vmatprep.mubr.bf16.mxu1 %v3679_v16 }
  0xad   : > { %3407 = vmatprep.mubr.bf16.mxu0 %v3680_v17 }
  0xb3   : > { %3304 = vmatmul.mubr.bf16.gmra.mrb[4].mxu1 %v3681_v18 }
  0xb4   : > { %3408 = vmatmul.mubr.bf16.gmra.mrb[4].mxu0 %v3682_v19  ;;  %3307 = vmatprep.mubr.bf16.mxu1 %v3683_v20 }
  0xb5   : > { %3411 = vmatprep.mubr.bf16.mxu0 %v3684_v21 }
  0xbb   : > { %3308 = vmatmul.mubr.bf16.gmra.mrb[8].mxu1 %v3685_v22 }
  0xbc   : > { %3412 = vmatmul.mubr.bf16.gmra.mrb[8].mxu0 %v3686_v23  ;;  %3311 = vmatprep.mubr.bf16.mxu1 %v3687_v24 }
  0xbd   : > { %3415 = vmatprep.mubr.bf16.mxu0 %v3688_v25 }
  0xc3   : > { %3312 = vmatmul.mubr.bf16.gmra.mrb[12].mxu1 %v3689_v26 }
  0xc4   : > { %3416 = vmatmul.mubr.bf16.gmra.mrb[12].mxu0 %v3690_v27  ;;  %3315 = vmatprep.mubr.bf16.mxu1 %v3691_v28 }
  0xc5   : > { %3419 = vmatprep.mubr.bf16.mxu0 %v3692_v29 }
  0xcb   : > { %3316 = vmatmul.mubr.bf16.gmra.mrb[16].mxu1 %v3693_v30 }
  0xcc   : > { %3420 = vmatmul.mubr.bf16.gmra.mrb[16].mxu0 %v3694_v31  ;;  %3319 = vmatprep.mubr.bf16.mxu1 %v3695_v32 }
  0xcd   : > { %3423 = vmatprep.mubr.bf16.mxu0 %v3696_v33 }
  0xd3   : > { %3320 = vmatmul.mubr.bf16.gmra.mrb[20].mxu1 %v3697_v34 }
  0xd4   : > { %3424 = vmatmul.mubr.bf16.gmra.mrb[20].mxu0 %v3698_v35  ;;  %3323 = vmatprep.mubr.bf16.mxu1 %v3699_v36 }
  0xd5   : > { %3427 = vmatprep.mubr.bf16.mxu0 %v3700_v37 }
  0xdb   : > { %3324 = vmatmul.mubr.bf16.gmra.mrb[24].mxu1 %v3701_v38 }
  0xdc   : > { %3428 = vmatmul.mubr.bf16.gmra.mrb[24].mxu0 %v3702_v39  ;;  %3327 = vmatprep.mubr.bf16.mxu1 %v3703_v40 }
  0xdd   : > { %3431 = vmatprep.mubr.bf16.mxu0 %v3704_v41 }
  0xe3   : > { %3328 = vmatmul.mubr.bf16.gmra.mrb[28].mxu1 %v3705_v42 }
  0xe4   : > { %3432 = vmatmul.mubr.bf16.gmra.mrb[28].mxu0 %v3706_v43  ;;  %3331 = vmatprep.mubr.bf16.mxu1 %v3707_v44 }
  0xe5   : > { %3435 = vmatprep.mubr.bf16.mxu0 %v3708_v45 }
  0xeb   : > { %3332 = vmatmul.mubr.bf16.gmra.mrb[32].mxu1 %v3709_v46 }
  0xec   : > { %3436 = vmatmul.mubr.bf16.gmra.mrb[32].mxu0 %v3710_v47 }
 0x17e   : > { %v3301_v48 = vpop.f32.mrb[0].mxu1 }
 0x17f   : > { %v3405_v49 = vpop.f32.mrb[0].mxu0  ;;  %v1443_v51 = vpop.f32.mrb[1].mxu1 }
 0x180   : > { %v3439_v52 = vadd.f32 %v3405_v49, %v3301_v48  ;;  %v2253_v53 = vpop.f32.mrb[1].mxu0  ;;  %v3302_v54 = vpop.f32.mrb[2].mxu1 }
 0x181   : > { %v3440_v55 = vadd.f32 %v2253_v53, %v1443_v51  ;;  %v3406_v56 = vpop.f32.mrb[2].mxu0  ;;  %v1446_v57 = vpop.f32.mrb[3].mxu1 }
 0x182   : > { %v2441_v58 = vadd.f32 %v3439_v52, %v4174_v50  ;;  %v3441_v59 = vadd.f32 %v3406_v56, %v3302_v54  ;;  %v2256_v60 = vpop.f32.mrb[3].mxu0 }
 0x183   : > { %v2439_v61 = vadd.f32 %v3440_v55, %v4174_v50  ;;  %v3442_v62 = vadd.f32 %v2256_v60, %v1446_v57 }
 0x184   : > { %v2477_v63 = vmax.f32 %v2441_v58, 0.0  ;;  %v2442_v0 = vadd.f32 %v3441_v59, %v4174_v50 }
 0x185   : > { %v2475_v1 = vmax.f32 %v2439_v61, 0.0  ;;  %v2440_v2 = vadd.f32 %v3442_v62, %v4174_v50 }
 0x186   : > { %v3093_v3 = vpack.c.bf16 %v2477_v63, %v2477_v63  ;;  %v2478_v4 = vmax.f32 %v2442_v0, 0.0  ;;  %v3305_v5 = vpop.f32.mrb[4].mxu1 }
 0x187   : > { %v3091_v6 = vpack.c.bf16 %v2475_v1, %v2475_v1  ;;  %v2476_v7 = vmax.f32 %v2440_v2, 0.0  ;;  %v3409_v8 = vpop.f32.mrb[4].mxu0  ;;  %v1459_v9 = vpop.f32.mrb[5].mxu1 }
 0x188   : > { %2658 = vst.msk [vmem:[%s4182_s12 + $0x8] sm:$0xf] %vm2655_vm0, %v3093_v3  ;;  %v3094_v10 = vpack.c.bf16 %v2478_v4, %v2478_v4  ;;  %v3443_v11 = vadd.f32 %v3409_v8, %v3305_v5  ;;  %v2269_v12 = vpop.f32.mrb[5].mxu0  ;;  %v3306_v13 = vpop.f32.mrb[6].mxu1 }
 0x189   : > { %2656 = vst.msk [vmem:[%s4182_s12] sm:$0xf] %vm2655_vm0, %v3091_v6  ;;  %v3092_v14 = vpack.c.bf16 %v2476_v7, %v2476_v7  ;;  %v3444_v15 = vadd.f32 %v2269_v12, %v1459_v9  ;;  %v3410_v16 = vpop.f32.mrb[6].mxu0  ;;  %v1462_v17 = vpop.f32.mrb[7].mxu1 }
 0x18a   : > { %2659 = vst.msk [vmem:[%s4182_s12 + $0xc] sm:$0xf] %vm2655_vm0, %v3094_v10  ;;  %v2445_v18 = vadd.f32 %v3443_v11, %v4174_v50  ;;  %v3445_v19 = vadd.f32 %v3410_v16, %v3306_v13  ;;  %v2272_v20 = vpop.f32.mrb[7].mxu0 }
 0x18b   : > { %2657 = vst.msk [vmem:[%s4182_s12 + $0x4] sm:$0xf] %vm2655_vm0, %v3092_v14  ;;  %v2443_v21 = vadd.f32 %v3444_v15, %v4174_v50  ;;  %v3446_v22 = vadd.f32 %v2272_v20, %v1462_v17 }
 0x18c   : > { %v2481_v23 = vmax.f32 %v2445_v18, 0.0  ;;  %v2446_v24 = vadd.f32 %v3445_v19, %v4174_v50 }
 0x18d   : > { %v2479_v25 = vmax.f32 %v2443_v21, 0.0  ;;  %v2444_v26 = vadd.f32 %v3446_v22, %v4174_v50 }
 0x18e   : > { %v3097_v27 = vpack.c.bf16 %v2481_v23, %v2481_v23  ;;  %v2482_v28 = vmax.f32 %v2446_v24, 0.0  ;;  %v3309_v29 = vpop.f32.mrb[8].mxu1 }
 0x18f   : > { %v3095_v30 = vpack.c.bf16 %v2479_v25, %v2479_v25  ;;  %v2480_v31 = vmax.f32 %v2444_v26, 0.0  ;;  %v3413_v32 = vpop.f32.mrb[8].mxu0  ;;  %v1475_v33 = vpop.f32.mrb[9].mxu1 }
 0x190   : > { %2662 = vst.msk [vmem:[%s4182_s12 + $0x18] sm:$0xf] %vm2655_vm0, %v3097_v27  ;;  %v3098_v34 = vpack.c.bf16 %v2482_v28, %v2482_v28  ;;  %v3447_v35 = vadd.f32 %v3413_v32, %v3309_v29  ;;  %v2285_v36 = vpop.f32.mrb[9].mxu0  ;;  %v3310_v37 = vpop.f32.mrb[10].mxu1 }
 0x191   : > { %2660 = vst.msk [vmem:[%s4182_s12 + $0x10] sm:$0xf] %vm2655_vm0, %v3095_v30  ;;  %v3096_v38 = vpack.c.bf16 %v2480_v31, %v2480_v31  ;;  %v3448_v39 = vadd.f32 %v2285_v36, %v1475_v33  ;;  %v3414_v40 = vpop.f32.mrb[10].mxu0  ;;  %v1478_v41 = vpop.f32.mrb[11].mxu1 }
 0x192   : > { %2663 = vst.msk [vmem:[%s4182_s12 + $0x1c] sm:$0xf] %vm2655_vm0, %v3098_v34  ;;  %v2449_v42 = vadd.f32 %v3447_v35, %v4174_v50  ;;  %v3449_v43 = vadd.f32 %v3414_v40, %v3310_v37  ;;  %v2288_v44 = vpop.f32.mrb[11].mxu0 }
 0x193   : > { %2661 = vst.msk [vmem:[%s4182_s12 + $0x14] sm:$0xf] %vm2655_vm0, %v3096_v38  ;;  %v2447_v45 = vadd.f32 %v3448_v39, %v4174_v50  ;;  %v3450_v46 = vadd.f32 %v2288_v44, %v1478_v41 }
 0x194   : > { %v2485_v47 = vmax.f32 %v2449_v42, 0.0  ;;  %v2450_v48 = vadd.f32 %v3449_v43, %v4174_v50 }
 0x195   : > { %v2483_v49 = vmax.f32 %v2447_v45, 0.0  ;;  %v2448_v51 = vadd.f32 %v3450_v46, %v4174_v50 }
 0x196   : > { %v3101_v52 = vpack.c.bf16 %v2485_v47, %v2485_v47  ;;  %v2486_v53 = vmax.f32 %v2450_v48, 0.0  ;;  %v3313_v54 = vpop.f32.mrb[12].mxu1 }
 0x197   : > { %v3099_v55 = vpack.c.bf16 %v2483_v49, %v2483_v49  ;;  %v2484_v56 = vmax.f32 %v2448_v51, 0.0  ;;  %v3417_v57 = vpop.f32.mrb[12].mxu0  ;;  %v1491_v58 = vpop.f32.mrb[13].mxu1 }
 0x198   : > { %2666 = vst.msk [vmem:[%s4182_s12 + $0x28] sm:$0xf] %vm2655_vm0, %v3101_v52  ;;  %v3102_v59 = vpack.c.bf16 %v2486_v53, %v2486_v53  ;;  %v3451_v60 = vadd.f32 %v3417_v57, %v3313_v54  ;;  %v2301_v61 = vpop.f32.mrb[13].mxu0  ;;  %v3314_v62 = vpop.f32.mrb[14].mxu1 }
 0x199   : > { %2664 = vst.msk [vmem:[%s4182_s12 + $0x20] sm:$0xf] %vm2655_vm0, %v3099_v55  ;;  %v3100_v63 = vpack.c.bf16 %v2484_v56, %v2484_v56  ;;  %v3452_v0 = vadd.f32 %v2301_v61, %v1491_v58  ;;  %v3418_v1 = vpop.f32.mrb[14].mxu0  ;;  %v1494_v2 = vpop.f32.mrb[15].mxu1 }
 0x19a   : > { %2667 = vst.msk [vmem:[%s4182_s12 + $0x2c] sm:$0xf] %vm2655_vm0, %v3102_v59  ;;  %v2453_v3 = vadd.f32 %v3451_v60, %v4174_v50  ;;  %v3453_v4 = vadd.f32 %v3418_v1, %v3314_v62  ;;  %v2304_v5 = vpop.f32.mrb[15].mxu0 }
 0x19b   : > { %2665 = vst.msk [vmem:[%s4182_s12 + $0x24] sm:$0xf] %vm2655_vm0, %v3100_v63  ;;  %v2451_v6 = vadd.f32 %v3452_v0, %v4174_v50  ;;  %v3454_v7 = vadd.f32 %v2304_v5, %v1494_v2 }
 0x19c   : > { %v2489_v8 = vmax.f32 %v2453_v3, 0.0  ;;  %v2454_v9 = vadd.f32 %v3453_v4, %v4174_v50 }
 0x19d   : > { %v2487_v10 = vmax.f32 %v2451_v6, 0.0  ;;  %v2452_v11 = vadd.f32 %v3454_v7, %v4174_v50 }
 0x19e   : > { %v3105_v12 = vpack.c.bf16 %v2489_v8, %v2489_v8  ;;  %v2490_v13 = vmax.f32 %v2454_v9, 0.0  ;;  %v3317_v14 = vpop.f32.mrb[16].mxu1 }
 0x19f   : > { %v3103_v15 = vpack.c.bf16 %v2487_v10, %v2487_v10  ;;  %v2488_v16 = vmax.f32 %v2452_v11, 0.0  ;;  %v3421_v17 = vpop.f32.mrb[16].mxu0  ;;  %v1507_v18 = vpop.f32.mrb[17].mxu1 }
 0x1a0   : > { %2670 = vst.msk [vmem:[%s4182_s12 + $0x38] sm:$0xf] %vm2655_vm0, %v3105_v12  ;;  %v3106_v19 = vpack.c.bf16 %v2490_v13, %v2490_v13  ;;  %v3455_v20 = vadd.f32 %v3421_v17, %v3317_v14  ;;  %v2317_v21 = vpop.f32.mrb[17].mxu0  ;;  %v3318_v22 = vpop.f32.mrb[18].mxu1 }
 0x1a1   : > { %2668 = vst.msk [vmem:[%s4182_s12 + $0x30] sm:$0xf] %vm2655_vm0, %v3103_v15  ;;  %v3104_v23 = vpack.c.bf16 %v2488_v16, %v2488_v16  ;;  %v3456_v24 = vadd.f32 %v2317_v21, %v1507_v18  ;;  %v3422_v25 = vpop.f32.mrb[18].mxu0  ;;  %v1510_v26 = vpop.f32.mrb[19].mxu1 }
 0x1a2   : > { %2671 = vst.msk [vmem:[%s4182_s12 + $0x3c] sm:$0xf] %vm2655_vm0, %v3106_v19  ;;  %v2457_v27 = vadd.f32 %v3455_v20, %v4174_v50  ;;  %v3457_v28 = vadd.f32 %v3422_v25, %v3318_v22  ;;  %v2320_v29 = vpop.f32.mrb[19].mxu0 }
 0x1a3   : > { %2669 = vst.msk [vmem:[%s4182_s12 + $0x34] sm:$0xf] %vm2655_vm0, %v3104_v23  ;;  %v2455_v30 = vadd.f32 %v3456_v24, %v4174_v50  ;;  %v3458_v31 = vadd.f32 %v2320_v29, %v1510_v26 }
 0x1a4   : > { %v2493_v32 = vmax.f32 %v2457_v27, 0.0  ;;  %v2458_v33 = vadd.f32 %v3457_v28, %v4174_v50 }
 0x1a5   : > { %v2491_v34 = vmax.f32 %v2455_v30, 0.0  ;;  %v2456_v35 = vadd.f32 %v3458_v31, %v4174_v50 }
 0x1a6   : > { %v3109_v36 = vpack.c.bf16 %v2493_v32, %v2493_v32  ;;  %v2494_v37 = vmax.f32 %v2458_v33, 0.0  ;;  %v3321_v38 = vpop.f32.mrb[20].mxu1 }
 0x1a7   : > { %v3107_v39 = vpack.c.bf16 %v2491_v34, %v2491_v34  ;;  %v2492_v40 = vmax.f32 %v2456_v35, 0.0  ;;  %v3425_v41 = vpop.f32.mrb[20].mxu0  ;;  %v1523_v42 = vpop.f32.mrb[21].mxu1 }
 0x1a8   : > { %2674 = vst.msk [vmem:[%s4182_s12 + $0x48] sm:$0xf] %vm2655_vm0, %v3109_v36  ;;  %v3110_v43 = vpack.c.bf16 %v2494_v37, %v2494_v37  ;;  %v3459_v44 = vadd.f32 %v3425_v41, %v3321_v38  ;;  %v2333_v45 = vpop.f32.mrb[21].mxu0  ;;  %v3322_v46 = vpop.f32.mrb[22].mxu1 }
 0x1a9   : > { %2672 = vst.msk [vmem:[%s4182_s12 + $0x40] sm:$0xf] %vm2655_vm0, %v3107_v39  ;;  %v3108_v47 = vpack.c.bf16 %v2492_v40, %v2492_v40  ;;  %v3460_v48 = vadd.f32 %v2333_v45, %v1523_v42  ;;  %v3426_v49 = vpop.f32.mrb[22].mxu0  ;;  %v1526_v51 = vpop.f32.mrb[23].mxu1 }
 0x1aa   : > { %2675 = vst.msk [vmem:[%s4182_s12 + $0x4c] sm:$0xf] %vm2655_vm0, %v3110_v43  ;;  %v2461_v52 = vadd.f32 %v3459_v44, %v4174_v50  ;;  %v3461_v53 = vadd.f32 %v3426_v49, %v3322_v46  ;;  %v2336_v54 = vpop.f32.mrb[23].mxu0 }
 0x1ab   : > { %2673 = vst.msk [vmem:[%s4182_s12 + $0x44] sm:$0xf] %vm2655_vm0, %v3108_v47  ;;  %v2459_v55 = vadd.f32 %v3460_v48, %v4174_v50  ;;  %v3462_v56 = vadd.f32 %v2336_v54, %v1526_v51 }
 0x1ac   : > { %v2497_v57 = vmax.f32 %v2461_v52, 0.0  ;;  %v2462_v58 = vadd.f32 %v3461_v53, %v4174_v50 }
 0x1ad   : > { %v2495_v59 = vmax.f32 %v2459_v55, 0.0  ;;  %v2460_v60 = vadd.f32 %v3462_v56, %v4174_v50 }
 0x1ae   : > { %v3113_v61 = vpack.c.bf16 %v2497_v57, %v2497_v57  ;;  %v2498_v62 = vmax.f32 %v2462_v58, 0.0  ;;  %v3325_v63 = vpop.f32.mrb[24].mxu1 }
 0x1af   : > { %v3111_v0 = vpack.c.bf16 %v2495_v59, %v2495_v59  ;;  %v2496_v1 = vmax.f32 %v2460_v60, 0.0  ;;  %v3429_v2 = vpop.f32.mrb[24].mxu0  ;;  %v1539_v3 = vpop.f32.mrb[25].mxu1 }
 0x1b0   : > { %2678 = vst.msk [vmem:[%s4182_s12 + $0x58] sm:$0xf] %vm2655_vm0, %v3113_v61  ;;  %v3114_v4 = vpack.c.bf16 %v2498_v62, %v2498_v62  ;;  %v3463_v5 = vadd.f32 %v3429_v2, %v3325_v63  ;;  %v2349_v6 = vpop.f32.mrb[25].mxu0  ;;  %v3326_v7 = vpop.f32.mrb[26].mxu1 }
 0x1b1   : > { %2676 = vst.msk [vmem:[%s4182_s12 + $0x50] sm:$0xf] %vm2655_vm0, %v3111_v0  ;;  %v3112_v8 = vpack.c.bf16 %v2496_v1, %v2496_v1  ;;  %v3464_v9 = vadd.f32 %v2349_v6, %v1539_v3  ;;  %v3430_v10 = vpop.f32.mrb[26].mxu0  ;;  %v1542_v11 = vpop.f32.mrb[27].mxu1 }
 0x1b2   : > { %2679 = vst.msk [vmem:[%s4182_s12 + $0x5c] sm:$0xf] %vm2655_vm0, %v3114_v4  ;;  %v2465_v12 = vadd.f32 %v3463_v5, %v4174_v50  ;;  %v3465_v13 = vadd.f32 %v3430_v10, %v3326_v7  ;;  %v2352_v14 = vpop.f32.mrb[27].mxu0 }
 0x1b3   : > { %2677 = vst.msk [vmem:[%s4182_s12 + $0x54] sm:$0xf] %vm2655_vm0, %v3112_v8  ;;  %v2463_v15 = vadd.f32 %v3464_v9, %v4174_v50  ;;  %v3466_v16 = vadd.f32 %v2352_v14, %v1542_v11 }
 0x1b4   : > { %v2501_v17 = vmax.f32 %v2465_v12, 0.0  ;;  %v2466_v18 = vadd.f32 %v3465_v13, %v4174_v50 }
 0x1b5   : > { %v2499_v19 = vmax.f32 %v2463_v15, 0.0  ;;  %v2464_v20 = vadd.f32 %v3466_v16, %v4174_v50 }
 0x1b6   : > { %v3117_v21 = vpack.c.bf16 %v2501_v17, %v2501_v17  ;;  %v2502_v22 = vmax.f32 %v2466_v18, 0.0  ;;  %v3329_v23 = vpop.f32.mrb[28].mxu1 }
 0x1b7   : > { %v3115_v24 = vpack.c.bf16 %v2499_v19, %v2499_v19  ;;  %v2500_v25 = vmax.f32 %v2464_v20, 0.0  ;;  %v3433_v26 = vpop.f32.mrb[28].mxu0  ;;  %v1555_v27 = vpop.f32.mrb[29].mxu1 }
 0x1b8   : > { %2682 = vst.msk [vmem:[%s4182_s12 + $0x68] sm:$0xf] %vm2655_vm0, %v3117_v21  ;;  %v3118_v28 = vpack.c.bf16 %v2502_v22, %v2502_v22  ;;  %v3467_v29 = vadd.f32 %v3433_v26, %v3329_v23  ;;  %v2365_v30 = vpop.f32.mrb[29].mxu0  ;;  %v3330_v31 = vpop.f32.mrb[30].mxu1 }
 0x1b9   : > { %2680 = vst.msk [vmem:[%s4182_s12 + $0x60] sm:$0xf] %vm2655_vm0, %v3115_v24  ;;  %v3116_v32 = vpack.c.bf16 %v2500_v25, %v2500_v25  ;;  %v3468_v33 = vadd.f32 %v2365_v30, %v1555_v27  ;;  %v3434_v34 = vpop.f32.mrb[30].mxu0  ;;  %v1558_v35 = vpop.f32.mrb[31].mxu1 }
 0x1ba   : > { %2683 = vst.msk [vmem:[%s4182_s12 + $0x6c] sm:$0xf] %vm2655_vm0, %v3118_v28  ;;  %v2469_v36 = vadd.f32 %v3467_v29, %v4174_v50  ;;  %v3469_v37 = vadd.f32 %v3434_v34, %v3330_v31  ;;  %v2368_v38 = vpop.f32.mrb[31].mxu0 }
 0x1bb   : > { %2681 = vst.msk [vmem:[%s4182_s12 + $0x64] sm:$0xf] %vm2655_vm0, %v3116_v32  ;;  %v2467_v39 = vadd.f32 %v3468_v33, %v4174_v50  ;;  %v3470_v40 = vadd.f32 %v2368_v38, %v1558_v35 }
 0x1bc   : > { %v2505_v41 = vmax.f32 %v2469_v36, 0.0  ;;  %v2470_v42 = vadd.f32 %v3469_v37, %v4174_v50 }
 0x1bd   : > { %v2503_v43 = vmax.f32 %v2467_v39, 0.0  ;;  %v2468_v44 = vadd.f32 %v3470_v40, %v4174_v50 }
 0x1be   : > { %v3121_v45 = vpack.c.bf16 %v2505_v41, %v2505_v41  ;;  %v2506_v46 = vmax.f32 %v2470_v42, 0.0  ;;  %v3333_v47 = vpop.f32.mrb[32].mxu1 }
 0x1bf   : > { %v3119_v48 = vpack.c.bf16 %v2503_v43, %v2503_v43  ;;  %v2504_v49 = vmax.f32 %v2468_v44, 0.0  ;;  %v3437_v51 = vpop.f32.mrb[32].mxu0  ;;  %v1571_v52 = vpop.f32.mrb[33].mxu1 }
 0x1c0   : > { %2686 = vst.msk [vmem:[%s4182_s12 + $0x78] sm:$0xf] %vm2655_vm0, %v3121_v45  ;;  %v3122_v53 = vpack.c.bf16 %v2506_v46, %v2506_v46  ;;  %v3471_v54 = vadd.f32 %v3437_v51, %v3333_v47  ;;  %v2381_v55 = vpop.f32.mrb[33].mxu0  ;;  %v3334_v56 = vpop.f32.mrb[34].mxu1 }
 0x1c1   : > { %2684 = vst.msk [vmem:[%s4182_s12 + $0x70] sm:$0xf] %vm2655_vm0, %v3119_v48  ;;  %v3120_v57 = vpack.c.bf16 %v2504_v49, %v2504_v49  ;;  %v3472_v58 = vadd.f32 %v2381_v55, %v1571_v52  ;;  %v3438_v59 = vpop.f32.mrb[34].mxu0  ;;  %v1574_v60 = vpop.f32.mrb[35].mxu1 }
 0x1c2   : > { %2687 = vst.msk [vmem:[%s4182_s12 + $0x7c] sm:$0xf] %vm2655_vm0, %v3122_v53  ;;  %v2473_v61 = vadd.f32 %v3471_v54, %v4174_v50  ;;  %v3473_v62 = vadd.f32 %v3438_v59, %v3334_v56  ;;  %v2384_v63 = vpop.f32.mrb[35].mxu0 }
 0x1c3   : > { %2685 = vst.msk [vmem:[%s4182_s12 + $0x74] sm:$0xf] %vm2655_vm0, %v3120_v57  ;;  %v2471_v0 = vadd.f32 %v3472_v58, %v4174_v50  ;;  %v3474_v1 = vadd.f32 %v2384_v63, %v1574_v60 }
 0x1c4   : > { %v2509_v2 = vmax.f32 %v2473_v61, 0.0  ;;  %v2474_v3 = vadd.f32 %v3473_v62, %v4174_v50 }
 0x1c5   : > { %v2507_v4 = vmax.f32 %v2471_v0, 0.0  ;;  %v2472_v5 = vadd.f32 %v3474_v1, %v4174_v50 }
 0x1c6   : > { %v3125_v6 = vpack.c.bf16 %v2509_v2, %v2509_v2  ;;  %v2510_v7 = vmax.f32 %v2474_v3, 0.0 }
 0x1c7   : > { %v3123_v8 = vpack.c.bf16 %v2507_v4, %v2507_v4  ;;  %v2508_v9 = vmax.f32 %v2472_v5, 0.0 }
 0x1c8   : > { %2690 = vst.msk [vmem:[%s4182_s12 + $0x88] sm:$0xf] %vm2655_vm0, %v3125_v6  ;;  %v3126_v10 = vpack.c.bf16 %v2510_v7, %v2510_v7 }
 0x1c9   : > { %2688 = vst.msk [vmem:[%s4182_s12 + $0x80] sm:$0xf] %vm2655_vm0, %v3123_v8  ;;  %v3124_v11 = vpack.c.bf16 %v2508_v9, %v2508_v9 }
 0x1ca   : > { %2691 = vst.msk [vmem:[%s4182_s12 + $0x8c] sm:$0xf] %vm2655_vm0, %v3126_v10 }
 0x1cb   : > { %2689 = vst.msk [vmem:[%s4182_s12 + $0x84] sm:$0xf] %vm2655_vm0, %v3124_v11 }
 0x1cc PF: > { %s13_s18 = sadd.s32 1, %s3765_s18   ;;  %s4314_s12 = smov %s3745_s13 }
 0x1cd   : > { %p10_p12 = scmp.ge.s32.totalorder %s13_s18, 6   ;;  %s4315_s13 = smov %s3838_s25 }
 0x1ce   : > { %s4316_s14 = smov %s3757_s16  ;;  %s4317_s15 = smov %s3761_s17 }
 0x1cf   : > { %s4318_s16 = smov %s4321_s19  ;;  %s4319_s17 = smov %s4325_s20 }
 0x1d0   :  { %12 = sbr.rel (!%p10_p12) target bundleno = 4 (0x4), region = 114 }

// kernel: feature_extractor_conv_forward.7
= control target key start
LH: loop header
LB: loop body
LE: loop exit
PB: predicated region body
PF: predicated region fallthrough
CT: control target
= control target key end

     0   :  { %s2750_s12 = smov 0   ;;  %s2752_s13 = smov 0   ;;  %s3145_s0 = inlined_call_operand.vmem [shape: bf16[2,4,144,256], index: 0, kind: input, shape index: {}]   ;;  %s3146_s1 = inlined_call_operand.vmem [shape: bf16[4,256,128], index: 1, kind: input, shape index: {}]   ;;  %s3147_s2 = inlined_call_operand.vmem [shape: f32[1,128], index: 2, kind: input, shape index: {}]   ;;  %s3148_s3 = inlined_call_operand.vmem [shape: bf16[2,144,128], index: 3, kind: output, shape index: {}]  }
   0x1   :  { %s2754_s14 = smov 0  }
   0x2 LB: > { %s25_s15 = sadd.s32 1, %s2724_s13  ;;  %p1847_p0 = scmp.ge.s32.totalorder %s2728_s14, 1  ;;  %s2728_s14 = sphi %s2754_s14, %s13_s14   ;;  %s2724_s13 = sphi %s2752_s13, %s3150_s13   ;;  %s2720_s12 = sphi %s2750_s12, %s3149_s12  }
   0x3   : > { %p27_p1 = scmp.ge.s32.totalorder %s25_s15, 2  ;;  %p159_p2 = scmp.lt.s32.totalorder %s2728_s14, 3 }
   0x5   : > { %s3152_s15 = smov (%p27_p1, %s25_s15), 0  ;;  %p160_p3 = pnand %p1847_p0, %p159_p2 }
   0x6   : > { %v2534_v0 = vld [vmem:[%s3146_s1 + $0xc0] sm:$0xff] (!%p160_p3)   ;;  %v2538_v4 = vld [vmem:[%s3146_s1 + $0xc8] sm:$0xff] (!%p160_p3)   ;;  %v2542_v8 = vld [vmem:[%s3146_s1 + $0xd0] sm:$0xff] (!%p160_p3)   ;;  %p193_p4 = scmp.lt.s32.totalorder (!%p160_p3), %s2720_s12, 1 }
   0x7   : > { %163 = sbr.rel (%p160_p3) target bundleno = 404 (0x194), region = 32  ;;  %v2535_v1 = vld [vmem:[%s3146_s1 + $0x40] sm:$0xff] (!%p160_p3)   ;;  %2228 = vmatprep.subr.bf16.mxu0 (!%p160_p3), %v2534_v0  ;;  %v2539_v5 = vld [vmem:[%s3146_s1 + $0x48] sm:$0xff] (!%p160_p3)   ;;  %v2543_v9 = vld [vmem:[%s3146_s1 + $0x50] sm:$0xff] (!%p160_p3)  }
   0x8   : > { %v2536_v2 = vld [vmem:[%s3146_s1 + $0x80] sm:$0xff] (!%p160_p3)   ;;  %2298 = vmatprep.subr.bf16.mxu1 (!%p160_p3), %v2535_v1  ;;  %v2540_v6 = vld [vmem:[%s3146_s1 + $0x88] sm:$0xff] (!%p160_p3)   ;;  %v2544_v10 = vld [vmem:[%s3146_s1 + $0x90] sm:$0xff] (!%p160_p3)  }
   0x9   : > { %v2537_v3 = vld [vmem:[%s3146_s1] sm:$0xff] (!%p160_p3)   ;;  %2229 = vmatpush3.bf16.msra.mxu0 (!%p160_p3), %v2536_v2  ;;  %v2541_v7 = vld [vmem:[%s3146_s1 + $0x8] sm:$0xff] (!%p160_p3)   ;;  %v2545_v11 = vld [vmem:[%s3146_s1 + $0x10] sm:$0xff] (!%p160_p3)  }
   0xa   : > { %2299 = vmatpush3.bf16.msra.mxu1 (!%p160_p3), %v2537_v3  ;;  %2230 = vmatprep.subr.bf16.mxu0 (!%p160_p3), %v2538_v4  ;;  %v2546_v12 = vld [vmem:[%s3146_s1 + $0xd8] sm:$0xff] (!%p160_p3)   ;;  %v2550_v16 = vld [vmem:[%s3146_s1 + $0xe0] sm:$0xff] (!%p160_p3)   ;;  %v2554_v20 = vld [vmem:[%s3146_s1 + $0xe8] sm:$0xff] (!%p160_p3)  }
   0xb   : > { %2300 = vmatprep.subr.bf16.mxu1 (!%p160_p3), %v2539_v5  ;;  %v2547_v13 = vld [vmem:[%s3146_s1 + $0x58] sm:$0xff] (!%p160_p3)   ;;  %v2551_v17 = vld [vmem:[%s3146_s1 + $0x60] sm:$0xff] (!%p160_p3)   ;;  %v2555_v21 = vld [vmem:[%s3146_s1 + $0x68] sm:$0xff] (!%p160_p3)  }
   0xc   : > { %v2548_v14 = vld [vmem:[%s3146_s1 + $0x98] sm:$0xff] (!%p160_p3)   ;;  %v2552_v18 = vld [vmem:[%s3146_s1 + $0xa0] sm:$0xff] (!%p160_p3)   ;;  %v2556_v22 = vld [vmem:[%s3146_s1 + $0xa8] sm:$0xff] (!%p160_p3)  }
   0xd   : > { %2231 = vmatpush3.bf16.msra.mxu0 (!%p160_p3), %v2540_v6  ;;  %v2549_v15 = vld [vmem:[%s3146_s1 + $0x18] sm:$0xff] (!%p160_p3)   ;;  %v2553_v19 = vld [vmem:[%s3146_s1 + $0x20] sm:$0xff] (!%p160_p3)   ;;  %v2557_v23 = vld [vmem:[%s3146_s1 + $0x28] sm:$0xff] (!%p160_p3)  }
   0xe   : > { %2301 = vmatpush3.bf16.msra.mxu1 %v2541_v7  ;;  %2232 = vmatprep.subr.bf16.mxu0 %v2542_v8  ;;  %s3154_s12 = smov (!%p193_p4, %s2720_s12), 1  ;;  %v2558_v24 = vld [vmem:[%s3146_s1 + $0xf0] sm:$0xff]   ;;  %v2562_v28 = vld [vmem:[%s3146_s1 + $0xf8] sm:$0xff]   ;;  %v2572_v36 = vld [vmem:[%s3146_s1 + $0x140] sm:$0xff]  }
   0xf   : > { %2302 = vmatprep.subr.bf16.mxu1 %v2543_v9  ;;  %v2559_v25 = vld [vmem:[%s3146_s1 + $0x70] sm:$0xff]   ;;  %s2508_s22 = smul.u32 576, %s3154_s12  ;;  %v2563_v29 = vld [vmem:[%s3146_s1 + $0x78] sm:$0xff]   ;;  %v2573_v37 = vld [vmem:[%s3146_s1 + $0x100] sm:$0xff]  }
  0x10   : > { %v2560_v26 = vld [vmem:[%s3146_s1 + $0xb0] sm:$0xff]   ;;  %v2564_v30 = vld [vmem:[%s3146_s1 + $0xb8] sm:$0xff]   ;;  %v2574_v38 = vld [vmem:[%s3146_s1 + $0x1c0] sm:$0xff]   ;;  %s2509_s10 = smul.u32 72, %s3154_s12 }
  0x11   : > { %2233 = vmatpush3.bf16.msra.mxu0 %v2544_v10  ;;  %v2561_v27 = vld [vmem:[%s3146_s1 + $0x30] sm:$0xff]   ;;  %s2868_s6 = scalar_lea.vmem %s3145_s0, %s2508_s22  ;;  %v2565_v31 = vld [vmem:[%s3146_s1 + $0x38] sm:$0xff]   ;;  %v2575_v39 = vld [vmem:[%s3146_s1 + $0x180] sm:$0xff]  }
  0x12   : > { %2303 = vmatpush3.bf16.msra.mxu1 %v2545_v11  ;;  %2234 = vmatprep.subr.bf16.mxu0 %v2546_v12  ;;  %v2566_v32 = vld [vmem:[%s2868_s6 + $0x90] ss:$8 sps:$4 sm:$0xff]   ;;  %v2568_v33 = vld [vmem:[%s2868_s6 + $0x94] ss:$8 sps:$4 sm:$0xff]   ;;  %v2569_v34 = vld [vmem:[%s2868_s6] ss:$8 sps:$4 sm:$0xff]   ;;  %s3094_s12 = scalar_lea.vmem %s3148_s3, %s2509_s10 }
  0x13   : > { %2304 = vmatprep.subr.bf16.mxu1 %v2547_v13  ;;  %v2571_v35 = vld [vmem:[%s2868_s6 + $0x4] ss:$8 sps:$4 sm:$0xff]   ;;  %534 = vmatprep.mubr.bf16.mxu0 %v2568_v33  ;;  %v2578_v41 = vld [vmem:[%s2868_s6 + $0x14] ss:$8 sps:$4 sm:$0xff]   ;;  %v2580_v42 = vld [vmem:[%s2868_s6 + $0xa0] ss:$8 sps:$4 sm:$0xff]  }
  0x14   : > { %825 = vmatprep.mubr.bf16.mxu1 %v2571_v35  ;;  %v2576_v40 = vld [vmem:[%s2868_s6 + $0xa4] ss:$8 sps:$4 sm:$0xff]   ;;  %v2581_v43 = vld [vmem:[%s2868_s6 + $0x10] ss:$8 sps:$4 sm:$0xff]   ;;  %v2586_v48 = vld [vmem:[%s2868_s6 + $0xb4] ss:$8 sps:$4 sm:$0xff]  }
  0x15   : > { %2235 = vmatpush3.bf16.msra.mxu0 %v2548_v14  ;;  %v2582_v44 = vld [vmem:[%s3146_s1 + $0x148] sm:$0xff]   ;;  %v2590_v50 = vld [vmem:[%s2868_s6 + $0xb0] ss:$8 sps:$4 sm:$0xff]   ;;  %v2598_v57 = vld [vmem:[%s2868_s6 + $0x34] ss:$8 sps:$4 sm:$0xff]  }
  0x16   : > { %2305 = vmatpush3.bf16.msra.mxu1 %v2549_v15  ;;  %2236 = vmatprep.subr.bf16.mxu0 %v2550_v16  ;;  %v2583_v45 = vld [vmem:[%s3146_s1 + $0x108] sm:$0xff]   ;;  %v2592_v52 = vld [vmem:[%s3146_s1 + $0x150] sm:$0xff]   ;;  %v2602_v60 = vld [vmem:[%s3146_s1 + $0x158] sm:$0xff]  }
  0x17   : > { %2306 = vmatprep.subr.bf16.mxu1 %v2551_v17  ;;  %v2584_v46 = vld [vmem:[%s3146_s1 + $0x1c8] sm:$0xff]   ;;  %v2593_v53 = vld [vmem:[%s3146_s1 + $0x110] sm:$0xff]   ;;  %v2603_v61 = vld [vmem:[%s3146_s1 + $0x118] sm:$0xff]  }
  0x18   : > { %v2585_v47 = vld [vmem:[%s3146_s1 + $0x188] sm:$0xff]   ;;  %v2594_v54 = vld [vmem:[%s3146_s1 + $0x1d0] sm:$0xff]   ;;  %v2604_v62 = vld [vmem:[%s3146_s1 + $0x1d8] sm:$0xff]  }
  0x19   : > { %2237 = vmatpush3.bf16.msra.mxu0 %v2552_v18  ;;  %v2588_v49 = vld [vmem:[%s2868_s6 + $0x24] ss:$8 sps:$4 sm:$0xff]   ;;  %v2591_v51 = vld [vmem:[%s2868_s6 + $0x20] ss:$8 sps:$4 sm:$0xff]   ;;  %v2595_v55 = vld [vmem:[%s3146_s1 + $0x190] sm:$0xff]  }
  0x1a   : > { %2307 = vmatpush3.bf16.msra.mxu1 %v2553_v19  ;;  %2238 = vmatprep.subr.bf16.mxu0 %v2554_v20  ;;  %v2596_v56 = vld [vmem:[%s2868_s6 + $0xc4] ss:$8 sps:$4 sm:$0xff]   ;;  %v2600_v58 = vld [vmem:[%s2868_s6 + $0xc0] ss:$8 sps:$4 sm:$0xff]   ;;  %v2601_v59 = vld [vmem:[%s2868_s6 + $0x30] ss:$8 sps:$4 sm:$0xff]  }
  0x1b   : > { %2308 = vmatprep.subr.bf16.mxu1 %v2555_v21  ;;  %v2605_v63 = vld [vmem:[%s3146_s1 + $0x198] sm:$0xff]   ;;  %v2608_v1 = vld [vmem:[%s2868_s6 + $0x44] ss:$8 sps:$4 sm:$0xff]   ;;  %v2611_v4 = vld [vmem:[%s2868_s6 + $0x40] ss:$8 sps:$4 sm:$0xff]  }
  0x1c   : > { %v2606_v0 = vld [vmem:[%s2868_s6 + $0xd4] ss:$8 sps:$4 sm:$0xff]   ;;  %v2610_v2 = vld [vmem:[%s2868_s6 + $0xd0] ss:$8 sps:$4 sm:$0xff]   ;;  %v2612_v3 = vld [vmem:[%s3146_s1 + $0x160] sm:$0xff]  }
  0x1d   : > { %2239 = vmatpush3.bf16.msra.mxu0 %v2556_v22  ;;  %v2613_v5 = vld [vmem:[%s3146_s1 + $0x120] sm:$0xff]   ;;  %v2617_v8 = vld [vmem:[%s2868_s6 + $0x54] ss:$8 sps:$4 sm:$0xff]   ;;  %v2622_v10 = vld [vmem:[%s3146_s1 + $0x168] sm:$0xff]  }
  0x1e   : > { %2309 = vmatpush3.bf16.msra.mxu1 %v2557_v23  ;;  %2240 = vmatprep.subr.bf16.mxu0 %v2558_v24  ;;  %v2614_v6 = vld [vmem:[%s3146_s1 + $0x1e0] sm:$0xff]   ;;  %v2623_v11 = vld [vmem:[%s3146_s1 + $0x128] sm:$0xff]   ;;  %v2621_v13 = vld [vmem:[%s2868_s6 + $0x50] ss:$8 sps:$4 sm:$0xff]  }
  0x1f   : > { %2310 = vmatprep.subr.bf16.mxu1 %v2559_v25  ;;  %v2615_v7 = vld [vmem:[%s2868_s6 + $0xe4] ss:$8 sps:$4 sm:$0xff]   ;;  %v2620_v12 = vld [vmem:[%s2868_s6 + $0xe0] ss:$8 sps:$4 sm:$0xff]   ;;  %v2624_v15 = vld [vmem:[%s2868_s6 + $0xf4] ss:$8 sps:$4 sm:$0xff]  }
  0x20   : > { %v2619_v9 = vld [vmem:[%s3146_s1 + $0x1a0] sm:$0xff]   ;;  %v2628_v14 = vld [vmem:[%s3146_s1 + $0x1e8] sm:$0xff]   ;;  %v2632_v18 = vld [vmem:[%s3146_s1 + $0x170] sm:$0xff]  }
  0x21   : > { %2241 = vmatpush3.bf16.msra.mxu0 %v2560_v26  ;;  %v2626_v16 = vld [vmem:[%s2868_s6 + $0x64] ss:$8 sps:$4 sm:$0xff]   ;;  %v2629_v19 = vld [vmem:[%s2868_s6 + $0xf0] ss:$8 sps:$4 sm:$0xff]   ;;  %v2630_v21 = vld [vmem:[%s2868_s6 + $0x60] ss:$8 sps:$4 sm:$0xff]  }
  0x22   : > { %2311 = vmatpush3.bf16.msra.mxu1 %v2561_v27  ;;  %2242 = vmatprep.subr.bf16.mxu0 %v2562_v28  ;;  %v2631_v17 = vld [vmem:[%s3146_s1 + $0x1a8] sm:$0xff]   ;;  %v2637_v20 = vld [vmem:[%s3146_s1 + $0x130] sm:$0xff]   ;;  %v2646_v26 = vld [vmem:[%s3146_s1 + $0x178] sm:$0xff]  }
  0x23   : > { %2312 = vmatprep.subr.bf16.mxu1 %v2563_v29  ;;  %v2633_v22 = vld [vmem:[%s2868_s6 + $0x104] ss:$8 sps:$4 sm:$0xff]   ;;  %v2640_v23 = vld [vmem:[%s3146_s1 + $0x1f0] sm:$0xff]   ;;  %v2649_v27 = vld [vmem:[%s3146_s1 + $0x138] sm:$0xff]  }
  0x24   : > { %v2641_v24 = vld [vmem:[%s3146_s1 + $0x1b0] sm:$0xff]   ;;  %v2638_v28 = vld [vmem:[%s2868_s6 + $0x100] ss:$8 sps:$4 sm:$0xff]   ;;  %v2650_v29 = vld [vmem:[%s3146_s1 + $0x1f8] sm:$0xff]  }
  0x25   : > { %2243 = vmatpush3.bf16.msra.mxu0 %v2564_v30  ;;  %v2635_v25 = vld [vmem:[%s2868_s6 + $0x74] ss:$8 sps:$4 sm:$0xff]   ;;  %v2644_v33 = vld [vmem:[%s2868_s6 + $0x84] ss:$8 sps:$4 sm:$0xff]   ;;  %v2648_v35 = vld [vmem:[%s2868_s6 + $0x80] ss:$8 sps:$4 sm:$0xff]  }
  0x26   : > { %2313 = vmatpush3.bf16.msra.mxu1 %v2565_v31  ;;  %2368 = vmatprep.subr.bf16.mxu0 %v2572_v36  ;;  %v2651_v30 = vld [vmem:[%s3146_s1 + $0x1b8] sm:$0xff]   ;;  %v2654_v36 = vld [vmem:[%s2868_s6 + $0x124] ss:$8 sps:$4 sm:$0xff]  }
  0x27   : > { %2438 = vmatprep.subr.bf16.mxu1 %v2574_v38  ;;  %v2639_v31 = vld [vmem:[%s2868_s6 + $0x70] ss:$8 sps:$4 sm:$0xff]   ;;  %v2652_v38 = vld [vmem:[%s2868_s6 + $0x120] ss:$8 sps:$4 sm:$0xff]  }
  0x28   : > { %535 = vmatmul.mubr.bf16.vlgmr.msra.gmra.mrb[0].mxu0 %v2566_v32  ;;  %v2642_v32 = vld [vmem:[%s2868_s6 + $0x114] ss:$8 sps:$4 sm:$0xff]  }
  0x29   : > { %826 = vmatmul.mubr.bf16.vlgmr.msra.gmra.mrb[0].mxu1 %v2569_v34  ;;  %2369 = vmatpush3.bf16.msra.mxu0 %v2573_v37  ;;  %v2647_v34 = vld [vmem:[%s2868_s6 + $0x110] ss:$8 sps:$4 sm:$0xff]   ;;  %v2657_v37 = vld [vmem:[%s2868_s6 + $0x1b4] ss:$8 sps:$4 sm:$0xff]  }
  0x2a   : > { %2439 = vmatpush3.bf16.msra.mxu1 %v2575_v39  ;;  %542 = vmatprep.mubr.bf16.mxu0 %v2576_v40  ;;  %v2655_v39 = vld [vmem:[%s2868_s6 + $0x1b0] ss:$8 sps:$4 sm:$0xff]   ;;  %v2658_v40 = vld [vmem:[%s2868_s6 + $0x134] ss:$8 sps:$4 sm:$0xff]  }
  0x2b   : > { %833 = vmatprep.mubr.bf16.mxu1 %v2578_v41  ;;  %2370 = vmatprep.subr.bf16.mxu0 %v2582_v44  ;;  %v2660_v41 = vld [vmem:[%s2868_s6 + $0x1c4] ss:$8 sps:$4 sm:$0xff]  }
  0x2c   : > { %2440 = vmatprep.subr.bf16.mxu1 %v2584_v46  ;;  %v2664_v44 = vld [vmem:[%s2868_s6 + $0x144] ss:$8 sps:$4 sm:$0xff]   ;;  %v2668_v46 = vld [vmem:[%s2868_s6 + $0x140] ss:$8 sps:$4 sm:$0xff]  }
  0x2d   : > { %2371 = vmatpush3.bf16.msra.mxu0 %v2583_v45  ;;  %v2666_v45 = vld [vmem:[%s2868_s6 + $0x1d4] ss:$8 sps:$4 sm:$0xff]  }
  0x2e   : > { %2441 = vmatpush3.bf16.msra.mxu1 %v2585_v47  ;;  %2372 = vmatprep.subr.bf16.mxu0 %v2592_v52  ;;  %v2669_v47 = vld [vmem:[%s2868_s6 + $0x1d0] ss:$8 sps:$4 sm:$0xff]   ;;  %v2676_v52 = vld [vmem:[%s2868_s6 + $0x164] ss:$8 sps:$4 sm:$0xff]  }
  0x2f   : > { %2442 = vmatprep.subr.bf16.mxu1 %v2594_v54  ;;  %v2680_v54 = vld [vmem:[%s2868_s6 + $0x160] ss:$8 sps:$4 sm:$0xff]  }
  0x30   : > { %543 = vmatmul.mubr.bf16.gmra.mrb[4].mxu0 %v2580_v42  ;;  %v2662_v42 = vld [vmem:[%s2868_s6 + $0x130] ss:$8 sps:$4 sm:$0xff]  }
  0x31   : > { %834 = vmatmul.mubr.bf16.gmra.mrb[4].mxu1 %v2581_v43  ;;  %550 = vmatprep.mubr.bf16.mxu0 %v2586_v48  ;;  %v2663_v43 = vld [vmem:[%s2868_s6 + $0x1c0] ss:$8 sps:$4 sm:$0xff]   ;;  %v2670_v48 = vld [vmem:[%s2868_s6 + $0x154] ss:$8 sps:$4 sm:$0xff]  }
  0x32   : > { %841 = vmatprep.mubr.bf16.mxu1 %v2588_v49  ;;  %2373 = vmatpush3.bf16.msra.mxu0 %v2593_v53  ;;  %v2672_v49 = vld [vmem:[%s2868_s6 + $0x1e4] ss:$8 sps:$4 sm:$0xff]   ;;  %v2678_v53 = vld [vmem:[%s2868_s6 + $0x1f4] ss:$8 sps:$4 sm:$0xff]  }
  0x33   : > { %2443 = vmatpush3.bf16.msra.mxu1 %v2595_v55  ;;  %2374 = vmatprep.subr.bf16.mxu0 %v2602_v60  ;;  %v2681_v55 = vld [vmem:[%s2868_s6 + $0x1f0] ss:$8 sps:$4 sm:$0xff]   ;;  %v2688_v60 = vld [vmem:[%s2868_s6 + $0x184] ss:$8 sps:$4 sm:$0xff]  }
  0x34   : > { %2444 = vmatprep.subr.bf16.mxu1 %v2604_v62  ;;  %v2692_v62 = vld [vmem:[%s2868_s6 + $0x180] ss:$8 sps:$4 sm:$0xff]  }
  0x36   : > { %2375 = vmatpush3.bf16.msra.mxu0 %v2603_v61  ;;  %v2690_v61 = vld [vmem:[%s2868_s6 + $0x214] ss:$8 sps:$4 sm:$0xff]  }
  0x37   : > { %2445 = vmatpush3.bf16.msra.mxu1 %v2605_v63  ;;  %2376 = vmatprep.subr.bf16.mxu0 %v2612_v3  ;;  %v2693_v63 = vld [vmem:[%s2868_s6 + $0x210] ss:$8 sps:$4 sm:$0xff]   ;;  %v2699_v3 = vld [vmem:[%s2868_s6 + $0x220] ss:$8 sps:$4 sm:$0xff]  }
  0x38   : > { %551 = vmatmul.mubr.bf16.gmra.mrb[8].mxu0 %v2590_v50  ;;  %2446 = vmatprep.subr.bf16.mxu1 %v2614_v6  ;;  %v2674_v50 = vld [vmem:[%s2868_s6 + $0x150] ss:$8 sps:$4 sm:$0xff]   ;;  %v2704_v6 = vld [vmem:[%s2868_s6 + $0x1a0] ss:$8 sps:$4 sm:$0xff]  }
  0x39   : > { %842 = vmatmul.mubr.bf16.gmra.mrb[8].mxu1 %v2591_v51  ;;  %558 = vmatprep.mubr.bf16.mxu0 %v2596_v56  ;;  %v2675_v51 = vld [vmem:[%s2868_s6 + $0x1e0] ss:$8 sps:$4 sm:$0xff]   ;;  %v2682_v56 = vld [vmem:[%s2868_s6 + $0x174] ss:$8 sps:$4 sm:$0xff]  }
  0x3a   : > { %849 = vmatprep.mubr.bf16.mxu1 %v2598_v57  ;;  %2377 = vmatpush3.bf16.msra.mxu0 %v2613_v5  ;;  %v2684_v57 = vld [vmem:[%s2868_s6 + $0x204] ss:$8 sps:$4 sm:$0xff]   ;;  %v2702_v5 = vld [vmem:[%s2868_s6 + $0x234] ss:$8 sps:$4 sm:$0xff]  }
  0x3b   : > { %2447 = vmatpush3.bf16.msra.mxu1 %v2619_v9  ;;  %2378 = vmatprep.subr.bf16.mxu0 %v2622_v10 }
  0x3c   : > { %2448 = vmatprep.subr.bf16.mxu1 %v2628_v14 }
  0x3e   : > { %2379 = vmatpush3.bf16.msra.mxu0 %v2623_v11 }
  0x3f   : > { %2449 = vmatpush3.bf16.msra.mxu1 %v2631_v17  ;;  %2380 = vmatprep.subr.bf16.mxu0 %v2632_v18 }
  0x40   : > { %559 = vmatmul.mubr.bf16.gmra.mrb[12].mxu0 %v2600_v58  ;;  %2450 = vmatprep.subr.bf16.mxu1 %v2640_v23  ;;  %v2686_v58 = vld [vmem:[%s2868_s6 + $0x170] ss:$8 sps:$4 sm:$0xff]  }
  0x41   : > { %850 = vmatmul.mubr.bf16.gmra.mrb[12].mxu1 %v2601_v59  ;;  %566 = vmatprep.mubr.bf16.mxu0 %v2606_v0  ;;  %v2687_v59 = vld [vmem:[%s2868_s6 + $0x200] ss:$8 sps:$4 sm:$0xff]   ;;  %v2694_v0 = vld [vmem:[%s2868_s6 + $0x194] ss:$8 sps:$4 sm:$0xff]  }
  0x42   : > { %857 = vmatprep.mubr.bf16.mxu1 %v2608_v1  ;;  %2381 = vmatpush3.bf16.msra.mxu0 %v2637_v20  ;;  %v2696_v1 = vld [vmem:[%s2868_s6 + $0x224] ss:$8 sps:$4 sm:$0xff]  }
  0x43   : > { %2451 = vmatpush3.bf16.msra.mxu1 %v2641_v24  ;;  %2382 = vmatprep.subr.bf16.mxu0 %v2646_v26 }
  0x44   : > { %2452 = vmatprep.subr.bf16.mxu1 %v2650_v29 }
  0x46   : > { %2383 = vmatpush3.bf16.msra.mxu0 %v2649_v27 }
  0x47   : > { %2453 = vmatpush3.bf16.msra.mxu1 %v2651_v30 }
  0x48   : > { %567 = vmatmul.mubr.bf16.gmra.mrb[16].mxu0 %v2610_v2  ;;  %v2698_v2 = vld [vmem:[%s2868_s6 + $0x190] ss:$8 sps:$4 sm:$0xff]  }
  0x49   : > { %858 = vmatmul.mubr.bf16.gmra.mrb[16].mxu1 %v2611_v4  ;;  %574 = vmatprep.mubr.bf16.mxu0 %v2615_v7  ;;  %v2700_v4 = vld [vmem:[%s2868_s6 + $0x1a4] ss:$8 sps:$4 sm:$0xff]   ;;  %v2705_v7 = vld [vmem:[%s2868_s6 + $0x230] ss:$8 sps:$4 sm:$0xff]  }
  0x4a   : > { %865 = vmatprep.mubr.bf16.mxu1 %v2617_v8 }
  0x50   : > { %575 = vmatmul.mubr.bf16.gmra.mrb[20].mxu0 %v2620_v12 }
  0x51   : > { %866 = vmatmul.mubr.bf16.gmra.mrb[20].mxu1 %v2621_v13  ;;  %582 = vmatprep.mubr.bf16.mxu0 %v2624_v15 }
  0x52   : > { %873 = vmatprep.mubr.bf16.mxu1 %v2626_v16 }
  0x58   : > { %583 = vmatmul.mubr.bf16.gmra.mrb[24].mxu0 %v2629_v19 }
  0x59   : > { %874 = vmatmul.mubr.bf16.gmra.mrb[24].mxu1 %v2630_v21  ;;  %590 = vmatprep.mubr.bf16.mxu0 %v2633_v22 }
  0x5a   : > { %881 = vmatprep.mubr.bf16.mxu1 %v2635_v25 }
  0x60   : > { %591 = vmatmul.mubr.bf16.gmra.mrb[28].mxu0 %v2638_v28 }
  0x61   : > { %882 = vmatmul.mubr.bf16.gmra.mrb[28].mxu1 %v2639_v31  ;;  %598 = vmatprep.mubr.bf16.mxu0 %v2642_v32 }
  0x62   : > { %889 = vmatprep.mubr.bf16.mxu1 %v2644_v33 }
  0x68   : > { %599 = vmatmul.mubr.bf16.gmra.mrb[32].mxu0 %v2647_v34 }
  0x69   : > { %890 = vmatmul.mubr.bf16.gmra.mrb[32].mxu1 %v2648_v35  ;;  %1168 = vmatprep.mubr.bf16.mxu0 %v2654_v36 }
  0x6a   : > { %1529 = vmatprep.mubr.bf16.mxu1 %v2657_v37 }
  0x70   : > { %1169 = vmatmul.mubr.bf16.vlgmr.msra.gmra.mrb[36].mxu0 %v2652_v38 }
  0x71   : > { %1530 = vmatmul.mubr.bf16.vlgmr.msra.gmra.mrb[36].mxu1 %v2655_v39  ;;  %1176 = vmatprep.mubr.bf16.mxu0 %v2658_v40 }
  0x72   : > { %1537 = vmatprep.mubr.bf16.mxu1 %v2660_v41 }
  0x78   : > { %1177 = vmatmul.mubr.bf16.gmra.mrb[40].mxu0 %v2662_v42 }
  0x79   : > { %1538 = vmatmul.mubr.bf16.gmra.mrb[40].mxu1 %v2663_v43  ;;  %1184 = vmatprep.mubr.bf16.mxu0 %v2664_v44 }
  0x7a   : > { %1545 = vmatprep.mubr.bf16.mxu1 %v2666_v45 }
  0x80   : > { %1185 = vmatmul.mubr.bf16.gmra.mrb[44].mxu0 %v2668_v46 }
  0x81   : > { %1546 = vmatmul.mubr.bf16.gmra.mrb[44].mxu1 %v2669_v47  ;;  %1192 = vmatprep.mubr.bf16.mxu0 %v2670_v48 }
  0x82   : > { %1553 = vmatprep.mubr.bf16.mxu1 %v2672_v49 }
  0x88   : > { %1193 = vmatmul.mubr.bf16.gmra.mrb[48].mxu0 %v2674_v50 }
  0x89   : > { %1554 = vmatmul.mubr.bf16.gmra.mrb[48].mxu1 %v2675_v51  ;;  %1200 = vmatprep.mubr.bf16.mxu0 %v2676_v52 }
  0x8a   : > { %1561 = vmatprep.mubr.bf16.mxu1 %v2678_v53 }
  0x90   : > { %1201 = vmatmul.mubr.bf16.gmra.mrb[52].mxu0 %v2680_v54 }
  0x91   : > { %1562 = vmatmul.mubr.bf16.gmra.mrb[52].mxu1 %v2681_v55  ;;  %1208 = vmatprep.mubr.bf16.mxu0 %v2682_v56 }
  0x92   : > { %1569 = vmatprep.mubr.bf16.mxu1 %v2684_v57 }
  0x98   : > { %1209 = vmatmul.mubr.bf16.gmra.mrb[56].mxu0 %v2686_v58 }
  0x99   : > { %1570 = vmatmul.mubr.bf16.gmra.mrb[56].mxu1 %v2687_v59  ;;  %1216 = vmatprep.mubr.bf16.mxu0 %v2688_v60 }
  0x9a   : > { %1577 = vmatprep.mubr.bf16.mxu1 %v2690_v61 }
  0xa0   : > { %1217 = vmatmul.mubr.bf16.gmra.mrb[60].mxu0 %v2692_v62 }
  0xa1   : > { %1578 = vmatmul.mubr.bf16.gmra.mrb[60].mxu1 %v2693_v63  ;;  %1224 = vmatprep.mubr.bf16.mxu0 %v2694_v0 }
  0xa2   : > { %1585 = vmatprep.mubr.bf16.mxu1 %v2696_v1 }
  0xa8   : > { %1225 = vmatmul.mubr.bf16.gmra.mrb[64].mxu0 %v2698_v2 }
  0xa9   : > { %1586 = vmatmul.mubr.bf16.gmra.mrb[64].mxu1 %v2699_v3  ;;  %1232 = vmatprep.mubr.bf16.mxu0 %v2700_v4 }
  0xaa   : > { %1593 = vmatprep.mubr.bf16.mxu1 %v2702_v5 }
  0xb0   : > { %1233 = vmatmul.mubr.bf16.gmra.mrb[68].mxu0 %v2704_v6 }
  0xb1   : > { %1594 = vmatmul.mubr.bf16.gmra.mrb[68].mxu1 %v2705_v7 }
  0xfb   : > { %v2244_v8 = vpop.f32.mrb[0].mxu0 }
  0xfc   : > { %v2314_v9 = vpop.f32.mrb[0].mxu1  ;;  %v2245_v10 = vpop.f32.mrb[1].mxu0 }
  0xfd   : > { %v2246_v11 = vadd.f32 %v2245_v10, %v2244_v8  ;;  %v2315_v12 = vpop.f32.mrb[1].mxu1  ;;  %v2247_v13 = vpop.f32.mrb[2].mxu0 }
  0xfe   : > { %v2316_v14 = vadd.f32 %v2315_v12, %v2314_v9  ;;  %v2317_v15 = vpop.f32.mrb[2].mxu1  ;;  %v2248_v16 = vpop.f32.mrb[3].mxu0 }
  0xff   : > { %v2249_v17 = vadd.f32 %v2248_v16, %v2247_v13  ;;  %v2318_v18 = vpop.f32.mrb[3].mxu1 }
 0x100   : > { %v3044_v19 = vadd.f32 %v2316_v14, %v2246_v11  ;;  %v2319_v20 = vadd.f32 %v2318_v18, %v2317_v15 }
 0x102   : > { %v3046_v21 = vadd.f32 %v2319_v20, %v2249_v17 }
 0x103   : > { %v2250_v22 = vpop.f32.mrb[4].mxu0 }
 0x104   : > { %v2320_v23 = vpop.f32.mrb[4].mxu1  ;;  %v2251_v24 = vpop.f32.mrb[5].mxu0 }
 0x105   : > { %v2252_v25 = vadd.f32 %v2251_v24, %v2250_v22  ;;  %v2321_v26 = vpop.f32.mrb[5].mxu1  ;;  %v2253_v27 = vpop.f32.mrb[6].mxu0 }
 0x106   : > { %v2322_v28 = vadd.f32 %v2321_v26, %v2320_v23  ;;  %v2323_v29 = vpop.f32.mrb[6].mxu1  ;;  %v2254_v30 = vpop.f32.mrb[7].mxu0 }
 0x107   : > { %v2255_v31 = vadd.f32 %v2254_v30, %v2253_v27  ;;  %v2324_v32 = vpop.f32.mrb[7].mxu1 }
 0x108   : > { %v3048_v33 = vadd.f32 %v2322_v28, %v2252_v25  ;;  %v2325_v34 = vadd.f32 %v2324_v32, %v2323_v29 }
 0x10a   : > { %v3050_v35 = vadd.f32 %v2325_v34, %v2255_v31 }
 0x10b   : > { %v2256_v36 = vpop.f32.mrb[8].mxu0 }
 0x10c   : > { %v2326_v37 = vpop.f32.mrb[8].mxu1  ;;  %v2257_v38 = vpop.f32.mrb[9].mxu0 }
 0x10d   : > { %v2258_v39 = vadd.f32 %v2257_v38, %v2256_v36  ;;  %v2327_v40 = vpop.f32.mrb[9].mxu1  ;;  %v2259_v41 = vpop.f32.mrb[10].mxu0 }
 0x10e   : > { %v2328_v42 = vadd.f32 %v2327_v40, %v2326_v37  ;;  %v2329_v43 = vpop.f32.mrb[10].mxu1  ;;  %v2260_v44 = vpop.f32.mrb[11].mxu0 }
 0x10f   : > { %v2261_v45 = vadd.f32 %v2260_v44, %v2259_v41  ;;  %v2330_v46 = vpop.f32.mrb[11].mxu1 }
 0x110   : > { %v3052_v47 = vadd.f32 %v2328_v42, %v2258_v39  ;;  %v2331_v48 = vadd.f32 %v2330_v46, %v2329_v43 }
 0x112   : > { %v3054_v49 = vadd.f32 %v2331_v48, %v2261_v45 }
 0x113   : > { %v2262_v50 = vpop.f32.mrb[12].mxu0 }
 0x114   : > { %v2332_v51 = vpop.f32.mrb[12].mxu1  ;;  %v2263_v52 = vpop.f32.mrb[13].mxu0 }
 0x115   : > { %v2264_v53 = vadd.f32 %v2263_v52, %v2262_v50  ;;  %v2333_v54 = vpop.f32.mrb[13].mxu1  ;;  %v2265_v55 = vpop.f32.mrb[14].mxu0 }
 0x116   : > { %v2334_v56 = vadd.f32 %v2333_v54, %v2332_v51  ;;  %v2335_v57 = vpop.f32.mrb[14].mxu1  ;;  %v2266_v58 = vpop.f32.mrb[15].mxu0 }
 0x117   : > { %v2267_v59 = vadd.f32 %v2266_v58, %v2265_v55  ;;  %v2336_v60 = vpop.f32.mrb[15].mxu1 }
 0x118   : > { %v3056_v61 = vadd.f32 %v2334_v56, %v2264_v53  ;;  %v2337_v62 = vadd.f32 %v2336_v60, %v2335_v57 }
 0x11a   : > { %v3058_v63 = vadd.f32 %v2337_v62, %v2267_v59 }
 0x11b   : > { %v2268_v0 = vpop.f32.mrb[16].mxu0 }
 0x11c   : > { %v2338_v1 = vpop.f32.mrb[16].mxu1  ;;  %v2269_v2 = vpop.f32.mrb[17].mxu0 }
 0x11d   : > { %v2270_v3 = vadd.f32 %v2269_v2, %v2268_v0  ;;  %v2339_v4 = vpop.f32.mrb[17].mxu1  ;;  %v2271_v5 = vpop.f32.mrb[18].mxu0 }
 0x11e   : > { %v2340_v6 = vadd.f32 %v2339_v4, %v2338_v1  ;;  %v2341_v7 = vpop.f32.mrb[18].mxu1  ;;  %v2272_v8 = vpop.f32.mrb[19].mxu0 }
 0x11f   : > { %v2273_v9 = vadd.f32 %v2272_v8, %v2271_v5  ;;  %v2342_v10 = vpop.f32.mrb[19].mxu1 }
 0x120   : > { %v3060_v11 = vadd.f32 %v2340_v6, %v2270_v3  ;;  %v2343_v12 = vadd.f32 %v2342_v10, %v2341_v7 }
 0x122   : > { %v3062_v13 = vadd.f32 %v2343_v12, %v2273_v9 }
 0x123   : > { %v2274_v14 = vpop.f32.mrb[20].mxu0 }
 0x124   : > { %v2344_v15 = vpop.f32.mrb[20].mxu1  ;;  %v2275_v16 = vpop.f32.mrb[21].mxu0 }
 0x125   : > { %v2276_v17 = vadd.f32 %v2275_v16, %v2274_v14  ;;  %v2345_v18 = vpop.f32.mrb[21].mxu1  ;;  %v2277_v20 = vpop.f32.mrb[22].mxu0 }
 0x126   : > { %v2346_v22 = vadd.f32 %v2345_v18, %v2344_v15  ;;  %v2347_v23 = vpop.f32.mrb[22].mxu1  ;;  %v2278_v24 = vpop.f32.mrb[23].mxu0 }
 0x127   : > { %v2279_v25 = vadd.f32 %v2278_v24, %v2277_v20  ;;  %v2348_v26 = vpop.f32.mrb[23].mxu1 }
 0x128   : > { %v3064_v27 = vadd.f32 %v2346_v22, %v2276_v17  ;;  %v2349_v28 = vadd.f32 %v2348_v26, %v2347_v23 }
 0x12a   : > { %v3066_v29 = vadd.f32 %v2349_v28, %v2279_v25 }
 0x12b   : > { %v2280_v30 = vpop.f32.mrb[24].mxu0 }
 0x12c   : > { %v2350_v31 = vpop.f32.mrb[24].mxu1  ;;  %v2281_v32 = vpop.f32.mrb[25].mxu0 }
 0x12d   : > { %v2282_v34 = vadd.f32 %v2281_v32, %v2280_v30  ;;  %v2351_v36 = vpop.f32.mrb[25].mxu1  ;;  %v2283_v37 = vpop.f32.mrb[26].mxu0  ;;  %v3084_v32 = vld [vmem:[%s3147_s2] ss:$0 sm:$0xff] }
 0x12e   : > { %v2352_v38 = vadd.f32 %v2351_v36, %v2350_v31  ;;  %v2353_v39 = vpop.f32.mrb[26].mxu1  ;;  %v2284_v40 = vpop.f32.mrb[27].mxu0 }
 0x12f   : > { %v2285_v41 = vadd.f32 %v2284_v40, %v2283_v37  ;;  %v2354_v42 = vpop.f32.mrb[27].mxu1 }
 0x130   : > { %v3068_v43 = vadd.f32 %v2352_v38, %v2282_v34  ;;  %v2355_v44 = vadd.f32 %v2354_v42, %v2353_v39 }
 0x132   : > { %v3070_v45 = vadd.f32 %v2355_v44, %v2285_v41 }
 0x133   : > { %v2286_v46 = vpop.f32.mrb[28].mxu0 }
 0x134   : > { %v2356_v48 = vpop.f32.mrb[28].mxu1  ;;  %v2287_v50 = vpop.f32.mrb[29].mxu0 }
 0x135   : > { %v2288_v51 = vadd.f32 %v2287_v50, %v2286_v46  ;;  %v2357_v52 = vpop.f32.mrb[29].mxu1  ;;  %v2289_v53 = vpop.f32.mrb[30].mxu0 }
 0x136   : > { %v2358_v54 = vadd.f32 %v2357_v52, %v2356_v48  ;;  %v2359_v55 = vpop.f32.mrb[30].mxu1  ;;  %v2290_v56 = vpop.f32.mrb[31].mxu0 }
 0x137   : > { %v2291_v57 = vadd.f32 %v2290_v56, %v2289_v53  ;;  %v2360_v58 = vpop.f32.mrb[31].mxu1 }
 0x138   : > { %v3072_v59 = vadd.f32 %v2358_v54, %v2288_v51  ;;  %v2361_v60 = vadd.f32 %v2360_v58, %v2359_v55 }
 0x13a   : > { %v3074_v62 = vadd.f32 %v2361_v60, %v2291_v57 }
 0x13b   : > { %v2292_v0 = vpop.f32.mrb[32].mxu0 }
 0x13c   : > { %v2362_v1 = vpop.f32.mrb[32].mxu1  ;;  %v2293_v2 = vpop.f32.mrb[33].mxu0 }
 0x13d   : > { %v2294_v3 = vadd.f32 %v2293_v2, %v2292_v0  ;;  %v2363_v4 = vpop.f32.mrb[33].mxu1  ;;  %v2295_v5 = vpop.f32.mrb[34].mxu0 }
 0x13e   : > { %v2364_v6 = vadd.f32 %v2363_v4, %v2362_v1  ;;  %v2365_v7 = vpop.f32.mrb[34].mxu1  ;;  %v2296_v8 = vpop.f32.mrb[35].mxu0 }
 0x13f   : > { %v2297_v9 = vadd.f32 %v2296_v8, %v2295_v5  ;;  %v2366_v10 = vpop.f32.mrb[35].mxu1 }
 0x140   : > { %v3076_v12 = vadd.f32 %v2364_v6, %v2294_v3  ;;  %v2367_v14 = vadd.f32 %v2366_v10, %v2365_v7 }
 0x142   : > { %v3078_v15 = vadd.f32 %v2367_v14, %v2297_v9 }
 0x143   : > { %v2384_v16 = vpop.f32.mrb[36].mxu0 }
 0x144   : > { %v2454_v17 = vpop.f32.mrb[36].mxu1  ;;  %v2385_v18 = vpop.f32.mrb[37].mxu0 }
 0x145   : > { %v2386_v20 = vadd.f32 %v2385_v18, %v2384_v16  ;;  %v2455_v22 = vpop.f32.mrb[37].mxu1  ;;  %v2387_v23 = vpop.f32.mrb[38].mxu0 }
 0x146   : > { %v2456_v24 = vadd.f32 %v2455_v22, %v2454_v17  ;;  %v2457_v25 = vpop.f32.mrb[38].mxu1  ;;  %v2388_v26 = vpop.f32.mrb[39].mxu0 }
 0x147   : > { %v1241_v28 = vadd.f32 %v2386_v20, %v3044_v19  ;;  %v2389_v30 = vadd.f32 %v2388_v26, %v2387_v23  ;;  %v2458_v31 = vpop.f32.mrb[39].mxu1 }
 0x148   : > { %v2459_v34 = vadd.f32 %v2458_v31, %v2457_v25 }
 0x149   : > { %v1602_v36 = vadd.f32 %v2456_v24, %v1241_v28  ;;  %v1242_v37 = vadd.f32 %v2389_v30, %v3046_v21 }
 0x14b   : > { %v1627_v38 = vadd.f32 %v3084_v32, %v1602_v36  ;;  %v1603_v39 = vadd.f32 %v2459_v34, %v1242_v37  ;;  %v2390_v40 = vpop.f32.mrb[40].mxu0 }
 0x14c   : > { %v2460_v41 = vpop.f32.mrb[40].mxu1  ;;  %v2391_v42 = vpop.f32.mrb[41].mxu0 }
 0x14d   : > { %v1628_v19 = vadd.f32 %v3084_v32, %v1603_v39  ;;  %v2392_v44 = vadd.f32 %v2391_v42, %v2390_v40  ;;  %v2461_v46 = vpop.f32.mrb[41].mxu1  ;;  %v2393_v48 = vpop.f32.mrb[42].mxu0  ;;  %v1645_v53 = vmax.f32 %v1627_v38, 0.0 }
 0x14e   : > { %v2462_v50 = vadd.f32 %v2461_v46, %v2460_v41  ;;  %v2463_v51 = vpop.f32.mrb[42].mxu1  ;;  %v2394_v52 = vpop.f32.mrb[43].mxu0 }
 0x14f   : > { %v1646_v54 = vmax.f32 %v1628_v19, 0.0  ;;  %v1243_v55 = vadd.f32 %v2392_v44, %v3048_v33  ;;  %v2395_v21 = vadd.f32 %v2394_v52, %v2393_v48  ;;  %v2464_v56 = vpop.f32.mrb[43].mxu1 }
 0x150   : > { %v2465_v57 = vadd.f32 %v2464_v56, %v2463_v51 }
 0x151   : > { %v2178_v58 = vpack.c.bf16 %v1646_v54, %v1645_v53  ;;  %v1604_v60 = vadd.f32 %v2462_v50, %v1243_v55  ;;  %v1244_v0 = vadd.f32 %v2395_v21, %v3050_v35 }
 0x153   : > { %2179 = vst [vmem:[%s3094_s12] sm:$0xff] %v2178_v58   ;;  %v1629_v1 = vadd.f32 %v3084_v32, %v1604_v60  ;;  %v1605_v2 = vadd.f32 %v2465_v57, %v1244_v0  ;;  %v2396_v3 = vpop.f32.mrb[44].mxu0 }
 0x154   : > { %v2466_v4 = vpop.f32.mrb[44].mxu1  ;;  %v2397_v33 = vpop.f32.mrb[45].mxu0 }
 0x155   : > { %v1630_v5 = vadd.f32 %v3084_v32, %v1605_v2  ;;  %v2398_v6 = vadd.f32 %v2397_v33, %v2396_v3  ;;  %v2467_v7 = vpop.f32.mrb[45].mxu1  ;;  %v2399_v8 = vpop.f32.mrb[46].mxu0  ;;  %v1647_v16 = vmax.f32 %v1629_v1, 0.0 }
 0x156   : > { %v2468_v9 = vadd.f32 %v2467_v7, %v2466_v4  ;;  %v2469_v10 = vpop.f32.mrb[46].mxu1  ;;  %v2400_v14 = vpop.f32.mrb[47].mxu0 }
 0x157   : > { %v1648_v17 = vmax.f32 %v1630_v5, 0.0  ;;  %v1245_v35 = vadd.f32 %v2398_v6, %v3052_v47  ;;  %v2401_v18 = vadd.f32 %v2400_v14, %v2399_v8  ;;  %v2470_v20 = vpop.f32.mrb[47].mxu1 }
 0x158   : > { %v2471_v22 = vadd.f32 %v2470_v20, %v2469_v10 }
 0x159   : > { %v2183_v23 = vpack.c.bf16 %v1648_v17, %v1647_v16  ;;  %v1606_v24 = vadd.f32 %v2468_v9, %v1245_v35  ;;  %v1246_v25 = vadd.f32 %v2401_v18, %v3054_v49 }
 0x15b   : > { %2220 = vst [vmem:[%s3094_s12 + $0x8] sm:$0xff] %v2183_v23   ;;  %v1631_v26 = vadd.f32 %v3084_v32, %v1606_v24  ;;  %v1607_v28 = vadd.f32 %v2471_v22, %v1246_v25  ;;  %v2402_v30 = vpop.f32.mrb[48].mxu0 }
 0x15c   : > { %v2472_v31 = vpop.f32.mrb[48].mxu1  ;;  %v2403_v34 = vpop.f32.mrb[49].mxu0 }
 0x15d   : > { %v1632_v36 = vadd.f32 %v3084_v32, %v1607_v28  ;;  %v2404_v37 = vadd.f32 %v2403_v34, %v2402_v30  ;;  %v2473_v38 = vpop.f32.mrb[49].mxu1  ;;  %v2405_v47 = vpop.f32.mrb[50].mxu0  ;;  %v1649_v42 = vmax.f32 %v1631_v26, 0.0 }
 0x15e   : > { %v2474_v39 = vadd.f32 %v2473_v38, %v2472_v31  ;;  %v2475_v40 = vpop.f32.mrb[50].mxu1  ;;  %v2406_v41 = vpop.f32.mrb[51].mxu0 }
 0x15f   : > { %v1650_v19 = vmax.f32 %v1632_v36, 0.0  ;;  %v1247_v49 = vadd.f32 %v2404_v37, %v3056_v61  ;;  %v2407_v44 = vadd.f32 %v2406_v41, %v2405_v47  ;;  %v2476_v46 = vpop.f32.mrb[51].mxu1 }
 0x160   : > { %v2477_v48 = vadd.f32 %v2476_v46, %v2475_v40 }
 0x161   : > { %v2188_v50 = vpack.c.bf16 %v1650_v19, %v1649_v42  ;;  %v1608_v51 = vadd.f32 %v2474_v39, %v1247_v49  ;;  %v1248_v52 = vadd.f32 %v2407_v44, %v3058_v63 }
 0x163   : > { %2221 = vst [vmem:[%s3094_s12 + $0x10] sm:$0xff] %v2188_v50   ;;  %v1633_v53 = vadd.f32 %v3084_v32, %v1608_v51  ;;  %v1609_v54 = vadd.f32 %v2477_v48, %v1248_v52  ;;  %v2408_v55 = vpop.f32.mrb[52].mxu0 }
 0x164   : > { %v2478_v21 = vpop.f32.mrb[52].mxu1  ;;  %v2409_v56 = vpop.f32.mrb[53].mxu0 }
 0x165   : > { %v1634_v57 = vadd.f32 %v3084_v32, %v1609_v54  ;;  %v2410_v58 = vadd.f32 %v2409_v56, %v2408_v55  ;;  %v2479_v60 = vpop.f32.mrb[53].mxu1  ;;  %v2411_v61 = vpop.f32.mrb[54].mxu0  ;;  %v1651_v3 = vmax.f32 %v1633_v53, 0.0 }
 0x166   : > { %v2480_v0 = vadd.f32 %v2479_v60, %v2478_v21  ;;  %v2481_v1 = vpop.f32.mrb[54].mxu1  ;;  %v2412_v2 = vpop.f32.mrb[55].mxu0 }
 0x167   : > { %v1652_v4 = vmax.f32 %v1634_v57, 0.0  ;;  %v1249_v63 = vadd.f32 %v2410_v58, %v3060_v11  ;;  %v2413_v33 = vadd.f32 %v2412_v2, %v2411_v61  ;;  %v2482_v5 = vpop.f32.mrb[55].mxu1 }
 0x168   : > { %v2483_v6 = vadd.f32 %v2482_v5, %v2481_v1 }
 0x169   : > { %v2193_v7 = vpack.c.bf16 %v1652_v4, %v1651_v3  ;;  %v1610_v8 = vadd.f32 %v2480_v0, %v1249_v63  ;;  %v1250_v9 = vadd.f32 %v2413_v33, %v3062_v13 }
 0x16b   : > { %2222 = vst [vmem:[%s3094_s12 + $0x18] sm:$0xff] %v2193_v7   ;;  %v1635_v10 = vadd.f32 %v3084_v32, %v1610_v8  ;;  %v1611_v14 = vadd.f32 %v2483_v6, %v1250_v9  ;;  %v2414_v16 = vpop.f32.mrb[56].mxu0 }
 0x16c   : > { %v2484_v17 = vpop.f32.mrb[56].mxu1  ;;  %v2415_v35 = vpop.f32.mrb[57].mxu0 }
 0x16d   : > { %v1636_v18 = vadd.f32 %v3084_v32, %v1611_v14  ;;  %v2416_v20 = vadd.f32 %v2415_v35, %v2414_v16  ;;  %v2485_v22 = vpop.f32.mrb[57].mxu1  ;;  %v2417_v11 = vpop.f32.mrb[58].mxu0  ;;  %v1653_v26 = vmax.f32 %v1635_v10, 0.0 }
 0x16e   : > { %v2486_v23 = vadd.f32 %v2485_v22, %v2484_v17  ;;  %v2487_v24 = vpop.f32.mrb[58].mxu1  ;;  %v2418_v25 = vpop.f32.mrb[59].mxu0 }
 0x16f   : > { %v1654_v28 = vmax.f32 %v1636_v18, 0.0  ;;  %v1251_v13 = vadd.f32 %v2416_v20, %v3064_v27  ;;  %v2419_v30 = vadd.f32 %v2418_v25, %v2417_v11  ;;  %v2488_v31 = vpop.f32.mrb[59].mxu1 }
 0x170   : > { %v2489_v34 = vadd.f32 %v2488_v31, %v2487_v24 }
 0x171   : > { %v2198_v36 = vpack.c.bf16 %v1654_v28, %v1653_v26  ;;  %v1612_v37 = vadd.f32 %v2486_v23, %v1251_v13  ;;  %v1252_v38 = vadd.f32 %v2419_v30, %v3066_v29 }
 0x173   : > { %2223 = vst [vmem:[%s3094_s12 + $0x20] sm:$0xff] %v2198_v36   ;;  %v1637_v47 = vadd.f32 %v3084_v32, %v1612_v37  ;;  %v1613_v39 = vadd.f32 %v2489_v34, %v1252_v38  ;;  %v2420_v40 = vpop.f32.mrb[60].mxu0 }
 0x174   : > { %v2490_v41 = vpop.f32.mrb[60].mxu1  ;;  %v2421_v42 = vpop.f32.mrb[61].mxu0 }
 0x175   : > { %v1638_v19 = vadd.f32 %v3084_v32, %v1613_v39  ;;  %v2422_v49 = vadd.f32 %v2421_v42, %v2420_v40  ;;  %v2491_v44 = vpop.f32.mrb[61].mxu1  ;;  %v2423_v27 = vpop.f32.mrb[62].mxu0  ;;  %v1655_v51 = vmax.f32 %v1637_v47, 0.0 }
 0x176   : > { %v2492_v46 = vadd.f32 %v2491_v44, %v2490_v41  ;;  %v2493_v48 = vpop.f32.mrb[62].mxu1  ;;  %v2424_v50 = vpop.f32.mrb[63].mxu0 }
 0x177   : > { %v1656_v52 = vmax.f32 %v1638_v19, 0.0  ;;  %v1253_v29 = vadd.f32 %v2422_v49, %v3068_v43  ;;  %v2425_v53 = vadd.f32 %v2424_v50, %v2423_v27  ;;  %v2494_v54 = vpop.f32.mrb[63].mxu1 }
 0x178   : > { %v2495_v55 = vadd.f32 %v2494_v54, %v2493_v48 }
 0x179   : > { %v2203_v21 = vpack.c.bf16 %v1656_v52, %v1655_v51  ;;  %v1614_v56 = vadd.f32 %v2492_v46, %v1253_v29  ;;  %v1254_v57 = vadd.f32 %v2425_v53, %v3070_v45 }
 0x17b   : > { %2224 = vst [vmem:[%s3094_s12 + $0x28] sm:$0xff] %v2203_v21   ;;  %v1639_v58 = vadd.f32 %v3084_v32, %v1614_v56  ;;  %v1615_v60 = vadd.f32 %v2495_v55, %v1254_v57  ;;  %v2426_v61 = vpop.f32.mrb[64].mxu0 }
 0x17c   : > { %v2496_v0 = vpop.f32.mrb[64].mxu1  ;;  %v2427_v1 = vpop.f32.mrb[65].mxu0 }
 0x17d   : > { %v1640_v2 = vadd.f32 %v3084_v32, %v1615_v60  ;;  %v2428_v3 = vadd.f32 %v2427_v1, %v2426_v61  ;;  %v2497_v4 = vpop.f32.mrb[65].mxu1  ;;  %v2429_v43 = vpop.f32.mrb[66].mxu0  ;;  %v1657_v6 = vmax.f32 %v1639_v58, 0.0 }
 0x17e   : > { %v2498_v63 = vadd.f32 %v2497_v4, %v2496_v0  ;;  %v2499_v33 = vpop.f32.mrb[66].mxu1  ;;  %v2430_v5 = vpop.f32.mrb[67].mxu0 }
 0x17f   : > { %v1658_v7 = vmax.f32 %v1640_v2, 0.0  ;;  %v1255_v45 = vadd.f32 %v2428_v3, %v3072_v59  ;;  %v2431_v8 = vadd.f32 %v2430_v5, %v2429_v43  ;;  %v2500_v9 = vpop.f32.mrb[67].mxu1 }
 0x180   : > { %v2501_v10 = vadd.f32 %v2500_v9, %v2499_v33 }
 0x181   : > { %v2208_v14 = vpack.c.bf16 %v1658_v7, %v1657_v6  ;;  %v1616_v16 = vadd.f32 %v2498_v63, %v1255_v45  ;;  %v1256_v17 = vadd.f32 %v2431_v8, %v3074_v62 }
 0x183   : > { %2225 = vst [vmem:[%s3094_s12 + $0x30] sm:$0xff] %v2208_v14   ;;  %v1641_v35 = vadd.f32 %v3084_v32, %v1616_v16  ;;  %v1617_v18 = vadd.f32 %v2501_v10, %v1256_v17  ;;  %v2432_v20 = vpop.f32.mrb[68].mxu0 }
 0x184   : > { %v2502_v22 = vpop.f32.mrb[68].mxu1  ;;  %v2433_v11 = vpop.f32.mrb[69].mxu0 }
 0x185   : > { %v1642_v23 = vadd.f32 %v3084_v32, %v1617_v18  ;;  %v2434_v24 = vadd.f32 %v2433_v11, %v2432_v20  ;;  %v2503_v25 = vpop.f32.mrb[69].mxu1  ;;  %v2435_v59 = vpop.f32.mrb[70].mxu0  ;;  %v1659_v30 = vmax.f32 %v1641_v35, 0.0 }
 0x186   : > { %v2504_v26 = vadd.f32 %v2503_v25, %v2502_v22  ;;  %v2505_v28 = vpop.f32.mrb[70].mxu1  ;;  %v2436_v13 = vpop.f32.mrb[71].mxu0 }
 0x187   : > { %v1660_v31 = vmax.f32 %v1642_v23, 0.0  ;;  %v1257_v62 = vadd.f32 %v2434_v24, %v3076_v12  ;;  %v2437_v34 = vadd.f32 %v2436_v13, %v2435_v59  ;;  %v2506_v36 = vpop.f32.mrb[71].mxu1 }
 0x188   : > { %v2507_v37 = vadd.f32 %v2506_v36, %v2505_v28 }
 0x189   : > { %v2213_v38 = vpack.c.bf16 %v1660_v31, %v1659_v30  ;;  %v1618_v47 = vadd.f32 %v2504_v26, %v1257_v62  ;;  %v1258_v39 = vadd.f32 %v2437_v34, %v3078_v15 }
 0x18b   : > { %2226 = vst [vmem:[%s3094_s12 + $0x38] sm:$0xff] %v2213_v38   ;;  %v1643_v40 = vadd.f32 %v3084_v32, %v1618_v47  ;;  %v1619_v41 = vadd.f32 %v2507_v37, %v1258_v39 }
 0x18d   : > { %v1644_v42 = vadd.f32 %v3084_v32, %v1619_v41  ;;  %v1661_v19 = vmax.f32 %v1643_v40, 0.0 }
 0x18f   : > { %v1662_v49 = vmax.f32 %v1644_v42, 0.0 }
 0x191   : > { %v2218_v44 = vpack.c.bf16 %v1662_v49, %v1661_v19 }
 0x193   : > { %2227 = vst [vmem:[%s3094_s12 + $0x40] sm:$0xff] %v2218_v44  }
 0x194 PF: > { %s13_s14 = sadd.s32 1, %s2728_s14   ;;  %s3149_s12 = smov %s2724_s13 }
 0x195   : > { %p10_p5 = scmp.ge.s32.totalorder %s13_s14, 4   ;;  %s3150_s13 = smov %s3152_s15 }
 0x197   :  { %12 = sbr.rel (!%p10_p5) target bundleno = 2 (0x2), region = 68 }

// kernel: feature_extractor_conv_forward.8
= control target key start
LH: loop header
LB: loop body
LE: loop exit
PB: predicated region body
PF: predicated region fallthrough
CT: control target
= control target key end

     0   :  { %s3805_s12 = smov 0   ;;  %s3807_s13 = smov 0   ;;  %s4698_s0 = inlined_call_operand.vmem [shape: bf16[2,4,36,512], index: 0, kind: input, shape index: {}]   ;;  %s4699_s1 = inlined_call_operand.vmem [shape: bf16[4,512,256], index: 1, kind: input, shape index: {}]   ;;  %s4700_s2 = inlined_call_operand.vmem [shape: f32[1,256], index: 2, kind: input, shape index: {}]   ;;  %s4701_s3 = inlined_call_operand.vmem [shape: bf16[2,36,256], index: 3, kind: output, shape index: {}]  }
   0x1   :  { %s3809_s14 = smov 0  }
   0x2 LB: > { %s25_s15 = sadd.s32 1, %s3779_s13  ;;  %p2690_p0 = scmp.ge.s32.totalorder %s3783_s14, 1  ;;  %s3783_s14 = sphi %s3809_s14, %s13_s14   ;;  %s3779_s13 = sphi %s3807_s13, %s4703_s13   ;;  %s3775_s12 = sphi %s3805_s12, %s4702_s12  }
   0x3   : > { %p27_p1 = scmp.ge.s32.totalorder %s25_s15, 2  ;;  %p159_p2 = scmp.lt.s32.totalorder %s3783_s14, 3 }
   0x5   : > { %s4705_s15 = smov (%p27_p1, %s25_s15), 0  ;;  %p160_p3 = pnand %p2690_p0, %p159_p2 }
   0x6   : > { %v3313_v0 = vld [vmem:[%s4699_s1 + $0x204] ss:$8 sps:$4 sm:$0xff] (!%p160_p3)   ;;  %v3317_v2 = vld [vmem:[%s4699_s1 + $0x200] ss:$8 sps:$4 sm:$0xff] (!%p160_p3)   ;;  %v3319_v4 = vld [vmem:[%s4699_s1 + $0x214] ss:$8 sps:$4 sm:$0xff] (!%p160_p3)  }
   0x7   : > { %163 = sbr.rel (%p160_p3) target bundleno = 505 (0x1f9), region = 32  ;;  %v3315_v1 = vld [vmem:[%s4699_s1 + $0x404] ss:$8 sps:$4 sm:$0xff] (!%p160_p3)   ;;  %739 = vmatprep.subr.bf16.mxu1 (!%p160_p3), %v3313_v0  ;;  %v3318_v3 = vld [vmem:[%s4699_s1 + $0x400] ss:$8 sps:$4 sm:$0xff] (!%p160_p3)   ;;  %p194_p4 = scmp.lt.s32.totalorder (!%p160_p3), %s3775_s12, 1 }
   0x8   : > { %1807 = vmatprep.subr.bf16.mxu0 (!%p160_p3), %v3315_v1  ;;  %740 = vmatpush1.bf16.msra.mxu1 (!%p160_p3), %v3317_v2  ;;  %v3321_v5 = vld [vmem:[%s4699_s1 + $0x414] ss:$8 sps:$4 sm:$0xff] (!%p160_p3)   ;;  %v3323_v6 = vld [vmem:[%s4699_s1 + $0x210] ss:$8 sps:$4 sm:$0xff] (!%p160_p3)   ;;  %v3325_v8 = vld [vmem:[%s4699_s1 + $0x224] ss:$8 sps:$4 sm:$0xff] (!%p160_p3)  }
   0x9   : > { %1808 = vmatpush1.bf16.msra.mxu0 (!%p160_p3), %v3318_v3  ;;  %741 = vmatprep.subr.bf16.mxu1 (!%p160_p3), %v3319_v4  ;;  %v3324_v7 = vld [vmem:[%s4699_s1 + $0x410] ss:$8 sps:$4 sm:$0xff] (!%p160_p3)   ;;  %v3327_v9 = vld [vmem:[%s4699_s1 + $0x424] ss:$8 sps:$4 sm:$0xff] (!%p160_p3)   ;;  %v3329_v10 = vld [vmem:[%s4699_s1 + $0x220] ss:$8 sps:$4 sm:$0xff] (!%p160_p3)  }
   0xa   : > { %1809 = vmatprep.subr.bf16.mxu0 (!%p160_p3), %v3321_v5  ;;  %v3330_v11 = vld [vmem:[%s4699_s1 + $0x420] ss:$8 sps:$4 sm:$0xff] (!%p160_p3)   ;;  %v3331_v12 = vld [vmem:[%s4699_s1 + $0x234] ss:$8 sps:$4 sm:$0xff] (!%p160_p3)   ;;  %v3335_v14 = vld [vmem:[%s4699_s1 + $0x230] ss:$8 sps:$4 sm:$0xff] (!%p160_p3)  }
   0xb   : > { %v3333_v13 = vld [vmem:[%s4699_s1 + $0x434] ss:$8 sps:$4 sm:$0xff] (!%p160_p3)   ;;  %v3336_v15 = vld [vmem:[%s4699_s1 + $0x430] ss:$8 sps:$4 sm:$0xff] (!%p160_p3)   ;;  %v3337_v16 = vld [vmem:[%s4699_s1 + $0x244] ss:$8 sps:$4 sm:$0xff] (!%p160_p3)  }
   0xc   : > { %742 = vmatpush1.bf16.msra.mxu1 (!%p160_p3), %v3323_v6  ;;  %v3339_v17 = vld [vmem:[%s4699_s1 + $0x444] ss:$8 sps:$4 sm:$0xff] (!%p160_p3)   ;;  %v3341_v18 = vld [vmem:[%s4699_s1 + $0x240] ss:$8 sps:$4 sm:$0xff] (!%p160_p3)   ;;  %v3343_v20 = vld [vmem:[%s4699_s1 + $0x254] ss:$8 sps:$4 sm:$0xff] (!%p160_p3)  }
   0xd   : > { %1810 = vmatpush1.bf16.msra.mxu0 (!%p160_p3), %v3324_v7  ;;  %743 = vmatprep.subr.bf16.mxu1 (!%p160_p3), %v3325_v8  ;;  %v3342_v19 = vld [vmem:[%s4699_s1 + $0x440] ss:$8 sps:$4 sm:$0xff] (!%p160_p3)   ;;  %v3345_v21 = vld [vmem:[%s4699_s1 + $0x454] ss:$8 sps:$4 sm:$0xff] (!%p160_p3)   ;;  %v3347_v22 = vld [vmem:[%s4699_s1 + $0x250] ss:$8 sps:$4 sm:$0xff] (!%p160_p3)  }
   0xe   : > { %1811 = vmatprep.subr.bf16.mxu0 %v3327_v9  ;;  %v3348_v23 = vld [vmem:[%s4699_s1 + $0x450] ss:$8 sps:$4 sm:$0xff]   ;;  %v3349_v24 = vld [vmem:[%s4699_s1 + $0x264] ss:$8 sps:$4 sm:$0xff]   ;;  %v3353_v26 = vld [vmem:[%s4699_s1 + $0x260] ss:$8 sps:$4 sm:$0xff]  }
   0xf   : > { %v3351_v25 = vld [vmem:[%s4699_s1 + $0x464] ss:$8 sps:$4 sm:$0xff]   ;;  %v3354_v27 = vld [vmem:[%s4699_s1 + $0x460] ss:$8 sps:$4 sm:$0xff]   ;;  %v3355_v28 = vld [vmem:[%s4699_s1 + $0x274] ss:$8 sps:$4 sm:$0xff]  }
  0x10   : > { %744 = vmatpush1.bf16.msra.mxu1 %v3329_v10  ;;  %v3357_v29 = vld [vmem:[%s4699_s1 + $0x474] ss:$8 sps:$4 sm:$0xff]   ;;  %v3359_v30 = vld [vmem:[%s4699_s1 + $0x270] ss:$8 sps:$4 sm:$0xff]   ;;  %v3361_v32 = vld [vmem:[%s4699_s1 + $0x284] ss:$8 sps:$4 sm:$0xff]  }
  0x11   : > { %1812 = vmatpush1.bf16.msra.mxu0 %v3330_v11  ;;  %745 = vmatprep.subr.bf16.mxu1 %v3331_v12  ;;  %v3360_v31 = vld [vmem:[%s4699_s1 + $0x470] ss:$8 sps:$4 sm:$0xff]   ;;  %v3363_v33 = vld [vmem:[%s4699_s1 + $0x484] ss:$8 sps:$4 sm:$0xff]   ;;  %v3365_v34 = vld [vmem:[%s4699_s1 + $0x280] ss:$8 sps:$4 sm:$0xff]  }
  0x12   : > { %1813 = vmatprep.subr.bf16.mxu0 %v3333_v13  ;;  %v3366_v35 = vld [vmem:[%s4699_s1 + $0x480] ss:$8 sps:$4 sm:$0xff]   ;;  %v3367_v36 = vld [vmem:[%s4699_s1 + $0x294] ss:$8 sps:$4 sm:$0xff]   ;;  %s4707_s12 = smov (!%p194_p4, %s3775_s12), 1 }
  0x13   : > { %v3369_v37 = vld [vmem:[%s4699_s1 + $0x494] ss:$8 sps:$4 sm:$0xff]   ;;  %v3371_v38 = vld [vmem:[%s4699_s1 + $0x290] ss:$8 sps:$4 sm:$0xff]   ;;  %v3373_v40 = vld [vmem:[%s4699_s1 + $0x2a4] ss:$8 sps:$4 sm:$0xff]  }
  0x14   : > { %746 = vmatpush1.bf16.msra.mxu1 %v3335_v14  ;;  %v3372_v39 = vld [vmem:[%s4699_s1 + $0x490] ss:$8 sps:$4 sm:$0xff]   ;;  %s3287_s29 = smul.u32 320, %s4707_s12  ;;  %v3375_v41 = vld [vmem:[%s4699_s1 + $0x4a4] ss:$8 sps:$4 sm:$0xff]  }
  0x15   : > { %1814 = vmatpush1.bf16.msra.mxu0 %v3336_v15  ;;  %747 = vmatprep.subr.bf16.mxu1 %v3337_v16  ;;  %v3377_v42 = vld [vmem:[%s4699_s1 + $0x2a0] ss:$8 sps:$4 sm:$0xff]   ;;  %v3379_v44 = vld [vmem:[%s4699_s1 + $0x2b4] ss:$8 sps:$4 sm:$0xff]   ;;  %v3383_v46 = vld [vmem:[%s4699_s1 + $0x2b0] ss:$8 sps:$4 sm:$0xff]  }
  0x16   : > { %1815 = vmatprep.subr.bf16.mxu0 %v3339_v17  ;;  %v3378_v43 = vld [vmem:[%s4699_s1 + $0x4a0] ss:$8 sps:$4 sm:$0xff]   ;;  %s3968_s17 = scalar_lea.vmem %s4698_s0, %s3287_s29  ;;  %v3381_v45 = vld [vmem:[%s4699_s1 + $0x4b4] ss:$8 sps:$4 sm:$0xff]   ;;  %v3384_v47 = vld [vmem:[%s4699_s1 + $0x4b0] ss:$8 sps:$4 sm:$0xff]  }
  0x17   : > { %v3411_v48 = vld [vmem:[%s3968_s17 + $0x54] ss:$16 sps:$4 sm:$0xff]   ;;  %v3389_v52 = vld [vmem:[%s4699_s1 + $0x2c0] ss:$8 sps:$4 sm:$0xff]   ;;  %v3395_v56 = vld [vmem:[%s4699_s1 + $0x2d0] ss:$8 sps:$4 sm:$0xff]  }
  0x18   : > { %748 = vmatpush1.bf16.msra.mxu1 %v3341_v18  ;;  %v3385_v49 = vld [vmem:[%s4699_s1 + $0x2c4] ss:$8 sps:$4 sm:$0xff]   ;;  %771 = vmatprep.mubr.bf16.mxu1 %v3411_v48  ;;  %v3390_v53 = vld [vmem:[%s4699_s1 + $0x4c0] ss:$8 sps:$4 sm:$0xff]   ;;  %v3391_v54 = vld [vmem:[%s4699_s1 + $0x2d4] ss:$8 sps:$4 sm:$0xff]  }
  0x19   : > { %1816 = vmatpush1.bf16.msra.mxu0 %v3342_v19  ;;  %749 = vmatprep.subr.bf16.mxu1 %v3343_v20  ;;  %v3387_v50 = vld [vmem:[%s4699_s1 + $0x4c4] ss:$8 sps:$4 sm:$0xff]   ;;  %v3393_v55 = vld [vmem:[%s4699_s1 + $0x4d4] ss:$8 sps:$4 sm:$0xff]   ;;  %v3396_v57 = vld [vmem:[%s4699_s1 + $0x4d0] ss:$8 sps:$4 sm:$0xff]  }
  0x1a   : > { %1817 = vmatprep.subr.bf16.mxu0 %v3345_v21  ;;  %v3417_v51 = vld [vmem:[%s3968_s17 + $0xa4] ss:$16 sps:$4 sm:$0xff]   ;;  %v3401_v60 = vld [vmem:[%s4699_s1 + $0x2e0] ss:$8 sps:$4 sm:$0xff]   ;;  %v3407_v0 = vld [vmem:[%s4699_s1 + $0x2f0] ss:$8 sps:$4 sm:$0xff]  }
  0x1b   : > { %1839 = vmatprep.mubr.bf16.mxu0 %v3417_v51  ;;  %v3397_v58 = vld [vmem:[%s4699_s1 + $0x2e4] ss:$8 sps:$4 sm:$0xff]   ;;  %v3402_v61 = vld [vmem:[%s4699_s1 + $0x4e0] ss:$8 sps:$4 sm:$0xff]   ;;  %v3403_v62 = vld [vmem:[%s4699_s1 + $0x2f4] ss:$8 sps:$4 sm:$0xff]  }
  0x1c   : > { %750 = vmatpush1.bf16.msra.mxu1 %v3347_v22  ;;  %v3399_v59 = vld [vmem:[%s4699_s1 + $0x4e4] ss:$8 sps:$4 sm:$0xff]   ;;  %v3405_v63 = vld [vmem:[%s4699_s1 + $0x4f4] ss:$8 sps:$4 sm:$0xff]   ;;  %v3408_v1 = vld [vmem:[%s4699_s1 + $0x4f0] ss:$8 sps:$4 sm:$0xff]  }
  0x1d   : > { %1818 = vmatpush1.bf16.msra.mxu0 %v3348_v23  ;;  %751 = vmatprep.subr.bf16.mxu1 %v3349_v24  ;;  %v3414_v2 = vld [vmem:[%s4699_s1 + $0x304] ss:$8 sps:$4 sm:$0xff]   ;;  %v3409_v4 = vld [vmem:[%s3968_s17 + $0x50] ss:$16 sps:$4 sm:$0xff]   ;;  %v3423_v8 = vld [vmem:[%s4699_s1 + $0x314] ss:$8 sps:$4 sm:$0xff]  }
  0x1e   : > { %1819 = vmatprep.subr.bf16.mxu0 %v3351_v25  ;;  %v3420_v3 = vld [vmem:[%s4699_s1 + $0x504] ss:$8 sps:$4 sm:$0xff]   ;;  %v3412_v5 = vld [vmem:[%s4699_s1 + $0x300] ss:$8 sps:$4 sm:$0xff]   ;;  %v3426_v9 = vld [vmem:[%s4699_s1 + $0x514] ss:$8 sps:$4 sm:$0xff]  }
  0x1f   : > { %v3415_v6 = vld [vmem:[%s3968_s17 + $0xa0] ss:$16 sps:$4 sm:$0xff]   ;;  %v3429_v12 = vld [vmem:[%s4699_s1 + $0x324] ss:$8 sps:$4 sm:$0xff]   ;;  %v3435_v16 = vld [vmem:[%s4699_s1 + $0x334] ss:$8 sps:$4 sm:$0xff]  }
  0x20   : > { %752 = vmatpush1.bf16.msra.mxu1 %v3353_v26  ;;  %v3418_v7 = vld [vmem:[%s4699_s1 + $0x500] ss:$8 sps:$4 sm:$0xff]   ;;  %v3421_v10 = vld [vmem:[%s4699_s1 + $0x310] ss:$8 sps:$4 sm:$0xff]   ;;  %v3432_v13 = vld [vmem:[%s4699_s1 + $0x524] ss:$8 sps:$4 sm:$0xff]  }
  0x21   : > { %1820 = vmatpush1.bf16.msra.mxu0 %v3354_v27  ;;  %753 = vmatprep.subr.bf16.mxu1 %v3355_v28  ;;  %v3424_v11 = vld [vmem:[%s4699_s1 + $0x510] ss:$8 sps:$4 sm:$0xff]   ;;  %v3427_v14 = vld [vmem:[%s4699_s1 + $0x320] ss:$8 sps:$4 sm:$0xff]   ;;  %v3438_v17 = vld [vmem:[%s4699_s1 + $0x534] ss:$8 sps:$4 sm:$0xff]  }
  0x22   : > { %1821 = vmatprep.subr.bf16.mxu0 %v3357_v29  ;;  %v3430_v15 = vld [vmem:[%s4699_s1 + $0x520] ss:$8 sps:$4 sm:$0xff]   ;;  %v3433_v18 = vld [vmem:[%s4699_s1 + $0x330] ss:$8 sps:$4 sm:$0xff]   ;;  %v3441_v20 = vld [vmem:[%s4699_s1 + $0x344] ss:$8 sps:$4 sm:$0xff]  }
  0x23   : > { %v3436_v19 = vld [vmem:[%s4699_s1 + $0x530] ss:$8 sps:$4 sm:$0xff]   ;;  %v3444_v21 = vld [vmem:[%s4699_s1 + $0x544] ss:$8 sps:$4 sm:$0xff]   ;;  %v3439_v22 = vld [vmem:[%s4699_s1 + $0x340] ss:$8 sps:$4 sm:$0xff]  }
  0x24   : > { %754 = vmatpush1.bf16.msra.mxu1 %v3359_v30  ;;  %v3442_v23 = vld [vmem:[%s4699_s1 + $0x540] ss:$8 sps:$4 sm:$0xff]   ;;  %v3487_v24 = vld [vmem:[%s3968_s17 + $0x74] ss:$16 sps:$4 sm:$0xff]   ;;  %v3445_v30 = vld [vmem:[%s4699_s1 + $0x350] ss:$8 sps:$4 sm:$0xff]  }
  0x25   : > { %1822 = vmatpush1.bf16.msra.mxu0 %v3360_v31  ;;  %755 = vmatprep.subr.bf16.mxu1 %v3361_v32  ;;  %v3489_v25 = vld [vmem:[%s3968_s17 + $0x70] ss:$16 sps:$4 sm:$0xff]   ;;  %v3490_v26 = vld [vmem:[%s3968_s17 + $0xc4] ss:$16 sps:$4 sm:$0xff]   ;;  %s3288_s23 = smul.u32 40, %s4707_s12 }
  0x26   : > { %1823 = vmatprep.subr.bf16.mxu0 %v3363_v33  ;;  %v3447_v27 = vld [vmem:[%s4699_s1 + $0x354] ss:$8 sps:$4 sm:$0xff]   ;;  %v3495_v29 = vld [vmem:[%s3968_s17 + $0xc0] ss:$16 sps:$4 sm:$0xff]   ;;  %v3453_v32 = vld [vmem:[%s4699_s1 + $0x364] ss:$8 sps:$4 sm:$0xff]  }
  0x27   : > { %v3450_v28 = vld [vmem:[%s4699_s1 + $0x554] ss:$8 sps:$4 sm:$0xff]   ;;  %v3448_v31 = vld [vmem:[%s4699_s1 + $0x550] ss:$8 sps:$4 sm:$0xff]   ;;  %v3456_v33 = vld [vmem:[%s4699_s1 + $0x564] ss:$8 sps:$4 sm:$0xff]   ;;  %s4670_s26 = scalar_lea.vmem %s4701_s3, %s3288_s23 }
  0x28   : > { %756 = vmatpush1.bf16.msra.mxu1 %v3365_v34  ;;  %v2701_v34 = vld [vmem:[%s3968_s17 + $0x90] sm:$0x33]  ;;  %v3468_v48 = vld [vmem:[%s4699_s1 + $0x584] ss:$8 sps:$4 sm:$0xff]   ;;  %v3466_v51 = vld [vmem:[%s4699_s1 + $0x580] ss:$8 sps:$4 sm:$0xff]  }
  0x29   : > { %1824 = vmatpush1.bf16.msra.mxu0 %v3366_v35  ;;  %757 = vmatprep.subr.bf16.mxu1 %v3367_v36  ;;  %v2927_v35 = vld [vmem:[%s3968_s17 + $0xe0] sm:$0x33]  ;;  %v2776_v36 = vcombine.high %v2701_v34, %v2701_v34 }
  0x2a   : > { %1825 = vmatprep.subr.bf16.mxu0 %v3369_v37  ;;  %v3002_v37 = vcombine.high %v2927_v35, %v2927_v35 }
  0x2c   : > { %758 = vmatpush1.bf16.msra.mxu1 %v3371_v38  ;;  %v2775_v38 = vcombine.low %v2701_v34, %v2701_v34  ;;  %v2702_v34 = vld [vmem:[%s3968_s17 + $0x98] sm:$0x33] }
  0x2d   : > { %1826 = vmatpush1.bf16.msra.mxu0 %v3372_v39  ;;  %759 = vmatprep.subr.bf16.mxu1 %v3373_v40  ;;  %v3001_v39 = vcombine.low %v2927_v35, %v2927_v35  ;;  %v3451_v40 = vld [vmem:[%s4699_s1 + $0x360] ss:$8 sps:$4 sm:$0xff]  }
  0x2e   : > { %1827 = vmatprep.subr.bf16.mxu0 %v3375_v41  ;;  %v3454_v41 = vld [vmem:[%s4699_s1 + $0x560] ss:$8 sps:$4 sm:$0xff]  }
  0x2f   : > { %v2928_v35 = vld [vmem:[%s3968_s17 + $0xe8] sm:$0x33] }
  0x30   : > { %760 = vmatpush1.bf16.msra.mxu1 %v3377_v42  ;;  %v3459_v42 = vld [vmem:[%s4699_s1 + $0x374] ss:$8 sps:$4 sm:$0xff]  }
  0x31   : > { %1828 = vmatpush1.bf16.msra.mxu0 %v3378_v43  ;;  %761 = vmatprep.subr.bf16.mxu1 %v3379_v44  ;;  %v3462_v43 = vld [vmem:[%s4699_s1 + $0x574] ss:$8 sps:$4 sm:$0xff]   ;;  %v3457_v44 = vld [vmem:[%s4699_s1 + $0x370] ss:$8 sps:$4 sm:$0xff]  }
  0x32   : > { %1829 = vmatprep.subr.bf16.mxu0 %v3381_v45  ;;  %v3460_v45 = vld [vmem:[%s4699_s1 + $0x570] ss:$8 sps:$4 sm:$0xff]  }
  0x34   : > { %762 = vmatpush1.bf16.msra.mxu1 %v3383_v46  ;;  %v3465_v46 = vld [vmem:[%s4699_s1 + $0x384] ss:$8 sps:$4 sm:$0xff]  }
  0x35   : > { %1830 = vmatpush1.bf16.msra.mxu0 %v3384_v47  ;;  %763 = vmatprep.subr.bf16.mxu1 %v3385_v49  ;;  %v3523_v47 = vld [vmem:[%s3968_s17 + $0x5c] ss:$16 sps:$4 sm:$0xff]  }
  0x36   : > { %1831 = vmatprep.subr.bf16.mxu0 %v3387_v50  ;;  %v3526_v49 = vld [vmem:[%s3968_s17 + $0xac] ss:$16 sps:$4 sm:$0xff]   ;;  %v3463_v50 = vld [vmem:[%s4699_s1 + $0x380] ss:$8 sps:$4 sm:$0xff]  }
  0x38   : > { %764 = vmatpush1.bf16.msra.mxu1 %v3389_v52  ;;  %v3471_v52 = vld [vmem:[%s4699_s1 + $0x394] ss:$8 sps:$4 sm:$0xff]  }
  0x39   : > { %1832 = vmatpush1.bf16.msra.mxu0 %v3390_v53  ;;  %765 = vmatprep.subr.bf16.mxu1 %v3391_v54  ;;  %v3474_v53 = vld [vmem:[%s4699_s1 + $0x594] ss:$8 sps:$4 sm:$0xff]   ;;  %v3469_v54 = vld [vmem:[%s4699_s1 + $0x390] ss:$8 sps:$4 sm:$0xff]  }
  0x3a   : > { %1833 = vmatprep.subr.bf16.mxu0 %v3393_v55  ;;  %v3472_v55 = vld [vmem:[%s4699_s1 + $0x590] ss:$8 sps:$4 sm:$0xff]  }
  0x3c   : > { %766 = vmatpush1.bf16.msra.mxu1 %v3395_v56  ;;  %v3477_v56 = vld [vmem:[%s4699_s1 + $0x3a4] ss:$8 sps:$4 sm:$0xff]  }
  0x3d   : > { %1834 = vmatpush1.bf16.msra.mxu0 %v3396_v57  ;;  %767 = vmatprep.subr.bf16.mxu1 %v3397_v58  ;;  %v3480_v57 = vld [vmem:[%s4699_s1 + $0x5a4] ss:$8 sps:$4 sm:$0xff]   ;;  %v3475_v58 = vld [vmem:[%s4699_s1 + $0x3a0] ss:$8 sps:$4 sm:$0xff]  }
  0x3e   : > { %1835 = vmatprep.subr.bf16.mxu0 %v3399_v59  ;;  %v3478_v59 = vld [vmem:[%s4699_s1 + $0x5a0] ss:$8 sps:$4 sm:$0xff]  }
  0x40   : > { %768 = vmatpush1.bf16.msra.mxu1 %v3401_v60  ;;  %v3483_v60 = vld [vmem:[%s4699_s1 + $0x3b4] ss:$8 sps:$4 sm:$0xff]  }
  0x41   : > { %1836 = vmatpush1.bf16.msra.mxu0 %v3402_v61  ;;  %769 = vmatprep.subr.bf16.mxu1 %v3403_v62  ;;  %v3486_v61 = vld [vmem:[%s4699_s1 + $0x5b4] ss:$8 sps:$4 sm:$0xff]   ;;  %v3481_v62 = vld [vmem:[%s4699_s1 + $0x3b0] ss:$8 sps:$4 sm:$0xff]  }
  0x42   : > { %1837 = vmatprep.subr.bf16.mxu0 %v3405_v63  ;;  %v3484_v63 = vld [vmem:[%s4699_s1 + $0x5b0] ss:$8 sps:$4 sm:$0xff]  }
  0x44   : > { %770 = vmatpush1.bf16.msra.mxu1 %v3407_v0  ;;  %v3494_v0 = vld [vmem:[%s4699_s1 + $0x3c4] ss:$8 sps:$4 sm:$0xff]  }
  0x45   : > { %1838 = vmatpush1.bf16.msra.mxu0 %v3408_v1  ;;  %800 = vmatprep.subr.bf16.mxu1 %v3414_v2  ;;  %v3498_v1 = vld [vmem:[%s4699_s1 + $0x5c4] ss:$8 sps:$4 sm:$0xff]   ;;  %v3492_v2 = vld [vmem:[%s4699_s1 + $0x3c0] ss:$8 sps:$4 sm:$0xff]  }
  0x46   : > { %1868 = vmatprep.subr.bf16.mxu0 %v3420_v3  ;;  %v3496_v3 = vld [vmem:[%s4699_s1 + $0x5c0] ss:$8 sps:$4 sm:$0xff]  }
  0x47   : > { %772 = vmatmul.mubr.bf16.vlgmr.msra.gmra.mrb[0].mxu1 %v3409_v4  ;;  %v3501_v4 = vld [vmem:[%s4699_s1 + $0x3d4] ss:$8 sps:$4 sm:$0xff]  }
  0x48   : > { %1840 = vmatmul.mubr.bf16.vlgmr.msra.gmra.mrb[0].mxu0 %v3415_v6  ;;  %801 = vmatpush1.bf16.msra.mxu1 %v3412_v5  ;;  %v3504_v5 = vld [vmem:[%s4699_s1 + $0x5d4] ss:$8 sps:$4 sm:$0xff]   ;;  %v3499_v6 = vld [vmem:[%s4699_s1 + $0x3d0] ss:$8 sps:$4 sm:$0xff]  }
  0x49   : > { %1869 = vmatpush1.bf16.msra.mxu0 %v3418_v7  ;;  %802 = vmatprep.subr.bf16.mxu1 %v3423_v8  ;;  %v3502_v7 = vld [vmem:[%s4699_s1 + $0x5d0] ss:$8 sps:$4 sm:$0xff]   ;;  %v3510_v8 = vld [vmem:[%s4699_s1 + $0x3e4] ss:$8 sps:$4 sm:$0xff]  }
  0x4a   : > { %1870 = vmatprep.subr.bf16.mxu0 %v3426_v9  ;;  %781 = vmatprep.mubr.bf16.mxu1 %v3487_v24  ;;  %v3514_v9 = vld [vmem:[%s4699_s1 + $0x5e4] ss:$8 sps:$4 sm:$0xff]  }
  0x4b   : > { %1849 = vmatprep.mubr.bf16.mxu0 %v3490_v26  ;;  %v3539_v24 = vld [vmem:[%s3968_s17 + $0x7c] ss:$16 sps:$4 sm:$0xff]   ;;  %v3533_v26 = vld [vmem:[%s4699_s1 + $0x10] ss:$8 sps:$4 sm:$0xff]  }
  0x4c   : > { %803 = vmatpush1.bf16.msra.mxu1 %v3421_v10  ;;  %v3508_v10 = vld [vmem:[%s4699_s1 + $0x3e0] ss:$8 sps:$4 sm:$0xff]  }
  0x4d   : > { %1871 = vmatpush1.bf16.msra.mxu0 %v3424_v11  ;;  %804 = vmatprep.subr.bf16.mxu1 %v3429_v12  ;;  %v3512_v11 = vld [vmem:[%s4699_s1 + $0x5e0] ss:$8 sps:$4 sm:$0xff]   ;;  %v3517_v12 = vld [vmem:[%s4699_s1 + $0x3f4] ss:$8 sps:$4 sm:$0xff]  }
  0x4e   : > { %1872 = vmatprep.subr.bf16.mxu0 %v3432_v13  ;;  %v3520_v13 = vld [vmem:[%s4699_s1 + $0x5f4] ss:$8 sps:$4 sm:$0xff]  }
  0x4f   : > { %782 = vmatmul.mubr.bf16.gmra.mrb[4].mxu1 %v3489_v25  ;;  %v3541_v25 = vld [vmem:[%s3968_s17 + $0xcc] ss:$16 sps:$4 sm:$0xff]  }
  0x50   : > { %805 = vmatpush1.bf16.msra.mxu1 %v3427_v14  ;;  %1850 = vmatmul.mubr.bf16.gmra.mrb[4].mxu0 %v3495_v29  ;;  %v3515_v14 = vld [vmem:[%s4699_s1 + $0x3f0] ss:$8 sps:$4 sm:$0xff]  }
  0x51   : > { %1873 = vmatpush1.bf16.msra.mxu0 %v3430_v15  ;;  %806 = vmatprep.subr.bf16.mxu1 %v3435_v16  ;;  %v3518_v15 = vld [vmem:[%s4699_s1 + $0x5f0] ss:$8 sps:$4 sm:$0xff]   ;;  %v3529_v16 = vld [vmem:[%s4699_s1 + $0x4] ss:$8 sps:$4 sm:$0xff]  }
  0x52   : > { %1874 = vmatprep.subr.bf16.mxu0 %v3438_v17  ;;  %791 = vmatprep.mubr.bf16.mxu1 %v2776_v36  ;;  %v3532_v17 = vld [vmem:[%s4699_s1 + $0x604] ss:$8 sps:$4 sm:$0xff]   ;;  %v3543_v29 = vld [vmem:[%s3968_s17 + $0x78] ss:$16 sps:$4 sm:$0xff]   ;;  %v3553_v36 = vld [vmem:[%s4699_s1 + $0x34] ss:$8 sps:$4 sm:$0xff]  }
  0x53   : > { %1859 = vmatprep.mubr.bf16.mxu0 %v3002_v37  ;;  %v3556_v37 = vld [vmem:[%s4699_s1 + $0x634] ss:$8 sps:$4 sm:$0xff]  }
  0x54   : > { %807 = vmatpush1.bf16.msra.mxu1 %v3433_v18  ;;  %v3521_v18 = vld [vmem:[%s3968_s17 + $0x58] ss:$16 sps:$4 sm:$0xff]  }
  0x55   : > { %1875 = vmatpush1.bf16.msra.mxu0 %v3436_v19  ;;  %808 = vmatprep.subr.bf16.mxu1 %v3441_v20  ;;  %v3524_v19 = vld [vmem:[%s3968_s17 + $0xa8] ss:$16 sps:$4 sm:$0xff]  }
  0x56   : > { %1876 = vmatprep.subr.bf16.mxu0 %v3444_v21  ;;  %v3527_v20 = vld [vmem:[%s4699_s1] ss:$8 sps:$4 sm:$0xff]  }
  0x57   : > { %792 = vmatmul.mubr.bf16.gmra.mrb[8].mxu1 %v2775_v38  ;;  %v3530_v21 = vld [vmem:[%s4699_s1 + $0x600] ss:$8 sps:$4 sm:$0xff]   ;;  %v2778_v38 = vcombine.high %v2702_v34, %v2702_v34 }
  0x58   : > { %809 = vmatpush1.bf16.msra.mxu1 %v3439_v22  ;;  %1860 = vmatmul.mubr.bf16.gmra.mrb[8].mxu0 %v3001_v39  ;;  %v3535_v22 = vld [vmem:[%s4699_s1 + $0x14] ss:$8 sps:$4 sm:$0xff]   ;;  %v3004_v39 = vcombine.high %v2928_v35, %v2928_v35 }
  0x59   : > { %1877 = vmatpush1.bf16.msra.mxu0 %v3442_v23  ;;  %810 = vmatprep.subr.bf16.mxu1 %v3447_v27  ;;  %v3538_v23 = vld [vmem:[%s4699_s1 + $0x614] ss:$8 sps:$4 sm:$0xff]   ;;  %v3536_v27 = vld [vmem:[%s4699_s1 + $0x610] ss:$8 sps:$4 sm:$0xff]  }
  0x5a   : > { %1878 = vmatprep.subr.bf16.mxu0 %v3450_v28  ;;  %832 = vmatprep.mubr.bf16.mxu1 %v3523_v47  ;;  %v3546_v28 = vld [vmem:[%s4699_s1 + $0x24] ss:$8 sps:$4 sm:$0xff]   ;;  %v3564_v47 = vld [vmem:[%s4699_s1 + $0x640] ss:$8 sps:$4 sm:$0xff]  }
  0x5b   : > { %1900 = vmatprep.mubr.bf16.mxu0 %v3526_v49  ;;  %v3572_v49 = vld [vmem:[%s4699_s1 + $0x654] ss:$8 sps:$4 sm:$0xff]  }
  0x5c   : > { %811 = vmatpush1.bf16.msra.mxu1 %v3445_v30  ;;  %v3550_v30 = vld [vmem:[%s4699_s1 + $0x624] ss:$8 sps:$4 sm:$0xff]  }
  0x5d   : > { %1879 = vmatpush1.bf16.msra.mxu0 %v3448_v31  ;;  %812 = vmatprep.subr.bf16.mxu1 %v3453_v32  ;;  %v3544_v31 = vld [vmem:[%s4699_s1 + $0x20] ss:$8 sps:$4 sm:$0xff]  }
  0x5e   : > { %1880 = vmatprep.subr.bf16.mxu0 %v3456_v33  ;;  %v3547_v32 = vld [vmem:[%s3968_s17 + $0xc8] ss:$16 sps:$4 sm:$0xff]  }
  0x5f   : > { %v3548_v33 = vld [vmem:[%s4699_s1 + $0x620] ss:$8 sps:$4 sm:$0xff]  }
  0x60   : > { %813 = vmatpush1.bf16.msra.mxu1 %v3451_v40  ;;  %v3551_v40 = vld [vmem:[%s4699_s1 + $0x30] ss:$8 sps:$4 sm:$0xff]  }
  0x61   : > { %1881 = vmatpush1.bf16.msra.mxu0 %v3454_v41  ;;  %814 = vmatprep.subr.bf16.mxu1 %v3459_v42  ;;  %v3554_v41 = vld [vmem:[%s4699_s1 + $0x630] ss:$8 sps:$4 sm:$0xff]   ;;  %v3562_v42 = vld [vmem:[%s4699_s1 + $0x44] ss:$8 sps:$4 sm:$0xff]  }
  0x62   : > { %1882 = vmatprep.subr.bf16.mxu0 %v3462_v43  ;;  %v3566_v43 = vld [vmem:[%s4699_s1 + $0x644] ss:$8 sps:$4 sm:$0xff]  }
  0x64   : > { %815 = vmatpush1.bf16.msra.mxu1 %v3457_v44  ;;  %v2777_v44 = vcombine.low %v2702_v34, %v2702_v34  ;;  %v3639_v34 = vld [vmem:[%s3968_s17 + $0xf0] ss:$16 sps:$4 sm:$0xff]  }
  0x65   : > { %1883 = vmatpush1.bf16.msra.mxu0 %v3460_v45  ;;  %816 = vmatprep.subr.bf16.mxu1 %v3465_v46  ;;  %v3560_v45 = vld [vmem:[%s4699_s1 + $0x40] ss:$8 sps:$4 sm:$0xff]   ;;  %v3003_v46 = vcombine.low %v2928_v35, %v2928_v35 }
  0x66   : > { %1884 = vmatprep.subr.bf16.mxu0 %v3468_v48  ;;  %v3569_v48 = vld [vmem:[%s4699_s1 + $0x54] ss:$8 sps:$4 sm:$0xff]   ;;  %v3642_v35 = vld [vmem:[%s4699_s1 + $0x700] ss:$8 sps:$4 sm:$0xff]  }
  0x68   : > { %817 = vmatpush1.bf16.msra.mxu1 %v3463_v50  ;;  %v3635_v50 = vld [vmem:[%s3968_s17 + $0x4] ss:$16 sps:$4 sm:$0xff]  }
  0x69   : > { %1885 = vmatpush1.bf16.msra.mxu0 %v3466_v51  ;;  %818 = vmatprep.subr.bf16.mxu1 %v3471_v52  ;;  %v3641_v51 = vld [vmem:[%s3968_s17 + $0xf4] ss:$16 sps:$4 sm:$0xff]   ;;  %v3567_v52 = vld [vmem:[%s4699_s1 + $0x50] ss:$8 sps:$4 sm:$0xff]  }
  0x6a   : > { %1886 = vmatprep.subr.bf16.mxu0 %v3474_v53  ;;  %v3570_v53 = vld [vmem:[%s4699_s1 + $0x650] ss:$8 sps:$4 sm:$0xff]  }
  0x6c   : > { %819 = vmatpush1.bf16.msra.mxu1 %v3469_v54  ;;  %v3575_v54 = vld [vmem:[%s4699_s1 + $0x64] ss:$8 sps:$4 sm:$0xff]  }
  0x6d   : > { %1887 = vmatpush1.bf16.msra.mxu0 %v3472_v55  ;;  %820 = vmatprep.subr.bf16.mxu1 %v3477_v56  ;;  %v3578_v55 = vld [vmem:[%s4699_s1 + $0x664] ss:$8 sps:$4 sm:$0xff]   ;;  %v3573_v56 = vld [vmem:[%s4699_s1 + $0x60] ss:$8 sps:$4 sm:$0xff]  }
  0x6e   : > { %1888 = vmatprep.subr.bf16.mxu0 %v3480_v57  ;;  %v3576_v57 = vld [vmem:[%s4699_s1 + $0x660] ss:$8 sps:$4 sm:$0xff]  }
  0x70   : > { %821 = vmatpush1.bf16.msra.mxu1 %v3475_v58  ;;  %v3581_v58 = vld [vmem:[%s4699_s1 + $0x74] ss:$8 sps:$4 sm:$0xff]  }
  0x71   : > { %1889 = vmatpush1.bf16.msra.mxu0 %v3478_v59  ;;  %822 = vmatprep.subr.bf16.mxu1 %v3483_v60  ;;  %v3584_v59 = vld [vmem:[%s4699_s1 + $0x674] ss:$8 sps:$4 sm:$0xff]   ;;  %v3579_v60 = vld [vmem:[%s4699_s1 + $0x70] ss:$8 sps:$4 sm:$0xff]  }
  0x72   : > { %1890 = vmatprep.subr.bf16.mxu0 %v3486_v61  ;;  %v3582_v61 = vld [vmem:[%s4699_s1 + $0x670] ss:$8 sps:$4 sm:$0xff]  }
  0x74   : > { %823 = vmatpush1.bf16.msra.mxu1 %v3481_v62  ;;  %v3587_v62 = vld [vmem:[%s4699_s1 + $0x84] ss:$8 sps:$4 sm:$0xff]  }
  0x75   : > { %1891 = vmatpush1.bf16.msra.mxu0 %v3484_v63  ;;  %824 = vmatprep.subr.bf16.mxu1 %v3494_v0  ;;  %v3590_v63 = vld [vmem:[%s4699_s1 + $0x684] ss:$8 sps:$4 sm:$0xff]   ;;  %v3585_v0 = vld [vmem:[%s4699_s1 + $0x80] ss:$8 sps:$4 sm:$0xff]  }
  0x76   : > { %1892 = vmatprep.subr.bf16.mxu0 %v3498_v1  ;;  %v3588_v1 = vld [vmem:[%s4699_s1 + $0x680] ss:$8 sps:$4 sm:$0xff]  }
  0x78   : > { %825 = vmatpush1.bf16.msra.mxu1 %v3492_v2  ;;  %v3593_v2 = vld [vmem:[%s4699_s1 + $0x94] ss:$8 sps:$4 sm:$0xff]  }
  0x79   : > { %1893 = vmatpush1.bf16.msra.mxu0 %v3496_v3  ;;  %826 = vmatprep.subr.bf16.mxu1 %v3501_v4  ;;  %v3596_v3 = vld [vmem:[%s4699_s1 + $0x694] ss:$8 sps:$4 sm:$0xff]   ;;  %v3591_v4 = vld [vmem:[%s4699_s1 + $0x90] ss:$8 sps:$4 sm:$0xff]  }
  0x7a   : > { %1894 = vmatprep.subr.bf16.mxu0 %v3504_v5  ;;  %v3594_v5 = vld [vmem:[%s4699_s1 + $0x690] ss:$8 sps:$4 sm:$0xff]  }
  0x7c   : > { %827 = vmatpush1.bf16.msra.mxu1 %v3499_v6  ;;  %v3599_v6 = vld [vmem:[%s4699_s1 + $0xa4] ss:$8 sps:$4 sm:$0xff]  }
  0x7d   : > { %1895 = vmatpush1.bf16.msra.mxu0 %v3502_v7  ;;  %828 = vmatprep.subr.bf16.mxu1 %v3510_v8  ;;  %v3602_v7 = vld [vmem:[%s4699_s1 + $0x6a4] ss:$8 sps:$4 sm:$0xff]   ;;  %v3597_v8 = vld [vmem:[%s4699_s1 + $0xa0] ss:$8 sps:$4 sm:$0xff]  }
  0x7e   : > { %1896 = vmatprep.subr.bf16.mxu0 %v3514_v9  ;;  %v3600_v9 = vld [vmem:[%s4699_s1 + $0x6a0] ss:$8 sps:$4 sm:$0xff]  }
  0x80   : > { %829 = vmatpush1.bf16.msra.mxu1 %v3508_v10  ;;  %v3605_v10 = vld [vmem:[%s4699_s1 + $0xb4] ss:$8 sps:$4 sm:$0xff]  }
  0x81   : > { %1897 = vmatpush1.bf16.msra.mxu0 %v3512_v11  ;;  %830 = vmatprep.subr.bf16.mxu1 %v3517_v12  ;;  %v3608_v11 = vld [vmem:[%s4699_s1 + $0x6b4] ss:$8 sps:$4 sm:$0xff]   ;;  %v3603_v12 = vld [vmem:[%s4699_s1 + $0xb0] ss:$8 sps:$4 sm:$0xff]  }
  0x82   : > { %1898 = vmatprep.subr.bf16.mxu0 %v3520_v13  ;;  %v3606_v13 = vld [vmem:[%s4699_s1 + $0x6b0] ss:$8 sps:$4 sm:$0xff]  }
  0x84   : > { %831 = vmatpush1.bf16.msra.mxu1 %v3515_v14  ;;  %v3611_v14 = vld [vmem:[%s4699_s1 + $0xc4] ss:$8 sps:$4 sm:$0xff]  }
  0x85   : > { %1899 = vmatpush1.bf16.msra.mxu0 %v3518_v15  ;;  %1235 = vmatprep.subr.bf16.mxu1 %v3529_v16  ;;  %v3614_v15 = vld [vmem:[%s4699_s1 + $0x6c4] ss:$8 sps:$4 sm:$0xff]   ;;  %v3609_v16 = vld [vmem:[%s4699_s1 + $0xc0] ss:$8 sps:$4 sm:$0xff]  }
  0x86   : > { %2389 = vmatprep.subr.bf16.mxu0 %v3532_v17  ;;  %v3612_v17 = vld [vmem:[%s4699_s1 + $0x6c0] ss:$8 sps:$4 sm:$0xff]  }
  0x87   : > { %833 = vmatmul.mubr.bf16.vlgmr.msra.gmra.mrb[0].mxu1 %v3521_v18  ;;  %v3617_v18 = vld [vmem:[%s4699_s1 + $0xd4] ss:$8 sps:$4 sm:$0xff]  }
  0x88   : > { %1901 = vmatmul.mubr.bf16.vlgmr.msra.gmra.mrb[0].mxu0 %v3524_v19  ;;  %1236 = vmatpush1.bf16.msra.mxu1 %v3527_v20  ;;  %v3620_v19 = vld [vmem:[%s4699_s1 + $0x6d4] ss:$8 sps:$4 sm:$0xff]   ;;  %v3615_v20 = vld [vmem:[%s4699_s1 + $0xd0] ss:$8 sps:$4 sm:$0xff]  }
  0x89   : > { %2390 = vmatpush1.bf16.msra.mxu0 %v3530_v21  ;;  %1237 = vmatprep.subr.bf16.mxu1 %v3535_v22  ;;  %v3618_v21 = vld [vmem:[%s4699_s1 + $0x6d0] ss:$8 sps:$4 sm:$0xff]   ;;  %v3623_v22 = vld [vmem:[%s4699_s1 + $0xe4] ss:$8 sps:$4 sm:$0xff]  }
  0x8a   : > { %2391 = vmatprep.subr.bf16.mxu0 %v3538_v23  ;;  %842 = vmatprep.mubr.bf16.mxu1 %v3539_v24  ;;  %v3626_v23 = vld [vmem:[%s4699_s1 + $0x6e4] ss:$8 sps:$4 sm:$0xff]   ;;  %v3621_v24 = vld [vmem:[%s4699_s1 + $0xe0] ss:$8 sps:$4 sm:$0xff]  }
  0x8b   : > { %1910 = vmatprep.mubr.bf16.mxu0 %v3541_v25  ;;  %v3624_v25 = vld [vmem:[%s4699_s1 + $0x6e0] ss:$8 sps:$4 sm:$0xff]  }
  0x8c   : > { %1238 = vmatpush1.bf16.msra.mxu1 %v3533_v26  ;;  %v3629_v26 = vld [vmem:[%s4699_s1 + $0xf4] ss:$8 sps:$4 sm:$0xff]  }
  0x8d   : > { %2392 = vmatpush1.bf16.msra.mxu0 %v3536_v27  ;;  %1239 = vmatprep.subr.bf16.mxu1 %v3546_v28  ;;  %v3632_v27 = vld [vmem:[%s4699_s1 + $0x6f4] ss:$8 sps:$4 sm:$0xff]   ;;  %v3627_v28 = vld [vmem:[%s4699_s1 + $0xf0] ss:$8 sps:$4 sm:$0xff]  }
  0x8e   : > { %2393 = vmatprep.subr.bf16.mxu0 %v3550_v30  ;;  %v3633_v30 = vld [vmem:[%s3968_s17] ss:$16 sps:$4 sm:$0xff]  }
  0x8f   : > { %843 = vmatmul.mubr.bf16.gmra.mrb[4].mxu1 %v3543_v29  ;;  %v3630_v29 = vld [vmem:[%s4699_s1 + $0x6f0] ss:$8 sps:$4 sm:$0xff]  }
  0x90   : > { %1911 = vmatmul.mubr.bf16.gmra.mrb[4].mxu0 %v3547_v32  ;;  %1240 = vmatpush1.bf16.msra.mxu1 %v3544_v31  ;;  %v3638_v31 = vld [vmem:[%s4699_s1 + $0x104] ss:$8 sps:$4 sm:$0xff]  }
  0x91   : > { %2394 = vmatpush1.bf16.msra.mxu0 %v3548_v33  ;;  %1241 = vmatprep.subr.bf16.mxu1 %v3553_v36  ;;  %v3644_v32 = vld [vmem:[%s4699_s1 + $0x704] ss:$8 sps:$4 sm:$0xff]   ;;  %v3636_v33 = vld [vmem:[%s4699_s1 + $0x100] ss:$8 sps:$4 sm:$0xff]   ;;  %v3647_v36 = vld [vmem:[%s4699_s1 + $0x114] ss:$8 sps:$4 sm:$0xff]  }
  0x92   : > { %2395 = vmatprep.subr.bf16.mxu0 %v3556_v37  ;;  %852 = vmatprep.mubr.bf16.mxu1 %v2778_v38  ;;  %v3650_v37 = vld [vmem:[%s4699_s1 + $0x714] ss:$8 sps:$4 sm:$0xff]  }
  0x93   : > { %1920 = vmatprep.mubr.bf16.mxu0 %v3004_v39  ;;  %v3651_v38 = vld [vmem:[%s3968_s17 + $0x24] ss:$16 sps:$4 sm:$0xff]  }
  0x94   : > { %1242 = vmatpush1.bf16.msra.mxu1 %v3551_v40  ;;  %v3716_v39 = vld [vmem:[%s3968_s17 + $0x114] ss:$16 sps:$4 sm:$0xff]   ;;  %v3645_v40 = vld [vmem:[%s4699_s1 + $0x110] ss:$8 sps:$4 sm:$0xff]  }
  0x95   : > { %2396 = vmatpush1.bf16.msra.mxu0 %v3554_v41  ;;  %1243 = vmatprep.subr.bf16.mxu1 %v3562_v42  ;;  %v3648_v41 = vld [vmem:[%s4699_s1 + $0x710] ss:$8 sps:$4 sm:$0xff]   ;;  %v3656_v42 = vld [vmem:[%s4699_s1 + $0x124] ss:$8 sps:$4 sm:$0xff]  }
  0x96   : > { %2397 = vmatprep.subr.bf16.mxu0 %v3566_v43  ;;  %v3659_v43 = vld [vmem:[%s4699_s1 + $0x724] ss:$8 sps:$4 sm:$0xff]  }
  0x97   : > { %853 = vmatmul.mubr.bf16.gmra.mrb[12].mxu1 %v2777_v44  ;;  %v3653_v44 = vld [vmem:[%s3968_s17 + $0x20] ss:$16 sps:$4 sm:$0xff]  }
  0x98   : > { %1921 = vmatmul.mubr.bf16.gmra.mrb[12].mxu0 %v3003_v46  ;;  %1244 = vmatpush1.bf16.msra.mxu1 %v3560_v45  ;;  %v223_v45 = vld [vmem:[%s3968_s17 + $0x40] sm:$0x33] }
  0x99   : > { %2398 = vmatpush1.bf16.msra.mxu0 %v3564_v47  ;;  %1245 = vmatprep.subr.bf16.mxu1 %v3569_v48  ;;  %v3718_v46 = vld [vmem:[%s3968_s17 + $0x110] ss:$16 sps:$4 sm:$0xff]  }
  0x9a   : > { %2399 = vmatprep.subr.bf16.mxu0 %v3572_v49  ;;  %1267 = vmatprep.mubr.bf16.mxu1 %v3635_v50  ;;  %v3077_v47 = vld [vmem:[%s3968_s17 + $0x130] sm:$0x33]  ;;  %v3654_v48 = vld [vmem:[%s4699_s1 + $0x120] ss:$8 sps:$4 sm:$0xff]  }
  0x9b   : > { %2421 = vmatprep.mubr.bf16.mxu0 %v3641_v51  ;;  %v3657_v49 = vld [vmem:[%s4699_s1 + $0x720] ss:$8 sps:$4 sm:$0xff]   ;;  %v3662_v50 = vld [vmem:[%s4699_s1 + $0x134] ss:$8 sps:$4 sm:$0xff]  }
  0x9c   : > { %1246 = vmatpush1.bf16.msra.mxu1 %v3567_v52  ;;  %v3665_v51 = vld [vmem:[%s4699_s1 + $0x734] ss:$8 sps:$4 sm:$0xff]   ;;  %v2852_v52 = vcombine.high %v223_v45, %v223_v45 }
  0x9d   : > { %2400 = vmatpush1.bf16.msra.mxu0 %v3570_v53  ;;  %1247 = vmatprep.subr.bf16.mxu1 %v3575_v54  ;;  %v3152_v53 = vcombine.high %v3077_v47, %v3077_v47  ;;  %v3660_v54 = vld [vmem:[%s4699_s1 + $0x130] ss:$8 sps:$4 sm:$0xff]  }
  0x9e   : > { %2401 = vmatprep.subr.bf16.mxu0 %v3578_v55  ;;  %v3663_v55 = vld [vmem:[%s4699_s1 + $0x730] ss:$8 sps:$4 sm:$0xff]  }
  0xa0   : > { %1248 = vmatpush1.bf16.msra.mxu1 %v3573_v56  ;;  %v3670_v56 = vld [vmem:[%s4699_s1 + $0x144] ss:$8 sps:$4 sm:$0xff]  }
  0xa1   : > { %2402 = vmatpush1.bf16.msra.mxu0 %v3576_v57  ;;  %1249 = vmatprep.subr.bf16.mxu1 %v3581_v58  ;;  %v3673_v57 = vld [vmem:[%s4699_s1 + $0x744] ss:$8 sps:$4 sm:$0xff]   ;;  %v2851_v58 = vcombine.low %v223_v45, %v223_v45  ;;  %v3748_v45 = vld [vmem:[%s3968_s17 + $0xf8] ss:$16 sps:$4 sm:$0xff]  }
  0xa2   : > { %2403 = vmatprep.subr.bf16.mxu0 %v3584_v59  ;;  %v3151_v59 = vcombine.low %v3077_v47, %v3077_v47  ;;  %v3753_v47 = vld [vmem:[%s3968_s17 + $0x11c] ss:$16 sps:$4 sm:$0xff]  }
  0xa4   : > { %1250 = vmatpush1.bf16.msra.mxu1 %v3579_v60  ;;  %v3668_v60 = vld [vmem:[%s4699_s1 + $0x140] ss:$8 sps:$4 sm:$0xff]  }
  0xa5   : > { %2404 = vmatpush1.bf16.msra.mxu0 %v3582_v61  ;;  %1251 = vmatprep.subr.bf16.mxu1 %v3587_v62  ;;  %v3671_v61 = vld [vmem:[%s4699_s1 + $0x740] ss:$8 sps:$4 sm:$0xff]   ;;  %v3676_v62 = vld [vmem:[%s4699_s1 + $0x154] ss:$8 sps:$4 sm:$0xff]  }
  0xa6   : > { %2405 = vmatprep.subr.bf16.mxu0 %v3590_v63  ;;  %v3679_v63 = vld [vmem:[%s4699_s1 + $0x754] ss:$8 sps:$4 sm:$0xff]  }
  0xa8   : > { %1252 = vmatpush1.bf16.msra.mxu1 %v3585_v0  ;;  %v3747_v0 = vld [vmem:[%s3968_s17 + $0xc] ss:$16 sps:$4 sm:$0xff]  }
  0xa9   : > { %2406 = vmatpush1.bf16.msra.mxu0 %v3588_v1  ;;  %1253 = vmatprep.subr.bf16.mxu1 %v3593_v2  ;;  %v3750_v1 = vld [vmem:[%s3968_s17 + $0xfc] ss:$16 sps:$4 sm:$0xff]   ;;  %v3674_v2 = vld [vmem:[%s4699_s1 + $0x150] ss:$8 sps:$4 sm:$0xff]  }
  0xaa   : > { %2407 = vmatprep.subr.bf16.mxu0 %v3596_v3  ;;  %v3677_v3 = vld [vmem:[%s4699_s1 + $0x750] ss:$8 sps:$4 sm:$0xff]  }
  0xac   : > { %1254 = vmatpush1.bf16.msra.mxu1 %v3591_v4  ;;  %v3682_v4 = vld [vmem:[%s4699_s1 + $0x164] ss:$8 sps:$4 sm:$0xff]  }
  0xad   : > { %2408 = vmatpush1.bf16.msra.mxu0 %v3594_v5  ;;  %1255 = vmatprep.subr.bf16.mxu1 %v3599_v6  ;;  %v3685_v5 = vld [vmem:[%s4699_s1 + $0x764] ss:$8 sps:$4 sm:$0xff]   ;;  %v3680_v6 = vld [vmem:[%s4699_s1 + $0x160] ss:$8 sps:$4 sm:$0xff]  }
  0xae   : > { %2409 = vmatprep.subr.bf16.mxu0 %v3602_v7  ;;  %v3683_v7 = vld [vmem:[%s4699_s1 + $0x760] ss:$8 sps:$4 sm:$0xff]  }
  0xb0   : > { %1256 = vmatpush1.bf16.msra.mxu1 %v3597_v8  ;;  %v3688_v8 = vld [vmem:[%s4699_s1 + $0x174] ss:$8 sps:$4 sm:$0xff]  }
  0xb1   : > { %2410 = vmatpush1.bf16.msra.mxu0 %v3600_v9  ;;  %1257 = vmatprep.subr.bf16.mxu1 %v3605_v10  ;;  %v3691_v9 = vld [vmem:[%s4699_s1 + $0x774] ss:$8 sps:$4 sm:$0xff]   ;;  %v3686_v10 = vld [vmem:[%s4699_s1 + $0x170] ss:$8 sps:$4 sm:$0xff]  }
  0xb2   : > { %2411 = vmatprep.subr.bf16.mxu0 %v3608_v11  ;;  %v3689_v11 = vld [vmem:[%s4699_s1 + $0x770] ss:$8 sps:$4 sm:$0xff]  }
  0xb4   : > { %1258 = vmatpush1.bf16.msra.mxu1 %v3603_v12  ;;  %v3694_v12 = vld [vmem:[%s4699_s1 + $0x184] ss:$8 sps:$4 sm:$0xff]  }
  0xb5   : > { %2412 = vmatpush1.bf16.msra.mxu0 %v3606_v13  ;;  %1259 = vmatprep.subr.bf16.mxu1 %v3611_v14  ;;  %v3697_v13 = vld [vmem:[%s4699_s1 + $0x784] ss:$8 sps:$4 sm:$0xff]   ;;  %v3692_v14 = vld [vmem:[%s4699_s1 + $0x180] ss:$8 sps:$4 sm:$0xff]  }
  0xb6   : > { %2413 = vmatprep.subr.bf16.mxu0 %v3614_v15  ;;  %v3695_v15 = vld [vmem:[%s4699_s1 + $0x780] ss:$8 sps:$4 sm:$0xff]  }
  0xb8   : > { %1260 = vmatpush1.bf16.msra.mxu1 %v3609_v16  ;;  %v3700_v16 = vld [vmem:[%s4699_s1 + $0x194] ss:$8 sps:$4 sm:$0xff]  }
  0xb9   : > { %2414 = vmatpush1.bf16.msra.mxu0 %v3612_v17  ;;  %1261 = vmatprep.subr.bf16.mxu1 %v3617_v18  ;;  %v3703_v17 = vld [vmem:[%s4699_s1 + $0x794] ss:$8 sps:$4 sm:$0xff]   ;;  %v3698_v18 = vld [vmem:[%s4699_s1 + $0x190] ss:$8 sps:$4 sm:$0xff]  }
  0xba   : > { %2415 = vmatprep.subr.bf16.mxu0 %v3620_v19  ;;  %v3701_v19 = vld [vmem:[%s4699_s1 + $0x790] ss:$8 sps:$4 sm:$0xff]  }
  0xbc   : > { %1262 = vmatpush1.bf16.msra.mxu1 %v3615_v20  ;;  %v3706_v20 = vld [vmem:[%s4699_s1 + $0x1a4] ss:$8 sps:$4 sm:$0xff]  }
  0xbd   : > { %2416 = vmatpush1.bf16.msra.mxu0 %v3618_v21  ;;  %1263 = vmatprep.subr.bf16.mxu1 %v3623_v22  ;;  %v3709_v21 = vld [vmem:[%s4699_s1 + $0x7a4] ss:$8 sps:$4 sm:$0xff]   ;;  %v3704_v22 = vld [vmem:[%s4699_s1 + $0x1a0] ss:$8 sps:$4 sm:$0xff]  }
  0xbe   : > { %2417 = vmatprep.subr.bf16.mxu0 %v3626_v23  ;;  %v3707_v23 = vld [vmem:[%s4699_s1 + $0x7a0] ss:$8 sps:$4 sm:$0xff]  }
  0xc0   : > { %1264 = vmatpush1.bf16.msra.mxu1 %v3621_v24  ;;  %v3712_v24 = vld [vmem:[%s4699_s1 + $0x1b4] ss:$8 sps:$4 sm:$0xff]  }
  0xc1   : > { %2418 = vmatpush1.bf16.msra.mxu0 %v3624_v25  ;;  %1265 = vmatprep.subr.bf16.mxu1 %v3629_v26  ;;  %v3715_v25 = vld [vmem:[%s4699_s1 + $0x7b4] ss:$8 sps:$4 sm:$0xff]   ;;  %v3710_v26 = vld [vmem:[%s4699_s1 + $0x1b0] ss:$8 sps:$4 sm:$0xff]  }
  0xc2   : > { %2419 = vmatprep.subr.bf16.mxu0 %v3632_v27  ;;  %v3713_v27 = vld [vmem:[%s4699_s1 + $0x7b0] ss:$8 sps:$4 sm:$0xff]  }
  0xc4   : > { %1266 = vmatpush1.bf16.msra.mxu1 %v3627_v28  ;;  %v3721_v28 = vld [vmem:[%s4699_s1 + $0x1c4] ss:$8 sps:$4 sm:$0xff]  }
  0xc5   : > { %2420 = vmatpush1.bf16.msra.mxu0 %v3630_v29  ;;  %1296 = vmatprep.subr.bf16.mxu1 %v3638_v31  ;;  %v3724_v29 = vld [vmem:[%s4699_s1 + $0x7c4] ss:$8 sps:$4 sm:$0xff]   ;;  %v3722_v31 = vld [vmem:[%s4699_s1 + $0x7c0] ss:$8 sps:$4 sm:$0xff]  }
  0xc6   : > { %2450 = vmatprep.subr.bf16.mxu0 %v3644_v32  ;;  %v3727_v32 = vld [vmem:[%s4699_s1 + $0x1d4] ss:$8 sps:$4 sm:$0xff]  }
  0xc7   : > { %1268 = vmatmul.mubr.bf16.vlgmr.msra.gmra.mrb[0].mxu1 %v3633_v30  ;;  %v3719_v30 = vld [vmem:[%s4699_s1 + $0x1c0] ss:$8 sps:$4 sm:$0xff]  }
  0xc8   : > { %2422 = vmatmul.mubr.bf16.vlgmr.msra.gmra.mrb[0].mxu0 %v3639_v34  ;;  %1297 = vmatpush1.bf16.msra.mxu1 %v3636_v33  ;;  %v3730_v33 = vld [vmem:[%s4699_s1 + $0x7d4] ss:$8 sps:$4 sm:$0xff]   ;;  %v3725_v34 = vld [vmem:[%s4699_s1 + $0x1d0] ss:$8 sps:$4 sm:$0xff]  }
  0xc9   : > { %2451 = vmatpush1.bf16.msra.mxu0 %v3642_v35  ;;  %1298 = vmatprep.subr.bf16.mxu1 %v3647_v36  ;;  %v3728_v35 = vld [vmem:[%s4699_s1 + $0x7d0] ss:$8 sps:$4 sm:$0xff]   ;;  %v3735_v36 = vld [vmem:[%s4699_s1 + $0x1e4] ss:$8 sps:$4 sm:$0xff]  }
  0xca   : > { %2452 = vmatprep.subr.bf16.mxu0 %v3650_v37  ;;  %1277 = vmatprep.mubr.bf16.mxu1 %v3651_v38  ;;  %v3738_v37 = vld [vmem:[%s4699_s1 + $0x7e4] ss:$8 sps:$4 sm:$0xff]   ;;  %v3733_v38 = vld [vmem:[%s4699_s1 + $0x1e0] ss:$8 sps:$4 sm:$0xff]  }
  0xcb   : > { %2431 = vmatprep.mubr.bf16.mxu0 %v3716_v39  ;;  %v3736_v39 = vld [vmem:[%s4699_s1 + $0x7e0] ss:$8 sps:$4 sm:$0xff]  }
  0xcc   : > { %1299 = vmatpush1.bf16.msra.mxu1 %v3645_v40  ;;  %v3741_v40 = vld [vmem:[%s4699_s1 + $0x1f4] ss:$8 sps:$4 sm:$0xff]  }
  0xcd   : > { %2453 = vmatpush1.bf16.msra.mxu0 %v3648_v41  ;;  %1300 = vmatprep.subr.bf16.mxu1 %v3656_v42  ;;  %v3744_v41 = vld [vmem:[%s4699_s1 + $0x7f4] ss:$8 sps:$4 sm:$0xff]   ;;  %v3739_v42 = vld [vmem:[%s4699_s1 + $0x1f0] ss:$8 sps:$4 sm:$0xff]  }
  0xce   : > { %2454 = vmatprep.subr.bf16.mxu0 %v3659_v43  ;;  %v3742_v43 = vld [vmem:[%s4699_s1 + $0x7f0] ss:$8 sps:$4 sm:$0xff]  }
  0xcf   : > { %1278 = vmatmul.mubr.bf16.gmra.mrb[4].mxu1 %v3653_v44  ;;  %v3745_v44 = vld [vmem:[%s3968_s17 + $0x8] ss:$16 sps:$4 sm:$0xff]  }
  0xd0   : > { %2432 = vmatmul.mubr.bf16.gmra.mrb[4].mxu0 %v3718_v46  ;;  %1301 = vmatpush1.bf16.msra.mxu1 %v3654_v48  ;;  %v3751_v46 = vld [vmem:[%s3968_s17 + $0x2c] ss:$16 sps:$4 sm:$0xff]  }
  0xd1   : > { %2455 = vmatpush1.bf16.msra.mxu0 %v3657_v49  ;;  %1302 = vmatprep.subr.bf16.mxu1 %v3662_v50  ;;  %v224_v48 = vld [vmem:[%s3968_s17 + $0x48] sm:$0x33]  ;;  %v3078_v49 = vld [vmem:[%s3968_s17 + $0x138] sm:$0x33] }
  0xd2   : > { %2456 = vmatprep.subr.bf16.mxu0 %v3665_v51  ;;  %1287 = vmatprep.mubr.bf16.mxu1 %v2852_v52  ;;  %v3755_v50 = vld [vmem:[%s3968_s17 + $0x28] ss:$16 sps:$4 sm:$0xff]   ;;  %v2854_v52 = vcombine.high %v224_v48, %v224_v48 }
  0xd3   : > { %2441 = vmatprep.mubr.bf16.mxu0 %v3152_v53  ;;  %v3756_v51 = vld [vmem:[%s3968_s17 + $0x118] ss:$16 sps:$4 sm:$0xff]   ;;  %v3154_v53 = vcombine.high %v3078_v49, %v3078_v49 }
  0xd4   : > { %1303 = vmatpush1.bf16.msra.mxu1 %v3660_v54  ;;  %v2853_v54 = vcombine.low %v224_v48, %v224_v48 }
  0xd5   : > { %2457 = vmatpush1.bf16.msra.mxu0 %v3663_v55  ;;  %1304 = vmatprep.subr.bf16.mxu1 %v3670_v56  ;;  %v3153_v55 = vcombine.low %v3078_v49, %v3078_v49 }
  0xd6   : > { %2458 = vmatprep.subr.bf16.mxu0 %v3673_v57 }
  0xd7   : > { %1288 = vmatmul.mubr.bf16.gmra.mrb[16].mxu1 %v2851_v58 }
  0xd8   : > { %2442 = vmatmul.mubr.bf16.gmra.mrb[16].mxu0 %v3151_v59  ;;  %1305 = vmatpush1.bf16.msra.mxu1 %v3668_v60 }
  0xd9   : > { %2459 = vmatpush1.bf16.msra.mxu0 %v3671_v61  ;;  %1306 = vmatprep.subr.bf16.mxu1 %v3676_v62 }
  0xda   : > { %2460 = vmatprep.subr.bf16.mxu0 %v3679_v63  ;;  %1328 = vmatprep.mubr.bf16.mxu1 %v3747_v0 }
  0xdb   : > { %2482 = vmatprep.mubr.bf16.mxu0 %v3750_v1 }
  0xdc   : > { %1307 = vmatpush1.bf16.msra.mxu1 %v3674_v2 }
  0xdd   : > { %2461 = vmatpush1.bf16.msra.mxu0 %v3677_v3  ;;  %1308 = vmatprep.subr.bf16.mxu1 %v3682_v4 }
  0xde   : > { %2462 = vmatprep.subr.bf16.mxu0 %v3685_v5 }
  0xe0   : > { %1309 = vmatpush1.bf16.msra.mxu1 %v3680_v6 }
  0xe1   : > { %2463 = vmatpush1.bf16.msra.mxu0 %v3683_v7  ;;  %1310 = vmatprep.subr.bf16.mxu1 %v3688_v8 }
  0xe2   : > { %2464 = vmatprep.subr.bf16.mxu0 %v3691_v9 }
  0xe4   : > { %1311 = vmatpush1.bf16.msra.mxu1 %v3686_v10 }
  0xe5   : > { %2465 = vmatpush1.bf16.msra.mxu0 %v3689_v11  ;;  %1312 = vmatprep.subr.bf16.mxu1 %v3694_v12 }
  0xe6   : > { %2466 = vmatprep.subr.bf16.mxu0 %v3697_v13 }
  0xe8   : > { %1313 = vmatpush1.bf16.msra.mxu1 %v3692_v14 }
  0xe9   : > { %2467 = vmatpush1.bf16.msra.mxu0 %v3695_v15  ;;  %1314 = vmatprep.subr.bf16.mxu1 %v3700_v16 }
  0xea   : > { %2468 = vmatprep.subr.bf16.mxu0 %v3703_v17 }
  0xec   : > { %1315 = vmatpush1.bf16.msra.mxu1 %v3698_v18 }
  0xed   : > { %2469 = vmatpush1.bf16.msra.mxu0 %v3701_v19  ;;  %1316 = vmatprep.subr.bf16.mxu1 %v3706_v20 }
  0xee   : > { %2470 = vmatprep.subr.bf16.mxu0 %v3709_v21 }
  0xf0   : > { %1317 = vmatpush1.bf16.msra.mxu1 %v3704_v22  ;;  %v2523_v22 = vlaneseq }
  0xf1   : > { %2471 = vmatpush1.bf16.msra.mxu0 %v3707_v23  ;;  %1318 = vmatprep.subr.bf16.mxu1 %v3712_v24 }
  0xf2   : > { %2472 = vmatprep.subr.bf16.mxu0 %v3715_v25  ;;  %v2524_v23 = vshrl.u32 %v2523_v22, 7  ;;  %v2521_v25 = vld [vmem:[%s4700_s2] sm:$0x3] }
  0xf4   : > { %1319 = vmatpush1.bf16.msra.mxu1 %v3710_v26  ;;  %v2525_v24 = vsub.s32 0, %v2524_v23  ;;  %v2529_v26 = vsub.s32 1, %v2524_v23 }
  0xf5   : > { %2473 = vmatpush1.bf16.msra.mxu0 %v3713_v27  ;;  %1320 = vmatprep.subr.bf16.mxu1 %v3721_v28 }
  0xf6   : > { %2474 = vmatprep.subr.bf16.mxu0 %v3724_v29  ;;  %v4658_v27 = vrot.slane %v2521_v25, %v2525_v24 }
  0xf8   : > { %1321 = vmatpush1.bf16.msra.mxu1 %v3719_v30  ;;  %v4660_v30 = vrot.slane %v2521_v25, %v2529_v26 }
  0xf9   : > { %2475 = vmatpush1.bf16.msra.mxu0 %v3722_v31  ;;  %1322 = vmatprep.subr.bf16.mxu1 %v3727_v32 }
  0xfa   : > { %2476 = vmatprep.subr.bf16.mxu0 %v3730_v33 }
  0xfc   : > { %1323 = vmatpush1.bf16.msra.mxu1 %v3725_v34 }
  0xfd   : > { %2477 = vmatpush1.bf16.msra.mxu0 %v3728_v35  ;;  %1324 = vmatprep.subr.bf16.mxu1 %v3735_v36 }
  0xfe   : > { %2478 = vmatprep.subr.bf16.mxu0 %v3738_v37 }
 0x100   : > { %1325 = vmatpush1.bf16.msra.mxu1 %v3733_v38 }
 0x101   : > { %2479 = vmatpush1.bf16.msra.mxu0 %v3736_v39  ;;  %1326 = vmatprep.subr.bf16.mxu1 %v3741_v40 }
 0x102   : > { %2480 = vmatprep.subr.bf16.mxu0 %v3744_v41 }
 0x104   : > { %1327 = vmatpush1.bf16.msra.mxu1 %v3739_v42 }
 0x105   : > { %2481 = vmatpush1.bf16.msra.mxu0 %v3742_v43 }
 0x107   : > { %1329 = vmatmul.mubr.bf16.vlgmr.msra.gmra.mrb[0].mxu1 %v3745_v44 }
 0x108   : > { %2483 = vmatmul.mubr.bf16.vlgmr.msra.gmra.mrb[0].mxu0 %v3748_v45  ;;  %1338 = vmatprep.mubr.bf16.mxu1 %v3751_v46 }
 0x109   : > { %2492 = vmatprep.mubr.bf16.mxu0 %v3753_v47 }
 0x10f   : > { %1339 = vmatmul.mubr.bf16.gmra.mrb[4].mxu1 %v3755_v50 }
 0x110   : > { %2493 = vmatmul.mubr.bf16.gmra.mrb[4].mxu0 %v3756_v51  ;;  %1348 = vmatprep.mubr.bf16.mxu1 %v2854_v52 }
 0x111   : > { %2502 = vmatprep.mubr.bf16.mxu0 %v3154_v53 }
 0x117   : > { %1349 = vmatmul.mubr.bf16.gmra.mrb[20].mxu1 %v2853_v54 }
 0x118   : > { %2503 = vmatmul.mubr.bf16.gmra.mrb[20].mxu0 %v3153_v55 }
 0x12a   : > { %v793_v56 = vpop.f32.mrb[8].mxu1 }
 0x12b   : > { %v1861_v57 = vpop.f32.mrb[8].mxu0  ;;  %v795_v58 = vpop.f32.mrb[9].mxu1 }
 0x12c   : > { %v1863_v59 = vpop.f32.mrb[9].mxu0  ;;  %v797_v60 = vpop.f32.mrb[10].mxu1 }
 0x12d   : > { %v1865_v61 = vpop.f32.mrb[10].mxu0  ;;  %v798_v62 = vpop.f32.mrb[11].mxu1 }
 0x12e   : > { %v1866_v63 = vpop.f32.mrb[11].mxu0 }
 0x16a   : > { %v854_v0 = vpop.f32.mrb[12].mxu1 }
 0x16b   : > { %v1922_v1 = vpop.f32.mrb[12].mxu0  ;;  %v855_v2 = vadd.f32 %v854_v0, %v793_v56  ;;  %v856_v4 = vpop.f32.mrb[13].mxu1 }
 0x16c   : > { %v4643_v3 = vadd.f32 %v1922_v1, %v1861_v57  ;;  %v1924_v5 = vpop.f32.mrb[13].mxu0  ;;  %v857_v6 = vadd.f32 %v856_v4, %v795_v58  ;;  %v858_v8 = vpop.f32.mrb[14].mxu1 }
 0x16d   : > { %v4645_v7 = vadd.f32 %v1924_v5, %v1863_v59  ;;  %v1926_v9 = vpop.f32.mrb[14].mxu0  ;;  %v859_v10 = vpop.f32.mrb[15].mxu1 }
 0x16e   : > { %v1927_v11 = vpop.f32.mrb[15].mxu0 }
 0x1aa   : > { %v1289_v12 = vpop.f32.mrb[16].mxu1 }
 0x1ab   : > { %v4647_v13 = vpop.f32.mrb[16].mxu0  ;;  %v4649_v14 = vadd.f32 %v1289_v12, %v855_v2  ;;  %v1291_v15 = vpop.f32.mrb[17].mxu1 }
 0x1ac   : > { %v4651_v16 = vpop.f32.mrb[17].mxu0  ;;  %v4653_v17 = vadd.f32 %v1291_v15, %v857_v6  ;;  %v1293_v18 = vpop.f32.mrb[18].mxu1 }
 0x1ad   : > { %v2447_v19 = vpop.f32.mrb[18].mxu0  ;;  %v1294_v20 = vpop.f32.mrb[19].mxu1 }
 0x1ae   : > { %v2448_v21 = vpop.f32.mrb[19].mxu0 }
 0x1da   : > { %v1330_v28 = vpop.f32.mrb[0].mxu1 }
 0x1db   : > { %v2484_v29 = vpop.f32.mrb[0].mxu0  ;;  %v1332_v32 = vpop.f32.mrb[1].mxu1 }
 0x1dc   : > { %v3231_v31 = vadd.f32 %v2484_v29, %v1330_v28  ;;  %v2486_v33 = vpop.f32.mrb[1].mxu0  ;;  %v1334_v35 = vpop.f32.mrb[2].mxu1 }
 0x1dd   : > { %v3232_v34 = vadd.f32 %v2486_v33, %v1332_v32  ;;  %v2488_v36 = vpop.f32.mrb[2].mxu0  ;;  %v1336_v39 = vpop.f32.mrb[3].mxu1 }
 0x1de   : > { %v2533_v37 = vadd.f32 %v3231_v31, %v4658_v27  ;;  %v3233_v38 = vadd.f32 %v2488_v36, %v1334_v35  ;;  %v2490_v40 = vpop.f32.mrb[3].mxu0 }
 0x1df   : > { %v2534_v41 = vadd.f32 %v3232_v34, %v4660_v30  ;;  %v3234_v42 = vadd.f32 %v2490_v40, %v1336_v39 }
 0x1e0   : > { %v2543_v43 = vmax.f32 %v2533_v37, 0.0  ;;  %v2535_v44 = vadd.f32 %v3233_v38, %v4658_v27 }
 0x1e1   : > { %v2544_v45 = vmax.f32 %v2534_v41, 0.0  ;;  %v2536_v46 = vadd.f32 %v3234_v42, %v4660_v30 }
 0x1e2   : > { %v2545_v47 = vmax.f32 %v2535_v44, 0.0  ;;  %v1340_v50 = vpop.f32.mrb[4].mxu1 }
 0x1e3   : > { %v3226_v48 = vpack.c.bf16 %v2544_v45, %v2543_v43  ;;  %v2546_v49 = vmax.f32 %v2536_v46, 0.0  ;;  %v2494_v51 = vpop.f32.mrb[4].mxu0  ;;  %v1342_v53 = vpop.f32.mrb[5].mxu1 }
 0x1e4   : > { %v3235_v52 = vadd.f32 %v2494_v51, %v1340_v50  ;;  %v2496_v54 = vpop.f32.mrb[5].mxu0  ;;  %v1344_v57 = vpop.f32.mrb[6].mxu1 }
 0x1e5   : > { %2585 = vst [vmem:[%s4670_s26] sm:$0xff] %v3226_v48  ;;  %v3227_v55 = vpack.c.bf16 %v2546_v49, %v2545_v47  ;;  %v3236_v56 = vadd.f32 %v2496_v54, %v1342_v53  ;;  %v2498_v58 = vpop.f32.mrb[6].mxu0  ;;  %v1346_v61 = vpop.f32.mrb[7].mxu1 }
 0x1e6   : > { %v2537_v59 = vadd.f32 %v3235_v52, %v4658_v27  ;;  %v3237_v60 = vadd.f32 %v2498_v58, %v1344_v57  ;;  %v2500_v62 = vpop.f32.mrb[7].mxu0 }
 0x1e7   : > { %2586 = vst [vmem:[%s4670_s26 + $0x8] sm:$0xff] %v3227_v55  ;;  %v2538_v63 = vadd.f32 %v3236_v56, %v4660_v30  ;;  %v3238_v0 = vadd.f32 %v2500_v62, %v1346_v61 }
 0x1e8   : > { %v2547_v1 = vmax.f32 %v2537_v59, 0.0  ;;  %v2539_v2 = vadd.f32 %v3237_v60, %v4658_v27 }
 0x1e9   : > { %v2548_v4 = vmax.f32 %v2538_v63, 0.0  ;;  %v2540_v5 = vadd.f32 %v3238_v0, %v4660_v30 }
 0x1ea   : > { %v2549_v6 = vmax.f32 %v2539_v2, 0.0  ;;  %v1350_v10 = vpop.f32.mrb[20].mxu1 }
 0x1eb   : > { %v3228_v8 = vpack.c.bf16 %v2548_v4, %v2547_v1  ;;  %v2550_v9 = vmax.f32 %v2540_v5, 0.0  ;;  %v2504_v11 = vpop.f32.mrb[20].mxu0  ;;  %v1351_v12 = vadd.f32 %v1350_v10, %v4649_v14  ;;  %v1352_v18 = vpop.f32.mrb[21].mxu1 }
 0x1ec   : > { %v2505_v15 = vadd.f32 %v2504_v11, %v4647_v13  ;;  %v2506_v19 = vpop.f32.mrb[21].mxu0  ;;  %v1353_v21 = vadd.f32 %v1352_v18, %v4653_v17  ;;  %v1354_v23 = vpop.f32.mrb[22].mxu1 }
 0x1ed   : > { %2587 = vst [vmem:[%s4670_s26 + $0x10] sm:$0xff] %v3228_v8  ;;  %v3229_v20 = vpack.c.bf16 %v2550_v9, %v2549_v6  ;;  %v2507_v22 = vadd.f32 %v2506_v19, %v4651_v16  ;;  %v2508_v24 = vpop.f32.mrb[22].mxu0  ;;  %v1937_v25 = vadd.f32 %v4643_v3, %v1351_v12  ;;  %v1355_v26 = vpop.f32.mrb[23].mxu1 }
 0x1ee   : > { %v2509_v28 = vpop.f32.mrb[23].mxu0  ;;  %v1938_v14 = vadd.f32 %v4645_v7, %v1353_v21 }
 0x1ef   : > { %2588 = vst [vmem:[%s4670_s26 + $0x18] sm:$0xff] %v3229_v20  ;;  %v2519_v29 = vadd.f32 %v2505_v15, %v1937_v25 }
 0x1f0   : > { %v2520_v13 = vadd.f32 %v2507_v22, %v1938_v14 }
 0x1f1   : > { %v2541_v31 = vadd.f32 %v4658_v27, %v2519_v29 }
 0x1f2   : > { %v2542_v32 = vadd.f32 %v4660_v30, %v2520_v13 }
 0x1f3   : > { %v2551_v33 = vmax.f32 %v2541_v31, 0.0 }
 0x1f4   : > { %v2552_v17 = vmax.f32 %v2542_v32, 0.0 }
 0x1f6   : > { %v3230_v34 = vpack.c.bf16 %v2552_v17, %v2551_v33 }
 0x1f8   : > { %2589 = vst [vmem:[%s4670_s26 + $0x20] sm:$0x33] %v3230_v34 }
 0x1f9 PF: > { %s13_s14 = sadd.s32 1, %s3783_s14   ;;  %s4702_s12 = smov %s3779_s13 }
 0x1fa   : > { %p10_p5 = scmp.ge.s32.totalorder %s13_s14, 4   ;;  %s4703_s13 = smov %s4705_s15 }
 0x1fc   :  { %12 = sbr.rel (!%p10_p5) target bundleno = 2 (0x2), region = 68 }

// kernel: feature_extractor_conv_forward.9
= control target key start
LH: loop header
LB: loop body
LE: loop exit
PB: predicated region body
PF: predicated region fallthrough
CT: control target
= control target key end

     0   :  { %v1197_v28 = vlaneseq  ;;  %v8599_v36 = vmov 1966171168   ;;  %s10522_s0 = inlined_call_operand.vmem [shape: bf16[2,9216], index: 0, kind: input, shape index: {}]   ;;  %s10523_s1 = inlined_call_operand.vmem [shape: bf16[9216,32], index: 1, kind: input, shape index: {}]   ;;  %s10524_s2 = inlined_call_operand.vmem [shape: f32[1,32], index: 2, kind: input, shape index: {}]   ;;  %s10525_s3 = inlined_call_operand.hbm [shape: f32[2,32], index: 3, kind: output, shape index: {}]  }
   0x1   :  { %v7990_v0 = vld [vmem:[%s10523_s1 + $0x40] sm:$0xff]   ;;  %v7994_v4 = vld [vmem:[%s10523_s1 + $0x48] sm:$0xff]   ;;  %v7998_v8 = vld [vmem:[%s10523_s1 + $0x50] sm:$0xff]   ;;  %v1195_v37 = vunpack.c.l.s4 %v8599_v36 }
   0x2   :  { %v7991_v1 = vld [vmem:[%s10523_s1 + $0xc0] sm:$0xff]   ;;  %7196 = vmatprep.subr.bf16.mxu0 %v7990_v0  ;;  %v7995_v5 = vld [vmem:[%s10523_s1 + $0xc8] sm:$0xff]   ;;  %v7999_v9 = vld [vmem:[%s10523_s1 + $0xd0] sm:$0xff]   ;;  %v1198_v33 = vshrl.u32 %v1197_v28, 7 }
   0x3   :  { %v7992_v2 = vld [vmem:[%s10523_s1] sm:$0xff]   ;;  %7218 = vmatprep.subr.bf16.mxu1 %v7991_v1  ;;  %v7996_v6 = vld [vmem:[%s10523_s1 + $0x8] sm:$0xff]   ;;  %v8000_v10 = vld [vmem:[%s10523_s1 + $0x10] sm:$0xff]   ;;  %v1196_v40 = vunpack.c.0.s8 %v1195_v37 }
   0x4   :  { %v7993_v3 = vld [vmem:[%s10523_s1 + $0x80] sm:$0xff]   ;;  %7197 = vmatpush3.bf16.msra.mxu0 %v7992_v2  ;;  %v7997_v7 = vld [vmem:[%s10523_s1 + $0x88] sm:$0xff]   ;;  %v8001_v11 = vld [vmem:[%s10523_s1 + $0x90] sm:$0xff]  }
   0x5   :  { %7219 = vmatpush3.bf16.msra.mxu1 %v7993_v3  ;;  %7198 = vmatprep.subr.bf16.mxu0 %v7994_v4  ;;  %v8002_v12 = vld [vmem:[%s10523_s1 + $0x58] sm:$0xff]   ;;  %v8006_v16 = vld [vmem:[%s10523_s1 + $0x60] sm:$0xff]   ;;  %v8010_v20 = vld [vmem:[%s10523_s1 + $0x68] sm:$0xff]   ;;  %v8726_v41 = vsub.s32 %v1196_v40, %v1198_v33 }
   0x6   :  { %7220 = vmatprep.subr.bf16.mxu1 %v7995_v5  ;;  %v8003_v13 = vld [vmem:[%s10523_s1 + $0xd8] sm:$0xff]   ;;  %v8007_v17 = vld [vmem:[%s10523_s1 + $0xe0] sm:$0xff]   ;;  %v8011_v21 = vld [vmem:[%s10523_s1 + $0xe8] sm:$0xff]  }
   0x7   :  { %v8004_v14 = vld [vmem:[%s10523_s1 + $0x18] sm:$0xff]   ;;  %v8008_v18 = vld [vmem:[%s10523_s1 + $0x20] sm:$0xff]   ;;  %v8012_v22 = vld [vmem:[%s10523_s1 + $0x28] sm:$0xff]  }
   0x8   :  { %7199 = vmatpush3.bf16.msra.mxu0 %v7996_v6  ;;  %v8005_v15 = vld [vmem:[%s10523_s1 + $0x98] sm:$0xff]   ;;  %v8009_v19 = vld [vmem:[%s10523_s1 + $0xa0] sm:$0xff]   ;;  %v8013_v23 = vld [vmem:[%s10523_s1 + $0xa8] sm:$0xff]  }
   0x9   :  { %7221 = vmatpush3.bf16.msra.mxu1 %v7997_v7  ;;  %7200 = vmatprep.subr.bf16.mxu0 %v7998_v8  ;;  %v8014_v24 = vld [vmem:[%s10523_s1 + $0x70] sm:$0xff]   ;;  %v8018_v29 = vld [vmem:[%s10523_s1 + $0x78] sm:$0xff]   ;;  %v16_v34 = vld [vmem:[%s10522_s0] sm:$0xff] }
   0xa   :  { %7222 = vmatprep.subr.bf16.mxu1 %v7999_v9  ;;  %v8015_v25 = vld [vmem:[%s10523_s1 + $0xf0] sm:$0xff]   ;;  %v8019_v30 = vld [vmem:[%s10523_s1 + $0xf8] sm:$0xff]   ;;  %v8023_v35 = vld [vmem:[%s10523_s1 + $0x140] sm:$0xff]   ;;  %v1193_v39 = vcombine.high %v16_v34, %v16_v34  ;;  %v1200_v42 = vrot.slane %v16_v34, %v8726_v41 }
   0xb   :  { %v8016_v26 = vld [vmem:[%s10523_s1 + $0x30] sm:$0xff]   ;;  %v8020_v31 = vld [vmem:[%s10523_s1 + $0x38] sm:$0xff]   ;;  %v8024_v38 = vld [vmem:[%s10523_s1 + $0x1c0] sm:$0xff]  }
   0xc   :  { %7201 = vmatpush3.bf16.msra.mxu0 %v8000_v10  ;;  %v8017_v27 = vld [vmem:[%s10523_s1 + $0xb0] sm:$0xff]   ;;  %v8021_v32 = vld [vmem:[%s10523_s1 + $0xb8] sm:$0xff]   ;;  %v8730_v43 = vrot.slane %v1193_v39, %v8726_v41  ;;  %v1208_v44 = vcombine.high %v1200_v42, %v1200_v42  ;;  %v1216_v45 = vrot.slane %v1200_v42, %v8726_v41  ;;  %v8025_v47 = vld [vmem:[%s10523_s1 + $0x100] sm:$0xff]  }
   0xd   :  { %7223 = vmatpush3.bf16.msra.mxu1 %v8001_v11  ;;  %7202 = vmatprep.subr.bf16.mxu0 %v8002_v12  ;;  %v8026_v49 = vld [vmem:[%s10523_s1 + $0x180] sm:$0xff]   ;;  %v8027_v52 = vld [vmem:[%s10523_s1 + $0x148] sm:$0xff]   ;;  %v8031_v58 = vld [vmem:[%s10523_s1 + $0x150] sm:$0xff]  }
   0xe   :  { %7224 = vmatprep.subr.bf16.mxu1 %v8003_v13  ;;  %v1209_v46 = vcombine.high %v8730_v43, %v8730_v43  ;;  %v1230_v48 = vrot.slane %v1208_v44, %v8726_v41  ;;  %v1238_v51 = vcombine.high %v1216_v45, %v1216_v45  ;;  %v8028_v54 = vld [vmem:[%s10523_s1 + $0x1c8] sm:$0xff]   ;;  %v8032_v59 = vld [vmem:[%s10523_s1 + $0x1d0] sm:$0xff]   ;;  %v8035_v62 = vld [vmem:[%s10523_s1 + $0x158] sm:$0xff]  }
   0xf   :  { %v8029_v55 = vld [vmem:[%s10523_s1 + $0x108] sm:$0xff]   ;;  %v8033_v60 = vld [vmem:[%s10523_s1 + $0x110] sm:$0xff]   ;;  %v8036_v63 = vld [vmem:[%s10523_s1 + $0x1d8] sm:$0xff]  }
  0x10   :  { %7203 = vmatpush3.bf16.msra.mxu0 %v8004_v14  ;;  %v1237_v50 = vrot.slane %v1209_v46, %v8726_v41  ;;  %5194 = vmatprep.mubr.bf16.mxu0 %v1230_v48  ;;  %v1240_v53 = vcombine.high %v1230_v48, %v1230_v48  ;;  %v8030_v57 = vld [vmem:[%s10523_s1 + $0x188] sm:$0xff]   ;;  %v8034_v61 = vld [vmem:[%s10523_s1 + $0x190] sm:$0xff]   ;;  %v8037_v0 = vld [vmem:[%s10523_s1 + $0x118] sm:$0xff]  }
  0x11   :  { %7225 = vmatpush3.bf16.msra.mxu1 %v8005_v15  ;;  %7204 = vmatprep.subr.bf16.mxu0 %v8006_v16  ;;  %v8038_v1 = vld [vmem:[%s10523_s1 + $0x198] sm:$0xff]   ;;  %v8039_v2 = vld [vmem:[%s10523_s1 + $0x160] sm:$0xff]   ;;  %v8043_v6 = vld [vmem:[%s10523_s1 + $0x168] sm:$0xff]  }
  0x12   :  { %7226 = vmatprep.subr.bf16.mxu1 %v8007_v17  ;;  %v1241_v56 = vcombine.high %v1237_v50, %v1237_v50  ;;  %5234 = vmatprep.mubr.bf16.mxu1 %v1240_v53  ;;  %v8040_v3 = vld [vmem:[%s10523_s1 + $0x1e0] sm:$0xff]   ;;  %v8044_v7 = vld [vmem:[%s10523_s1 + $0x1e8] sm:$0xff]   ;;  %v8047_v10 = vld [vmem:[%s10523_s1 + $0x170] sm:$0xff]  }
  0x13   :  { %v8041_v4 = vld [vmem:[%s10523_s1 + $0x120] sm:$0xff]   ;;  %v8045_v8 = vld [vmem:[%s10523_s1 + $0x128] sm:$0xff]   ;;  %v8048_v11 = vld [vmem:[%s10523_s1 + $0x1f0] sm:$0xff]  }
  0x14   :  { %7205 = vmatpush3.bf16.msra.mxu0 %v8008_v18  ;;  %v8042_v5 = vld [vmem:[%s10523_s1 + $0x1a0] sm:$0xff]   ;;  %v8046_v9 = vld [vmem:[%s10523_s1 + $0x1a8] sm:$0xff]   ;;  %v8049_v12 = vld [vmem:[%s10523_s1 + $0x130] sm:$0xff]   ;;  %v1223_v18 = vrot.slane %v8730_v43, %v8726_v41 }
  0x15   :  { %7227 = vmatpush3.bf16.msra.mxu1 %v8009_v19  ;;  %7206 = vmatprep.subr.bf16.mxu0 %v8010_v20  ;;  %v8050_v13 = vld [vmem:[%s10523_s1 + $0x1b0] sm:$0xff]   ;;  %v8051_v14 = vld [vmem:[%s10523_s1 + $0x178] sm:$0xff]   ;;  %v8055_v19 = vld [vmem:[%s10523_s1 + $0x240] sm:$0xff]  }
  0x16   :  { %7228 = vmatprep.subr.bf16.mxu1 %v8011_v21  ;;  %v8052_v15 = vld [vmem:[%s10523_s1 + $0x1f8] sm:$0xff]   ;;  %v8056_v20 = vld [vmem:[%s10523_s1 + $0x2c0] sm:$0xff]   ;;  %v8063_v28 = vld [vmem:[%s10523_s1 + $0x250] sm:$0xff]  }
  0x17   :  { %v8053_v16 = vld [vmem:[%s10523_s1 + $0x138] sm:$0xff]   ;;  %v8057_v21 = vld [vmem:[%s10523_s1 + $0x200] sm:$0xff]   ;;  %v8075_v40 = vld [vmem:[%s10523_s1 + $0x268] sm:$0xff]  }
  0x18   :  { %7207 = vmatpush3.bf16.msra.mxu0 %v8012_v22  ;;  %v8054_v17 = vld [vmem:[%s10523_s1 + $0x1b8] sm:$0xff]   ;;  %v8058_v22 = vld [vmem:[%s10523_s1 + $0x280] sm:$0xff]   ;;  %v8076_v42 = vld [vmem:[%s10523_s1 + $0x2e8] sm:$0xff]  }
  0x19   :  { %7229 = vmatpush3.bf16.msra.mxu1 %v8013_v23  ;;  %7208 = vmatprep.subr.bf16.mxu0 %v8014_v24  ;;  %v1239_v23 = vcombine.high %v1223_v18, %v1223_v18  ;;  %v8059_v24 = vld [vmem:[%s10523_s1 + $0x248] sm:$0xff]   ;;  %v8068_v33 = vld [vmem:[%s10523_s1 + $0x2d8] sm:$0xff]   ;;  %v8071_v36 = vld [vmem:[%s10523_s1 + $0x260] sm:$0xff]  }
  0x1a   :  { %7230 = vmatprep.subr.bf16.mxu1 %v8015_v25  ;;  %v8060_v25 = vld [vmem:[%s10523_s1 + $0x2c8] sm:$0xff]   ;;  %v8069_v34 = vld [vmem:[%s10523_s1 + $0x218] sm:$0xff]   ;;  %v8072_v37 = vld [vmem:[%s10523_s1 + $0x2e0] sm:$0xff]  }
  0x1b   :  { %v8074_v39 = vld [vmem:[%s10523_s1 + $0x2a0] sm:$0xff]   ;;  %v8077_v43 = vld [vmem:[%s10523_s1 + $0x228] sm:$0xff]  }
  0x1c   :  { %7209 = vmatpush3.bf16.msra.mxu0 %v8016_v26  ;;  %v8061_v26 = vld [vmem:[%s10523_s1 + $0x208] sm:$0xff]  }
  0x1d   :  { %7231 = vmatpush3.bf16.msra.mxu1 %v8017_v27  ;;  %7210 = vmatprep.subr.bf16.mxu0 %v8018_v29  ;;  %v8062_v27 = vld [vmem:[%s10523_s1 + $0x288] sm:$0xff]   ;;  %v8064_v29 = vld [vmem:[%s10523_s1 + $0x2d0] sm:$0xff]  }
  0x1e   :  { %7232 = vmatprep.subr.bf16.mxu1 %v8019_v30  ;;  %v8065_v30 = vld [vmem:[%s10523_s1 + $0x210] sm:$0xff]   ;;  %v8078_v44 = vld [vmem:[%s10523_s1 + $0x2a8] sm:$0xff]  }
  0x1f   :  { %v17_v46 = vld [vmem:[%s10522_s0 + $0x8] sm:$0xff] }
  0x20   :  { %7211 = vmatpush3.bf16.msra.mxu0 %v8020_v31  ;;  %v8066_v31 = vld [vmem:[%s10523_s1 + $0x290] sm:$0xff]   ;;  %v1249_v48 = vrot.slane %v17_v46, %v8726_v41 }
  0x21   :  { %7233 = vmatpush3.bf16.msra.mxu1 %v8021_v32  ;;  %7240 = vmatprep.subr.bf16.mxu0 %v8023_v35  ;;  %v8067_v32 = vld [vmem:[%s10523_s1 + $0x258] sm:$0xff]  }
  0x22   :  { %7262 = vmatprep.subr.bf16.mxu1 %v8024_v38  ;;  %v8070_v35 = vld [vmem:[%s10523_s1 + $0x298] sm:$0xff]   ;;  %v8073_v38 = vld [vmem:[%s10523_s1 + $0x220] sm:$0xff]  }
  0x23   :  { %5195 = vmatmul.mubr.bf16.vlgmr.msra.gmra.mrb[0].mxu0 %v1216_v45  ;;  %v8079_v45 = vld [vmem:[%s10523_s1 + $0x270] sm:$0xff]  }
  0x24   :  { %7241 = vmatpush3.bf16.msra.mxu0 %v8025_v47  ;;  %5235 = vmatmul.mubr.bf16.vlgmr.msra.gmra.mrb[0].mxu1 %v1238_v51  ;;  %v8080_v47 = vld [vmem:[%s10523_s1 + $0x2f0] sm:$0xff]  }
  0x25   :  { %7242 = vmatprep.subr.bf16.mxu0 %v8027_v52  ;;  %7263 = vmatpush3.bf16.msra.mxu1 %v8026_v49  ;;  %v1242_v49 = vcombine.high %v17_v46, %v17_v46  ;;  %v8082_v51 = vld [vmem:[%s10523_s1 + $0x2b0] sm:$0xff]   ;;  %v1257_v52 = vcombine.high %v1249_v48, %v1249_v48 }
  0x26   :  { %5274 = vmatprep.mubr.bf16.mxu0 %v1237_v50  ;;  %7264 = vmatprep.subr.bf16.mxu1 %v8028_v54  ;;  %v8081_v50 = vld [vmem:[%s10523_s1 + $0x230] sm:$0xff]   ;;  %v8083_v54 = vld [vmem:[%s10523_s1 + $0x278] sm:$0xff]  }
  0x27   :  { %5314 = vmatprep.mubr.bf16.mxu1 %v1241_v56  ;;  %v8918_v53 = vrot.slane %v1242_v49, %v8726_v41  ;;  %v1279_v56 = vrot.slane %v1257_v52, %v8726_v41  ;;  %v8130_v46 = vld [vmem:[%s10523_s1 + $0x410] sm:$0xff]   ;;  %v8133_v49 = vld [vmem:[%s10523_s1 + $0x4d8] sm:$0xff]   ;;  %v8136_v52 = vld [vmem:[%s10523_s1 + $0x460] sm:$0xff]  }
  0x28   :  { %7243 = vmatpush3.bf16.msra.mxu0 %v8029_v55  ;;  %v8084_v55 = vld [vmem:[%s10523_s1 + $0x2f8] sm:$0xff]  }
  0x29   :  { %7244 = vmatprep.subr.bf16.mxu0 %v8031_v58  ;;  %7265 = vmatpush3.bf16.msra.mxu1 %v8030_v57  ;;  %v1258_v57 = vcombine.high %v8918_v53, %v8918_v53  ;;  %v8085_v58 = vld [vmem:[%s10523_s1 + $0x238] sm:$0xff]  }
  0x2a   :  { %7266 = vmatprep.subr.bf16.mxu1 %v8032_v59  ;;  %v8086_v59 = vld [vmem:[%s10523_s1 + $0x2b8] sm:$0xff]  }
  0x2c   :  { %7245 = vmatpush3.bf16.msra.mxu0 %v8033_v60  ;;  %v1289_v60 = vcombine.high %v1279_v56, %v1279_v56 }
  0x2d   :  { %7246 = vmatprep.subr.bf16.mxu0 %v8035_v62  ;;  %7267 = vmatpush3.bf16.msra.mxu1 %v8034_v61  ;;  %v1265_v61 = vrot.slane %v1249_v48, %v8726_v41  ;;  %v8087_v62 = vld [vmem:[%s10523_s1 + $0x340] sm:$0xff]   ;;  %v8132_v48 = vld [vmem:[%s10523_s1 + $0x458] sm:$0xff]  }
  0x2e   :  { %7268 = vmatprep.subr.bf16.mxu1 %v8036_v63  ;;  %v8088_v63 = vld [vmem:[%s10523_s1 + $0x3c0] sm:$0xff]  }
  0x30   :  { %7247 = vmatpush3.bf16.msra.mxu0 %v8037_v0  ;;  %v1286_v0 = vrot.slane %v1258_v57, %v8726_v41  ;;  %v8141_v57 = vld [vmem:[%s10523_s1 + $0x4e8] sm:$0xff]  }
  0x31   :  { %7248 = vmatprep.subr.bf16.mxu0 %v8039_v2  ;;  %7269 = vmatpush3.bf16.msra.mxu1 %v8038_v1  ;;  %v8089_v1 = vld [vmem:[%s10523_s1 + $0x300] sm:$0xff]  }
  0x32   :  { %7270 = vmatprep.subr.bf16.mxu1 %v8040_v3  ;;  %v8090_v2 = vld [vmem:[%s10523_s1 + $0x380] sm:$0xff]   ;;  %v1287_v3 = vcombine.high %v1265_v61, %v1265_v61 }
  0x34   :  { %7249 = vmatpush3.bf16.msra.mxu0 %v8041_v4  ;;  %v8091_v4 = vld [vmem:[%s10523_s1 + $0x348] sm:$0xff]  }
  0x35   :  { %7250 = vmatprep.subr.bf16.mxu0 %v8043_v6  ;;  %7271 = vmatpush3.bf16.msra.mxu1 %v8042_v5  ;;  %v8092_v5 = vld [vmem:[%s10523_s1 + $0x3c8] sm:$0xff]   ;;  %v1290_v6 = vcombine.high %v1286_v0, %v1286_v0 }
  0x36   :  { %7272 = vmatprep.subr.bf16.mxu1 %v8044_v7  ;;  %v8093_v7 = vld [vmem:[%s10523_s1 + $0x308] sm:$0xff]  }
  0x38   :  { %7251 = vmatpush3.bf16.msra.mxu0 %v8045_v8  ;;  %v8094_v8 = vld [vmem:[%s10523_s1 + $0x388] sm:$0xff]  }
  0x39   :  { %7252 = vmatprep.subr.bf16.mxu0 %v8047_v10  ;;  %7273 = vmatpush3.bf16.msra.mxu1 %v8046_v9  ;;  %v8095_v9 = vld [vmem:[%s10523_s1 + $0x350] sm:$0xff]  }
  0x3a   :  { %7274 = vmatprep.subr.bf16.mxu1 %v8048_v11  ;;  %v8096_v10 = vld [vmem:[%s10523_s1 + $0x3d0] sm:$0xff]  }
  0x3b   :  { %v8097_v11 = vld [vmem:[%s10523_s1 + $0x310] sm:$0xff]  }
  0x3c   :  { %7253 = vmatpush3.bf16.msra.mxu0 %v8049_v12  ;;  %v8098_v12 = vld [vmem:[%s10523_s1 + $0x390] sm:$0xff]  }
  0x3d   :  { %7254 = vmatprep.subr.bf16.mxu0 %v8051_v14  ;;  %7275 = vmatpush3.bf16.msra.mxu1 %v8050_v13  ;;  %v8099_v13 = vld [vmem:[%s10523_s1 + $0x358] sm:$0xff]  }
  0x3e   :  { %7276 = vmatprep.subr.bf16.mxu1 %v8052_v15  ;;  %v8100_v14 = vld [vmem:[%s10523_s1 + $0x3d8] sm:$0xff]  }
  0x3f   :  { %v8101_v15 = vld [vmem:[%s10523_s1 + $0x318] sm:$0xff]  }
  0x40   :  { %7255 = vmatpush3.bf16.msra.mxu0 %v8053_v16  ;;  %v8102_v16 = vld [vmem:[%s10523_s1 + $0x398] sm:$0xff]  }
  0x41   :  { %7284 = vmatprep.subr.bf16.mxu0 %v8055_v19  ;;  %7277 = vmatpush3.bf16.msra.mxu1 %v8054_v17  ;;  %v8103_v17 = vld [vmem:[%s10523_s1 + $0x360] sm:$0xff]  }
  0x42   :  { %7306 = vmatprep.subr.bf16.mxu1 %v8056_v20  ;;  %v8105_v19 = vld [vmem:[%s10523_s1 + $0x320] sm:$0xff]  }
  0x43   :  { %5275 = vmatmul.mubr.bf16.vlgmr.msra.gmra.mrb[4].mxu0 %v1223_v18  ;;  %v8104_v18 = vld [vmem:[%s10523_s1 + $0x3e0] sm:$0xff]  }
  0x44   :  { %7285 = vmatpush3.bf16.msra.mxu0 %v8057_v21  ;;  %5315 = vmatmul.mubr.bf16.vlgmr.msra.gmra.mrb[4].mxu1 %v1239_v23  ;;  %v8106_v20 = vld [vmem:[%s10523_s1 + $0x3a0] sm:$0xff]   ;;  %v8107_v21 = vld [vmem:[%s10523_s1 + $0x368] sm:$0xff]  }
  0x45   :  { %7286 = vmatprep.subr.bf16.mxu0 %v8059_v24  ;;  %7307 = vmatpush3.bf16.msra.mxu1 %v8058_v22  ;;  %v8108_v22 = vld [vmem:[%s10523_s1 + $0x3e8] sm:$0xff]  }
  0x46   :  { %7308 = vmatprep.subr.bf16.mxu1 %v8060_v25  ;;  %5354 = vmatprep.mubr.bf16.mxu0 %v1279_v56  ;;  %v8109_v23 = vld [vmem:[%s10523_s1 + $0x328] sm:$0xff]   ;;  %v8111_v25 = vld [vmem:[%s10523_s1 + $0x370] sm:$0xff]  }
  0x47   :  { %5394 = vmatprep.mubr.bf16.mxu1 %v1289_v60  ;;  %v8110_v24 = vld [vmem:[%s10523_s1 + $0x3a8] sm:$0xff]   ;;  %v8144_v60 = vld [vmem:[%s10523_s1 + $0x470] sm:$0xff]  }
  0x48   :  { %7287 = vmatpush3.bf16.msra.mxu0 %v8061_v26  ;;  %v8112_v26 = vld [vmem:[%s10523_s1 + $0x3f0] sm:$0xff]   ;;  %v8140_v56 = vld [vmem:[%s10523_s1 + $0x468] sm:$0xff]  }
  0x49   :  { %7288 = vmatprep.subr.bf16.mxu0 %v8063_v28  ;;  %7309 = vmatpush3.bf16.msra.mxu1 %v8062_v27  ;;  %v8113_v27 = vld [vmem:[%s10523_s1 + $0x330] sm:$0xff]  }
  0x4a   :  { %7310 = vmatprep.subr.bf16.mxu1 %v8064_v29  ;;  %v8114_v28 = vld [vmem:[%s10523_s1 + $0x3b0] sm:$0xff]   ;;  %v8115_v29 = vld [vmem:[%s10523_s1 + $0x378] sm:$0xff]  }
  0x4c   :  { %7289 = vmatpush3.bf16.msra.mxu0 %v8065_v30  ;;  %v8116_v30 = vld [vmem:[%s10523_s1 + $0x3f8] sm:$0xff]  }
  0x4d   :  { %7290 = vmatprep.subr.bf16.mxu0 %v8067_v32  ;;  %7311 = vmatpush3.bf16.msra.mxu1 %v8066_v31  ;;  %v8117_v31 = vld [vmem:[%s10523_s1 + $0x338] sm:$0xff]  }
  0x4e   :  { %7312 = vmatprep.subr.bf16.mxu1 %v8068_v33  ;;  %v8118_v32 = vld [vmem:[%s10523_s1 + $0x3b8] sm:$0xff]   ;;  %v1272_v33 = vrot.slane %v8918_v53, %v8726_v41  ;;  %v8137_v53 = vld [vmem:[%s10523_s1 + $0x4e0] sm:$0xff]  }
  0x50   :  { %7291 = vmatpush3.bf16.msra.mxu0 %v8069_v34  ;;  %v8120_v34 = vld [vmem:[%s10523_s1 + $0x440] sm:$0xff]  }
  0x51   :  { %7292 = vmatprep.subr.bf16.mxu0 %v8071_v36  ;;  %7313 = vmatpush3.bf16.msra.mxu1 %v8070_v35  ;;  %v8121_v35 = vld [vmem:[%s10523_s1 + $0x4c0] sm:$0xff]  }
  0x52   :  { %7314 = vmatprep.subr.bf16.mxu1 %v8072_v37  ;;  %v8122_v36 = vld [vmem:[%s10523_s1 + $0x400] sm:$0xff]  }
  0x53   :  { %v8123_v37 = vld [vmem:[%s10523_s1 + $0x480] sm:$0xff]  }
  0x54   :  { %7293 = vmatpush3.bf16.msra.mxu0 %v8073_v38  ;;  %v1288_v38 = vcombine.high %v1272_v33, %v1272_v33 }
  0x55   :  { %7294 = vmatprep.subr.bf16.mxu0 %v8075_v40  ;;  %7315 = vmatpush3.bf16.msra.mxu1 %v8074_v39  ;;  %v8124_v39 = vld [vmem:[%s10523_s1 + $0x448] sm:$0xff]  }
  0x56   :  { %7316 = vmatprep.subr.bf16.mxu1 %v8076_v42  ;;  %v8125_v40 = vld [vmem:[%s10523_s1 + $0x4c8] sm:$0xff]  }
  0x57   :  { %v8126_v42 = vld [vmem:[%s10523_s1 + $0x408] sm:$0xff]  }
  0x58   :  { %7295 = vmatpush3.bf16.msra.mxu0 %v8077_v43  ;;  %v8127_v43 = vld [vmem:[%s10523_s1 + $0x488] sm:$0xff]  }
  0x59   :  { %7296 = vmatprep.subr.bf16.mxu0 %v8079_v45  ;;  %7317 = vmatpush3.bf16.msra.mxu1 %v8078_v44  ;;  %v8128_v44 = vld [vmem:[%s10523_s1 + $0x450] sm:$0xff]  }
  0x5a   :  { %7318 = vmatprep.subr.bf16.mxu1 %v8080_v47  ;;  %v8129_v45 = vld [vmem:[%s10523_s1 + $0x4d0] sm:$0xff]  }
  0x5b   :  { %v8131_v47 = vld [vmem:[%s10523_s1 + $0x490] sm:$0xff]  }
  0x5c   :  { %7297 = vmatpush3.bf16.msra.mxu0 %v8081_v50  ;;  %v8134_v50 = vld [vmem:[%s10523_s1 + $0x418] sm:$0xff]  }
  0x5d   :  { %7298 = vmatprep.subr.bf16.mxu0 %v8083_v54  ;;  %7319 = vmatpush3.bf16.msra.mxu1 %v8082_v51  ;;  %v8135_v51 = vld [vmem:[%s10523_s1 + $0x498] sm:$0xff]   ;;  %v8138_v54 = vld [vmem:[%s10523_s1 + $0x420] sm:$0xff]  }
  0x5e   :  { %7320 = vmatprep.subr.bf16.mxu1 %v8084_v55  ;;  %v8139_v55 = vld [vmem:[%s10523_s1 + $0x4a0] sm:$0xff]  }
  0x60   :  { %7299 = vmatpush3.bf16.msra.mxu0 %v8085_v58  ;;  %v8142_v58 = vld [vmem:[%s10523_s1 + $0x428] sm:$0xff]  }
  0x61   :  { %7328 = vmatprep.subr.bf16.mxu0 %v8087_v62  ;;  %7321 = vmatpush3.bf16.msra.mxu1 %v8086_v59  ;;  %v8143_v59 = vld [vmem:[%s10523_s1 + $0x4a8] sm:$0xff]   ;;  %v8145_v62 = vld [vmem:[%s10523_s1 + $0x4f0] sm:$0xff]  }
  0x62   :  { %7350 = vmatprep.subr.bf16.mxu1 %v8088_v63 }
  0x63   :  { %5355 = vmatmul.mubr.bf16.vlgmr.msra.gmra.mrb[8].mxu0 %v1265_v61  ;;  %v18_v61 = vld [vmem:[%s10522_s0 + $0x10] sm:$0xff] }
  0x64   :  { %7329 = vmatpush3.bf16.msra.mxu0 %v8089_v1  ;;  %5434 = vmatprep.mubr.bf16.mxu0 %v1286_v0  ;;  %v1298_v63 = vrot.slane %v18_v61, %v8726_v41  ;;  %v1291_v0 = vcombine.high %v18_v61, %v18_v61  ;;  %v8146_v1 = vld [vmem:[%s10523_s1 + $0x430] sm:$0xff]  }
  0x65   :  { %5395 = vmatmul.mubr.bf16.vlgmr.msra.gmra.mrb[8].mxu1 %v1287_v3  ;;  %7330 = vmatprep.subr.bf16.mxu0 %v8091_v4  ;;  %v8195_v61 = vld [vmem:[%s10523_s1 + $0x610] sm:$0xff]  }
  0x66   :  { %7351 = vmatpush3.bf16.msra.mxu1 %v8090_v2  ;;  %5474 = vmatprep.mubr.bf16.mxu1 %v1290_v6  ;;  %v8147_v2 = vld [vmem:[%s10523_s1 + $0x4b0] sm:$0xff]   ;;  %v1306_v3 = vcombine.high %v1298_v63, %v1298_v63  ;;  %v9124_v4 = vrot.slane %v1291_v0, %v8726_v41  ;;  %v8149_v6 = vld [vmem:[%s10523_s1 + $0x4f8] sm:$0xff]  }
  0x67   :  { %7352 = vmatprep.subr.bf16.mxu1 %v8092_v5  ;;  %v8148_v5 = vld [vmem:[%s10523_s1 + $0x478] sm:$0xff]  }
  0x68   :  { %7331 = vmatpush3.bf16.msra.mxu0 %v8093_v7  ;;  %v1328_v7 = vrot.slane %v1306_v3, %v8726_v41  ;;  %v8198_v0 = vld [vmem:[%s10523_s1 + $0x6d8] sm:$0xff]   ;;  %v8201_v3 = vld [vmem:[%s10523_s1 + $0x660] sm:$0xff]  }
  0x69   :  { %7332 = vmatprep.subr.bf16.mxu0 %v8095_v9  ;;  %v8150_v9 = vld [vmem:[%s10523_s1 + $0x438] sm:$0xff]  }
  0x6a   :  { %7353 = vmatpush3.bf16.msra.mxu1 %v8094_v8  ;;  %v1307_v8 = vcombine.high %v9124_v4, %v9124_v4 }
  0x6b   :  { %7354 = vmatprep.subr.bf16.mxu1 %v8096_v10  ;;  %v8151_v10 = vld [vmem:[%s10523_s1 + $0x4b8] sm:$0xff]  }
  0x6c   :  { %7333 = vmatpush3.bf16.msra.mxu0 %v8097_v11  ;;  %v1338_v11 = vcombine.high %v1328_v7, %v1328_v7 }
  0x6d   :  { %7334 = vmatprep.subr.bf16.mxu0 %v8099_v13  ;;  %v8152_v13 = vld [vmem:[%s10523_s1 + $0x540] sm:$0xff]  }
  0x6e   :  { %7355 = vmatpush3.bf16.msra.mxu1 %v8098_v12  ;;  %v1314_v12 = vrot.slane %v1298_v63, %v8726_v41  ;;  %v8197_v63 = vld [vmem:[%s10523_s1 + $0x658] sm:$0xff]  }
  0x6f   :  { %7356 = vmatprep.subr.bf16.mxu1 %v8100_v14  ;;  %v8153_v14 = vld [vmem:[%s10523_s1 + $0x5c0] sm:$0xff]  }
  0x70   :  { %7335 = vmatpush3.bf16.msra.mxu0 %v8101_v15  ;;  %v1335_v15 = vrot.slane %v1307_v8, %v8726_v41  ;;  %v8206_v8 = vld [vmem:[%s10523_s1 + $0x6e8] sm:$0xff]  }
  0x71   :  { %7336 = vmatprep.subr.bf16.mxu0 %v8103_v17  ;;  %v8155_v17 = vld [vmem:[%s10523_s1 + $0x580] sm:$0xff]  }
  0x72   :  { %7357 = vmatpush3.bf16.msra.mxu1 %v8102_v16  ;;  %v8154_v16 = vld [vmem:[%s10523_s1 + $0x500] sm:$0xff]  }
  0x73   :  { %7358 = vmatprep.subr.bf16.mxu1 %v8104_v18  ;;  %v1336_v18 = vcombine.high %v1314_v12, %v1314_v12 }
  0x74   :  { %7337 = vmatpush3.bf16.msra.mxu0 %v8105_v19  ;;  %v8156_v19 = vld [vmem:[%s10523_s1 + $0x548] sm:$0xff]  }
  0x75   :  { %7338 = vmatprep.subr.bf16.mxu0 %v8107_v21  ;;  %v1339_v21 = vcombine.high %v1335_v15, %v1335_v15 }
  0x76   :  { %7359 = vmatpush3.bf16.msra.mxu1 %v8106_v20  ;;  %v8157_v20 = vld [vmem:[%s10523_s1 + $0x5c8] sm:$0xff]  }
  0x77   :  { %7360 = vmatprep.subr.bf16.mxu1 %v8108_v22  ;;  %v8158_v22 = vld [vmem:[%s10523_s1 + $0x508] sm:$0xff]  }
  0x78   :  { %7339 = vmatpush3.bf16.msra.mxu0 %v8109_v23  ;;  %v8159_v23 = vld [vmem:[%s10523_s1 + $0x588] sm:$0xff]  }
  0x79   :  { %7340 = vmatprep.subr.bf16.mxu0 %v8111_v25  ;;  %v8161_v25 = vld [vmem:[%s10523_s1 + $0x5d0] sm:$0xff]  }
  0x7a   :  { %7361 = vmatpush3.bf16.msra.mxu1 %v8110_v24  ;;  %v8160_v24 = vld [vmem:[%s10523_s1 + $0x550] sm:$0xff]  }
  0x7b   :  { %7362 = vmatprep.subr.bf16.mxu1 %v8112_v26  ;;  %v8162_v26 = vld [vmem:[%s10523_s1 + $0x510] sm:$0xff]  }
  0x7c   :  { %7341 = vmatpush3.bf16.msra.mxu0 %v8113_v27  ;;  %v8163_v27 = vld [vmem:[%s10523_s1 + $0x590] sm:$0xff]  }
  0x7d   :  { %7342 = vmatprep.subr.bf16.mxu0 %v8115_v29  ;;  %v8165_v29 = vld [vmem:[%s10523_s1 + $0x5d8] sm:$0xff]  }
  0x7e   :  { %7363 = vmatpush3.bf16.msra.mxu1 %v8114_v28  ;;  %v8164_v28 = vld [vmem:[%s10523_s1 + $0x558] sm:$0xff]  }
  0x7f   :  { %7364 = vmatprep.subr.bf16.mxu1 %v8116_v30  ;;  %v8166_v30 = vld [vmem:[%s10523_s1 + $0x518] sm:$0xff]  }
  0x80   :  { %7343 = vmatpush3.bf16.msra.mxu0 %v8117_v31  ;;  %v8167_v31 = vld [vmem:[%s10523_s1 + $0x598] sm:$0xff]  }
  0x81   :  { %7372 = vmatprep.subr.bf16.mxu0 %v8120_v34  ;;  %v8170_v34 = vld [vmem:[%s10523_s1 + $0x520] sm:$0xff]  }
  0x82   :  { %7365 = vmatpush3.bf16.msra.mxu1 %v8118_v32  ;;  %v8168_v32 = vld [vmem:[%s10523_s1 + $0x560] sm:$0xff]  }
  0x83   :  { %5435 = vmatmul.mubr.bf16.vlgmr.msra.gmra.mrb[12].mxu0 %v1272_v33  ;;  %7394 = vmatprep.subr.bf16.mxu1 %v8121_v35  ;;  %v8169_v33 = vld [vmem:[%s10523_s1 + $0x5e0] sm:$0xff]  }
  0x84   :  { %7373 = vmatpush3.bf16.msra.mxu0 %v8122_v36  ;;  %5514 = vmatprep.mubr.bf16.mxu0 %v1328_v7  ;;  %v8171_v35 = vld [vmem:[%s10523_s1 + $0x5a0] sm:$0xff]   ;;  %v8172_v36 = vld [vmem:[%s10523_s1 + $0x568] sm:$0xff]  }
  0x85   :  { %5475 = vmatmul.mubr.bf16.vlgmr.msra.gmra.mrb[12].mxu1 %v1288_v38  ;;  %7374 = vmatprep.subr.bf16.mxu0 %v8124_v39  ;;  %v8174_v38 = vld [vmem:[%s10523_s1 + $0x528] sm:$0xff]  }
  0x86   :  { %7395 = vmatpush3.bf16.msra.mxu1 %v8123_v37  ;;  %5554 = vmatprep.mubr.bf16.mxu1 %v1338_v11  ;;  %v8173_v37 = vld [vmem:[%s10523_s1 + $0x5e8] sm:$0xff]   ;;  %v8209_v11 = vld [vmem:[%s10523_s1 + $0x670] sm:$0xff]  }
  0x87   :  { %7396 = vmatprep.subr.bf16.mxu1 %v8125_v40  ;;  %v8175_v39 = vld [vmem:[%s10523_s1 + $0x5a8] sm:$0xff]   ;;  %v8176_v40 = vld [vmem:[%s10523_s1 + $0x570] sm:$0xff]  }
  0x88   :  { %7375 = vmatpush3.bf16.msra.mxu0 %v8126_v42  ;;  %v8177_v42 = vld [vmem:[%s10523_s1 + $0x5f0] sm:$0xff]   ;;  %v8205_v7 = vld [vmem:[%s10523_s1 + $0x668] sm:$0xff]  }
  0x89   :  { %7376 = vmatprep.subr.bf16.mxu0 %v8128_v44  ;;  %v8179_v44 = vld [vmem:[%s10523_s1 + $0x5b0] sm:$0xff]  }
  0x8a   :  { %7397 = vmatpush3.bf16.msra.mxu1 %v8127_v43  ;;  %v8178_v43 = vld [vmem:[%s10523_s1 + $0x530] sm:$0xff]  }
  0x8b   :  { %7398 = vmatprep.subr.bf16.mxu1 %v8129_v45  ;;  %v8180_v45 = vld [vmem:[%s10523_s1 + $0x578] sm:$0xff]  }
  0x8c   :  { %7377 = vmatpush3.bf16.msra.mxu0 %v8130_v46  ;;  %v8181_v46 = vld [vmem:[%s10523_s1 + $0x5f8] sm:$0xff]  }
  0x8d   :  { %7378 = vmatprep.subr.bf16.mxu0 %v8132_v48  ;;  %v8183_v48 = vld [vmem:[%s10523_s1 + $0x5b8] sm:$0xff]  }
  0x8e   :  { %7399 = vmatpush3.bf16.msra.mxu1 %v8131_v47  ;;  %v8182_v47 = vld [vmem:[%s10523_s1 + $0x538] sm:$0xff]  }
  0x8f   :  { %7400 = vmatprep.subr.bf16.mxu1 %v8133_v49  ;;  %v1321_v49 = vrot.slane %v9124_v4, %v8726_v41  ;;  %v8202_v4 = vld [vmem:[%s10523_s1 + $0x6e0] sm:$0xff]  }
  0x90   :  { %7379 = vmatpush3.bf16.msra.mxu0 %v8134_v50  ;;  %v8185_v50 = vld [vmem:[%s10523_s1 + $0x640] sm:$0xff]  }
  0x91   :  { %7380 = vmatprep.subr.bf16.mxu0 %v8136_v52  ;;  %v8187_v52 = vld [vmem:[%s10523_s1 + $0x600] sm:$0xff]  }
  0x92   :  { %7401 = vmatpush3.bf16.msra.mxu1 %v8135_v51  ;;  %v8186_v51 = vld [vmem:[%s10523_s1 + $0x6c0] sm:$0xff]  }
  0x93   :  { %7402 = vmatprep.subr.bf16.mxu1 %v8137_v53  ;;  %v8188_v53 = vld [vmem:[%s10523_s1 + $0x680] sm:$0xff]  }
  0x94   :  { %7381 = vmatpush3.bf16.msra.mxu0 %v8138_v54  ;;  %v1337_v54 = vcombine.high %v1321_v49, %v1321_v49 }
  0x95   :  { %7382 = vmatprep.subr.bf16.mxu0 %v8140_v56  ;;  %v8190_v56 = vld [vmem:[%s10523_s1 + $0x6c8] sm:$0xff]  }
  0x96   :  { %7403 = vmatpush3.bf16.msra.mxu1 %v8139_v55  ;;  %v8189_v55 = vld [vmem:[%s10523_s1 + $0x648] sm:$0xff]  }
  0x97   :  { %7404 = vmatprep.subr.bf16.mxu1 %v8141_v57  ;;  %v8191_v57 = vld [vmem:[%s10523_s1 + $0x608] sm:$0xff]  }
  0x98   :  { %7383 = vmatpush3.bf16.msra.mxu0 %v8142_v58  ;;  %v8192_v58 = vld [vmem:[%s10523_s1 + $0x688] sm:$0xff]  }
  0x99   :  { %7384 = vmatprep.subr.bf16.mxu0 %v8144_v60  ;;  %v8194_v60 = vld [vmem:[%s10523_s1 + $0x6d0] sm:$0xff]  }
  0x9a   :  { %7405 = vmatpush3.bf16.msra.mxu1 %v8143_v59  ;;  %v8193_v59 = vld [vmem:[%s10523_s1 + $0x650] sm:$0xff]  }
  0x9b   :  { %7406 = vmatprep.subr.bf16.mxu1 %v8145_v62  ;;  %v8196_v62 = vld [vmem:[%s10523_s1 + $0x690] sm:$0xff]  }
  0x9c   :  { %7385 = vmatpush3.bf16.msra.mxu0 %v8146_v1  ;;  %v8199_v1 = vld [vmem:[%s10523_s1 + $0x618] sm:$0xff]  }
  0x9d   :  { %7386 = vmatprep.subr.bf16.mxu0 %v8148_v5  ;;  %v8203_v5 = vld [vmem:[%s10523_s1 + $0x620] sm:$0xff]  }
  0x9e   :  { %7407 = vmatpush3.bf16.msra.mxu1 %v8147_v2  ;;  %v8200_v2 = vld [vmem:[%s10523_s1 + $0x698] sm:$0xff]  }
  0x9f   :  { %7408 = vmatprep.subr.bf16.mxu1 %v8149_v6  ;;  %v8204_v6 = vld [vmem:[%s10523_s1 + $0x6a0] sm:$0xff]  }
  0xa0   :  { %7387 = vmatpush3.bf16.msra.mxu0 %v8150_v9  ;;  %v8207_v9 = vld [vmem:[%s10523_s1 + $0x628] sm:$0xff]  }
  0xa1   :  { %7416 = vmatprep.subr.bf16.mxu0 %v8152_v13  ;;  %v8210_v13 = vld [vmem:[%s10523_s1 + $0x6f0] sm:$0xff]  }
  0xa2   :  { %7409 = vmatpush3.bf16.msra.mxu1 %v8151_v10  ;;  %v8208_v10 = vld [vmem:[%s10523_s1 + $0x6a8] sm:$0xff]  }
  0xa3   :  { %5515 = vmatmul.mubr.bf16.vlgmr.msra.gmra.mrb[16].mxu0 %v1314_v12  ;;  %7438 = vmatprep.subr.bf16.mxu1 %v8153_v14  ;;  %v19_v12 = vld [vmem:[%s10522_s0 + $0x18] sm:$0xff] }
  0xa4   :  { %7417 = vmatpush3.bf16.msra.mxu0 %v8154_v16  ;;  %5594 = vmatprep.mubr.bf16.mxu0 %v1335_v15  ;;  %v1347_v14 = vrot.slane %v19_v12, %v8726_v41  ;;  %v1340_v15 = vcombine.high %v19_v12, %v19_v12  ;;  %v8211_v16 = vld [vmem:[%s10523_s1 + $0x630] sm:$0xff]   ;;  %v8248_v12 = vld [vmem:[%s10523_s1 + $0x7b8] sm:$0xff]  }
  0xa5   :  { %5555 = vmatmul.mubr.bf16.vlgmr.msra.gmra.mrb[16].mxu1 %v1336_v18  ;;  %7418 = vmatprep.subr.bf16.mxu0 %v8156_v19 }
  0xa6   :  { %7439 = vmatpush3.bf16.msra.mxu1 %v8155_v17  ;;  %5634 = vmatprep.mubr.bf16.mxu1 %v1339_v21  ;;  %v8213_v17 = vld [vmem:[%s10523_s1 + $0x678] sm:$0xff]   ;;  %v1355_v18 = vcombine.high %v1347_v14, %v1347_v14  ;;  %v9330_v19 = vrot.slane %v1340_v15, %v8726_v41  ;;  %v8251_v15 = vld [vmem:[%s10523_s1 + $0x8c0] sm:$0xff]  }
  0xa7   :  { %7440 = vmatprep.subr.bf16.mxu1 %v8157_v20  ;;  %v8212_v20 = vld [vmem:[%s10523_s1 + $0x6b0] sm:$0xff]   ;;  %v8214_v21 = vld [vmem:[%s10523_s1 + $0x6f8] sm:$0xff]  }
  0xa8   :  { %7419 = vmatpush3.bf16.msra.mxu0 %v8158_v22  ;;  %v1377_v22 = vrot.slane %v1355_v18, %v8726_v41 }
  0xa9   :  { %7420 = vmatprep.subr.bf16.mxu0 %v8160_v24  ;;  %v8215_v24 = vld [vmem:[%s10523_s1 + $0x638] sm:$0xff]  }
  0xaa   :  { %7441 = vmatpush3.bf16.msra.mxu1 %v8159_v23  ;;  %v1356_v23 = vcombine.high %v9330_v19, %v9330_v19 }
  0xab   :  { %7442 = vmatprep.subr.bf16.mxu1 %v8161_v25  ;;  %v1387_v25 = vcombine.high %v1377_v22, %v1377_v22 }
  0xac   :  { %7421 = vmatpush3.bf16.msra.mxu0 %v8162_v26  ;;  %v1363_v26 = vrot.slane %v1347_v14, %v8726_v41  ;;  %v8250_v14 = vld [vmem:[%s10523_s1 + $0x840] sm:$0xff]  }
  0xad   :  { %7422 = vmatprep.subr.bf16.mxu0 %v8164_v28  ;;  %v8216_v28 = vld [vmem:[%s10523_s1 + $0x6b8] sm:$0xff]  }
  0xae   :  { %7443 = vmatpush3.bf16.msra.mxu1 %v8163_v27  ;;  %v8217_v27 = vld [vmem:[%s10523_s1 + $0x740] sm:$0xff]  }
  0xaf   :  { %7444 = vmatprep.subr.bf16.mxu1 %v8165_v29  ;;  %v1384_v29 = vrot.slane %v1356_v23, %v8726_v41  ;;  %v8258_v23 = vld [vmem:[%s10523_s1 + $0x850] sm:$0xff]  }
  0xb0   :  { %7423 = vmatpush3.bf16.msra.mxu0 %v8166_v30  ;;  %v8218_v30 = vld [vmem:[%s10523_s1 + $0x7c0] sm:$0xff]  }
  0xb1   :  { %7424 = vmatprep.subr.bf16.mxu0 %v8168_v32  ;;  %v1385_v32 = vcombine.high %v1363_v26, %v1363_v26 }
  0xb2   :  { %7445 = vmatpush3.bf16.msra.mxu1 %v8167_v31  ;;  %v8219_v31 = vld [vmem:[%s10523_s1 + $0x700] sm:$0xff]  }
  0xb3   :  { %7446 = vmatprep.subr.bf16.mxu1 %v8169_v33  ;;  %v8221_v33 = vld [vmem:[%s10523_s1 + $0x748] sm:$0xff]  }
  0xb4   :  { %7425 = vmatpush3.bf16.msra.mxu0 %v8170_v34  ;;  %v8220_v34 = vld [vmem:[%s10523_s1 + $0x780] sm:$0xff]  }
  0xb5   :  { %7426 = vmatprep.subr.bf16.mxu0 %v8172_v36  ;;  %v8222_v36 = vld [vmem:[%s10523_s1 + $0x7c8] sm:$0xff]  }
  0xb6   :  { %7447 = vmatpush3.bf16.msra.mxu1 %v8171_v35  ;;  %v1388_v35 = vcombine.high %v1384_v29, %v1384_v29 }
  0xb7   :  { %7448 = vmatprep.subr.bf16.mxu1 %v8173_v37  ;;  %v8223_v37 = vld [vmem:[%s10523_s1 + $0x708] sm:$0xff]  }
  0xb8   :  { %7427 = vmatpush3.bf16.msra.mxu0 %v8174_v38  ;;  %v8225_v38 = vld [vmem:[%s10523_s1 + $0x750] sm:$0xff]  }
  0xb9   :  { %7428 = vmatprep.subr.bf16.mxu0 %v8176_v40  ;;  %v8226_v40 = vld [vmem:[%s10523_s1 + $0x7d0] sm:$0xff]  }
  0xba   :  { %7449 = vmatpush3.bf16.msra.mxu1 %v8175_v39  ;;  %v8224_v39 = vld [vmem:[%s10523_s1 + $0x788] sm:$0xff]  }
  0xbb   :  { %7450 = vmatprep.subr.bf16.mxu1 %v8177_v42  ;;  %v8227_v42 = vld [vmem:[%s10523_s1 + $0x710] sm:$0xff]  }
  0xbc   :  { %7429 = vmatpush3.bf16.msra.mxu0 %v8178_v43  ;;  %v8229_v43 = vld [vmem:[%s10523_s1 + $0x758] sm:$0xff]  }
  0xbd   :  { %7430 = vmatprep.subr.bf16.mxu0 %v8180_v45  ;;  %v8230_v45 = vld [vmem:[%s10523_s1 + $0x7d8] sm:$0xff]  }
  0xbe   :  { %7451 = vmatpush3.bf16.msra.mxu1 %v8179_v44  ;;  %v8228_v44 = vld [vmem:[%s10523_s1 + $0x790] sm:$0xff]  }
  0xbf   :  { %7452 = vmatprep.subr.bf16.mxu1 %v8181_v46  ;;  %v8231_v46 = vld [vmem:[%s10523_s1 + $0x718] sm:$0xff]  }
  0xc0   :  { %7431 = vmatpush3.bf16.msra.mxu0 %v8182_v47  ;;  %v8232_v47 = vld [vmem:[%s10523_s1 + $0x798] sm:$0xff]  }
  0xc1   :  { %7460 = vmatprep.subr.bf16.mxu0 %v8185_v50  ;;  %v8235_v50 = vld [vmem:[%s10523_s1 + $0x720] sm:$0xff]  }
  0xc2   :  { %7453 = vmatpush3.bf16.msra.mxu1 %v8183_v48  ;;  %v8233_v48 = vld [vmem:[%s10523_s1 + $0x760] sm:$0xff]  }
  0xc3   :  { %5595 = vmatmul.mubr.bf16.vlgmr.msra.gmra.mrb[20].mxu0 %v1321_v49  ;;  %7482 = vmatprep.subr.bf16.mxu1 %v8186_v51  ;;  %v8234_v49 = vld [vmem:[%s10523_s1 + $0x7e0] sm:$0xff]  }
  0xc4   :  { %7461 = vmatpush3.bf16.msra.mxu0 %v8187_v52  ;;  %5674 = vmatprep.mubr.bf16.mxu0 %v1377_v22  ;;  %v8236_v51 = vld [vmem:[%s10523_s1 + $0x7a0] sm:$0xff]   ;;  %v8237_v52 = vld [vmem:[%s10523_s1 + $0x768] sm:$0xff]  }
  0xc5   :  { %5635 = vmatmul.mubr.bf16.vlgmr.msra.gmra.mrb[20].mxu1 %v1337_v54  ;;  %7462 = vmatprep.subr.bf16.mxu0 %v8189_v55  ;;  %v8239_v54 = vld [vmem:[%s10523_s1 + $0x728] sm:$0xff]  }
  0xc6   :  { %7483 = vmatpush3.bf16.msra.mxu1 %v8188_v53  ;;  %5714 = vmatprep.mubr.bf16.mxu1 %v1387_v25  ;;  %v8238_v53 = vld [vmem:[%s10523_s1 + $0x7e8] sm:$0xff]   ;;  %v8260_v25 = vld [vmem:[%s10523_s1 + $0x810] sm:$0xff]  }
  0xc7   :  { %7484 = vmatprep.subr.bf16.mxu1 %v8190_v56  ;;  %v8240_v55 = vld [vmem:[%s10523_s1 + $0x7a8] sm:$0xff]   ;;  %v6619_v56 = vld [vmem:[%s10524_s2] ss:$0 sm:$0xff] }
  0xc8   :  { %7463 = vmatpush3.bf16.msra.mxu0 %v8191_v57  ;;  %v8241_v57 = vld [vmem:[%s10523_s1 + $0x770] sm:$0xff]   ;;  %v8257_v22 = vld [vmem:[%s10523_s1 + $0x888] sm:$0xff]  }
  0xc9   :  { %7464 = vmatprep.subr.bf16.mxu0 %v8193_v59  ;;  %v8242_v59 = vld [vmem:[%s10523_s1 + $0x7f0] sm:$0xff]  }
  0xca   :  { %7485 = vmatpush3.bf16.msra.mxu1 %v8192_v58 }
  0xcb   :  { %7486 = vmatprep.subr.bf16.mxu1 %v8194_v60 }
  0xcc   :  { %7465 = vmatpush3.bf16.msra.mxu0 %v8195_v61  ;;  %v8243_v61 = vld [vmem:[%s10523_s1 + $0x730] sm:$0xff]  }
  0xcd   :  { %7466 = vmatprep.subr.bf16.mxu0 %v8197_v63 }
  0xce   :  { %7487 = vmatpush3.bf16.msra.mxu1 %v8196_v62 }
  0xcf   :  { %7488 = vmatprep.subr.bf16.mxu1 %v8198_v0 }
  0xd0   :  { %7467 = vmatpush3.bf16.msra.mxu0 %v8199_v1  ;;  %v8244_v1 = vld [vmem:[%s10523_s1 + $0x7b0] sm:$0xff]  }
  0xd1   :  { %7468 = vmatprep.subr.bf16.mxu0 %v8201_v3 }
  0xd2   :  { %7489 = vmatpush3.bf16.msra.mxu1 %v8200_v2  ;;  %v8245_v2 = vld [vmem:[%s10523_s1 + $0x778] sm:$0xff]  }
  0xd3   :  { %7490 = vmatprep.subr.bf16.mxu1 %v8202_v4 }
  0xd4   :  { %7469 = vmatpush3.bf16.msra.mxu0 %v8203_v5 }
  0xd5   :  { %7470 = vmatprep.subr.bf16.mxu0 %v8205_v7 }
  0xd6   :  { %7491 = vmatpush3.bf16.msra.mxu1 %v8204_v6 }
  0xd7   :  { %7492 = vmatprep.subr.bf16.mxu1 %v8206_v8  ;;  %v8246_v8 = vld [vmem:[%s10523_s1 + $0x7f8] sm:$0xff]  }
  0xd8   :  { %7471 = vmatpush3.bf16.msra.mxu0 %v8207_v9 }
  0xd9   :  { %7472 = vmatprep.subr.bf16.mxu0 %v8209_v11 }
  0xda   :  { %7493 = vmatpush3.bf16.msra.mxu1 %v8208_v10  ;;  %v8247_v10 = vld [vmem:[%s10523_s1 + $0x738] sm:$0xff]  }
  0xdb   :  { %7494 = vmatprep.subr.bf16.mxu1 %v8210_v13  ;;  %v1370_v13 = vrot.slane %v9330_v19, %v8726_v41  ;;  %v8254_v19 = vld [vmem:[%s10523_s1 + $0x848] sm:$0xff]  }
  0xdc   :  { %7473 = vmatpush3.bf16.msra.mxu0 %v8211_v16  ;;  %v8252_v16 = vld [vmem:[%s10523_s1 + $0x800] sm:$0xff]  }
  0xdd   :  { %7474 = vmatprep.subr.bf16.mxu0 %v8213_v17  ;;  %v8253_v17 = vld [vmem:[%s10523_s1 + $0x880] sm:$0xff]   ;;  %v1386_v18 = vcombine.high %v1370_v13, %v1370_v13 }
  0xde   :  { %7495 = vmatpush3.bf16.msra.mxu1 %v8212_v20  ;;  %v8255_v20 = vld [vmem:[%s10523_s1 + $0x8c8] sm:$0xff]  }
  0xdf   :  { %7496 = vmatprep.subr.bf16.mxu1 %v8214_v21  ;;  %v8256_v21 = vld [vmem:[%s10523_s1 + $0x808] sm:$0xff]  }
  0xe0   :  { %7475 = vmatpush3.bf16.msra.mxu0 %v8215_v24  ;;  %v8259_v24 = vld [vmem:[%s10523_s1 + $0x8d0] sm:$0xff]  }
  0xe1   :  { %7504 = vmatprep.subr.bf16.mxu0 %v8217_v27  ;;  %v8262_v27 = vld [vmem:[%s10523_s1 + $0x858] sm:$0xff]  }
  0xe2   :  { %7497 = vmatpush3.bf16.msra.mxu1 %v8216_v28  ;;  %v8263_v28 = vld [vmem:[%s10523_s1 + $0x8d8] sm:$0xff]  }
  0xe3   :  { %5675 = vmatmul.mubr.bf16.vlgmr.msra.gmra.mrb[24].mxu0 %v1363_v26  ;;  %7526 = vmatprep.subr.bf16.mxu1 %v8218_v30  ;;  %v8261_v26 = vld [vmem:[%s10523_s1 + $0x890] sm:$0xff]   ;;  %v8265_v30 = vld [vmem:[%s10523_s1 + $0x898] sm:$0xff]  }
  0xe4   :  { %7505 = vmatpush3.bf16.msra.mxu0 %v8219_v31  ;;  %5754 = vmatprep.mubr.bf16.mxu0 %v1384_v29  ;;  %v8264_v29 = vld [vmem:[%s10523_s1 + $0x818] sm:$0xff]   ;;  %v8266_v31 = vld [vmem:[%s10523_s1 + $0x860] sm:$0xff]  }
  0xe5   :  { %5715 = vmatmul.mubr.bf16.vlgmr.msra.gmra.mrb[24].mxu1 %v1385_v32  ;;  %7506 = vmatprep.subr.bf16.mxu0 %v8221_v33  ;;  %v8267_v32 = vld [vmem:[%s10523_s1 + $0x8e0] sm:$0xff]  }
  0xe6   :  { %7527 = vmatpush3.bf16.msra.mxu1 %v8220_v34  ;;  %5794 = vmatprep.mubr.bf16.mxu1 %v1388_v35  ;;  %v8268_v33 = vld [vmem:[%s10523_s1 + $0x820] sm:$0xff]   ;;  %v8270_v35 = vld [vmem:[%s10523_s1 + $0x868] sm:$0xff]  }
  0xe7   :  { %7528 = vmatprep.subr.bf16.mxu1 %v8222_v36  ;;  %v8269_v34 = vld [vmem:[%s10523_s1 + $0x8a0] sm:$0xff]   ;;  %v8271_v36 = vld [vmem:[%s10523_s1 + $0x8e8] sm:$0xff]  }
  0xe8   :  { %7507 = vmatpush3.bf16.msra.mxu0 %v8223_v37  ;;  %v8272_v37 = vld [vmem:[%s10523_s1 + $0x828] sm:$0xff]  }
  0xe9   :  { %7508 = vmatprep.subr.bf16.mxu0 %v8225_v38  ;;  %v8273_v38 = vld [vmem:[%s10523_s1 + $0x8a8] sm:$0xff]  }
  0xea   :  { %7529 = vmatpush3.bf16.msra.mxu1 %v8224_v39  ;;  %v8274_v39 = vld [vmem:[%s10523_s1 + $0x870] sm:$0xff]  }
  0xeb   :  { %7530 = vmatprep.subr.bf16.mxu1 %v8226_v40  ;;  %v8275_v40 = vld [vmem:[%s10523_s1 + $0x8f0] sm:$0xff]  }
  0xec   :  { %7509 = vmatpush3.bf16.msra.mxu0 %v8227_v42 }
  0xed   :  { %7510 = vmatprep.subr.bf16.mxu0 %v8229_v43  ;;  %v8276_v43 = vld [vmem:[%s10523_s1 + $0x830] sm:$0xff]  }
  0xee   :  { %7531 = vmatpush3.bf16.msra.mxu1 %v8228_v44 }
  0xef   :  { %7532 = vmatprep.subr.bf16.mxu1 %v8230_v45  ;;  %v20_v45 = vld [vmem:[%s10522_s0 + $0x20] sm:$0xff] }
  0xf0   :  { %7511 = vmatpush3.bf16.msra.mxu0 %v8231_v46 }
  0xf1   :  { %7512 = vmatprep.subr.bf16.mxu0 %v8233_v48 }
  0xf2   :  { %7533 = vmatpush3.bf16.msra.mxu1 %v8232_v47 }
  0xf3   :  { %7534 = vmatprep.subr.bf16.mxu1 %v8234_v49  ;;  %v8277_v49 = vld [vmem:[%s10523_s1 + $0x8b0] sm:$0xff]  }
  0xf4   :  { %7513 = vmatpush3.bf16.msra.mxu0 %v8235_v50  ;;  %v8278_v50 = vld [vmem:[%s10523_s1 + $0x878] sm:$0xff]  }
  0xf5   :  { %7514 = vmatprep.subr.bf16.mxu0 %v8237_v52  ;;  %v1389_v52 = vcombine.high %v20_v45, %v20_v45 }
  0xf6   :  { %7535 = vmatpush3.bf16.msra.mxu1 %v8236_v51  ;;  %v7212_v58 = vpop.f32.mrb[0].mxu0  ;;  %v1396_v51 = vrot.slane %v20_v45, %v8726_v41 }
  0xf7   :  { %v7213_v60 = vpop.f32.mrb[1].mxu0  ;;  %7536 = vmatprep.subr.bf16.mxu1 %v8238_v53  ;;  %v7234_v62 = vpop.f32.mrb[0].mxu1 }
  0xf8   :  { %v7214_v63 = vadd.f32 %v7213_v60, %v7212_v58  ;;  %v7215_v0 = vpop.f32.mrb[2].mxu0  ;;  %7515 = vmatpush3.bf16.msra.mxu0 %v8239_v54  ;;  %v7235_v3 = vpop.f32.mrb[1].mxu1  ;;  %v8279_v58 = vld [vmem:[%s10523_s1 + $0x8f8] sm:$0xff]  }
  0xf9   :  { %v7216_v4 = vpop.f32.mrb[3].mxu0  ;;  %7516 = vmatprep.subr.bf16.mxu0 %v8241_v57  ;;  %v7236_v6 = vadd.f32 %v7235_v3, %v7234_v62  ;;  %v7237_v7 = vpop.f32.mrb[2].mxu1  ;;  %v9551_v62 = vrot.slane %v1389_v52, %v8726_v41  ;;  %v8281_v0 = vld [vmem:[%s10523_s1 + $0x8b8] sm:$0xff]   ;;  %v8282_v3 = vld [vmem:[%s10523_s1 + $0x940] sm:$0xff]  }
  0xfa   :  { %v5197_v5 = vadd.f32 %v7214_v63, %v6619_v56  ;;  %7537 = vmatpush3.bf16.msra.mxu1 %v8240_v55  ;;  %v7238_v9 = vpop.f32.mrb[3].mxu1  ;;  %v8284_v7 = vld [vmem:[%s10523_s1 + $0x900] sm:$0xff]   ;;  %v8313_v52 = vld [vmem:[%s10523_s1 + $0x9b8] sm:$0xff]  }
  0xfb   :  { %7538 = vmatprep.subr.bf16.mxu1 %v8242_v59  ;;  %v1404_v59 = vcombine.high %v1396_v51, %v1396_v51  ;;  %v1405_v4 = vcombine.high %v9551_v62, %v9551_v62  ;;  %v8285_v9 = vld [vmem:[%s10523_s1 + $0x980] sm:$0xff]  }
  0xfc   :  { %v9445_v11 = vadd.f32 %v7236_v6, %v5197_v5  ;;  %7517 = vmatpush3.bf16.msra.mxu0 %v8243_v61  ;;  %v8280_v61 = vld [vmem:[%s10523_s1 + $0x838] sm:$0xff]   ;;  %v8283_v6 = vld [vmem:[%s10523_s1 + $0x9c0] sm:$0xff]  }
  0xfd   :  { %7518 = vmatprep.subr.bf16.mxu0 %v8245_v2  ;;  %v1412_v2 = vrot.slane %v1396_v51, %v8726_v41 }
  0xfe   :  { %7539 = vmatpush3.bf16.msra.mxu1 %v8244_v1  ;;  %v1426_v1 = vrot.slane %v1404_v59, %v8726_v41  ;;  %v8319_v59 = vld [vmem:[%s10523_s1 + $0xa48] sm:$0xff]  }
  0xff   :  { %7540 = vmatprep.subr.bf16.mxu1 %v8246_v8  ;;  %v1433_v8 = vrot.slane %v1405_v4, %v8726_v41  ;;  %v8328_v4 = vld [vmem:[%s10523_s1 + $0xad8] sm:$0xff]  }
 0x100   :  { %7519 = vmatpush3.bf16.msra.mxu0 %v8247_v10  ;;  %v1436_v5 = vcombine.high %v1426_v1, %v1426_v1  ;;  %v1434_v10 = vcombine.high %v1412_v2, %v1412_v2 }
 0x101   :  { %7548 = vmatprep.subr.bf16.mxu0 %v8250_v14  ;;  %v8288_v14 = vld [vmem:[%s10523_s1 + $0x908] sm:$0xff]  }
 0x102   :  { %7541 = vmatpush3.bf16.msra.mxu1 %v8248_v12  ;;  %v8287_v12 = vld [vmem:[%s10523_s1 + $0x9c8] sm:$0xff]  }
 0x103   :  { %5755 = vmatmul.mubr.bf16.vlgmr.msra.gmra.mrb[28].mxu0 %v1370_v13  ;;  %7570 = vmatprep.subr.bf16.mxu1 %v8251_v15  ;;  %v1437_v13 = vcombine.high %v1433_v8, %v1433_v8  ;;  %v8289_v15 = vld [vmem:[%s10523_s1 + $0x988] sm:$0xff]  }
 0x104   :  { %7549 = vmatpush3.bf16.msra.mxu0 %v8252_v16  ;;  %5834 = vmatprep.mubr.bf16.mxu0 %v1426_v1  ;;  %v8290_v16 = vld [vmem:[%s10523_s1 + $0x950] sm:$0xff]  }
 0x105   :  { %5795 = vmatmul.mubr.bf16.vlgmr.msra.gmra.mrb[28].mxu1 %v1386_v18  ;;  %7550 = vmatprep.subr.bf16.mxu0 %v8254_v19  ;;  %v8292_v18 = vld [vmem:[%s10523_s1 + $0x910] sm:$0xff]  }
 0x106   :  { %7571 = vmatpush3.bf16.msra.mxu1 %v8253_v17  ;;  %5874 = vmatprep.mubr.bf16.mxu1 %v1436_v5  ;;  %v8291_v17 = vld [vmem:[%s10523_s1 + $0x9d0] sm:$0xff]   ;;  %v8329_v5 = vld [vmem:[%s10523_s1 + $0xa18] sm:$0xff]  }
 0x107   :  { %7572 = vmatprep.subr.bf16.mxu1 %v8255_v20  ;;  %v8293_v19 = vld [vmem:[%s10523_s1 + $0x990] sm:$0xff]   ;;  %v8294_v20 = vld [vmem:[%s10523_s1 + $0x958] sm:$0xff]  }
 0x108   :  { %7551 = vmatpush3.bf16.msra.mxu0 %v8256_v21  ;;  %v8295_v21 = vld [vmem:[%s10523_s1 + $0x9d8] sm:$0xff]   ;;  %v8325_v1 = vld [vmem:[%s10523_s1 + $0xa10] sm:$0xff]  }
 0x109   :  { %7552 = vmatprep.subr.bf16.mxu0 %v8258_v23  ;;  %v8297_v23 = vld [vmem:[%s10523_s1 + $0x998] sm:$0xff]  }
 0x10a   :  { %7573 = vmatpush3.bf16.msra.mxu1 %v8257_v22  ;;  %v8296_v22 = vld [vmem:[%s10523_s1 + $0x918] sm:$0xff]  }
 0x10b   :  { %7574 = vmatprep.subr.bf16.mxu1 %v8259_v24  ;;  %v8298_v24 = vld [vmem:[%s10523_s1 + $0x960] sm:$0xff]  }
 0x10c   :  { %7553 = vmatpush3.bf16.msra.mxu0 %v8260_v25  ;;  %v8299_v25 = vld [vmem:[%s10523_s1 + $0x9e0] sm:$0xff]  }
 0x10d   :  { %7554 = vmatprep.subr.bf16.mxu0 %v8262_v27  ;;  %v8301_v27 = vld [vmem:[%s10523_s1 + $0x9a0] sm:$0xff]  }
 0x10e   :  { %7575 = vmatpush3.bf16.msra.mxu1 %v8261_v26  ;;  %v8300_v26 = vld [vmem:[%s10523_s1 + $0x920] sm:$0xff]  }
 0x10f   :  { %7576 = vmatprep.subr.bf16.mxu1 %v8263_v28  ;;  %v8302_v28 = vld [vmem:[%s10523_s1 + $0x968] sm:$0xff]  }
 0x110   :  { %7555 = vmatpush3.bf16.msra.mxu0 %v8264_v29  ;;  %v8303_v29 = vld [vmem:[%s10523_s1 + $0x9e8] sm:$0xff]  }
 0x111   :  { %7556 = vmatprep.subr.bf16.mxu0 %v8266_v31  ;;  %v8305_v31 = vld [vmem:[%s10523_s1 + $0x9a8] sm:$0xff]  }
 0x112   :  { %7577 = vmatpush3.bf16.msra.mxu1 %v8265_v30  ;;  %v8304_v30 = vld [vmem:[%s10523_s1 + $0x928] sm:$0xff]  }
 0x113   :  { %7578 = vmatprep.subr.bf16.mxu1 %v8267_v32  ;;  %v8306_v32 = vld [vmem:[%s10523_s1 + $0x970] sm:$0xff]  }
 0x114   :  { %7557 = vmatpush3.bf16.msra.mxu0 %v8268_v33 }
 0x115   :  { %7558 = vmatprep.subr.bf16.mxu0 %v8270_v35 }
 0x116   :  { %7579 = vmatpush3.bf16.msra.mxu1 %v8269_v34  ;;  %v7256_v42 = vpop.f32.mrb[4].mxu0  ;;  %v8307_v34 = vld [vmem:[%s10523_s1 + $0x9f0] sm:$0xff]  }
 0x117   :  { %v7257_v44 = vpop.f32.mrb[5].mxu0  ;;  %7580 = vmatprep.subr.bf16.mxu1 %v8271_v36  ;;  %v7278_v46 = vpop.f32.mrb[4].mxu1  ;;  %v8308_v36 = vld [vmem:[%s10523_s1 + $0x930] sm:$0xff]  }
 0x118   :  { %v7258_v47 = vadd.f32 %v7257_v44, %v7256_v42  ;;  %v7259_v48 = vpop.f32.mrb[6].mxu0  ;;  %7559 = vmatpush3.bf16.msra.mxu0 %v8272_v37  ;;  %v7279_v53 = vpop.f32.mrb[5].mxu1  ;;  %v8310_v42 = vld [vmem:[%s10523_s1 + $0x978] sm:$0xff]  }
 0x119   :  { %v7260_v54 = vpop.f32.mrb[7].mxu0  ;;  %7560 = vmatprep.subr.bf16.mxu0 %v8274_v39  ;;  %v7280_v56 = vadd.f32 %v7279_v53, %v7278_v46  ;;  %v7281_v57 = vpop.f32.mrb[6].mxu1  ;;  %v8311_v48 = vld [vmem:[%s10523_s1 + $0x9f8] sm:$0xff]   ;;  %v1419_v53 = vrot.slane %v9551_v62, %v8726_v41  ;;  %v8322_v62 = vld [vmem:[%s10523_s1 + $0xa88] sm:$0xff]  }
 0x11a   :  { %v5277_v55 = vadd.f32 %v7258_v47, %v9445_v11  ;;  %7581 = vmatpush3.bf16.msra.mxu1 %v8273_v38  ;;  %v7282_v60 = vpop.f32.mrb[7].mxu1  ;;  %v8286_v11 = vld [vmem:[%s10523_s1 + $0x948] sm:$0xff]   ;;  %v8315_v54 = vld [vmem:[%s10523_s1 + $0xa40] sm:$0xff]  }
 0x11b   :  { %7582 = vmatprep.subr.bf16.mxu1 %v8275_v40  ;;  %v8309_v40 = vld [vmem:[%s10523_s1 + $0x9b0] sm:$0xff]   ;;  %v8318_v57 = vld [vmem:[%s10523_s1 + $0xa80] sm:$0xff]   ;;  %v8320_v60 = vld [vmem:[%s10523_s1 + $0xac8] sm:$0xff]  }
 0x11c   :  { %v9553_v63 = vadd.f32 %v7280_v56, %v5277_v55  ;;  %7561 = vmatpush3.bf16.msra.mxu0 %v8276_v43  ;;  %v8316_v55 = vld [vmem:[%s10523_s1 + $0xac0] sm:$0xff]  }
 0x11d   :  { %7562 = vmatprep.subr.bf16.mxu0 %v8278_v50  ;;  %v8312_v50 = vld [vmem:[%s10523_s1 + $0x938] sm:$0xff]   ;;  %v8317_v56 = vld [vmem:[%s10523_s1 + $0xa00] sm:$0xff]  }
 0x11e   :  { %7583 = vmatpush3.bf16.msra.mxu1 %v8277_v49 }
 0x11f   :  { %7584 = vmatprep.subr.bf16.mxu1 %v8279_v58  ;;  %v1435_v58 = vcombine.high %v1419_v53, %v1419_v53 }
 0x120   :  { %7563 = vmatpush3.bf16.msra.mxu0 %v8280_v61  ;;  %v8321_v61 = vld [vmem:[%s10523_s1 + $0xa08] sm:$0xff]  }
 0x121   :  { %7592 = vmatprep.subr.bf16.mxu0 %v8282_v3  ;;  %v8327_v3 = vld [vmem:[%s10523_s1 + $0xa58] sm:$0xff]  }
 0x122   :  { %7585 = vmatpush3.bf16.msra.mxu1 %v8281_v0  ;;  %v8324_v0 = vld [vmem:[%s10523_s1 + $0xad0] sm:$0xff]  }
 0x123   :  { %5835 = vmatmul.mubr.bf16.vlgmr.msra.gmra.mrb[32].mxu0 %v1412_v2  ;;  %7614 = vmatprep.subr.bf16.mxu1 %v8283_v6  ;;  %v8326_v2 = vld [vmem:[%s10523_s1 + $0xa90] sm:$0xff]   ;;  %v8330_v6 = vld [vmem:[%s10523_s1 + $0xa98] sm:$0xff]  }
 0x124   :  { %7593 = vmatpush3.bf16.msra.mxu0 %v8284_v7  ;;  %5914 = vmatprep.mubr.bf16.mxu0 %v1433_v8  ;;  %v8331_v7 = vld [vmem:[%s10523_s1 + $0xa60] sm:$0xff]  }
 0x125   :  { %5875 = vmatmul.mubr.bf16.vlgmr.msra.gmra.mrb[32].mxu1 %v1434_v10  ;;  %7594 = vmatprep.subr.bf16.mxu0 %v8286_v11  ;;  %v8332_v8 = vld [vmem:[%s10523_s1 + $0xae0] sm:$0xff]   ;;  %v8335_v11 = vld [vmem:[%s10523_s1 + $0xa68] sm:$0xff]  }
 0x126   :  { %7615 = vmatpush3.bf16.msra.mxu1 %v8285_v9  ;;  %5954 = vmatprep.mubr.bf16.mxu1 %v1437_v13  ;;  %v8333_v9 = vld [vmem:[%s10523_s1 + $0xa20] sm:$0xff]   ;;  %v8337_v13 = vld [vmem:[%s10523_s1 + $0xa28] sm:$0xff]  }
 0x127   :  { %7616 = vmatprep.subr.bf16.mxu1 %v8287_v12  ;;  %v8334_v10 = vld [vmem:[%s10523_s1 + $0xaa0] sm:$0xff]   ;;  %v8336_v12 = vld [vmem:[%s10523_s1 + $0xae8] sm:$0xff]  }
 0x128   :  { %7595 = vmatpush3.bf16.msra.mxu0 %v8288_v14  ;;  %v8338_v14 = vld [vmem:[%s10523_s1 + $0xaa8] sm:$0xff]  }
 0x129   :  { %7596 = vmatprep.subr.bf16.mxu0 %v8290_v16 }
 0x12a   :  { %7617 = vmatpush3.bf16.msra.mxu1 %v8289_v15  ;;  %v8339_v15 = vld [vmem:[%s10523_s1 + $0xa70] sm:$0xff]  }
 0x12b   :  { %7618 = vmatprep.subr.bf16.mxu1 %v8291_v17  ;;  %v8340_v17 = vld [vmem:[%s10523_s1 + $0xaf0] sm:$0xff]  }
 0x12c   :  { %7597 = vmatpush3.bf16.msra.mxu0 %v8292_v18 }
 0x12d   :  { %7598 = vmatprep.subr.bf16.mxu0 %v8294_v20 }
 0x12e   :  { %7619 = vmatpush3.bf16.msra.mxu1 %v8293_v19  ;;  %v8341_v19 = vld [vmem:[%s10523_s1 + $0xa30] sm:$0xff]  }
 0x12f   :  { %7620 = vmatprep.subr.bf16.mxu1 %v8295_v21 }
 0x130   :  { %7599 = vmatpush3.bf16.msra.mxu0 %v8296_v22 }
 0x131   :  { %7600 = vmatprep.subr.bf16.mxu0 %v8298_v24  ;;  %v8343_v24 = vld [vmem:[%s10523_s1 + $0xa78] sm:$0xff]  }
 0x132   :  { %7621 = vmatpush3.bf16.msra.mxu1 %v8297_v23  ;;  %v8342_v23 = vld [vmem:[%s10523_s1 + $0xab0] sm:$0xff]  }
 0x133   :  { %7622 = vmatprep.subr.bf16.mxu1 %v8299_v25  ;;  %v21_v25 = vld [vmem:[%s10522_s0 + $0x28] sm:$0xff] }
 0x134   :  { %7601 = vmatpush3.bf16.msra.mxu0 %v8300_v26 }
 0x135   :  { %7602 = vmatprep.subr.bf16.mxu0 %v8302_v28  ;;  %v1445_v28 = vrot.slane %v21_v25, %v8726_v41 }
 0x136   :  { %7623 = vmatpush3.bf16.msra.mxu1 %v8301_v27  ;;  %v7300_v33 = vpop.f32.mrb[8].mxu0 }
 0x137   :  { %v7301_v35 = vpop.f32.mrb[9].mxu0  ;;  %7624 = vmatprep.subr.bf16.mxu1 %v8303_v29  ;;  %v1438_v29 = vcombine.high %v21_v25, %v21_v25  ;;  %v8377_v25 = vld [vmem:[%s10523_s1 + $0xb38] sm:$0xff]  }
 0x138   :  { %v7322_v37 = vpop.f32.mrb[8].mxu1  ;;  %v7302_v38 = vadd.f32 %v7301_v35, %v7300_v33  ;;  %v7303_v39 = vpop.f32.mrb[10].mxu0  ;;  %7603 = vmatpush3.bf16.msra.mxu0 %v8304_v30  ;;  %v8344_v33 = vld [vmem:[%s10523_s1 + $0xaf8] sm:$0xff]  }
 0x139   :  { %v7323_v43 = vpop.f32.mrb[9].mxu1  ;;  %v7304_v44 = vpop.f32.mrb[11].mxu0  ;;  %7604 = vmatprep.subr.bf16.mxu0 %v8306_v32  ;;  %v8345_v35 = vld [vmem:[%s10523_s1 + $0xa38] sm:$0xff]  }
 0x13a   :  { %v5357_v45 = vadd.f32 %v7302_v38, %v9553_v63  ;;  %v7324_v46 = vadd.f32 %v7323_v43, %v7322_v37  ;;  %v7325_v47 = vpop.f32.mrb[10].mxu1  ;;  %7625 = vmatpush3.bf16.msra.mxu1 %v8305_v31  ;;  %v8323_v63 = vld [vmem:[%s10523_s1 + $0xa50] sm:$0xff]   ;;  %v9763_v37 = vrot.slane %v1438_v29, %v8726_v41  ;;  %v8346_v39 = vld [vmem:[%s10523_s1 + $0xab8] sm:$0xff]   ;;  %v8347_v43 = vld [vmem:[%s10523_s1 + $0xb40] sm:$0xff]  }
 0x13b   :  { %v7326_v49 = vpop.f32.mrb[11].mxu1  ;;  %7626 = vmatprep.subr.bf16.mxu1 %v8307_v34  ;;  %v8349_v47 = vld [vmem:[%s10523_s1 + $0xb00] sm:$0xff]  }
 0x13c   :  { %v9657_v51 = vadd.f32 %v7324_v46, %v5357_v45  ;;  %7605 = vmatpush3.bf16.msra.mxu0 %v8308_v36  ;;  %v1453_v36 = vcombine.high %v1445_v28, %v1445_v28  ;;  %v1454_v44 = vcombine.high %v9763_v37, %v9763_v37  ;;  %v8348_v45 = vld [vmem:[%s10523_s1 + $0xbc0] sm:$0xff]  }
 0x13d   :  { %7606 = vmatprep.subr.bf16.mxu0 %v8310_v42  ;;  %v1461_v42 = vrot.slane %v1445_v28, %v8726_v41  ;;  %v8350_v49 = vld [vmem:[%s10523_s1 + $0xb80] sm:$0xff]   ;;  %v1468_v28 = vrot.slane %v9763_v37, %v8726_v41  ;;  %v8387_v37 = vld [vmem:[%s10523_s1 + $0xc88] sm:$0xff]  }
 0x13e   :  { %7627 = vmatpush3.bf16.msra.mxu1 %v8309_v40  ;;  %v1475_v40 = vrot.slane %v1453_v36, %v8726_v41  ;;  %v8380_v29 = vld [vmem:[%s10523_s1 + $0xc40] sm:$0xff]   ;;  %v8386_v36 = vld [vmem:[%s10523_s1 + $0xc08] sm:$0xff]  }
 0x13f   :  { %7628 = vmatprep.subr.bf16.mxu1 %v8311_v48  ;;  %v1482_v48 = vrot.slane %v1454_v44, %v8726_v41  ;;  %v8393_v44 = vld [vmem:[%s10523_s1 + $0xcd8] sm:$0xff]  }
 0x140   :  { %7607 = vmatpush3.bf16.msra.mxu0 %v8312_v50  ;;  %v1485_v46 = vcombine.high %v1475_v40, %v1475_v40  ;;  %v1483_v50 = vcombine.high %v1461_v42, %v1461_v42 }
 0x141   :  { %7636 = vmatprep.subr.bf16.mxu0 %v8315_v54  ;;  %v8353_v54 = vld [vmem:[%s10523_s1 + $0xb08] sm:$0xff]  }
 0x142   :  { %7629 = vmatpush3.bf16.msra.mxu1 %v8313_v52  ;;  %v8352_v52 = vld [vmem:[%s10523_s1 + $0xbc8] sm:$0xff]  }
 0x143   :  { %5915 = vmatmul.mubr.bf16.vlgmr.msra.gmra.mrb[36].mxu0 %v1419_v53  ;;  %7658 = vmatprep.subr.bf16.mxu1 %v8316_v55  ;;  %v1486_v53 = vcombine.high %v1482_v48, %v1482_v48  ;;  %v8354_v55 = vld [vmem:[%s10523_s1 + $0xb88] sm:$0xff]  }
 0x144   :  { %7637 = vmatpush3.bf16.msra.mxu0 %v8317_v56  ;;  %5994 = vmatprep.mubr.bf16.mxu0 %v1475_v40  ;;  %v8355_v56 = vld [vmem:[%s10523_s1 + $0xb50] sm:$0xff]  }
 0x145   :  { %5955 = vmatmul.mubr.bf16.vlgmr.msra.gmra.mrb[36].mxu1 %v1435_v58  ;;  %7638 = vmatprep.subr.bf16.mxu0 %v8319_v59  ;;  %v8357_v58 = vld [vmem:[%s10523_s1 + $0xb10] sm:$0xff]  }
 0x146   :  { %7659 = vmatpush3.bf16.msra.mxu1 %v8318_v57  ;;  %6034 = vmatprep.mubr.bf16.mxu1 %v1485_v46  ;;  %v8356_v57 = vld [vmem:[%s10523_s1 + $0xbd0] sm:$0xff]   ;;  %v8395_v46 = vld [vmem:[%s10523_s1 + $0xc98] sm:$0xff]  }
 0x147   :  { %7660 = vmatprep.subr.bf16.mxu1 %v8320_v60  ;;  %v8358_v59 = vld [vmem:[%s10523_s1 + $0xb90] sm:$0xff]   ;;  %v8359_v60 = vld [vmem:[%s10523_s1 + $0xb58] sm:$0xff]  }
 0x148   :  { %7639 = vmatpush3.bf16.msra.mxu0 %v8321_v61  ;;  %v8360_v61 = vld [vmem:[%s10523_s1 + $0xbd8] sm:$0xff]   ;;  %v8390_v40 = vld [vmem:[%s10523_s1 + $0xc10] sm:$0xff]  }
 0x149   :  { %7640 = vmatprep.subr.bf16.mxu0 %v8323_v63  ;;  %v8362_v63 = vld [vmem:[%s10523_s1 + $0xb98] sm:$0xff]  }
 0x14a   :  { %7661 = vmatpush3.bf16.msra.mxu1 %v8322_v62  ;;  %v8361_v62 = vld [vmem:[%s10523_s1 + $0xb18] sm:$0xff]  }
 0x14b   :  { %7662 = vmatprep.subr.bf16.mxu1 %v8324_v0  ;;  %v8363_v0 = vld [vmem:[%s10523_s1 + $0xb60] sm:$0xff]  }
 0x14c   :  { %7641 = vmatpush3.bf16.msra.mxu0 %v8325_v1  ;;  %v8364_v1 = vld [vmem:[%s10523_s1 + $0xbe0] sm:$0xff]  }
 0x14d   :  { %7642 = vmatprep.subr.bf16.mxu0 %v8327_v3  ;;  %v8366_v3 = vld [vmem:[%s10523_s1 + $0xba0] sm:$0xff]  }
 0x14e   :  { %7663 = vmatpush3.bf16.msra.mxu1 %v8326_v2  ;;  %v8365_v2 = vld [vmem:[%s10523_s1 + $0xb20] sm:$0xff]  }
 0x14f   :  { %7664 = vmatprep.subr.bf16.mxu1 %v8328_v4  ;;  %v8367_v4 = vld [vmem:[%s10523_s1 + $0xb68] sm:$0xff]  }
 0x150   :  { %7643 = vmatpush3.bf16.msra.mxu0 %v8329_v5  ;;  %v8368_v5 = vld [vmem:[%s10523_s1 + $0xbe8] sm:$0xff]  }
 0x151   :  { %7644 = vmatprep.subr.bf16.mxu0 %v8331_v7  ;;  %v8370_v7 = vld [vmem:[%s10523_s1 + $0xba8] sm:$0xff]  }
 0x152   :  { %7665 = vmatpush3.bf16.msra.mxu1 %v8330_v6  ;;  %v8369_v6 = vld [vmem:[%s10523_s1 + $0xb28] sm:$0xff]  }
 0x153   :  { %7666 = vmatprep.subr.bf16.mxu1 %v8332_v8  ;;  %v8371_v8 = vld [vmem:[%s10523_s1 + $0xb70] sm:$0xff]  }
 0x154   :  { %7645 = vmatpush3.bf16.msra.mxu0 %v8333_v9 }
 0x155   :  { %7646 = vmatprep.subr.bf16.mxu0 %v8335_v11 }
 0x156   :  { %7667 = vmatpush3.bf16.msra.mxu1 %v8334_v10  ;;  %v7344_v16 = vpop.f32.mrb[12].mxu0  ;;  %v8372_v10 = vld [vmem:[%s10523_s1 + $0xbf0] sm:$0xff]  }
 0x157   :  { %v7345_v18 = vpop.f32.mrb[13].mxu0  ;;  %7668 = vmatprep.subr.bf16.mxu1 %v8336_v12  ;;  %v8373_v12 = vld [vmem:[%s10523_s1 + $0xb30] sm:$0xff]  }
 0x158   :  { %v7366_v20 = vpop.f32.mrb[12].mxu1  ;;  %v7346_v21 = vadd.f32 %v7345_v18, %v7344_v16  ;;  %v7347_v22 = vpop.f32.mrb[14].mxu0  ;;  %7647 = vmatpush3.bf16.msra.mxu0 %v8337_v13  ;;  %v8374_v16 = vld [vmem:[%s10523_s1 + $0xbb0] sm:$0xff]  }
 0x159   :  { %v7367_v26 = vpop.f32.mrb[13].mxu1  ;;  %v7348_v27 = vpop.f32.mrb[15].mxu0  ;;  %7648 = vmatprep.subr.bf16.mxu0 %v8339_v15 }
 0x15a   :  { %v5437_v30 = vadd.f32 %v7346_v21, %v9657_v51  ;;  %v7368_v31 = vadd.f32 %v7367_v26, %v7366_v20  ;;  %v7369_v32 = vpop.f32.mrb[14].mxu1  ;;  %7669 = vmatpush3.bf16.msra.mxu1 %v8338_v14  ;;  %v8351_v51 = vld [vmem:[%s10523_s1 + $0xb48] sm:$0xff]   ;;  %v8378_v27 = vld [vmem:[%s10523_s1 + $0xbb8] sm:$0xff]  }
 0x15b   :  { %v7370_v34 = vpop.f32.mrb[15].mxu1  ;;  %7670 = vmatprep.subr.bf16.mxu1 %v8340_v17  ;;  %v8375_v17 = vld [vmem:[%s10523_s1 + $0xb78] sm:$0xff]   ;;  %v8383_v32 = vld [vmem:[%s10523_s1 + $0xc80] sm:$0xff]  }
 0x15c   :  { %v9765_v38 = vadd.f32 %v7368_v31, %v5437_v30  ;;  %7649 = vmatpush3.bf16.msra.mxu0 %v8341_v19  ;;  %v8381_v30 = vld [vmem:[%s10523_s1 + $0xcc0] sm:$0xff]   ;;  %v8384_v34 = vld [vmem:[%s10523_s1 + $0xc48] sm:$0xff]  }
 0x15d   :  { %7650 = vmatprep.subr.bf16.mxu0 %v8343_v24  ;;  %v8382_v31 = vld [vmem:[%s10523_s1 + $0xc00] sm:$0xff]  }
 0x15e   :  { %7671 = vmatpush3.bf16.msra.mxu1 %v8342_v23  ;;  %v8376_v23 = vld [vmem:[%s10523_s1 + $0xbf8] sm:$0xff]  }
 0x15f   :  { %7672 = vmatprep.subr.bf16.mxu1 %v8344_v33  ;;  %v1484_v33 = vcombine.high %v1468_v28, %v1468_v28 }
 0x160   :  { %7651 = vmatpush3.bf16.msra.mxu0 %v8345_v35  ;;  %v8385_v35 = vld [vmem:[%s10523_s1 + $0xcc8] sm:$0xff]  }
 0x161   :  { %7680 = vmatprep.subr.bf16.mxu0 %v8347_v43  ;;  %v8392_v43 = vld [vmem:[%s10523_s1 + $0xc58] sm:$0xff]  }
 0x162   :  { %7673 = vmatpush3.bf16.msra.mxu1 %v8346_v39  ;;  %v8389_v39 = vld [vmem:[%s10523_s1 + $0xcd0] sm:$0xff]  }
 0x163   :  { %5995 = vmatmul.mubr.bf16.vlgmr.msra.gmra.mrb[40].mxu0 %v1461_v42  ;;  %7702 = vmatprep.subr.bf16.mxu1 %v8348_v45  ;;  %v8391_v42 = vld [vmem:[%s10523_s1 + $0xc90] sm:$0xff]   ;;  %v8394_v45 = vld [vmem:[%s10523_s1 + $0xc18] sm:$0xff]  }
 0x164   :  { %7681 = vmatpush3.bf16.msra.mxu0 %v8349_v47  ;;  %6074 = vmatprep.mubr.bf16.mxu0 %v1482_v48  ;;  %v8396_v47 = vld [vmem:[%s10523_s1 + $0xc60] sm:$0xff]  }
 0x165   :  { %6035 = vmatmul.mubr.bf16.vlgmr.msra.gmra.mrb[40].mxu1 %v1483_v50  ;;  %7682 = vmatprep.subr.bf16.mxu0 %v8351_v51  ;;  %v8397_v48 = vld [vmem:[%s10523_s1 + $0xce0] sm:$0xff]   ;;  %v8400_v51 = vld [vmem:[%s10523_s1 + $0xc68] sm:$0xff]  }
 0x166   :  { %7703 = vmatpush3.bf16.msra.mxu1 %v8350_v49  ;;  %6114 = vmatprep.mubr.bf16.mxu1 %v1486_v53  ;;  %v8398_v49 = vld [vmem:[%s10523_s1 + $0xc20] sm:$0xff]   ;;  %v8402_v53 = vld [vmem:[%s10523_s1 + $0xc28] sm:$0xff]  }
 0x167   :  { %7704 = vmatprep.subr.bf16.mxu1 %v8352_v52  ;;  %v8399_v50 = vld [vmem:[%s10523_s1 + $0xca0] sm:$0xff]   ;;  %v8401_v52 = vld [vmem:[%s10523_s1 + $0xce8] sm:$0xff]  }
 0x168   :  { %7683 = vmatpush3.bf16.msra.mxu0 %v8353_v54  ;;  %v8403_v54 = vld [vmem:[%s10523_s1 + $0xca8] sm:$0xff]  }
 0x169   :  { %7684 = vmatprep.subr.bf16.mxu0 %v8355_v56 }
 0x16a   :  { %7705 = vmatpush3.bf16.msra.mxu1 %v8354_v55  ;;  %v8404_v55 = vld [vmem:[%s10523_s1 + $0xc70] sm:$0xff]  }
 0x16b   :  { %7706 = vmatprep.subr.bf16.mxu1 %v8356_v57  ;;  %v8405_v57 = vld [vmem:[%s10523_s1 + $0xcf0] sm:$0xff]  }
 0x16c   :  { %7685 = vmatpush3.bf16.msra.mxu0 %v8357_v58 }
 0x16d   :  { %7686 = vmatprep.subr.bf16.mxu0 %v8359_v60 }
 0x16e   :  { %7707 = vmatpush3.bf16.msra.mxu1 %v8358_v59  ;;  %v8406_v59 = vld [vmem:[%s10523_s1 + $0xc30] sm:$0xff]  }
 0x16f   :  { %7708 = vmatprep.subr.bf16.mxu1 %v8360_v61 }
 0x170   :  { %7687 = vmatpush3.bf16.msra.mxu0 %v8361_v62 }
 0x171   :  { %7688 = vmatprep.subr.bf16.mxu0 %v8363_v0 }
 0x172   :  { %7709 = vmatpush3.bf16.msra.mxu1 %v8362_v63  ;;  %v8407_v63 = vld [vmem:[%s10523_s1 + $0xcb0] sm:$0xff]  }
 0x173   :  { %7710 = vmatprep.subr.bf16.mxu1 %v8364_v1 }
 0x174   :  { %7689 = vmatpush3.bf16.msra.mxu0 %v8365_v2  ;;  %v8408_v2 = vld [vmem:[%s10523_s1 + $0xc78] sm:$0xff]  }
 0x175   :  { %7690 = vmatprep.subr.bf16.mxu0 %v8367_v4 }
 0x176   :  { %7711 = vmatpush3.bf16.msra.mxu1 %v8366_v3  ;;  %v7388_v9 = vpop.f32.mrb[16].mxu0  ;;  %v22_v3 = vld [vmem:[%s10522_s0 + $0x30] sm:$0xff] }
 0x177   :  { %v7389_v11 = vpop.f32.mrb[17].mxu0  ;;  %7712 = vmatprep.subr.bf16.mxu1 %v8368_v5 }
 0x178   :  { %v7410_v13 = vpop.f32.mrb[16].mxu1  ;;  %v7390_v14 = vadd.f32 %v7389_v11, %v7388_v9  ;;  %v7391_v15 = vpop.f32.mrb[18].mxu0  ;;  %7691 = vmatpush3.bf16.msra.mxu0 %v8369_v6  ;;  %v1487_v9 = vcombine.high %v22_v3, %v22_v3  ;;  %v8410_v11 = vld [vmem:[%s10523_s1 + $0xc38] sm:$0xff]  }
 0x179   :  { %v7411_v18 = vpop.f32.mrb[17].mxu1  ;;  %v7392_v19 = vpop.f32.mrb[19].mxu0  ;;  %7692 = vmatprep.subr.bf16.mxu0 %v8371_v8  ;;  %v1494_v8 = vrot.slane %v22_v3, %v8726_v41  ;;  %v8443_v3 = vld [vmem:[%s10523_s1 + $0xdb8] sm:$0xff]  }
 0x17a   :  { %v5517_v20 = vadd.f32 %v7390_v14, %v9765_v38  ;;  %v7412_v21 = vadd.f32 %v7411_v18, %v7410_v13  ;;  %v7413_v22 = vpop.f32.mrb[18].mxu1  ;;  %7713 = vmatpush3.bf16.msra.mxu1 %v8370_v7  ;;  %v8388_v38 = vld [vmem:[%s10523_s1 + $0xc50] sm:$0xff]   ;;  %v8409_v7 = vld [vmem:[%s10523_s1 + $0xcf8] sm:$0xff]   ;;  %v9980_v15 = vrot.slane %v1487_v9, %v8726_v41  ;;  %v8413_v19 = vld [vmem:[%s10523_s1 + $0xdc0] sm:$0xff]  }
 0x17b   :  { %v7414_v24 = vpop.f32.mrb[19].mxu1  ;;  %7714 = vmatprep.subr.bf16.mxu1 %v8372_v10  ;;  %v8411_v13 = vld [vmem:[%s10523_s1 + $0xcb8] sm:$0xff]   ;;  %v1502_v14 = vcombine.high %v1494_v8, %v1494_v8 }
 0x17c   :  { %v9869_v26 = vadd.f32 %v7412_v21, %v5517_v20  ;;  %7693 = vmatpush3.bf16.msra.mxu0 %v8373_v12  ;;  %v1503_v20 = vcombine.high %v9980_v15, %v9980_v15  ;;  %v8414_v21 = vld [vmem:[%s10523_s1 + $0xd00] sm:$0xff]  }
 0x17d   :  { %7694 = vmatprep.subr.bf16.mxu0 %v8375_v17  ;;  %v8412_v17 = vld [vmem:[%s10523_s1 + $0xd40] sm:$0xff]   ;;  %v1524_v18 = vrot.slane %v1502_v14, %v8726_v41  ;;  %v8453_v14 = vld [vmem:[%s10523_s1 + $0xe50] sm:$0xff]  }
 0x17e   :  { %7715 = vmatpush3.bf16.msra.mxu1 %v8374_v16  ;;  %v1510_v16 = vrot.slane %v1494_v8, %v8726_v41  ;;  %v1531_v24 = vrot.slane %v1503_v20, %v8726_v41  ;;  %v8448_v8 = vld [vmem:[%s10523_s1 + $0xe80] sm:$0xff]   ;;  %v8459_v20 = vld [vmem:[%s10523_s1 + $0xe18] sm:$0xff]  }
 0x17f   :  { %7716 = vmatprep.subr.bf16.mxu1 %v8376_v23  ;;  %v1534_v22 = vcombine.high %v1524_v18, %v1524_v18  ;;  %v8415_v23 = vld [vmem:[%s10523_s1 + $0xd80] sm:$0xff]  }
 0x180   :  { %7695 = vmatpush3.bf16.msra.mxu0 %v8377_v25  ;;  %v1532_v25 = vcombine.high %v1510_v16, %v1510_v16 }
 0x181   :  { %7724 = vmatprep.subr.bf16.mxu0 %v8380_v29  ;;  %v8418_v29 = vld [vmem:[%s10523_s1 + $0xd08] sm:$0xff]  }
 0x182   :  { %7717 = vmatpush3.bf16.msra.mxu1 %v8378_v27  ;;  %v8417_v27 = vld [vmem:[%s10523_s1 + $0xdc8] sm:$0xff]  }
 0x183   :  { %6075 = vmatmul.mubr.bf16.vlgmr.msra.gmra.mrb[44].mxu0 %v1468_v28  ;;  %7746 = vmatprep.subr.bf16.mxu1 %v8381_v30  ;;  %v1535_v28 = vcombine.high %v1531_v24, %v1531_v24  ;;  %v8419_v30 = vld [vmem:[%s10523_s1 + $0xd88] sm:$0xff]  }
 0x184   :  { %7725 = vmatpush3.bf16.msra.mxu0 %v8382_v31  ;;  %6154 = vmatprep.mubr.bf16.mxu0 %v1524_v18  ;;  %v8420_v31 = vld [vmem:[%s10523_s1 + $0xd50] sm:$0xff]   ;;  %v8457_v18 = vld [vmem:[%s10523_s1 + $0xe58] sm:$0xff]  }
 0x185   :  { %6115 = vmatmul.mubr.bf16.vlgmr.msra.gmra.mrb[44].mxu1 %v1484_v33  ;;  %7726 = vmatprep.subr.bf16.mxu0 %v8384_v34  ;;  %v8422_v33 = vld [vmem:[%s10523_s1 + $0xd10] sm:$0xff]  }
 0x186   :  { %7747 = vmatpush3.bf16.msra.mxu1 %v8383_v32  ;;  %6194 = vmatprep.mubr.bf16.mxu1 %v1534_v22  ;;  %v8421_v32 = vld [vmem:[%s10523_s1 + $0xdd0] sm:$0xff]   ;;  %v8461_v22 = vld [vmem:[%s10523_s1 + $0xe60] sm:$0xff]  }
 0x187   :  { %7748 = vmatprep.subr.bf16.mxu1 %v8385_v35  ;;  %v8423_v34 = vld [vmem:[%s10523_s1 + $0xd90] sm:$0xff]   ;;  %v8424_v35 = vld [vmem:[%s10523_s1 + $0xd58] sm:$0xff]  }
 0x188   :  { %7727 = vmatpush3.bf16.msra.mxu0 %v8386_v36  ;;  %v8425_v36 = vld [vmem:[%s10523_s1 + $0xdd8] sm:$0xff]  }
 0x189   :  { %7728 = vmatprep.subr.bf16.mxu0 %v8388_v38  ;;  %v8427_v38 = vld [vmem:[%s10523_s1 + $0xd98] sm:$0xff]  }
 0x18a   :  { %7749 = vmatpush3.bf16.msra.mxu1 %v8387_v37  ;;  %v8426_v37 = vld [vmem:[%s10523_s1 + $0xd18] sm:$0xff]  }
 0x18b   :  { %7750 = vmatprep.subr.bf16.mxu1 %v8389_v39  ;;  %v8428_v39 = vld [vmem:[%s10523_s1 + $0xd60] sm:$0xff]  }
 0x18c   :  { %7729 = vmatpush3.bf16.msra.mxu0 %v8390_v40  ;;  %v8429_v40 = vld [vmem:[%s10523_s1 + $0xde0] sm:$0xff]  }
 0x18d   :  { %7730 = vmatprep.subr.bf16.mxu0 %v8392_v43  ;;  %v8431_v43 = vld [vmem:[%s10523_s1 + $0xda0] sm:$0xff]  }
 0x18e   :  { %7751 = vmatpush3.bf16.msra.mxu1 %v8391_v42  ;;  %v8430_v42 = vld [vmem:[%s10523_s1 + $0xd20] sm:$0xff]  }
 0x18f   :  { %7752 = vmatprep.subr.bf16.mxu1 %v8393_v44  ;;  %v8432_v44 = vld [vmem:[%s10523_s1 + $0xd68] sm:$0xff]  }
 0x190   :  { %7731 = vmatpush3.bf16.msra.mxu0 %v8394_v45  ;;  %v8433_v45 = vld [vmem:[%s10523_s1 + $0xde8] sm:$0xff]  }
 0x191   :  { %7732 = vmatprep.subr.bf16.mxu0 %v8396_v47  ;;  %v8435_v47 = vld [vmem:[%s10523_s1 + $0xda8] sm:$0xff]  }
 0x192   :  { %7753 = vmatpush3.bf16.msra.mxu1 %v8395_v46  ;;  %v8434_v46 = vld [vmem:[%s10523_s1 + $0xd28] sm:$0xff]  }
 0x193   :  { %7754 = vmatprep.subr.bf16.mxu1 %v8397_v48  ;;  %v8436_v48 = vld [vmem:[%s10523_s1 + $0xd70] sm:$0xff]  }
 0x194   :  { %7733 = vmatpush3.bf16.msra.mxu0 %v8398_v49 }
 0x195   :  { %7734 = vmatprep.subr.bf16.mxu0 %v8400_v51 }
 0x196   :  { %7755 = vmatpush3.bf16.msra.mxu1 %v8399_v50  ;;  %v7432_v56 = vpop.f32.mrb[20].mxu0  ;;  %v8437_v50 = vld [vmem:[%s10523_s1 + $0xdf0] sm:$0xff]  }
 0x197   :  { %v7433_v58 = vpop.f32.mrb[21].mxu0  ;;  %7756 = vmatprep.subr.bf16.mxu1 %v8401_v52  ;;  %v8438_v52 = vld [vmem:[%s10523_s1 + $0xd30] sm:$0xff]  }
 0x198   :  { %v7454_v60 = vpop.f32.mrb[20].mxu1  ;;  %v7434_v61 = vadd.f32 %v7433_v58, %v7432_v56  ;;  %v7435_v62 = vpop.f32.mrb[22].mxu0  ;;  %7735 = vmatpush3.bf16.msra.mxu0 %v8402_v53  ;;  %v8439_v56 = vld [vmem:[%s10523_s1 + $0xdb0] sm:$0xff]  }
 0x199   :  { %v7455_v0 = vpop.f32.mrb[21].mxu1  ;;  %v7436_v1 = vpop.f32.mrb[23].mxu0  ;;  %7736 = vmatprep.subr.bf16.mxu0 %v8404_v55 }
 0x19a   :  { %v5597_v4 = vadd.f32 %v7434_v61, %v9869_v26  ;;  %v7456_v5 = vadd.f32 %v7455_v0, %v7454_v60  ;;  %v7457_v6 = vpop.f32.mrb[22].mxu1  ;;  %7757 = vmatpush3.bf16.msra.mxu1 %v8403_v54  ;;  %v8416_v26 = vld [vmem:[%s10523_s1 + $0xd48] sm:$0xff]   ;;  %v8442_v1 = vld [vmem:[%s10523_s1 + $0xd38] sm:$0xff]  }
 0x19b   :  { %v7458_v10 = vpop.f32.mrb[23].mxu1  ;;  %7758 = vmatprep.subr.bf16.mxu1 %v8405_v57  ;;  %v8440_v57 = vld [vmem:[%s10523_s1 + $0xd78] sm:$0xff]   ;;  %v8446_v6 = vld [vmem:[%s10523_s1 + $0xec0] sm:$0xff]  }
 0x19c   :  { %v9974_v12 = vadd.f32 %v7456_v5, %v5597_v4  ;;  %7737 = vmatpush3.bf16.msra.mxu0 %v8406_v59  ;;  %v1517_v4 = vrot.slane %v9980_v15, %v8726_v41  ;;  %v8445_v5 = vld [vmem:[%s10523_s1 + $0xe40] sm:$0xff]   ;;  %v8449_v10 = vld [vmem:[%s10523_s1 + $0xe48] sm:$0xff]   ;;  %v8454_v15 = vld [vmem:[%s10523_s1 + $0xed0] sm:$0xff]  }
 0x19d   :  { %7738 = vmatprep.subr.bf16.mxu0 %v8408_v2 }
 0x19e   :  { %7759 = vmatpush3.bf16.msra.mxu1 %v8407_v63  ;;  %v8441_v63 = vld [vmem:[%s10523_s1 + $0xdf8] sm:$0xff]   ;;  %v1533_v9 = vcombine.high %v1517_v4, %v1517_v4 }
 0x19f   :  { %7760 = vmatprep.subr.bf16.mxu1 %v8409_v7  ;;  %v8447_v7 = vld [vmem:[%s10523_s1 + $0xe00] sm:$0xff]  }
 0x1a0   :  { %7739 = vmatpush3.bf16.msra.mxu0 %v8410_v11  ;;  %v8450_v11 = vld [vmem:[%s10523_s1 + $0xec8] sm:$0xff]  }
 0x1a1   :  { %7768 = vmatprep.subr.bf16.mxu0 %v8412_v17  ;;  %v8456_v17 = vld [vmem:[%s10523_s1 + $0xe90] sm:$0xff]  }
 0x1a2   :  { %7761 = vmatpush3.bf16.msra.mxu1 %v8411_v13  ;;  %v8452_v13 = vld [vmem:[%s10523_s1 + $0xe88] sm:$0xff]  }
 0x1a3   :  { %6155 = vmatmul.mubr.bf16.vlgmr.msra.gmra.mrb[48].mxu0 %v1510_v16  ;;  %7790 = vmatprep.subr.bf16.mxu1 %v8413_v19  ;;  %v8455_v16 = vld [vmem:[%s10523_s1 + $0xe10] sm:$0xff]   ;;  %v8458_v19 = vld [vmem:[%s10523_s1 + $0xed8] sm:$0xff]  }
 0x1a4   :  { %7769 = vmatpush3.bf16.msra.mxu0 %v8414_v21  ;;  %6234 = vmatprep.mubr.bf16.mxu0 %v1531_v24  ;;  %v8460_v21 = vld [vmem:[%s10523_s1 + $0xe98] sm:$0xff]   ;;  %v8463_v24 = vld [vmem:[%s10523_s1 + $0xe20] sm:$0xff]  }
 0x1a5   :  { %6195 = vmatmul.mubr.bf16.vlgmr.msra.gmra.mrb[48].mxu1 %v1532_v25  ;;  %7770 = vmatprep.subr.bf16.mxu0 %v8416_v26  ;;  %v8464_v25 = vld [vmem:[%s10523_s1 + $0xea0] sm:$0xff]   ;;  %v8465_v26 = vld [vmem:[%s10523_s1 + $0xe68] sm:$0xff]  }
 0x1a6   :  { %7791 = vmatpush3.bf16.msra.mxu1 %v8415_v23  ;;  %6274 = vmatprep.mubr.bf16.mxu1 %v1535_v28  ;;  %v8462_v23 = vld [vmem:[%s10523_s1 + $0xee0] sm:$0xff]   ;;  %v8467_v28 = vld [vmem:[%s10523_s1 + $0xe28] sm:$0xff]  }
 0x1a7   :  { %7792 = vmatprep.subr.bf16.mxu1 %v8417_v27  ;;  %v8466_v27 = vld [vmem:[%s10523_s1 + $0xee8] sm:$0xff]  }
 0x1a8   :  { %7771 = vmatpush3.bf16.msra.mxu0 %v8418_v29  ;;  %v8468_v29 = vld [vmem:[%s10523_s1 + $0xea8] sm:$0xff]  }
 0x1a9   :  { %7772 = vmatprep.subr.bf16.mxu0 %v8420_v31 }
 0x1aa   :  { %7793 = vmatpush3.bf16.msra.mxu1 %v8419_v30  ;;  %v8469_v30 = vld [vmem:[%s10523_s1 + $0xe70] sm:$0xff]  }
 0x1ab   :  { %7794 = vmatprep.subr.bf16.mxu1 %v8421_v32  ;;  %v8470_v32 = vld [vmem:[%s10523_s1 + $0xef0] sm:$0xff]  }
 0x1ac   :  { %7773 = vmatpush3.bf16.msra.mxu0 %v8422_v33 }
 0x1ad   :  { %7774 = vmatprep.subr.bf16.mxu0 %v8424_v35 }
 0x1ae   :  { %7795 = vmatpush3.bf16.msra.mxu1 %v8423_v34  ;;  %v8471_v34 = vld [vmem:[%s10523_s1 + $0xe30] sm:$0xff]  }
 0x1af   :  { %7796 = vmatprep.subr.bf16.mxu1 %v8425_v36 }
 0x1b0   :  { %7775 = vmatpush3.bf16.msra.mxu0 %v8426_v37 }
 0x1b1   :  { %7776 = vmatprep.subr.bf16.mxu0 %v8428_v39 }
 0x1b2   :  { %7797 = vmatpush3.bf16.msra.mxu1 %v8427_v38  ;;  %v8472_v38 = vld [vmem:[%s10523_s1 + $0xeb0] sm:$0xff]  }
 0x1b3   :  { %7798 = vmatprep.subr.bf16.mxu1 %v8429_v40 }
 0x1b4   :  { %7777 = vmatpush3.bf16.msra.mxu0 %v8430_v42  ;;  %v8473_v42 = vld [vmem:[%s10523_s1 + $0xe78] sm:$0xff]  }
 0x1b5   :  { %7778 = vmatprep.subr.bf16.mxu0 %v8432_v44 }
 0x1b6   :  { %7799 = vmatpush3.bf16.msra.mxu1 %v8431_v43  ;;  %v7476_v49 = vpop.f32.mrb[24].mxu0  ;;  %v8474_v43 = vld [vmem:[%s10523_s1 + $0xef8] sm:$0xff]  }
 0x1b7   :  { %v7477_v51 = vpop.f32.mrb[25].mxu0  ;;  %7800 = vmatprep.subr.bf16.mxu1 %v8433_v45 }
 0x1b8   :  { %v7498_v53 = vpop.f32.mrb[24].mxu1  ;;  %v7478_v54 = vadd.f32 %v7477_v51, %v7476_v49  ;;  %v7479_v55 = vpop.f32.mrb[26].mxu0  ;;  %7779 = vmatpush3.bf16.msra.mxu0 %v8434_v46  ;;  %v8475_v49 = vld [vmem:[%s10523_s1 + $0xe38] sm:$0xff]  }
 0x1b9   :  { %v7499_v58 = vpop.f32.mrb[25].mxu1  ;;  %v7480_v59 = vpop.f32.mrb[27].mxu0  ;;  %7780 = vmatprep.subr.bf16.mxu0 %v8436_v48 }
 0x1ba   :  { %v5677_v60 = vadd.f32 %v7478_v54, %v9974_v12  ;;  %v7500_v61 = vadd.f32 %v7499_v58, %v7498_v53  ;;  %v7501_v62 = vpop.f32.mrb[26].mxu1  ;;  %7801 = vmatpush3.bf16.msra.mxu1 %v8435_v47  ;;  %v8451_v12 = vld [vmem:[%s10523_s1 + $0xe08] sm:$0xff]   ;;  %v23_v47 = vld [vmem:[%s10522_s0 + $0x38] sm:$0xff]  ;;  %v8478_v58 = vld [vmem:[%s10523_s1 + $0xfc0] sm:$0xff]  }
 0x1bb   :  { %v7502_v0 = vpop.f32.mrb[27].mxu1  ;;  %7802 = vmatprep.subr.bf16.mxu1 %v8437_v50  ;;  %v1543_v50 = vrot.slane %v23_v47, %v8726_v41  ;;  %v1536_v51 = vcombine.high %v23_v47, %v23_v47  ;;  %v8476_v53 = vld [vmem:[%s10523_s1 + $0xeb8] sm:$0xff]   ;;  %v8480_v62 = vld [vmem:[%s10523_s1 + $0xf80] sm:$0xff]  }
 0x1bc   :  { %v10081_v2 = vadd.f32 %v7500_v61, %v5677_v60  ;;  %7781 = vmatpush3.bf16.msra.mxu0 %v8438_v52  ;;  %v8479_v60 = vld [vmem:[%s10523_s1 + $0xf00] sm:$0xff]  }
 0x1bd   :  { %7782 = vmatprep.subr.bf16.mxu0 %v8440_v57  ;;  %v1551_v54 = vcombine.high %v1543_v50, %v1543_v50  ;;  %v1559_v55 = vrot.slane %v1543_v50, %v8726_v41  ;;  %v10196_v57 = vrot.slane %v1536_v51, %v8726_v41  ;;  %v8512_v47 = vld [vmem:[%s10523_s1 + $0x1000] sm:$0xff]   ;;  %v8514_v50 = vld [vmem:[%s10523_s1 + $0x1048] sm:$0xff]  }
 0x1be   :  { %7803 = vmatpush3.bf16.msra.mxu1 %v8439_v56  ;;  %v8477_v56 = vld [vmem:[%s10523_s1 + $0xf40] sm:$0xff]   ;;  %v8515_v51 = vld [vmem:[%s10523_s1 + $0x10c8] sm:$0xff]  }
 0x1bf   :  { %7804 = vmatprep.subr.bf16.mxu1 %v8441_v63  ;;  %v1573_v59 = vrot.slane %v1551_v54, %v8726_v41  ;;  %v1552_v61 = vcombine.high %v10196_v57, %v10196_v57  ;;  %v1581_v0 = vcombine.high %v1559_v55, %v1559_v55  ;;  %v8518_v54 = vld [vmem:[%s10523_s1 + $0x1050] sm:$0xff]  }
 0x1c0   :  { %7783 = vmatpush3.bf16.msra.mxu0 %v8442_v1  ;;  %v8481_v1 = vld [vmem:[%s10523_s1 + $0xf48] sm:$0xff]  }
 0x1c1   :  { %7812 = vmatprep.subr.bf16.mxu0 %v8445_v5  ;;  %v1583_v63 = vcombine.high %v1573_v59, %v1573_v59 }
 0x1c2   :  { %7805 = vmatpush3.bf16.msra.mxu1 %v8443_v3  ;;  %v8482_v3 = vld [vmem:[%s10523_s1 + $0xfc8] sm:$0xff]  }
 0x1c3   :  { %6235 = vmatmul.mubr.bf16.vlgmr.msra.gmra.mrb[52].mxu0 %v1517_v4  ;;  %7834 = vmatprep.subr.bf16.mxu1 %v8446_v6  ;;  %v8483_v4 = vld [vmem:[%s10523_s1 + $0xf08] sm:$0xff]  }
 0x1c4   :  { %7813 = vmatpush3.bf16.msra.mxu0 %v8447_v7  ;;  %6314 = vmatprep.mubr.bf16.mxu0 %v1573_v59  ;;  %v8484_v6 = vld [vmem:[%s10523_s1 + $0xf88] sm:$0xff]   ;;  %v8485_v7 = vld [vmem:[%s10523_s1 + $0xf50] sm:$0xff]   ;;  %v8523_v59 = vld [vmem:[%s10523_s1 + $0x10d8] sm:$0xff]  }
 0x1c5   :  { %6275 = vmatmul.mubr.bf16.vlgmr.msra.gmra.mrb[52].mxu1 %v1533_v9  ;;  %7814 = vmatprep.subr.bf16.mxu0 %v8449_v10  ;;  %v8487_v9 = vld [vmem:[%s10523_s1 + $0xf10] sm:$0xff]  }
 0x1c6   :  { %7835 = vmatpush3.bf16.msra.mxu1 %v8448_v8  ;;  %6354 = vmatprep.mubr.bf16.mxu1 %v1583_v63  ;;  %v8486_v8 = vld [vmem:[%s10523_s1 + $0xfd0] sm:$0xff]   ;;  %v8527_v63 = vld [vmem:[%s10523_s1 + $0x10e0] sm:$0xff]  }
 0x1c7   :  { %7836 = vmatprep.subr.bf16.mxu1 %v8450_v11  ;;  %v8488_v10 = vld [vmem:[%s10523_s1 + $0xf90] sm:$0xff]   ;;  %v8489_v11 = vld [vmem:[%s10523_s1 + $0xf58] sm:$0xff]  }
 0x1c8   :  { %7815 = vmatpush3.bf16.msra.mxu0 %v8451_v12  ;;  %v8490_v12 = vld [vmem:[%s10523_s1 + $0xfd8] sm:$0xff]  }
 0x1c9   :  { %7816 = vmatprep.subr.bf16.mxu0 %v8453_v14  ;;  %v8492_v14 = vld [vmem:[%s10523_s1 + $0xf98] sm:$0xff]  }
 0x1ca   :  { %7837 = vmatpush3.bf16.msra.mxu1 %v8452_v13  ;;  %v8491_v13 = vld [vmem:[%s10523_s1 + $0xf18] sm:$0xff]  }
 0x1cb   :  { %7838 = vmatprep.subr.bf16.mxu1 %v8454_v15  ;;  %v8493_v15 = vld [vmem:[%s10523_s1 + $0xf60] sm:$0xff]  }
 0x1cc   :  { %7817 = vmatpush3.bf16.msra.mxu0 %v8455_v16  ;;  %v8494_v16 = vld [vmem:[%s10523_s1 + $0xfe0] sm:$0xff]  }
 0x1cd   :  { %7818 = vmatprep.subr.bf16.mxu0 %v8457_v18  ;;  %v8496_v18 = vld [vmem:[%s10523_s1 + $0xfa0] sm:$0xff]  }
 0x1ce   :  { %7839 = vmatpush3.bf16.msra.mxu1 %v8456_v17  ;;  %v8495_v17 = vld [vmem:[%s10523_s1 + $0xf20] sm:$0xff]  }
 0x1cf   :  { %7840 = vmatprep.subr.bf16.mxu1 %v8458_v19  ;;  %v8497_v19 = vld [vmem:[%s10523_s1 + $0xf68] sm:$0xff]  }
 0x1d0   :  { %7819 = vmatpush3.bf16.msra.mxu0 %v8459_v20  ;;  %v8498_v20 = vld [vmem:[%s10523_s1 + $0xfe8] sm:$0xff]  }
 0x1d1   :  { %7820 = vmatprep.subr.bf16.mxu0 %v8461_v22  ;;  %v8500_v22 = vld [vmem:[%s10523_s1 + $0xfa8] sm:$0xff]  }
 0x1d2   :  { %7841 = vmatpush3.bf16.msra.mxu1 %v8460_v21  ;;  %v8499_v21 = vld [vmem:[%s10523_s1 + $0xf28] sm:$0xff]  }
 0x1d3   :  { %7842 = vmatprep.subr.bf16.mxu1 %v8462_v23  ;;  %v8501_v23 = vld [vmem:[%s10523_s1 + $0xf70] sm:$0xff]  }
 0x1d4   :  { %7821 = vmatpush3.bf16.msra.mxu0 %v8463_v24 }
 0x1d5   :  { %7822 = vmatprep.subr.bf16.mxu0 %v8465_v26 }
 0x1d6   :  { %7843 = vmatpush3.bf16.msra.mxu1 %v8464_v25  ;;  %v7520_v31 = vpop.f32.mrb[28].mxu0  ;;  %v8502_v25 = vld [vmem:[%s10523_s1 + $0xff0] sm:$0xff]  }
 0x1d7   :  { %v7521_v33 = vpop.f32.mrb[29].mxu0  ;;  %7844 = vmatprep.subr.bf16.mxu1 %v8466_v27  ;;  %v8503_v27 = vld [vmem:[%s10523_s1 + $0xf30] sm:$0xff]  }
 0x1d8   :  { %v7542_v35 = vpop.f32.mrb[28].mxu1  ;;  %v7522_v36 = vadd.f32 %v7521_v33, %v7520_v31  ;;  %v7523_v37 = vpop.f32.mrb[30].mxu0  ;;  %7823 = vmatpush3.bf16.msra.mxu0 %v8467_v28  ;;  %v8504_v31 = vld [vmem:[%s10523_s1 + $0xfb0] sm:$0xff]  }
 0x1d9   :  { %v7543_v39 = vpop.f32.mrb[29].mxu1  ;;  %v7524_v40 = vpop.f32.mrb[31].mxu0  ;;  %7824 = vmatprep.subr.bf16.mxu0 %v8469_v30 }
 0x1da   :  { %v5757_v44 = vadd.f32 %v7522_v36, %v10081_v2  ;;  %v7544_v45 = vadd.f32 %v7543_v39, %v7542_v35  ;;  %v7545_v46 = vpop.f32.mrb[30].mxu1  ;;  %7845 = vmatpush3.bf16.msra.mxu1 %v8468_v29  ;;  %v1580_v2 = vrot.slane %v1552_v61, %v8726_v41  ;;  %v8507_v40 = vld [vmem:[%s10523_s1 + $0xf38] sm:$0xff]  }
 0x1db   :  { %v7546_v48 = vpop.f32.mrb[31].mxu1  ;;  %7846 = vmatprep.subr.bf16.mxu1 %v8470_v32  ;;  %v8505_v32 = vld [vmem:[%s10523_s1 + $0xf78] sm:$0xff]   ;;  %v8511_v46 = vld [vmem:[%s10523_s1 + $0x10c0] sm:$0xff]  }
 0x1dc   :  { %v10186_v52 = vadd.f32 %v7544_v45, %v5757_v44  ;;  %7825 = vmatpush3.bf16.msra.mxu0 %v8471_v34  ;;  %v1584_v5 = vcombine.high %v1580_v2, %v1580_v2  ;;  %v1566_v44 = vrot.slane %v10196_v57, %v8726_v41  ;;  %v8510_v45 = vld [vmem:[%s10523_s1 + $0x1040] sm:$0xff]   ;;  %v8521_v57 = vld [vmem:[%s10523_s1 + $0x1090] sm:$0xff]   ;;  %v8525_v61 = vld [vmem:[%s10523_s1 + $0x1098] sm:$0xff]  }
 0x1dd   :  { %7826 = vmatprep.subr.bf16.mxu0 %v8473_v42  ;;  %v8513_v48 = vld [vmem:[%s10523_s1 + $0x1080] sm:$0xff]  }
 0x1de   :  { %7847 = vmatpush3.bf16.msra.mxu1 %v8472_v38  ;;  %v8506_v38 = vld [vmem:[%s10523_s1 + $0xff8] sm:$0xff]  }
 0x1df   :  { %7848 = vmatprep.subr.bf16.mxu1 %v8474_v43  ;;  %v8508_v43 = vld [vmem:[%s10523_s1 + $0xfb8] sm:$0xff]  }
 0x1e0   :  { %7827 = vmatpush3.bf16.msra.mxu0 %v8475_v49  ;;  %v1582_v49 = vcombine.high %v1566_v44, %v1566_v44 }
 0x1e1   :  { %7856 = vmatprep.subr.bf16.mxu0 %v8477_v56  ;;  %v8520_v56 = vld [vmem:[%s10523_s1 + $0x1010] sm:$0xff]  }
 0x1e2   :  { %7849 = vmatpush3.bf16.msra.mxu1 %v8476_v53  ;;  %v8517_v53 = vld [vmem:[%s10523_s1 + $0x1088] sm:$0xff]  }
 0x1e3   :  { %6315 = vmatmul.mubr.bf16.vlgmr.msra.gmra.mrb[56].mxu0 %v1559_v55  ;;  %7878 = vmatprep.subr.bf16.mxu1 %v8478_v58  ;;  %v8519_v55 = vld [vmem:[%s10523_s1 + $0x10d0] sm:$0xff]   ;;  %v8522_v58 = vld [vmem:[%s10523_s1 + $0x1058] sm:$0xff]  }
 0x1e4   :  { %7857 = vmatpush3.bf16.msra.mxu0 %v8479_v60  ;;  %6394 = vmatprep.mubr.bf16.mxu0 %v1580_v2  ;;  %v8524_v60 = vld [vmem:[%s10523_s1 + $0x1018] sm:$0xff]   ;;  %v8530_v2 = vld [vmem:[%s10523_s1 + $0x1068] sm:$0xff]  }
 0x1e5   :  { %6355 = vmatmul.mubr.bf16.vlgmr.msra.gmra.mrb[56].mxu1 %v1581_v0  ;;  %7858 = vmatprep.subr.bf16.mxu0 %v8481_v1  ;;  %v8528_v0 = vld [vmem:[%s10523_s1 + $0x1020] sm:$0xff]  }
 0x1e6   :  { %7879 = vmatpush3.bf16.msra.mxu1 %v8480_v62  ;;  %6434 = vmatprep.mubr.bf16.mxu1 %v1584_v5  ;;  %v8526_v62 = vld [vmem:[%s10523_s1 + $0x1060] sm:$0xff]   ;;  %v8533_v5 = vld [vmem:[%s10523_s1 + $0x10a8] sm:$0xff]  }
 0x1e7   :  { %7880 = vmatprep.subr.bf16.mxu1 %v8482_v3  ;;  %v8529_v1 = vld [vmem:[%s10523_s1 + $0x10a0] sm:$0xff]   ;;  %v8531_v3 = vld [vmem:[%s10523_s1 + $0x10e8] sm:$0xff]  }
 0x1e8   :  { %7859 = vmatpush3.bf16.msra.mxu0 %v8483_v4  ;;  %v8532_v4 = vld [vmem:[%s10523_s1 + $0x1028] sm:$0xff]  }
 0x1e9   :  { %7860 = vmatprep.subr.bf16.mxu0 %v8485_v7 }
 0x1ea   :  { %7881 = vmatpush3.bf16.msra.mxu1 %v8484_v6  ;;  %v8534_v6 = vld [vmem:[%s10523_s1 + $0x1070] sm:$0xff]  }
 0x1eb   :  { %7882 = vmatprep.subr.bf16.mxu1 %v8486_v8  ;;  %v8535_v8 = vld [vmem:[%s10523_s1 + $0x10f0] sm:$0xff]  }
 0x1ec   :  { %7861 = vmatpush3.bf16.msra.mxu0 %v8487_v9 }
 0x1ed   :  { %7862 = vmatprep.subr.bf16.mxu0 %v8489_v11 }
 0x1ee   :  { %7883 = vmatpush3.bf16.msra.mxu1 %v8488_v10  ;;  %v8536_v10 = vld [vmem:[%s10523_s1 + $0x1030] sm:$0xff]  }
 0x1ef   :  { %7884 = vmatprep.subr.bf16.mxu1 %v8490_v12 }
 0x1f0   :  { %7863 = vmatpush3.bf16.msra.mxu0 %v8491_v13 }
 0x1f1   :  { %7864 = vmatprep.subr.bf16.mxu0 %v8493_v15 }
 0x1f2   :  { %7885 = vmatpush3.bf16.msra.mxu1 %v8492_v14 }
 0x1f3   :  { %7886 = vmatprep.subr.bf16.mxu1 %v8494_v16  ;;  %v8537_v16 = vld [vmem:[%s10523_s1 + $0x10b0] sm:$0xff]  }
 0x1f4   :  { %7865 = vmatpush3.bf16.msra.mxu0 %v8495_v17  ;;  %v8538_v17 = vld [vmem:[%s10523_s1 + $0x1078] sm:$0xff]  }
 0x1f5   :  { %7866 = vmatprep.subr.bf16.mxu0 %v8497_v19 }
 0x1f6   :  { %7887 = vmatpush3.bf16.msra.mxu1 %v8496_v18  ;;  %v7564_v24 = vpop.f32.mrb[32].mxu0 }
 0x1f7   :  { %v7565_v26 = vpop.f32.mrb[33].mxu0  ;;  %7888 = vmatprep.subr.bf16.mxu1 %v8498_v20 }
 0x1f8   :  { %v7586_v28 = vpop.f32.mrb[32].mxu1  ;;  %v7566_v29 = vadd.f32 %v7565_v26, %v7564_v24  ;;  %v7567_v30 = vpop.f32.mrb[34].mxu0  ;;  %7867 = vmatpush3.bf16.msra.mxu0 %v8499_v21  ;;  %v8539_v21 = vld [vmem:[%s10523_s1 + $0x10f8] sm:$0xff]  }
 0x1f9   :  { %v7587_v33 = vpop.f32.mrb[33].mxu1  ;;  %v7568_v34 = vpop.f32.mrb[35].mxu0  ;;  %7868 = vmatprep.subr.bf16.mxu0 %v8501_v23  ;;  %v24_v23 = vld [vmem:[%s10522_s0 + $0x40] sm:$0xff] }
 0x1fa   :  { %v5837_v35 = vadd.f32 %v7566_v29, %v10186_v52  ;;  %v7588_v36 = vadd.f32 %v7587_v33, %v7586_v28  ;;  %v7589_v37 = vpop.f32.mrb[34].mxu1  ;;  %7889 = vmatpush3.bf16.msra.mxu1 %v8500_v22  ;;  %v8516_v52 = vld [vmem:[%s10523_s1 + $0x1008] sm:$0xff]   ;;  %v1592_v26 = vrot.slane %v24_v23, %v8726_v41  ;;  %v8542_v28 = vld [vmem:[%s10523_s1 + $0x1140] sm:$0xff]   ;;  %v8541_v29 = vld [vmem:[%s10523_s1 + $0x10b8] sm:$0xff]  }
 0x1fb   :  { %v7590_v39 = vpop.f32.mrb[35].mxu1  ;;  %7890 = vmatprep.subr.bf16.mxu1 %v8502_v25  ;;  %v8540_v25 = vld [vmem:[%s10523_s1 + $0x1038] sm:$0xff]   ;;  %v8543_v33 = vld [vmem:[%s10523_s1 + $0x11c0] sm:$0xff]  }
 0x1fc   :  { %v10293_v42 = vadd.f32 %v7588_v36, %v5837_v35  ;;  %7869 = vmatpush3.bf16.msra.mxu0 %v8503_v27  ;;  %v1585_v27 = vcombine.high %v24_v23, %v24_v23  ;;  %v1600_v30 = vcombine.high %v1592_v26, %v1592_v26  ;;  %v8544_v35 = vld [vmem:[%s10523_s1 + $0x1100] sm:$0xff]  }
 0x1fd   :  { %7870 = vmatprep.subr.bf16.mxu0 %v8505_v32 }
 0x1fe   :  { %7891 = vmatpush3.bf16.msra.mxu1 %v8504_v31  ;;  %v1608_v31 = vrot.slane %v1592_v26, %v8726_v41  ;;  %v10408_v32 = vrot.slane %v1585_v27, %v8726_v41  ;;  %v1622_v34 = vrot.slane %v1600_v30, %v8726_v41 }
 0x1ff   :  { %7892 = vmatprep.subr.bf16.mxu1 %v8506_v38  ;;  %v8546_v38 = vld [vmem:[%s10523_s1 + $0x1148] sm:$0xff]  }
 0x200   :  { %7871 = vmatpush3.bf16.msra.mxu0 %v8507_v40  ;;  %v1601_v36 = vcombine.high %v10408_v32, %v10408_v32  ;;  %v1630_v37 = vcombine.high %v1608_v31, %v1608_v31  ;;  %v1632_v39 = vcombine.high %v1622_v34, %v1622_v34  ;;  %v8545_v40 = vld [vmem:[%s10523_s1 + $0x1180] sm:$0xff]  }
 0x201   :  { %7900 = vmatprep.subr.bf16.mxu0 %v8510_v45 }
 0x202   :  { %7893 = vmatpush3.bf16.msra.mxu1 %v8508_v43  ;;  %v8547_v43 = vld [vmem:[%s10523_s1 + $0x11c8] sm:$0xff]  }
 0x203   :  { %6395 = vmatmul.mubr.bf16.vlgmr.msra.gmra.mrb[60].mxu0 %v1566_v44  ;;  %7922 = vmatprep.subr.bf16.mxu1 %v8511_v46  ;;  %v8548_v44 = vld [vmem:[%s10523_s1 + $0x1108] sm:$0xff]   ;;  %v8550_v46 = vld [vmem:[%s10523_s1 + $0x1150] sm:$0xff]  }
 0x204   :  { %7901 = vmatpush3.bf16.msra.mxu0 %v8512_v47  ;;  %6474 = vmatprep.mubr.bf16.mxu0 %v1622_v34  ;;  %v8549_v47 = vld [vmem:[%s10523_s1 + $0x1188] sm:$0xff]  }
 0x205   :  { %6435 = vmatmul.mubr.bf16.vlgmr.msra.gmra.mrb[60].mxu1 %v1582_v49  ;;  %7902 = vmatprep.subr.bf16.mxu0 %v8514_v50  ;;  %v8552_v49 = vld [vmem:[%s10523_s1 + $0x1110] sm:$0xff]   ;;  %v8554_v50 = vld [vmem:[%s10523_s1 + $0x1158] sm:$0xff]  }
 0x206   :  { %7923 = vmatpush3.bf16.msra.mxu1 %v8513_v48  ;;  %6514 = vmatprep.mubr.bf16.mxu1 %v1632_v39  ;;  %v8551_v48 = vld [vmem:[%s10523_s1 + $0x11d0] sm:$0xff]  }
 0x207   :  { %7924 = vmatprep.subr.bf16.mxu1 %v8515_v51  ;;  %v8553_v51 = vld [vmem:[%s10523_s1 + $0x1190] sm:$0xff]  }
 0x208   :  { %7903 = vmatpush3.bf16.msra.mxu0 %v8516_v52  ;;  %v8555_v52 = vld [vmem:[%s10523_s1 + $0x11d8] sm:$0xff]  }
 0x209   :  { %7904 = vmatprep.subr.bf16.mxu0 %v8518_v54  ;;  %v8558_v54 = vld [vmem:[%s10523_s1 + $0x1160] sm:$0xff]  }
 0x20a   :  { %7925 = vmatpush3.bf16.msra.mxu1 %v8517_v53  ;;  %v8556_v53 = vld [vmem:[%s10523_s1 + $0x1118] sm:$0xff]  }
 0x20b   :  { %7926 = vmatprep.subr.bf16.mxu1 %v8519_v55  ;;  %v8557_v55 = vld [vmem:[%s10523_s1 + $0x1198] sm:$0xff]  }
 0x20c   :  { %7905 = vmatpush3.bf16.msra.mxu0 %v8520_v56  ;;  %v8559_v56 = vld [vmem:[%s10523_s1 + $0x11e0] sm:$0xff]  }
 0x20d   :  { %7906 = vmatprep.subr.bf16.mxu0 %v8522_v58  ;;  %v8562_v58 = vld [vmem:[%s10523_s1 + $0x1168] sm:$0xff]  }
 0x20e   :  { %7927 = vmatpush3.bf16.msra.mxu1 %v8521_v57  ;;  %v8560_v57 = vld [vmem:[%s10523_s1 + $0x1120] sm:$0xff]  }
 0x20f   :  { %7928 = vmatprep.subr.bf16.mxu1 %v8523_v59  ;;  %v8561_v59 = vld [vmem:[%s10523_s1 + $0x11a0] sm:$0xff]  }
 0x210   :  { %7907 = vmatpush3.bf16.msra.mxu0 %v8524_v60  ;;  %v8563_v60 = vld [vmem:[%s10523_s1 + $0x11e8] sm:$0xff]  }
 0x211   :  { %7908 = vmatprep.subr.bf16.mxu0 %v8526_v62  ;;  %v8566_v62 = vld [vmem:[%s10523_s1 + $0x1170] sm:$0xff]  }
 0x212   :  { %7929 = vmatpush3.bf16.msra.mxu1 %v8525_v61  ;;  %v8564_v61 = vld [vmem:[%s10523_s1 + $0x1128] sm:$0xff]  }
 0x213   :  { %7930 = vmatprep.subr.bf16.mxu1 %v8527_v63 }
 0x214   :  { %7909 = vmatpush3.bf16.msra.mxu0 %v8528_v0  ;;  %v8565_v0 = vld [vmem:[%s10523_s1 + $0x11a8] sm:$0xff]  }
 0x215   :  { %7910 = vmatprep.subr.bf16.mxu0 %v8530_v2  ;;  %v8567_v2 = vld [vmem:[%s10523_s1 + $0x11f0] sm:$0xff]  }
 0x216   :  { %7931 = vmatpush3.bf16.msra.mxu1 %v8529_v1  ;;  %v7608_v7 = vpop.f32.mrb[36].mxu0 }
 0x217   :  { %v7609_v9 = vpop.f32.mrb[37].mxu0  ;;  %7932 = vmatprep.subr.bf16.mxu1 %v8531_v3 }
 0x218   :  { %v7630_v11 = vpop.f32.mrb[36].mxu1  ;;  %v7610_v12 = vadd.f32 %v7609_v9, %v7608_v7  ;;  %v7611_v13 = vpop.f32.mrb[38].mxu0  ;;  %7911 = vmatpush3.bf16.msra.mxu0 %v8532_v4  ;;  %v8570_v7 = vld [vmem:[%s10523_s1 + $0x1178] sm:$0xff]  }
 0x219   :  { %v7631_v14 = vpop.f32.mrb[37].mxu1  ;;  %v7612_v15 = vpop.f32.mrb[39].mxu0  ;;  %7912 = vmatprep.subr.bf16.mxu0 %v8534_v6  ;;  %v8568_v6 = vld [vmem:[%s10523_s1 + $0x1130] sm:$0xff]  }
 0x21a   :  { %v5917_v18 = vadd.f32 %v7610_v12, %v10293_v42  ;;  %v7632_v19 = vadd.f32 %v7631_v14, %v7630_v11  ;;  %v7633_v20 = vpop.f32.mrb[38].mxu1  ;;  %7933 = vmatpush3.bf16.msra.mxu1 %v8533_v5  ;;  %v1629_v42 = vrot.slane %v1601_v36, %v8726_v41  ;;  %v8569_v13 = vld [vmem:[%s10523_s1 + $0x11b0] sm:$0xff]   ;;  %v8571_v15 = vld [vmem:[%s10523_s1 + $0x11f8] sm:$0xff]  }
 0x21b   :  { %v7634_v22 = vpop.f32.mrb[39].mxu1  ;;  %7934 = vmatprep.subr.bf16.mxu1 %v8535_v8 }
 0x21c   :  { %v10394_v24 = vadd.f32 %v7632_v19, %v5917_v18  ;;  %7913 = vmatpush3.bf16.msra.mxu0 %v8536_v10  ;;  %v1633_v45 = vcombine.high %v1629_v42, %v1629_v42 }
 0x21d   :  { %7914 = vmatprep.subr.bf16.mxu0 %v8538_v17  ;;  %v8572_v17 = vld [vmem:[%s10523_s1 + $0x1138] sm:$0xff]  }
 0x21e   :  { %7935 = vmatpush3.bf16.msra.mxu1 %v8537_v16 }
 0x21f   :  { %7936 = vmatprep.subr.bf16.mxu1 %v8539_v21 }
 0x220   :  { %7915 = vmatpush3.bf16.msra.mxu0 %v8540_v25 }
 0x221   :  { %7944 = vmatprep.subr.bf16.mxu0 %v8542_v28 }
 0x222   :  { %7937 = vmatpush3.bf16.msra.mxu1 %v8541_v29 }
 0x223   :  { %6475 = vmatmul.mubr.bf16.vlgmr.msra.gmra.mrb[64].mxu0 %v1608_v31  ;;  %7966 = vmatprep.subr.bf16.mxu1 %v8543_v33 }
 0x224   :  { %7945 = vmatpush3.bf16.msra.mxu0 %v8544_v35  ;;  %6554 = vmatprep.mubr.bf16.mxu0 %v1629_v42 }
 0x225   :  { %6515 = vmatmul.mubr.bf16.vlgmr.msra.gmra.mrb[64].mxu1 %v1630_v37  ;;  %7946 = vmatprep.subr.bf16.mxu0 %v8546_v38 }
 0x226   :  { %7967 = vmatpush3.bf16.msra.mxu1 %v8545_v40  ;;  %6594 = vmatprep.mubr.bf16.mxu1 %v1633_v45 }
 0x227   :  { %7968 = vmatprep.subr.bf16.mxu1 %v8547_v43 }
 0x228   :  { %7947 = vmatpush3.bf16.msra.mxu0 %v8548_v44 }
 0x229   :  { %7948 = vmatprep.subr.bf16.mxu0 %v8550_v46 }
 0x22a   :  { %7969 = vmatpush3.bf16.msra.mxu1 %v8549_v47 }
 0x22b   :  { %7970 = vmatprep.subr.bf16.mxu1 %v8551_v48 }
 0x22c   :  { %7949 = vmatpush3.bf16.msra.mxu0 %v8552_v49 }
 0x22d   :  { %7950 = vmatprep.subr.bf16.mxu0 %v8554_v50 }
 0x22e   :  { %7971 = vmatpush3.bf16.msra.mxu1 %v8553_v51 }
 0x22f   :  { %7972 = vmatprep.subr.bf16.mxu1 %v8555_v52 }
 0x230   :  { %7951 = vmatpush3.bf16.msra.mxu0 %v8556_v53 }
 0x231   :  { %7952 = vmatprep.subr.bf16.mxu0 %v8558_v54 }
 0x232   :  { %7973 = vmatpush3.bf16.msra.mxu1 %v8557_v55 }
 0x233   :  { %7974 = vmatprep.subr.bf16.mxu1 %v8559_v56 }
 0x234   :  { %7953 = vmatpush3.bf16.msra.mxu0 %v8560_v57 }
 0x235   :  { %7954 = vmatprep.subr.bf16.mxu0 %v8562_v58 }
 0x236   :  { %7975 = vmatpush3.bf16.msra.mxu1 %v8561_v59  ;;  %v7652_v63 = vpop.f32.mrb[40].mxu0 }
 0x237   :  { %v7653_v1 = vpop.f32.mrb[41].mxu0  ;;  %7976 = vmatprep.subr.bf16.mxu1 %v8563_v60 }
 0x238   :  { %v7674_v3 = vpop.f32.mrb[40].mxu1  ;;  %v7654_v4 = vadd.f32 %v7653_v1, %v7652_v63  ;;  %v7655_v5 = vpop.f32.mrb[42].mxu0  ;;  %7955 = vmatpush3.bf16.msra.mxu0 %v8564_v61 }
 0x239   :  { %v7675_v8 = vpop.f32.mrb[41].mxu1  ;;  %v7656_v9 = vpop.f32.mrb[43].mxu0  ;;  %7956 = vmatprep.subr.bf16.mxu0 %v8566_v62 }
 0x23a   :  { %v5997_v10 = vadd.f32 %v7654_v4, %v10394_v24  ;;  %v7676_v11 = vadd.f32 %v7675_v8, %v7674_v3  ;;  %v7677_v12 = vpop.f32.mrb[42].mxu1  ;;  %7977 = vmatpush3.bf16.msra.mxu1 %v8565_v0 }
 0x23b   :  { %v7678_v14 = vpop.f32.mrb[43].mxu1  ;;  %7978 = vmatprep.subr.bf16.mxu1 %v8567_v2 }
 0x23c   :  { %v6037_v16 = vadd.f32 %v7676_v11, %v5997_v10  ;;  %7957 = vmatpush3.bf16.msra.mxu0 %v8568_v6 }
 0x23d   :  { %8 = vsyncpa [#allocation3], 0  ;;  %7958 = vmatprep.subr.bf16.mxu0 %v8570_v7  ;;  %v1615_v18 = vrot.slane %v10408_v32, %v8726_v41  ;;  %v8573_v19 = vld [vmem:[%s10523_s1 + $0x11b8] sm:$0xff]   ;;  %s8600_s1 = smov [#allocation2]   ;;  %vm6603_vm0 = vcmask 254976  }
 0x23e   :  { %7979 = vmatpush3.bf16.msra.mxu1 %v8569_v13  ;;  %s6611_s23 = sshll.u32 %s8600_s1, 4  ;;  %s6612_s23 = int_to_ptr.vmem [resolvable:$true] %s6611_s23 }
 0x23f   :  { %7980 = vmatprep.subr.bf16.mxu1 %v8571_v15  ;;  %v1631_v20 = vcombine.high %v1615_v18, %v1615_v18  ;;  %s8575_s24 = scalar_lea.vmem %s6612_s23, 32  ;;  %p8580_p1 = scmp.lt.s32.totalorder %s6612_s23, %s6612_s23 }
 0x240   :  { %7959 = vmatpush3.bf16.msra.mxu0 %v8572_v17  ;;  %p8576_p0 = scmp.ne.s32.totalorder %s6612_s23, %s8575_s24  ;;  %p8581_p2 = scmp.lt.s32.totalorder %s8575_s24, %s8575_s24 }
 0x242   :  { %7981 = vmatpush3.bf16.msra.mxu1 %v8573_v19  ;;  %p8582_p3 = por %p8581_p2, %p8580_p1 }
 0x243   :  { %6555 = vmatmul.mubr.bf16.vlgmr.msra.gmra.mrb[68].mxu0 %v1615_v18 }
 0x244   :  { %p8583_p4 = pnand %p8582_p3, %p8576_p0 }
 0x245   :  { %6595 = vmatmul.mubr.bf16.vlgmr.msra.gmra.mrb[68].mxu1 %v1631_v20 }
 0x256   :  { %v7696_v21 = vpop.f32.mrb[44].mxu0 }
 0x257   :  { %v7697_v22 = vpop.f32.mrb[45].mxu0 }
 0x258   :  { %v7718_v23 = vpop.f32.mrb[44].mxu1  ;;  %v7698_v24 = vadd.f32 %v7697_v22, %v7696_v21  ;;  %v7699_v25 = vpop.f32.mrb[46].mxu0 }
 0x259   :  { %v7719_v26 = vpop.f32.mrb[45].mxu1  ;;  %v7700_v27 = vpop.f32.mrb[47].mxu0 }
 0x25a   :  { %v6077_v28 = vadd.f32 %v7698_v24, %v6037_v16  ;;  %v7720_v41 = vadd.f32 %v7719_v26, %v7718_v23  ;;  %v7721_v29 = vpop.f32.mrb[46].mxu1 }
 0x25b   :  { %v7722_v30 = vpop.f32.mrb[47].mxu1 }
 0x25c   :  { %v6117_v31 = vadd.f32 %v7720_v41, %v6077_v28 }
 0x276   :  { %v7740_v32 = vpop.f32.mrb[48].mxu0 }
 0x277   :  { %v7741_v33 = vpop.f32.mrb[49].mxu0 }
 0x278   :  { %v7762_v34 = vpop.f32.mrb[48].mxu1  ;;  %v7742_v35 = vadd.f32 %v7741_v33, %v7740_v32  ;;  %v7743_v36 = vpop.f32.mrb[50].mxu0 }
 0x279   :  { %v7763_v37 = vpop.f32.mrb[49].mxu1  ;;  %v7744_v38 = vpop.f32.mrb[51].mxu0 }
 0x27a   :  { %v6157_v39 = vadd.f32 %v7742_v35, %v6117_v31  ;;  %v7764_v40 = vadd.f32 %v7763_v37, %v7762_v34  ;;  %v7765_v42 = vpop.f32.mrb[50].mxu1 }
 0x27b   :  { %v7766_v43 = vpop.f32.mrb[51].mxu1 }
 0x27c   :  { %v6197_v44 = vadd.f32 %v7764_v40, %v6157_v39 }
 0x296   :  { %v7784_v45 = vpop.f32.mrb[52].mxu0 }
 0x297   :  { %v7785_v46 = vpop.f32.mrb[53].mxu0 }
 0x298   :  { %v7806_v47 = vpop.f32.mrb[52].mxu1  ;;  %v7786_v48 = vadd.f32 %v7785_v46, %v7784_v45  ;;  %v7787_v49 = vpop.f32.mrb[54].mxu0 }
 0x299   :  { %v7807_v50 = vpop.f32.mrb[53].mxu1  ;;  %v7788_v51 = vpop.f32.mrb[55].mxu0 }
 0x29a   :  { %v6237_v52 = vadd.f32 %v7786_v48, %v6197_v44  ;;  %v7808_v53 = vadd.f32 %v7807_v50, %v7806_v47  ;;  %v7809_v54 = vpop.f32.mrb[54].mxu1 }
 0x29b   :  { %v7810_v55 = vpop.f32.mrb[55].mxu1 }
 0x29c   :  { %v6277_v56 = vadd.f32 %v7808_v53, %v6237_v52 }
 0x2b6   :  { %v7828_v57 = vpop.f32.mrb[56].mxu0 }
 0x2b7   :  { %v7829_v58 = vpop.f32.mrb[57].mxu0 }
 0x2b8   :  { %v7850_v59 = vpop.f32.mrb[56].mxu1  ;;  %v7830_v60 = vadd.f32 %v7829_v58, %v7828_v57  ;;  %v7831_v61 = vpop.f32.mrb[58].mxu0 }
 0x2b9   :  { %v7851_v62 = vpop.f32.mrb[57].mxu1  ;;  %v7832_v63 = vpop.f32.mrb[59].mxu0 }
 0x2ba   :  { %v6317_v0 = vadd.f32 %v7830_v60, %v6277_v56  ;;  %v7852_v1 = vadd.f32 %v7851_v62, %v7850_v59  ;;  %v7853_v2 = vpop.f32.mrb[58].mxu1 }
 0x2bb   :  { %v7854_v3 = vpop.f32.mrb[59].mxu1 }
 0x2bc   :  { %v6357_v4 = vadd.f32 %v7852_v1, %v6317_v0 }
 0x2d6   :  { %v7872_v5 = vpop.f32.mrb[60].mxu0 }
 0x2d7   :  { %v7873_v6 = vpop.f32.mrb[61].mxu0 }
 0x2d8   :  { %v7894_v7 = vpop.f32.mrb[60].mxu1  ;;  %v7874_v8 = vadd.f32 %v7873_v6, %v7872_v5  ;;  %v7875_v9 = vpop.f32.mrb[62].mxu0 }
 0x2d9   :  { %v7895_v10 = vpop.f32.mrb[61].mxu1  ;;  %v7876_v11 = vpop.f32.mrb[63].mxu0 }
 0x2da   :  { %v6397_v12 = vadd.f32 %v7874_v8, %v6357_v4  ;;  %v7896_v13 = vadd.f32 %v7895_v10, %v7894_v7  ;;  %v7897_v14 = vpop.f32.mrb[62].mxu1 }
 0x2db   :  { %v7898_v15 = vpop.f32.mrb[63].mxu1 }
 0x2dc   :  { %v6437_v16 = vadd.f32 %v7896_v13, %v6397_v12 }
 0x2f6   :  { %v7916_v17 = vpop.f32.mrb[64].mxu0 }
 0x2f7   :  { %v7917_v18 = vpop.f32.mrb[65].mxu0 }
 0x2f8   :  { %v7938_v19 = vpop.f32.mrb[64].mxu1  ;;  %v7918_v20 = vadd.f32 %v7917_v18, %v7916_v17  ;;  %v7919_v21 = vpop.f32.mrb[66].mxu0 }
 0x2f9   :  { %v7939_v22 = vpop.f32.mrb[65].mxu1  ;;  %v7920_v23 = vpop.f32.mrb[67].mxu0 }
 0x2fa   :  { %v6477_v24 = vadd.f32 %v7918_v20, %v6437_v16  ;;  %v7940_v25 = vadd.f32 %v7939_v22, %v7938_v19  ;;  %v7941_v26 = vpop.f32.mrb[66].mxu1 }
 0x2fb   :  { %v7942_v27 = vpop.f32.mrb[67].mxu1 }
 0x2fc   :  { %v6517_v28 = vadd.f32 %v7940_v25, %v6477_v24 }
 0x316   :  { %v7960_v41 = vpop.f32.mrb[68].mxu0 }
 0x317   :  { %v7961_v29 = vpop.f32.mrb[69].mxu0 }
 0x318   :  { %v7982_v30 = vpop.f32.mrb[68].mxu1  ;;  %v7962_v31 = vadd.f32 %v7961_v29, %v7960_v41  ;;  %v7963_v32 = vpop.f32.mrb[70].mxu0 }
 0x319   :  { %v7983_v33 = vpop.f32.mrb[69].mxu1  ;;  %v7964_v34 = vpop.f32.mrb[71].mxu0 }
 0x31a   :  { %v6557_v35 = vadd.f32 %v7962_v31, %v6517_v28  ;;  %v7984_v36 = vadd.f32 %v7983_v33, %v7982_v30  ;;  %v7985_v37 = vpop.f32.mrb[70].mxu1 }
 0x31b   :  { %v7986_v38 = vpop.f32.mrb[71].mxu1 }
 0x31c   :  { %v6597_v39 = vadd.f32 %v7984_v36, %v6557_v35 }
 0x31e   :  { %v6602_v40 = vmax.f32 %v6597_v39, 0.0 }
 0x320   :  { %6604 = vst.msk [vmem:[#allocation2] sm:$0x3] %vm6603_vm0, %v6602_v40 }
 0x321   :  { %8586 = shalt.err (!%p8583_p4)
}
 0x322   :  { %s8587_s27 = scalar_lea.hbm %s10525_s3, 32 }
 0x323   :  { %p8588_p5 = scmp.ne.s32.totalorder %s10525_s3, %s8587_s27  ;;  %p8591_p6 = scmp.lt.u32.totalorder %s8587_s27, %s10525_s3 }
 0x325   :  { %p8593_p7 = pnand %p8591_p6, %p8588_p5 }
 0x327   :  { %8596 = shalt.err (!%p8593_p7)
}
 0x328   :  { %6614 = dma.vmem_to_hbm [thread:$0]  %s6612_s23, 32, %s10525_s3, [#allocation3]  }
 0x329   :  { %8597 = dma.done.wait [#allocation3], 32  }
 0x32a   :  { %8598 = vsyncadd [#allocation3], 4294967264 }
 0x32b   :  { %6618 = vsyncpa [#allocation3], 1 }

</bundles_post_ra>
